<compile_context>
chip_gen: v7x
topology: tpu7x:2x2x1
jax: 0.10.0
libtpu: 0.0.40
codegen_flags: <defaults>
</compile_context>

<pallas_src>
import functools

import jax
import jax.numpy as jnp
from jax.experimental import pallas as pl
from jax.experimental.pallas import tpu as pltpu

BN_EPS = 1e-5


# --------------------------------------------------------------------------- #
# In-kernel building block: conv3x3('same') -> maxpool2x2 -> BN(eval) -> ReLU
# --------------------------------------------------------------------------- #
def _conv_pool_bn_relu(xpad_ref, x, w, scale, shift, K, PAD):
    """x: (Hin, Win, 1, Cin) HWC activations; w: (K*K, Cin, Cout) taps
    (tap = kh*K + kw); scale/shift: (1, 1, 1, Cout) folded bias+BN(eval).
    Returns (Hin//2, Win//2, 1, Cout)."""
    Hin, Win, _, Cin = x.shape
    Cout = w.shape[2]
    Ho, Wo = Hin, Win                       # 'same' conv: PAD == (K - 1) // 2
    Ho2, Wo2 = Ho // 2, Wo // 2

    # Zero-pad into a tiny VMEM scratch (borders rewritten each grid step).
    xpad_ref[...] = jnp.zeros_like(xpad_ref)
    xpad_ref[PAD:PAD + Hin, PAD:PAD + Win, :, :] = x
    xp = xpad_ref[...]

    # im2col slabs for all taps, hoisted ahead of the MXU accumulation chain.
    slabs = [xp[kh:kh + Ho, kw:kw + Wo, :, :].reshape(Ho * Wo, Cin)
             for kh in range(K) for kw in range(K)]
    acc = jnp.dot(slabs[0], w[0], preferred_element_type=jnp.float32)
    for t in range(1, K * K):
        acc = acc + jnp.dot(slabs[t], w[t], preferred_element_type=jnp.float32)
    # acc: (Ho*Wo, Cout) f32

    # 2x2 max pool, register-level (layout-preserving reshapes only).
    r = acc.reshape(Ho2, 2, Wo, Cout)
    hmax = jnp.maximum(r[:, 0], r[:, 1])                        # (Ho2, Wo, Cout)
    r2 = hmax.reshape(Ho2, Wo2, 2, Cout)
    pooled = jnp.maximum(r2[:, :, 0:1, :], r2[:, :, 1:2, :])    # (Ho2, Wo2, 1, Cout)

    # conv bias + BatchNorm2d (eval) folded into scale/shift, then ReLU.
    return jnp.maximum(pooled * scale + shift, 0.0)


# --------------------------------------------------------------------------- #
# Fused kernel: conv block 1 -> conv block 2 -> Linear+BN+ReLU -> Linear
#               -> log_softmax.  One sample per grid step.
# --------------------------------------------------------------------------- #
def cnn_fused_kernel(x_ref, w1_ref, s1_ref, t1_ref, w2_ref, s2_ref, t2_ref,
                     afc_ref, sfc_ref, tfc_ref, wfin_ref, bfin_ref,
                     o_ref, pad1_ref, pad2_ref, *, K, PAD):
    _, H, W, Cin = x_ref.shape
    x = x_ref[...].reshape(H, W, 1, Cin)

    y1 = _conv_pool_bn_relu(pad1_ref, x, w1_ref[...], s1_ref[...], t1_ref[...],
                            K, PAD)
    y2 = _conv_pool_bn_relu(pad2_ref, y1, w2_ref[...], s2_ref[...], t2_ref[...],
                            K, PAD)

    # Dense head.  y2 is (H2, W2, 1, C2) in HWC order; the first Linear's
    # weight rows were permuted in the wrapper to the same HWC order, and the
    # flatten is expressed as C2-row blocks of that weight, so activations
    # never need a lane-dim reshape / transpose.
    H2, W2, _, C2 = y2.shape
    y2_2d = y2.reshape(H2 * W2, C2)                             # (S, C2)
    h = jnp.dot(y2_2d[0:1, :], afc_ref[0:C2, :],
                preferred_element_type=jnp.float32)             # (1, Dfc)
    for s in range(1, H2 * W2):
        h = h + jnp.dot(y2_2d[s:s + 1, :], afc_ref[s * C2:(s + 1) * C2, :],
                        preferred_element_type=jnp.float32)

    # Linear bias + BatchNorm1d (eval) folded into sfc/tfc, then ReLU.
    h = jnp.maximum(h * sfc_ref[...] + tfc_ref[...], 0.0)       # (1, Dfc)

    # Final Linear -> log_softmax(dim=1).
    logits = jnp.dot(h, wfin_ref[...],
                     preferred_element_type=jnp.float32) + bfin_ref[...]
    m = jnp.max(logits, axis=1, keepdims=True)
    shifted = logits - m
    lse = jnp.log(jnp.sum(jnp.exp(shifted), axis=1, keepdims=True))
    o_ref[0] = shifted - lse


def _const_spec(a):
    zeros = (0,) * a.ndim
    return pl.BlockSpec(a.shape, lambda n: zeros)


# --------------------------------------------------------------------------- #
# Wrapper: one-time parameter folding / layout prep + the single pallas_call
# --------------------------------------------------------------------------- #
def cnn_forward(params, x_nchw, *, K=3, PAD=1):
    N, Cin, H, W = x_nchw.shape
    c1, c2 = params["conv"]
    fc = params["fc"][0]
    fin = params["final"]

    C1 = c1["w"].shape[0]
    C2 = c2["w"].shape[0]
    H1, W1 = H // 2, W // 2
    H2, W2 = H1 // 2, W1 // 2
    Dfc = fc["w"].shape[0]
    Dout = fin["w"].shape[0]
    f32 = jnp.float32

    # --- tiny one-time parameter preprocessing (weights only) ---------------
    def fold_conv(p):
        cout, cin = p["w"].shape[0], p["w"].shape[1]
        scale = p["gamma"] * jax.lax.rsqrt(p["var"] + BN_EPS)
        shift = (p["b"] - p["mean"]) * scale + p["beta"]        # bias folded in
        # OIHW -> (tap = kh*K + kw, Cin, Cout), matching the kernel's im2col
        w = jnp.transpose(p["w"], (2, 3, 1, 0)).reshape(K * K, cin, cout)
        return (w.astype(f32),
                scale.reshape(1, 1, 1, cout).astype(f32),
                shift.reshape(1, 1, 1, cout).astype(f32))

    w1, s1, t1 = fold_conv(c1)
    w2, s2, t2 = fold_conv(c2)

    # First Linear: permute rows from PyTorch's CHW flatten order to the
    # kernel's HWC order; fold bias + BN1d(eval) into scale/shift.
    wfc_t = fc["w"].T.astype(f32)                               # (C2*H2*W2, Dfc)
    afc = jnp.transpose(wfc_t.reshape(C2, H2, W2, Dfc),
                        (1, 2, 0, 3)).reshape(H2 * W2 * C2, Dfc)
    sfc = fc["gamma"] * jax.lax.rsqrt(fc["var"] + BN_EPS)
    tfc = (fc["b"] - fc["mean"]) * sfc + fc["beta"]
    sfc = sfc.reshape(1, Dfc).astype(f32)
    tfc = tfc.reshape(1, Dfc).astype(f32)

    wfin = fin["w"].T.astype(f32)                               # (Dfc, Dout)
    bfin = fin["b"].reshape(1, Dout).astype(f32)

    x_nhwc = jnp.transpose(x_nchw, (0, 2, 3, 1)).astype(f32)    # (N, H, W, Cin)

    kernel = functools.partial(cnn_fused_kernel, K=K, PAD=PAD)
    out = pl.pallas_call(
        kernel,
        out_shape=jax.ShapeDtypeStruct((N, 1, Dout), f32),
        grid_spec=pltpu.PrefetchScalarGridSpec(
            num_scalar_prefetch=0,
            grid=(N,),
            in_specs=[
                pl.BlockSpec((1, H, W, Cin), lambda n: (n, 0, 0, 0)),
                _const_spec(w1), _const_spec(s1), _const_spec(t1),
                _const_spec(w2), _const_spec(s2), _const_spec(t2),
                _const_spec(afc), _const_spec(sfc), _const_spec(tfc),
                _const_spec(wfin), _const_spec(bfin),
            ],
            out_specs=pl.BlockSpec((1, 1, Dout), lambda n: (n, 0, 0)),
            scratch_shapes=[
                pltpu.VMEM((H + 2 * PAD, W + 2 * PAD, 1, Cin), f32),
                pltpu.VMEM((H1 + 2 * PAD, W1 + 2 * PAD, 1, C1), f32),
            ],
        ),
        compiler_params=pltpu.CompilerParams(dimension_semantics=("parallel",)),
    )(x_nhwc, w1, s1, t1, w2, s2, t2, afc, sfc, tfc, wfin, bfin)
    return out.reshape(N, Dout)


# --------------------------------------------------------------------------- #
# Deterministic synthetic parameters (PyTorch layouts: conv OIHW, linear (out,in))
# --------------------------------------------------------------------------- #
def init_params(key):
    def conv_layer(k, cin, cout):
        ks = jax.random.split(k, 6)
        return {
            "w": 0.1 * jax.random.normal(ks[0], (cout, cin, 3, 3), jnp.float32),
            "b": 0.1 * jax.random.normal(ks[1], (cout,), jnp.float32),
            "gamma": 1.0 + 0.1 * jax.random.normal(ks[2], (cout,), jnp.float32),
            "beta": 0.1 * jax.random.normal(ks[3], (cout,), jnp.float32),
            "mean": 0.1 * jax.random.normal(ks[4], (cout,), jnp.float32),
            "var": 1.0 + 0.1 * jnp.abs(jax.random.normal(ks[5], (cout,), jnp.float32)),
        }

    def fc_layer(k, din, dout):
        ks = jax.random.split(k, 6)
        return {
            "w": 0.1 * jax.random.normal(ks[0], (dout, din), jnp.float32),
            "b": 0.1 * jax.random.normal(ks[1], (dout,), jnp.float32),
            "gamma": 1.0 + 0.1 * jax.random.normal(ks[2], (dout,), jnp.float32),
            "beta": 0.1 * jax.random.normal(ks[3], (dout,), jnp.float32),
            "mean": 0.1 * jax.random.normal(ks[4], (dout,), jnp.float32),
            "var": 1.0 + 0.1 * jnp.abs(jax.random.normal(ks[5], (dout,), jnp.float32)),
        }

    k0, k1, k2, k3 = jax.random.split(key, 4)
    k3a, k3b = jax.random.split(k3)
    return {
        "conv": [conv_layer(k0, 4, 8), conv_layer(k1, 8, 8)],
        "fc": [fc_layer(k2, 8 * 4 * 4, 32)],
        "final": {"w": 0.1 * jax.random.normal(k3a, (10, 32), jnp.float32),
                  "b": 0.1 * jax.random.normal(k3b, (10,), jnp.float32)},
    }


# --------------------------------------------------------------------------- #
# Pure-JAX (XLA) reference of the PyTorch forward (eval mode), for validation
# --------------------------------------------------------------------------- #
def cnn_reference(params, x):
    h = x.astype(jnp.float32)
    for p in params["conv"]:
        h = jax.lax.conv_general_dilated(
            h, p["w"], window_strides=(1, 1), padding=((1, 1), (1, 1)),
            dimension_numbers=("NCHW", "OIHW", "NCHW"))
        h = h + p["b"].reshape(1, -1, 1, 1)
        h = jax.lax.reduce_window(h, -jnp.inf, jax.lax.max,
                                  (1, 1, 2, 2), (1, 1, 2, 2), "VALID")
        scale = (p["gamma"] * jax.lax.rsqrt(p["var"] + BN_EPS)).reshape(1, -1, 1, 1)
        h = (h - p["mean"].reshape(1, -1, 1, 1)) * scale + p["beta"].reshape(1, -1, 1, 1)
        h = jnp.maximum(h, 0.0)
    h = h.reshape(h.shape[0], -1)
    fc = params["fc"][0]
    h = h @ fc["w"].T + fc["b"]
    scale = fc["gamma"] * jax.lax.rsqrt(fc["var"] + BN_EPS)
    h = (h - fc["mean"]) * scale + fc["beta"]
    h = jnp.maximum(h, 0.0)
    fin = params["final"]
    logits = h @ fin["w"].T + fin["b"]
    return jax.nn.log_softmax(logits, axis=1)


if __name__ == "__main__":
    key = jax.random.PRNGKey(0)
    pkey, xkey = jax.random.split(key)
    params = init_params(pkey)
    x = jax.random.normal(xkey, (2, 4, 16, 16), dtype=jnp.float32)   # NCHW

    out = jax.jit(cnn_forward)(params, x)
    out = jax.block_until_ready(out)

    assert out.shape == (2, 10)
    assert bool(jnp.all(jnp.isfinite(out)))
    # rows of log_softmax must exponentiate to ~1
    assert bool(jnp.allclose(jnp.sum(jnp.exp(out), axis=1), 1.0, atol=1e-4))
    # match the pure-JAX reference of the PyTorch forward
    ref = jax.jit(cnn_reference)(params, x)
    assert bool(jnp.allclose(out, ref, atol=1e-3, rtol=1e-3)), \
        float(jnp.max(jnp.abs(out - ref)))
    print("KERNEL_OK")
</pallas_src>

<mosaic_0001>
module attributes {stable_mosaic.version = 11 : i64} {
  func.func @cnn_fused_kernel(%arg0: i32, %arg1: memref<1x16x16x4xf32, #tpu.memory_space<vmem>>, %arg2: memref<9x4x8xf32, #tpu.memory_space<vmem>>, %arg3: memref<1x1x1x8xf32, #tpu.memory_space<vmem>>, %arg4: memref<1x1x1x8xf32, #tpu.memory_space<vmem>>, %arg5: memref<9x8x8xf32, #tpu.memory_space<vmem>>, %arg6: memref<1x1x1x8xf32, #tpu.memory_space<vmem>>, %arg7: memref<1x1x1x8xf32, #tpu.memory_space<vmem>>, %arg8: memref<128x32xf32, #tpu.memory_space<vmem>>, %arg9: memref<1x32xf32, #tpu.memory_space<vmem>>, %arg10: memref<1x32xf32, #tpu.memory_space<vmem>>, %arg11: memref<32x10xf32, #tpu.memory_space<vmem>>, %arg12: memref<1x10xf32, #tpu.memory_space<vmem>>, %arg13: memref<1x1x10xf32, #tpu.memory_space<vmem>>, %arg14: memref<18x18x1x4xf32, #tpu.memory_space<vmem>>, %arg15: memref<10x10x1x8xf32, #tpu.memory_space<vmem>>) attributes {dimension_semantics = [#tpu.dimension_semantics<parallel>], iteration_bounds = array<i64: 2>, scalar_prefetch = 0 : i64, scratch_operands = 2 : i64, tpu.core_type = #tpu.core_type<tc>, window_params = [{transform_indices = @transform_0, window_bounds = array<i64: 1, 16, 16, 4>}, {pipeline_mode = #tpu.pipeline_mode<synchronous>, transform_indices = @transform_1, window_bounds = array<i64: 9, 4, 8>}, {pipeline_mode = #tpu.pipeline_mode<synchronous>, transform_indices = @transform_2, window_bounds = array<i64: 1, 1, 1, 8>}, {pipeline_mode = #tpu.pipeline_mode<synchronous>, transform_indices = @transform_3, window_bounds = array<i64: 1, 1, 1, 8>}, {pipeline_mode = #tpu.pipeline_mode<synchronous>, transform_indices = @transform_4, window_bounds = array<i64: 9, 8, 8>}, {pipeline_mode = #tpu.pipeline_mode<synchronous>, transform_indices = @transform_5, window_bounds = array<i64: 1, 1, 1, 8>}, {pipeline_mode = #tpu.pipeline_mode<synchronous>, transform_indices = @transform_6, window_bounds = array<i64: 1, 1, 1, 8>}, {pipeline_mode = #tpu.pipeline_mode<synchronous>, transform_indices = @transform_7, window_bounds = array<i64: 128, 32>}, {pipeline_mode = #tpu.pipeline_mode<synchronous>, transform_indices = @transform_8, window_bounds = array<i64: 1, 32>}, {pipeline_mode = #tpu.pipeline_mode<synchronous>, transform_indices = @transform_9, window_bounds = array<i64: 1, 32>}, {pipeline_mode = #tpu.pipeline_mode<synchronous>, transform_indices = @transform_10, window_bounds = array<i64: 32, 10>}, {pipeline_mode = #tpu.pipeline_mode<synchronous>, transform_indices = @transform_11, window_bounds = array<i64: 1, 10>}, {transform_indices = @transform_12, window_bounds = array<i64: 1, 1, 10>}]} {
    %c0 = arith.constant 0 : index
    %c0_0 = arith.constant 0 : index
    %c0_1 = arith.constant 0 : index
    %c0_2 = arith.constant 0 : index
    %0 = vector.load %arg1[%c0, %c0_0, %c0_1, %c0_2] : memref<1x16x16x4xf32, #tpu.memory_space<vmem>>, vector<1x16x16x4xf32>
    %1 = vector.shape_cast %0 : vector<1x16x16x4xf32> to vector<16x16x1x4xf32>
    %c0_3 = arith.constant 0 : index
    %c0_4 = arith.constant 0 : index
    %c0_5 = arith.constant 0 : index
    %2 = vector.load %arg2[%c0_3, %c0_4, %c0_5] : memref<9x4x8xf32, #tpu.memory_space<vmem>>, vector<9x4x8xf32>
    %c0_6 = arith.constant 0 : index
    %c0_7 = arith.constant 0 : index
    %c0_8 = arith.constant 0 : index
    %c0_9 = arith.constant 0 : index
    %3 = vector.load %arg3[%c0_6, %c0_7, %c0_8, %c0_9] : memref<1x1x1x8xf32, #tpu.memory_space<vmem>>, vector<1x1x1x8xf32>
    %c0_10 = arith.constant 0 : index
    %c0_11 = arith.constant 0 : index
    %c0_12 = arith.constant 0 : index
    %c0_13 = arith.constant 0 : index
    %4 = vector.load %arg4[%c0_10, %c0_11, %c0_12, %c0_13] : memref<1x1x1x8xf32, #tpu.memory_space<vmem>>, vector<1x1x1x8xf32>
    %cst = arith.constant 0.000000e+00 : f32
    %5 = vector.broadcast %cst : f32 to vector<18x18x1x4xf32>
    %c0_14 = arith.constant 0 : index
    %c0_15 = arith.constant 0 : index
    %c0_16 = arith.constant 0 : index
    %c0_17 = arith.constant 0 : index
    %6 = vector.load %arg14[%c0_14, %c0_15, %c0_16, %c0_17] : memref<18x18x1x4xf32, #tpu.memory_space<vmem>>, vector<18x18x1x4xf32>
    tpu.vector_store %arg14[%c0_14, %c0_15, %c0_16, %c0_17], %5 {strides = array<i32>} : memref<18x18x1x4xf32, #tpu.memory_space<vmem>>, vector<18x18x1x4xf32>,
    %c1 = arith.constant 1 : index
    %c1_18 = arith.constant 1 : index
    %c0_19 = arith.constant 0 : index
    %c0_20 = arith.constant 0 : index
    %7 = vector.load %arg14[%c1, %c1_18, %c0_19, %c0_20] : memref<18x18x1x4xf32, #tpu.memory_space<vmem>>, vector<16x16x1x4xf32>
    tpu.vector_store %arg14[%c1, %c1_18, %c0_19, %c0_20], %1 {strides = array<i32>} : memref<18x18x1x4xf32, #tpu.memory_space<vmem>>, vector<16x16x1x4xf32>,
    %c0_21 = arith.constant 0 : index
    %c0_22 = arith.constant 0 : index
    %c0_23 = arith.constant 0 : index
    %c0_24 = arith.constant 0 : index
    %8 = vector.load %arg14[%c0_21, %c0_22, %c0_23, %c0_24] : memref<18x18x1x4xf32, #tpu.memory_space<vmem>>, vector<18x18x1x4xf32>
    %9 = vector.extract_strided_slice %8 {offsets = [0, 0, 0, 0], sizes = [16, 16, 1, 4], strides = [1, 1, 1, 1]} : vector<18x18x1x4xf32> to vector<16x16x1x4xf32>
    %10 = vector.shape_cast %9 : vector<16x16x1x4xf32> to vector<256x4xf32>
    %11 = vector.extract_strided_slice %8 {offsets = [0, 1, 0, 0], sizes = [16, 16, 1, 4], strides = [1, 1, 1, 1]} : vector<18x18x1x4xf32> to vector<16x16x1x4xf32>
    %12 = vector.shape_cast %11 : vector<16x16x1x4xf32> to vector<256x4xf32>
    %13 = vector.extract_strided_slice %8 {offsets = [0, 2, 0, 0], sizes = [16, 16, 1, 4], strides = [1, 1, 1, 1]} : vector<18x18x1x4xf32> to vector<16x16x1x4xf32>
    %14 = vector.shape_cast %13 : vector<16x16x1x4xf32> to vector<256x4xf32>
    %15 = vector.extract_strided_slice %8 {offsets = [1, 0, 0, 0], sizes = [16, 16, 1, 4], strides = [1, 1, 1, 1]} : vector<18x18x1x4xf32> to vector<16x16x1x4xf32>
    %16 = vector.shape_cast %15 : vector<16x16x1x4xf32> to vector<256x4xf32>
    %17 = vector.extract_strided_slice %8 {offsets = [1, 1, 0, 0], sizes = [16, 16, 1, 4], strides = [1, 1, 1, 1]} : vector<18x18x1x4xf32> to vector<16x16x1x4xf32>
    %18 = vector.shape_cast %17 : vector<16x16x1x4xf32> to vector<256x4xf32>
    %19 = vector.extract_strided_slice %8 {offsets = [1, 2, 0, 0], sizes = [16, 16, 1, 4], strides = [1, 1, 1, 1]} : vector<18x18x1x4xf32> to vector<16x16x1x4xf32>
    %20 = vector.shape_cast %19 : vector<16x16x1x4xf32> to vector<256x4xf32>
    %21 = vector.extract_strided_slice %8 {offsets = [2, 0, 0, 0], sizes = [16, 16, 1, 4], strides = [1, 1, 1, 1]} : vector<18x18x1x4xf32> to vector<16x16x1x4xf32>
    %22 = vector.shape_cast %21 : vector<16x16x1x4xf32> to vector<256x4xf32>
    %23 = vector.extract_strided_slice %8 {offsets = [2, 1, 0, 0], sizes = [16, 16, 1, 4], strides = [1, 1, 1, 1]} : vector<18x18x1x4xf32> to vector<16x16x1x4xf32>
    %24 = vector.shape_cast %23 : vector<16x16x1x4xf32> to vector<256x4xf32>
    %25 = vector.extract_strided_slice %8 {offsets = [2, 2, 0, 0], sizes = [16, 16, 1, 4], strides = [1, 1, 1, 1]} : vector<18x18x1x4xf32> to vector<16x16x1x4xf32>
    %26 = vector.shape_cast %25 : vector<16x16x1x4xf32> to vector<256x4xf32>
    %27 = vector.extract_strided_slice %2 {offsets = [0, 0, 0], sizes = [1, 4, 8], strides = [1, 1, 1]} : vector<9x4x8xf32> to vector<1x4x8xf32>
    %28 = vector.shape_cast %27 : vector<1x4x8xf32> to vector<4x8xf32>
    %cst_25 = arith.constant dense<0.000000e+00> : vector<256x8xf32>
    %29 = tpu.matmul %10, %28, %cst_25 {dimension_numbers = #tpu.dot_dimension_numbers<[1], [0], [0], [1], [0, 0, 1, 1], [], []>} : vector<256x4xf32>, vector<4x8xf32>, vector<256x8xf32> -> vector<256x8xf32>
    %30 = vector.extract_strided_slice %2 {offsets = [1, 0, 0], sizes = [1, 4, 8], strides = [1, 1, 1]} : vector<9x4x8xf32> to vector<1x4x8xf32>
    %31 = vector.shape_cast %30 : vector<1x4x8xf32> to vector<4x8xf32>
    %cst_26 = arith.constant dense<0.000000e+00> : vector<256x8xf32>
    %32 = tpu.matmul %12, %31, %cst_26 {dimension_numbers = #tpu.dot_dimension_numbers<[1], [0], [0], [1], [0, 0, 1, 1], [], []>} : vector<256x4xf32>, vector<4x8xf32>, vector<256x8xf32> -> vector<256x8xf32>
    %33 = arith.addf %29, %32 : vector<256x8xf32>
    %34 = vector.extract_strided_slice %2 {offsets = [2, 0, 0], sizes = [1, 4, 8], strides = [1, 1, 1]} : vector<9x4x8xf32> to vector<1x4x8xf32>
    %35 = vector.shape_cast %34 : vector<1x4x8xf32> to vector<4x8xf32>
    %cst_27 = arith.constant dense<0.000000e+00> : vector<256x8xf32>
    %36 = tpu.matmul %14, %35, %cst_27 {dimension_numbers = #tpu.dot_dimension_numbers<[1], [0], [0], [1], [0, 0, 1, 1], [], []>} : vector<256x4xf32>, vector<4x8xf32>, vector<256x8xf32> -> vector<256x8xf32>
    %37 = arith.addf %33, %36 : vector<256x8xf32>
    %38 = vector.extract_strided_slice %2 {offsets = [3, 0, 0], sizes = [1, 4, 8], strides = [1, 1, 1]} : vector<9x4x8xf32> to vector<1x4x8xf32>
    %39 = vector.shape_cast %38 : vector<1x4x8xf32> to vector<4x8xf32>
    %cst_28 = arith.constant dense<0.000000e+00> : vector<256x8xf32>
    %40 = tpu.matmul %16, %39, %cst_28 {dimension_numbers = #tpu.dot_dimension_numbers<[1], [0], [0], [1], [0, 0, 1, 1], [], []>} : vector<256x4xf32>, vector<4x8xf32>, vector<256x8xf32> -> vector<256x8xf32>
    %41 = arith.addf %37, %40 : vector<256x8xf32>
    %42 = vector.extract_strided_slice %2 {offsets = [4, 0, 0], sizes = [1, 4, 8], strides = [1, 1, 1]} : vector<9x4x8xf32> to vector<1x4x8xf32>
    %43 = vector.shape_cast %42 : vector<1x4x8xf32> to vector<4x8xf32>
    %cst_29 = arith.constant dense<0.000000e+00> : vector<256x8xf32>
    %44 = tpu.matmul %18, %43, %cst_29 {dimension_numbers = #tpu.dot_dimension_numbers<[1], [0], [0], [1], [0, 0, 1, 1], [], []>} : vector<256x4xf32>, vector<4x8xf32>, vector<256x8xf32> -> vector<256x8xf32>
    %45 = arith.addf %41, %44 : vector<256x8xf32>
    %46 = vector.extract_strided_slice %2 {offsets = [5, 0, 0], sizes = [1, 4, 8], strides = [1, 1, 1]} : vector<9x4x8xf32> to vector<1x4x8xf32>
    %47 = vector.shape_cast %46 : vector<1x4x8xf32> to vector<4x8xf32>
    %cst_30 = arith.constant dense<0.000000e+00> : vector<256x8xf32>
    %48 = tpu.matmul %20, %47, %cst_30 {dimension_numbers = #tpu.dot_dimension_numbers<[1], [0], [0], [1], [0, 0, 1, 1], [], []>} : vector<256x4xf32>, vector<4x8xf32>, vector<256x8xf32> -> vector<256x8xf32>
    %49 = arith.addf %45, %48 : vector<256x8xf32>
    %50 = vector.extract_strided_slice %2 {offsets = [6, 0, 0], sizes = [1, 4, 8], strides = [1, 1, 1]} : vector<9x4x8xf32> to vector<1x4x8xf32>
    %51 = vector.shape_cast %50 : vector<1x4x8xf32> to vector<4x8xf32>
    %cst_31 = arith.constant dense<0.000000e+00> : vector<256x8xf32>
    %52 = tpu.matmul %22, %51, %cst_31 {dimension_numbers = #tpu.dot_dimension_numbers<[1], [0], [0], [1], [0, 0, 1, 1], [], []>} : vector<256x4xf32>, vector<4x8xf32>, vector<256x8xf32> -> vector<256x8xf32>
    %53 = arith.addf %49, %52 : vector<256x8xf32>
    %54 = vector.extract_strided_slice %2 {offsets = [7, 0, 0], sizes = [1, 4, 8], strides = [1, 1, 1]} : vector<9x4x8xf32> to vector<1x4x8xf32>
    %55 = vector.shape_cast %54 : vector<1x4x8xf32> to vector<4x8xf32>
    %cst_32 = arith.constant dense<0.000000e+00> : vector<256x8xf32>
    %56 = tpu.matmul %24, %55, %cst_32 {dimension_numbers = #tpu.dot_dimension_numbers<[1], [0], [0], [1], [0, 0, 1, 1], [], []>} : vector<256x4xf32>, vector<4x8xf32>, vector<256x8xf32> -> vector<256x8xf32>
    %57 = arith.addf %53, %56 : vector<256x8xf32>
    %58 = vector.extract_strided_slice %2 {offsets = [8, 0, 0], sizes = [1, 4, 8], strides = [1, 1, 1]} : vector<9x4x8xf32> to vector<1x4x8xf32>
    %59 = vector.shape_cast %58 : vector<1x4x8xf32> to vector<4x8xf32>
    %cst_33 = arith.constant dense<0.000000e+00> : vector<256x8xf32>
    %60 = tpu.matmul %26, %59, %cst_33 {dimension_numbers = #tpu.dot_dimension_numbers<[1], [0], [0], [1], [0, 0, 1, 1], [], []>} : vector<256x4xf32>, vector<4x8xf32>, vector<256x8xf32> -> vector<256x8xf32>
    %61 = arith.addf %57, %60 : vector<256x8xf32>
    %62 = vector.shape_cast %61 : vector<256x8xf32> to vector<8x2x16x8xf32>
    %63 = vector.extract_strided_slice %62 {offsets = [0, 0, 0, 0], sizes = [8, 1, 16, 8], strides = [1, 1, 1, 1]} : vector<8x2x16x8xf32> to vector<8x1x16x8xf32>
    %64 = vector.shape_cast %63 : vector<8x1x16x8xf32> to vector<8x16x8xf32>
    %65 = vector.extract_strided_slice %62 {offsets = [0, 1, 0, 0], sizes = [8, 1, 16, 8], strides = [1, 1, 1, 1]} : vector<8x2x16x8xf32> to vector<8x1x16x8xf32>
    %66 = vector.shape_cast %65 : vector<8x1x16x8xf32> to vector<8x16x8xf32>
    %67 = arith.maximumf %64, %66 : vector<8x16x8xf32>
    %68 = vector.shape_cast %67 : vector<8x16x8xf32> to vector<8x8x2x8xf32>
    %69 = vector.extract_strided_slice %68 {offsets = [0, 0, 0, 0], sizes = [8, 8, 1, 8], strides = [1, 1, 1, 1]} : vector<8x8x2x8xf32> to vector<8x8x1x8xf32>
    %70 = vector.extract_strided_slice %68 {offsets = [0, 0, 1, 0], sizes = [8, 8, 1, 8], strides = [1, 1, 1, 1]} : vector<8x8x2x8xf32> to vector<8x8x1x8xf32>
    %71 = arith.maximumf %69, %70 : vector<8x8x1x8xf32>
    %72 = vector.broadcast %3 : vector<1x1x1x8xf32> to vector<8x8x1x8xf32>
    %73 = arith.mulf %71, %72 : vector<8x8x1x8xf32>
    %74 = vector.broadcast %4 : vector<1x1x1x8xf32> to vector<8x8x1x8xf32>
    %75 = arith.addf %73, %74 : vector<8x8x1x8xf32>
    %cst_34 = arith.constant 0.000000e+00 : f32
    %76 = vector.broadcast %cst_34 : f32 to vector<8x8x1x8xf32>
    %77 = arith.maximumf %75, %76 : vector<8x8x1x8xf32>
    %c0_35 = arith.constant 0 : index
    %c0_36 = arith.constant 0 : index
    %c0_37 = arith.constant 0 : index
    %78 = vector.load %arg5[%c0_35, %c0_36, %c0_37] : memref<9x8x8xf32, #tpu.memory_space<vmem>>, vector<9x8x8xf32>
    %c0_38 = arith.constant 0 : index
    %c0_39 = arith.constant 0 : index
    %c0_40 = arith.constant 0 : index
    %c0_41 = arith.constant 0 : index
    %79 = vector.load %arg6[%c0_38, %c0_39, %c0_40, %c0_41] : memref<1x1x1x8xf32, #tpu.memory_space<vmem>>, vector<1x1x1x8xf32>
    %c0_42 = arith.constant 0 : index
    %c0_43 = arith.constant 0 : index
    %c0_44 = arith.constant 0 : index
    %c0_45 = arith.constant 0 : index
    %80 = vector.load %arg7[%c0_42, %c0_43, %c0_44, %c0_45] : memref<1x1x1x8xf32, #tpu.memory_space<vmem>>, vector<1x1x1x8xf32>
    %cst_46 = arith.constant 0.000000e+00 : f32
    %81 = vector.broadcast %cst_46 : f32 to vector<10x10x1x8xf32>
    %c0_47 = arith.constant 0 : index
    %c0_48 = arith.constant 0 : index
    %c0_49 = arith.constant 0 : index
    %c0_50 = arith.constant 0 : index
    %82 = vector.load %arg15[%c0_47, %c0_48, %c0_49, %c0_50] : memref<10x10x1x8xf32, #tpu.memory_space<vmem>>, vector<10x10x1x8xf32>
    tpu.vector_store %arg15[%c0_47, %c0_48, %c0_49, %c0_50], %81 {strides = array<i32>} : memref<10x10x1x8xf32, #tpu.memory_space<vmem>>, vector<10x10x1x8xf32>,
    %c1_51 = arith.constant 1 : index
    %c1_52 = arith.constant 1 : index
    %c0_53 = arith.constant 0 : index
    %c0_54 = arith.constant 0 : index
    %83 = vector.load %arg15[%c1_51, %c1_52, %c0_53, %c0_54] : memref<10x10x1x8xf32, #tpu.memory_space<vmem>>, vector<8x8x1x8xf32>
    tpu.vector_store %arg15[%c1_51, %c1_52, %c0_53, %c0_54], %77 {strides = array<i32>} : memref<10x10x1x8xf32, #tpu.memory_space<vmem>>, vector<8x8x1x8xf32>,
    %c0_55 = arith.constant 0 : index
    %c0_56 = arith.constant 0 : index
    %c0_57 = arith.constant 0 : index
    %c0_58 = arith.constant 0 : index
    %84 = vector.load %arg15[%c0_55, %c0_56, %c0_57, %c0_58] : memref<10x10x1x8xf32, #tpu.memory_space<vmem>>, vector<10x10x1x8xf32>
    %85 = vector.extract_strided_slice %84 {offsets = [0, 0, 0, 0], sizes = [8, 8, 1, 8], strides = [1, 1, 1, 1]} : vector<10x10x1x8xf32> to vector<8x8x1x8xf32>
    %86 = vector.shape_cast %85 : vector<8x8x1x8xf32> to vector<64x8xf32>
    %87 = vector.extract_strided_slice %84 {offsets = [0, 1, 0, 0], sizes = [8, 8, 1, 8], strides = [1, 1, 1, 1]} : vector<10x10x1x8xf32> to vector<8x8x1x8xf32>
    %88 = vector.shape_cast %87 : vector<8x8x1x8xf32> to vector<64x8xf32>
    %89 = vector.extract_strided_slice %84 {offsets = [0, 2, 0, 0], sizes = [8, 8, 1, 8], strides = [1, 1, 1, 1]} : vector<10x10x1x8xf32> to vector<8x8x1x8xf32>
    %90 = vector.shape_cast %89 : vector<8x8x1x8xf32> to vector<64x8xf32>
    %91 = vector.extract_strided_slice %84 {offsets = [1, 0, 0, 0], sizes = [8, 8, 1, 8], strides = [1, 1, 1, 1]} : vector<10x10x1x8xf32> to vector<8x8x1x8xf32>
    %92 = vector.shape_cast %91 : vector<8x8x1x8xf32> to vector<64x8xf32>
    %93 = vector.extract_strided_slice %84 {offsets = [1, 1, 0, 0], sizes = [8, 8, 1, 8], strides = [1, 1, 1, 1]} : vector<10x10x1x8xf32> to vector<8x8x1x8xf32>
    %94 = vector.shape_cast %93 : vector<8x8x1x8xf32> to vector<64x8xf32>
    %95 = vector.extract_strided_slice %84 {offsets = [1, 2, 0, 0], sizes = [8, 8, 1, 8], strides = [1, 1, 1, 1]} : vector<10x10x1x8xf32> to vector<8x8x1x8xf32>
    %96 = vector.shape_cast %95 : vector<8x8x1x8xf32> to vector<64x8xf32>
    %97 = vector.extract_strided_slice %84 {offsets = [2, 0, 0, 0], sizes = [8, 8, 1, 8], strides = [1, 1, 1, 1]} : vector<10x10x1x8xf32> to vector<8x8x1x8xf32>
    %98 = vector.shape_cast %97 : vector<8x8x1x8xf32> to vector<64x8xf32>
    %99 = vector.extract_strided_slice %84 {offsets = [2, 1, 0, 0], sizes = [8, 8, 1, 8], strides = [1, 1, 1, 1]} : vector<10x10x1x8xf32> to vector<8x8x1x8xf32>
    %100 = vector.shape_cast %99 : vector<8x8x1x8xf32> to vector<64x8xf32>
    %101 = vector.extract_strided_slice %84 {offsets = [2, 2, 0, 0], sizes = [8, 8, 1, 8], strides = [1, 1, 1, 1]} : vector<10x10x1x8xf32> to vector<8x8x1x8xf32>
    %102 = vector.shape_cast %101 : vector<8x8x1x8xf32> to vector<64x8xf32>
    %103 = vector.extract_strided_slice %78 {offsets = [0, 0, 0], sizes = [1, 8, 8], strides = [1, 1, 1]} : vector<9x8x8xf32> to vector<1x8x8xf32>
    %104 = vector.shape_cast %103 : vector<1x8x8xf32> to vector<8x8xf32>
    %cst_59 = arith.constant dense<0.000000e+00> : vector<64x8xf32>
    %105 = tpu.matmul %86, %104, %cst_59 {dimension_numbers = #tpu.dot_dimension_numbers<[1], [0], [0], [1], [0, 0, 1, 1], [], []>} : vector<64x8xf32>, vector<8x8xf32>, vector<64x8xf32> -> vector<64x8xf32>
    %106 = vector.extract_strided_slice %78 {offsets = [1, 0, 0], sizes = [1, 8, 8], strides = [1, 1, 1]} : vector<9x8x8xf32> to vector<1x8x8xf32>
    %107 = vector.shape_cast %106 : vector<1x8x8xf32> to vector<8x8xf32>
    %cst_60 = arith.constant dense<0.000000e+00> : vector<64x8xf32>
    %108 = tpu.matmul %88, %107, %cst_60 {dimension_numbers = #tpu.dot_dimension_numbers<[1], [0], [0], [1], [0, 0, 1, 1], [], []>} : vector<64x8xf32>, vector<8x8xf32>, vector<64x8xf32> -> vector<64x8xf32>
    %109 = arith.addf %105, %108 : vector<64x8xf32>
    %110 = vector.extract_strided_slice %78 {offsets = [2, 0, 0], sizes = [1, 8, 8], strides = [1, 1, 1]} : vector<9x8x8xf32> to vector<1x8x8xf32>
    %111 = vector.shape_cast %110 : vector<1x8x8xf32> to vector<8x8xf32>
    %cst_61 = arith.constant dense<0.000000e+00> : vector<64x8xf32>
    %112 = tpu.matmul %90, %111, %cst_61 {dimension_numbers = #tpu.dot_dimension_numbers<[1], [0], [0], [1], [0, 0, 1, 1], [], []>} : vector<64x8xf32>, vector<8x8xf32>, vector<64x8xf32> -> vector<64x8xf32>
    %113 = arith.addf %109, %112 : vector<64x8xf32>
    %114 = vector.extract_strided_slice %78 {offsets = [3, 0, 0], sizes = [1, 8, 8], strides = [1, 1, 1]} : vector<9x8x8xf32> to vector<1x8x8xf32>
    %115 = vector.shape_cast %114 : vector<1x8x8xf32> to vector<8x8xf32>
    %cst_62 = arith.constant dense<0.000000e+00> : vector<64x8xf32>
    %116 = tpu.matmul %92, %115, %cst_62 {dimension_numbers = #tpu.dot_dimension_numbers<[1], [0], [0], [1], [0, 0, 1, 1], [], []>} : vector<64x8xf32>, vector<8x8xf32>, vector<64x8xf32> -> vector<64x8xf32>
    %117 = arith.addf %113, %116 : vector<64x8xf32>
    %118 = vector.extract_strided_slice %78 {offsets = [4, 0, 0], sizes = [1, 8, 8], strides = [1, 1, 1]} : vector<9x8x8xf32> to vector<1x8x8xf32>
    %119 = vector.shape_cast %118 : vector<1x8x8xf32> to vector<8x8xf32>
    %cst_63 = arith.constant dense<0.000000e+00> : vector<64x8xf32>
    %120 = tpu.matmul %94, %119, %cst_63 {dimension_numbers = #tpu.dot_dimension_numbers<[1], [0], [0], [1], [0, 0, 1, 1], [], []>} : vector<64x8xf32>, vector<8x8xf32>, vector<64x8xf32> -> vector<64x8xf32>
    %121 = arith.addf %117, %120 : vector<64x8xf32>
    %122 = vector.extract_strided_slice %78 {offsets = [5, 0, 0], sizes = [1, 8, 8], strides = [1, 1, 1]} : vector<9x8x8xf32> to vector<1x8x8xf32>
    %123 = vector.shape_cast %122 : vector<1x8x8xf32> to vector<8x8xf32>
    %cst_64 = arith.constant dense<0.000000e+00> : vector<64x8xf32>
    %124 = tpu.matmul %96, %123, %cst_64 {dimension_numbers = #tpu.dot_dimension_numbers<[1], [0], [0], [1], [0, 0, 1, 1], [], []>} : vector<64x8xf32>, vector<8x8xf32>, vector<64x8xf32> -> vector<64x8xf32>
    %125 = arith.addf %121, %124 : vector<64x8xf32>
    %126 = vector.extract_strided_slice %78 {offsets = [6, 0, 0], sizes = [1, 8, 8], strides = [1, 1, 1]} : vector<9x8x8xf32> to vector<1x8x8xf32>
    %127 = vector.shape_cast %126 : vector<1x8x8xf32> to vector<8x8xf32>
    %cst_65 = arith.constant dense<0.000000e+00> : vector<64x8xf32>
    %128 = tpu.matmul %98, %127, %cst_65 {dimension_numbers = #tpu.dot_dimension_numbers<[1], [0], [0], [1], [0, 0, 1, 1], [], []>} : vector<64x8xf32>, vector<8x8xf32>, vector<64x8xf32> -> vector<64x8xf32>
    %129 = arith.addf %125, %128 : vector<64x8xf32>
    %130 = vector.extract_strided_slice %78 {offsets = [7, 0, 0], sizes = [1, 8, 8], strides = [1, 1, 1]} : vector<9x8x8xf32> to vector<1x8x8xf32>
    %131 = vector.shape_cast %130 : vector<1x8x8xf32> to vector<8x8xf32>
    %cst_66 = arith.constant dense<0.000000e+00> : vector<64x8xf32>
    %132 = tpu.matmul %100, %131, %cst_66 {dimension_numbers = #tpu.dot_dimension_numbers<[1], [0], [0], [1], [0, 0, 1, 1], [], []>} : vector<64x8xf32>, vector<8x8xf32>, vector<64x8xf32> -> vector<64x8xf32>
    %133 = arith.addf %129, %132 : vector<64x8xf32>
    %134 = vector.extract_strided_slice %78 {offsets = [8, 0, 0], sizes = [1, 8, 8], strides = [1, 1, 1]} : vector<9x8x8xf32> to vector<1x8x8xf32>
    %135 = vector.shape_cast %134 : vector<1x8x8xf32> to vector<8x8xf32>
    %cst_67 = arith.constant dense<0.000000e+00> : vector<64x8xf32>
    %136 = tpu.matmul %102, %135, %cst_67 {dimension_numbers = #tpu.dot_dimension_numbers<[1], [0], [0], [1], [0, 0, 1, 1], [], []>} : vector<64x8xf32>, vector<8x8xf32>, vector<64x8xf32> -> vector<64x8xf32>
    %137 = arith.addf %133, %136 : vector<64x8xf32>
    %138 = vector.shape_cast %137 : vector<64x8xf32> to vector<4x2x8x8xf32>
    %139 = vector.extract_strided_slice %138 {offsets = [0, 0, 0, 0], sizes = [4, 1, 8, 8], strides = [1, 1, 1, 1]} : vector<4x2x8x8xf32> to vector<4x1x8x8xf32>
    %140 = vector.shape_cast %139 : vector<4x1x8x8xf32> to vector<4x8x8xf32>
    %141 = vector.extract_strided_slice %138 {offsets = [0, 1, 0, 0], sizes = [4, 1, 8, 8], strides = [1, 1, 1, 1]} : vector<4x2x8x8xf32> to vector<4x1x8x8xf32>
    %142 = vector.shape_cast %141 : vector<4x1x8x8xf32> to vector<4x8x8xf32>
    %143 = arith.maximumf %140, %142 : vector<4x8x8xf32>
    %144 = vector.shape_cast %143 : vector<4x8x8xf32> to vector<4x4x2x8xf32>
    %145 = vector.extract_strided_slice %144 {offsets = [0, 0, 0, 0], sizes = [4, 4, 1, 8], strides = [1, 1, 1, 1]} : vector<4x4x2x8xf32> to vector<4x4x1x8xf32>
    %146 = vector.extract_strided_slice %144 {offsets = [0, 0, 1, 0], sizes = [4, 4, 1, 8], strides = [1, 1, 1, 1]} : vector<4x4x2x8xf32> to vector<4x4x1x8xf32>
    %147 = arith.maximumf %145, %146 : vector<4x4x1x8xf32>
    %148 = vector.broadcast %79 : vector<1x1x1x8xf32> to vector<4x4x1x8xf32>
    %149 = arith.mulf %147, %148 : vector<4x4x1x8xf32>
    %150 = vector.broadcast %80 : vector<1x1x1x8xf32> to vector<4x4x1x8xf32>
    %151 = arith.addf %149, %150 : vector<4x4x1x8xf32>
    %cst_68 = arith.constant 0.000000e+00 : f32
    %152 = vector.broadcast %cst_68 : f32 to vector<4x4x1x8xf32>
    %153 = arith.maximumf %151, %152 : vector<4x4x1x8xf32>
    %154 = vector.shape_cast %153 : vector<4x4x1x8xf32> to vector<16x8xf32>
    %155 = vector.extract_strided_slice %154 {offsets = [0, 0], sizes = [1, 8], strides = [1, 1]} : vector<16x8xf32> to vector<1x8xf32>
    %c0_69 = arith.constant 0 : index
    %c0_70 = arith.constant 0 : index
    %156 = vector.load %arg8[%c0_69, %c0_70] : memref<128x32xf32, #tpu.memory_space<vmem>>, vector<8x32xf32>
    %cst_71 = arith.constant dense<0.000000e+00> : vector<1x32xf32>
    %157 = tpu.matmul %155, %156, %cst_71 {dimension_numbers = #tpu.dot_dimension_numbers<[1], [0], [0], [1], [0, 0, 1, 1], [], []>} : vector<1x8xf32>, vector<8x32xf32>, vector<1x32xf32> -> vector<1x32xf32>
    %158 = vector.extract_strided_slice %154 {offsets = [1, 0], sizes = [1, 8], strides = [1, 1]} : vector<16x8xf32> to vector<1x8xf32>
    %c8 = arith.constant 8 : index
    %c0_72 = arith.constant 0 : index
    %159 = vector.load %arg8[%c8, %c0_72] : memref<128x32xf32, #tpu.memory_space<vmem>>, vector<8x32xf32>
    %cst_73 = arith.constant dense<0.000000e+00> : vector<1x32xf32>
    %160 = tpu.matmul %158, %159, %cst_73 {dimension_numbers = #tpu.dot_dimension_numbers<[1], [0], [0], [1], [0, 0, 1, 1], [], []>} : vector<1x8xf32>, vector<8x32xf32>, vector<1x32xf32> -> vector<1x32xf32>
    %161 = arith.addf %157, %160 : vector<1x32xf32>
    %162 = vector.extract_strided_slice %154 {offsets = [2, 0], sizes = [1, 8], strides = [1, 1]} : vector<16x8xf32> to vector<1x8xf32>
    %c16 = arith.constant 16 : index
    %c0_74 = arith.constant 0 : index
    %163 = vector.load %arg8[%c16, %c0_74] : memref<128x32xf32, #tpu.memory_space<vmem>>, vector<8x32xf32>
    %cst_75 = arith.constant dense<0.000000e+00> : vector<1x32xf32>
    %164 = tpu.matmul %162, %163, %cst_75 {dimension_numbers = #tpu.dot_dimension_numbers<[1], [0], [0], [1], [0, 0, 1, 1], [], []>} : vector<1x8xf32>, vector<8x32xf32>, vector<1x32xf32> -> vector<1x32xf32>
    %165 = arith.addf %161, %164 : vector<1x32xf32>
    %166 = vector.extract_strided_slice %154 {offsets = [3, 0], sizes = [1, 8], strides = [1, 1]} : vector<16x8xf32> to vector<1x8xf32>
    %c24 = arith.constant 24 : index
    %c0_76 = arith.constant 0 : index
    %167 = vector.load %arg8[%c24, %c0_76] : memref<128x32xf32, #tpu.memory_space<vmem>>, vector<8x32xf32>
    %cst_77 = arith.constant dense<0.000000e+00> : vector<1x32xf32>
    %168 = tpu.matmul %166, %167, %cst_77 {dimension_numbers = #tpu.dot_dimension_numbers<[1], [0], [0], [1], [0, 0, 1, 1], [], []>} : vector<1x8xf32>, vector<8x32xf32>, vector<1x32xf32> -> vector<1x32xf32>
    %169 = arith.addf %165, %168 : vector<1x32xf32>
    %170 = vector.extract_strided_slice %154 {offsets = [4, 0], sizes = [1, 8], strides = [1, 1]} : vector<16x8xf32> to vector<1x8xf32>
    %c32 = arith.constant 32 : index
    %c0_78 = arith.constant 0 : index
    %171 = vector.load %arg8[%c32, %c0_78] : memref<128x32xf32, #tpu.memory_space<vmem>>, vector<8x32xf32>
    %cst_79 = arith.constant dense<0.000000e+00> : vector<1x32xf32>
    %172 = tpu.matmul %170, %171, %cst_79 {dimension_numbers = #tpu.dot_dimension_numbers<[1], [0], [0], [1], [0, 0, 1, 1], [], []>} : vector<1x8xf32>, vector<8x32xf32>, vector<1x32xf32> -> vector<1x32xf32>
    %173 = arith.addf %169, %172 : vector<1x32xf32>
    %174 = vector.extract_strided_slice %154 {offsets = [5, 0], sizes = [1, 8], strides = [1, 1]} : vector<16x8xf32> to vector<1x8xf32>
    %c40 = arith.constant 40 : index
    %c0_80 = arith.constant 0 : index
    %175 = vector.load %arg8[%c40, %c0_80] : memref<128x32xf32, #tpu.memory_space<vmem>>, vector<8x32xf32>
    %cst_81 = arith.constant dense<0.000000e+00> : vector<1x32xf32>
    %176 = tpu.matmul %174, %175, %cst_81 {dimension_numbers = #tpu.dot_dimension_numbers<[1], [0], [0], [1], [0, 0, 1, 1], [], []>} : vector<1x8xf32>, vector<8x32xf32>, vector<1x32xf32> -> vector<1x32xf32>
    %177 = arith.addf %173, %176 : vector<1x32xf32>
    %178 = vector.extract_strided_slice %154 {offsets = [6, 0], sizes = [1, 8], strides = [1, 1]} : vector<16x8xf32> to vector<1x8xf32>
    %c48 = arith.constant 48 : index
    %c0_82 = arith.constant 0 : index
    %179 = vector.load %arg8[%c48, %c0_82] : memref<128x32xf32, #tpu.memory_space<vmem>>, vector<8x32xf32>
    %cst_83 = arith.constant dense<0.000000e+00> : vector<1x32xf32>
    %180 = tpu.matmul %178, %179, %cst_83 {dimension_numbers = #tpu.dot_dimension_numbers<[1], [0], [0], [1], [0, 0, 1, 1], [], []>} : vector<1x8xf32>, vector<8x32xf32>, vector<1x32xf32> -> vector<1x32xf32>
    %181 = arith.addf %177, %180 : vector<1x32xf32>
    %182 = vector.extract_strided_slice %154 {offsets = [7, 0], sizes = [1, 8], strides = [1, 1]} : vector<16x8xf32> to vector<1x8xf32>
    %c56 = arith.constant 56 : index
    %c0_84 = arith.constant 0 : index
    %183 = vector.load %arg8[%c56, %c0_84] : memref<128x32xf32, #tpu.memory_space<vmem>>, vector<8x32xf32>
    %cst_85 = arith.constant dense<0.000000e+00> : vector<1x32xf32>
    %184 = tpu.matmul %182, %183, %cst_85 {dimension_numbers = #tpu.dot_dimension_numbers<[1], [0], [0], [1], [0, 0, 1, 1], [], []>} : vector<1x8xf32>, vector<8x32xf32>, vector<1x32xf32> -> vector<1x32xf32>
    %185 = arith.addf %181, %184 : vector<1x32xf32>
    %186 = vector.extract_strided_slice %154 {offsets = [8, 0], sizes = [1, 8], strides = [1, 1]} : vector<16x8xf32> to vector<1x8xf32>
    %c64 = arith.constant 64 : index
    %c0_86 = arith.constant 0 : index
    %187 = vector.load %arg8[%c64, %c0_86] : memref<128x32xf32, #tpu.memory_space<vmem>>, vector<8x32xf32>
    %cst_87 = arith.constant dense<0.000000e+00> : vector<1x32xf32>
    %188 = tpu.matmul %186, %187, %cst_87 {dimension_numbers = #tpu.dot_dimension_numbers<[1], [0], [0], [1], [0, 0, 1, 1], [], []>} : vector<1x8xf32>, vector<8x32xf32>, vector<1x32xf32> -> vector<1x32xf32>
    %189 = arith.addf %185, %188 : vector<1x32xf32>
    %190 = vector.extract_strided_slice %154 {offsets = [9, 0], sizes = [1, 8], strides = [1, 1]} : vector<16x8xf32> to vector<1x8xf32>
    %c72 = arith.constant 72 : index
    %c0_88 = arith.constant 0 : index
    %191 = vector.load %arg8[%c72, %c0_88] : memref<128x32xf32, #tpu.memory_space<vmem>>, vector<8x32xf32>
    %cst_89 = arith.constant dense<0.000000e+00> : vector<1x32xf32>
    %192 = tpu.matmul %190, %191, %cst_89 {dimension_numbers = #tpu.dot_dimension_numbers<[1], [0], [0], [1], [0, 0, 1, 1], [], []>} : vector<1x8xf32>, vector<8x32xf32>, vector<1x32xf32> -> vector<1x32xf32>
    %193 = arith.addf %189, %192 : vector<1x32xf32>
    %194 = vector.extract_strided_slice %154 {offsets = [10, 0], sizes = [1, 8], strides = [1, 1]} : vector<16x8xf32> to vector<1x8xf32>
    %c80 = arith.constant 80 : index
    %c0_90 = arith.constant 0 : index
    %195 = vector.load %arg8[%c80, %c0_90] : memref<128x32xf32, #tpu.memory_space<vmem>>, vector<8x32xf32>
    %cst_91 = arith.constant dense<0.000000e+00> : vector<1x32xf32>
    %196 = tpu.matmul %194, %195, %cst_91 {dimension_numbers = #tpu.dot_dimension_numbers<[1], [0], [0], [1], [0, 0, 1, 1], [], []>} : vector<1x8xf32>, vector<8x32xf32>, vector<1x32xf32> -> vector<1x32xf32>
    %197 = arith.addf %193, %196 : vector<1x32xf32>
    %198 = vector.extract_strided_slice %154 {offsets = [11, 0], sizes = [1, 8], strides = [1, 1]} : vector<16x8xf32> to vector<1x8xf32>
    %c88 = arith.constant 88 : index
    %c0_92 = arith.constant 0 : index
    %199 = vector.load %arg8[%c88, %c0_92] : memref<128x32xf32, #tpu.memory_space<vmem>>, vector<8x32xf32>
    %cst_93 = arith.constant dense<0.000000e+00> : vector<1x32xf32>
    %200 = tpu.matmul %198, %199, %cst_93 {dimension_numbers = #tpu.dot_dimension_numbers<[1], [0], [0], [1], [0, 0, 1, 1], [], []>} : vector<1x8xf32>, vector<8x32xf32>, vector<1x32xf32> -> vector<1x32xf32>
    %201 = arith.addf %197, %200 : vector<1x32xf32>
    %202 = vector.extract_strided_slice %154 {offsets = [12, 0], sizes = [1, 8], strides = [1, 1]} : vector<16x8xf32> to vector<1x8xf32>
    %c96 = arith.constant 96 : index
    %c0_94 = arith.constant 0 : index
    %203 = vector.load %arg8[%c96, %c0_94] : memref<128x32xf32, #tpu.memory_space<vmem>>, vector<8x32xf32>
    %cst_95 = arith.constant dense<0.000000e+00> : vector<1x32xf32>
    %204 = tpu.matmul %202, %203, %cst_95 {dimension_numbers = #tpu.dot_dimension_numbers<[1], [0], [0], [1], [0, 0, 1, 1], [], []>} : vector<1x8xf32>, vector<8x32xf32>, vector<1x32xf32> -> vector<1x32xf32>
    %205 = arith.addf %201, %204 : vector<1x32xf32>
    %206 = vector.extract_strided_slice %154 {offsets = [13, 0], sizes = [1, 8], strides = [1, 1]} : vector<16x8xf32> to vector<1x8xf32>
    %c104 = arith.constant 104 : index
    %c0_96 = arith.constant 0 : index
    %207 = vector.load %arg8[%c104, %c0_96] : memref<128x32xf32, #tpu.memory_space<vmem>>, vector<8x32xf32>
    %cst_97 = arith.constant dense<0.000000e+00> : vector<1x32xf32>
    %208 = tpu.matmul %206, %207, %cst_97 {dimension_numbers = #tpu.dot_dimension_numbers<[1], [0], [0], [1], [0, 0, 1, 1], [], []>} : vector<1x8xf32>, vector<8x32xf32>, vector<1x32xf32> -> vector<1x32xf32>
    %209 = arith.addf %205, %208 : vector<1x32xf32>
    %210 = vector.extract_strided_slice %154 {offsets = [14, 0], sizes = [1, 8], strides = [1, 1]} : vector<16x8xf32> to vector<1x8xf32>
    %c112 = arith.constant 112 : index
    %c0_98 = arith.constant 0 : index
    %211 = vector.load %arg8[%c112, %c0_98] : memref<128x32xf32, #tpu.memory_space<vmem>>, vector<8x32xf32>
    %cst_99 = arith.constant dense<0.000000e+00> : vector<1x32xf32>
    %212 = tpu.matmul %210, %211, %cst_99 {dimension_numbers = #tpu.dot_dimension_numbers<[1], [0], [0], [1], [0, 0, 1, 1], [], []>} : vector<1x8xf32>, vector<8x32xf32>, vector<1x32xf32> -> vector<1x32xf32>
    %213 = arith.addf %209, %212 : vector<1x32xf32>
    %214 = vector.extract_strided_slice %154 {offsets = [15, 0], sizes = [1, 8], strides = [1, 1]} : vector<16x8xf32> to vector<1x8xf32>
    %c120 = arith.constant 120 : index
    %c0_100 = arith.constant 0 : index
    %215 = vector.load %arg8[%c120, %c0_100] : memref<128x32xf32, #tpu.memory_space<vmem>>, vector<8x32xf32>
    %cst_101 = arith.constant dense<0.000000e+00> : vector<1x32xf32>
    %216 = tpu.matmul %214, %215, %cst_101 {dimension_numbers = #tpu.dot_dimension_numbers<[1], [0], [0], [1], [0, 0, 1, 1], [], []>} : vector<1x8xf32>, vector<8x32xf32>, vector<1x32xf32> -> vector<1x32xf32>
    %217 = arith.addf %213, %216 : vector<1x32xf32>
    %c0_102 = arith.constant 0 : index
    %c0_103 = arith.constant 0 : index
    %218 = vector.load %arg9[%c0_102, %c0_103] : memref<1x32xf32, #tpu.memory_space<vmem>>, vector<1x32xf32>
    %219 = arith.mulf %217, %218 : vector<1x32xf32>
    %c0_104 = arith.constant 0 : index
    %c0_105 = arith.constant 0 : index
    %220 = vector.load %arg10[%c0_104, %c0_105] : memref<1x32xf32, #tpu.memory_space<vmem>>, vector<1x32xf32>
    %221 = arith.addf %219, %220 : vector<1x32xf32>
    %cst_106 = arith.constant 0.000000e+00 : f32
    %222 = vector.broadcast %cst_106 : f32 to vector<1x32xf32>
    %223 = arith.maximumf %221, %222 : vector<1x32xf32>
    %c0_107 = arith.constant 0 : index
    %c0_108 = arith.constant 0 : index
    %224 = vector.load %arg11[%c0_107, %c0_108] : memref<32x10xf32, #tpu.memory_space<vmem>>, vector<32x10xf32>
    %cst_109 = arith.constant dense<0.000000e+00> : vector<1x10xf32>
    %225 = tpu.matmul %223, %224, %cst_109 {dimension_numbers = #tpu.dot_dimension_numbers<[1], [0], [0], [1], [0, 0, 1, 1], [], []>} : vector<1x32xf32>, vector<32x10xf32>, vector<1x10xf32> -> vector<1x10xf32>
    %c0_110 = arith.constant 0 : index
    %c0_111 = arith.constant 0 : index
    %226 = vector.load %arg12[%c0_110, %c0_111] : memref<1x10xf32, #tpu.memory_space<vmem>>, vector<1x10xf32>
    %227 = arith.addf %225, %226 : vector<1x10xf32>
    %cst_112 = arith.constant dense<0xFF800000> : vector<1xf32>
    %228 = vector.multi_reduction <maximumf>, %227, %cst_112 [1] : vector<1x10xf32> to vector<1xf32>
    %229 = vector.shape_cast %228 : vector<1xf32> to vector<1x1xf32>
    %230 = vector.broadcast %229 : vector<1x1xf32> to vector<1x10xf32>
    %231 = arith.subf %227, %230 : vector<1x10xf32>
    %232 = math.exp %231 : vector<1x10xf32>
    %cst_113 = arith.constant dense<0.000000e+00> : vector<1xf32>
    %233 = vector.multi_reduction <add>, %232, %cst_113 [1] : vector<1x10xf32> to vector<1xf32>
    %234 = vector.shape_cast %233 : vector<1xf32> to vector<1x1xf32>
    %235 = math.log %234 : vector<1x1xf32>
    %236 = vector.broadcast %235 : vector<1x1xf32> to vector<1x10xf32>
    %237 = arith.subf %231, %236 : vector<1x10xf32>
    %c0_114 = arith.constant 0 : index
    %c0_115 = arith.constant 0 : index
    %c0_116 = arith.constant 0 : index
    %238 = vector.load %arg13[%c0_114, %c0_115, %c0_116] : memref<1x1x10xf32, #tpu.memory_space<vmem>>, vector<1x1x10xf32>
    %239 = vector.shape_cast %238 : vector<1x1x10xf32> to vector<1x10xf32>
    %240 = vector.shape_cast %237 : vector<1x10xf32> to vector<1x1x10xf32>
    tpu.vector_store %arg13[%c0_114, %c0_115, %c0_116], %240 {strides = array<i32>} : memref<1x1x10xf32, #tpu.memory_space<vmem>>, vector<1x1x10xf32>,
    return
  }
  func.func @transform_0(%arg0: i32) -> (i32, i32, i32, i32) {
    %c0_i32 = arith.constant 0 : i32
    %c0_i32_0 = arith.constant 0 : i32
    %c0_i32_1 = arith.constant 0 : i32
    %c0_i32_2 = arith.constant 0 : i32
    return %arg0, %c0_i32, %c0_i32_0, %c0_i32_1 : i32, i32, i32, i32
  }
  func.func @transform_1(%arg0: i32) -> (i32, i32, i32) {
    %c0_i32 = arith.constant 0 : i32
    %c0_i32_0 = arith.constant 0 : i32
    %c0_i32_1 = arith.constant 0 : i32
    %c0_i32_2 = arith.constant 0 : i32
    return %c0_i32, %c0_i32_0, %c0_i32_1 : i32, i32, i32
  }
  func.func @transform_2(%arg0: i32) -> (i32, i32, i32, i32) {
    %c0_i32 = arith.constant 0 : i32
    %c0_i32_0 = arith.constant 0 : i32
    %c0_i32_1 = arith.constant 0 : i32
    %c0_i32_2 = arith.constant 0 : i32
    %c0_i32_3 = arith.constant 0 : i32
    return %c0_i32, %c0_i32_0, %c0_i32_1, %c0_i32_2 : i32, i32, i32, i32
  }
  func.func @transform_3(%arg0: i32) -> (i32, i32, i32, i32) {
    %c0_i32 = arith.constant 0 : i32
    %c0_i32_0 = arith.constant 0 : i32
    %c0_i32_1 = arith.constant 0 : i32
    %c0_i32_2 = arith.constant 0 : i32
    %c0_i32_3 = arith.constant 0 : i32
    return %c0_i32, %c0_i32_0, %c0_i32_1, %c0_i32_2 : i32, i32, i32, i32
  }
  func.func @transform_4(%arg0: i32) -> (i32, i32, i32) {
    %c0_i32 = arith.constant 0 : i32
    %c0_i32_0 = arith.constant 0 : i32
    %c0_i32_1 = arith.constant 0 : i32
    %c0_i32_2 = arith.constant 0 : i32
    return %c0_i32, %c0_i32_0, %c0_i32_1 : i32, i32, i32
  }
  func.func @transform_5(%arg0: i32) -> (i32, i32, i32, i32) {
    %c0_i32 = arith.constant 0 : i32
    %c0_i32_0 = arith.constant 0 : i32
    %c0_i32_1 = arith.constant 0 : i32
    %c0_i32_2 = arith.constant 0 : i32
    %c0_i32_3 = arith.constant 0 : i32
    return %c0_i32, %c0_i32_0, %c0_i32_1, %c0_i32_2 : i32, i32, i32, i32
  }
  func.func @transform_6(%arg0: i32) -> (i32, i32, i32, i32) {
    %c0_i32 = arith.constant 0 : i32
    %c0_i32_0 = arith.constant 0 : i32
    %c0_i32_1 = arith.constant 0 : i32
    %c0_i32_2 = arith.constant 0 : i32
    %c0_i32_3 = arith.constant 0 : i32
    return %c0_i32, %c0_i32_0, %c0_i32_1, %c0_i32_2 : i32, i32, i32, i32
  }
  func.func @transform_7(%arg0: i32) -> (i32, i32) {
    %c0_i32 = arith.constant 0 : i32
    %c0_i32_0 = arith.constant 0 : i32
    %c0_i32_1 = arith.constant 0 : i32
    return %c0_i32, %c0_i32_0 : i32, i32
  }
  func.func @transform_8(%arg0: i32) -> (i32, i32) {
    %c0_i32 = arith.constant 0 : i32
    %c0_i32_0 = arith.constant 0 : i32
    %c0_i32_1 = arith.constant 0 : i32
    return %c0_i32, %c0_i32_0 : i32, i32
  }
  func.func @transform_9(%arg0: i32) -> (i32, i32) {
    %c0_i32 = arith.constant 0 : i32
    %c0_i32_0 = arith.constant 0 : i32
    %c0_i32_1 = arith.constant 0 : i32
    return %c0_i32, %c0_i32_0 : i32, i32
  }
  func.func @transform_10(%arg0: i32) -> (i32, i32) {
    %c0_i32 = arith.constant 0 : i32
    %c0_i32_0 = arith.constant 0 : i32
    %c0_i32_1 = arith.constant 0 : i32
    return %c0_i32, %c0_i32_0 : i32, i32
  }
  func.func @transform_11(%arg0: i32) -> (i32, i32) {
    %c0_i32 = arith.constant 0 : i32
    %c0_i32_0 = arith.constant 0 : i32
    %c0_i32_1 = arith.constant 0 : i32
    return %c0_i32, %c0_i32_0 : i32, i32
  }
  func.func @transform_12(%arg0: i32) -> (i32, i32, i32) {
    %c0_i32 = arith.constant 0 : i32
    %c0_i32_0 = arith.constant 0 : i32
    %c0_i32_1 = arith.constant 0 : i32
    return %arg0, %c0_i32, %c0_i32_0 : i32, i32, i32
  }
}

</mosaic_0001>

<bundles_post_ra>
// kernel: cnn_forward.1
= control target key start
LH: loop header
LB: loop body
LE: loop exit
PB: predicated region body
PF: predicated region fallthrough
CT: control target
= control target key end

     0   :  { %s22792_s0 = inlined_call_operand.vmem [shape: f32[2,16,16,4], index: 0, kind: input, shape index: {}]   ;;  %s22793_s1 = inlined_call_operand.vmem [shape: f32[9,4,8], index: 1, kind: input, shape index: {}]   ;;  %s22794_s2 = inlined_call_operand.vmem [shape: f32[1,1,1,8], index: 2, kind: input, shape index: {}]   ;;  %s22795_s3 = inlined_call_operand.vmem [shape: f32[1,1,1,8], index: 3, kind: input, shape index: {}]   ;;  %s22796_s4 = inlined_call_operand.vmem [shape: f32[9,8,8], index: 4, kind: input, shape index: {}]   ;;  %s22797_s5 = inlined_call_operand.vmem [shape: f32[1,1,1,8], index: 5, kind: input, shape index: {}]   ;;  %s22798_s6 = inlined_call_operand.vmem [shape: f32[1,1,1,8], index: 6, kind: input, shape index: {}]   ;;  %s22799_s7 = inlined_call_operand.vmem [shape: f32[128,32], index: 7, kind: input, shape index: {}]   ;;  %s22800_s8 = inlined_call_operand.vmem [shape: f32[1,32], index: 8, kind: input, shape index: {}]   ;;  %s22801_s9 = inlined_call_operand.vmem [shape: f32[1,32], index: 9, kind: input, shape index: {}]   ;;  %s22802_s10 = inlined_call_operand.vmem [shape: f32[32,10], index: 10, kind: input, shape index: {}]   ;;  %s22803_s11 = inlined_call_operand.vmem [shape: f32[1,10], index: 11, kind: input, shape index: {}]   ;;  %s22804_s12 = inlined_call_operand.hbm [shape: f32[2,1,10], index: 12, kind: output, shape index: {}]  }
   0x1   :  { %23050 = sst [smem:[#allocation166_spill]] %s22792_s0 }
   0x2   :  { %23051 = sst [smem:[#allocation167_spill]] %s22793_s1 }
   0x3   :  { %17 = vsyncpa [#allocation5], 0 }
   0x4   :  { %19 = vsyncpa [#allocation5 + $0x1], 0  ;;  %s17759_s21 = smov 0   ;;  %s17761_s22 = smov 0  }
   0x5   :  { %s17763_s23 = smov 0   ;;  %s17765_s24 = smov 0  }
   0x6 LB: > { %s17780_s25 = sadd.s32 4294967295, %s17686_s24   ;;  %s15371_s26 = sadd.s32 4294967294, %s17686_s24   ;;  %s17686_s24 = sphi %s17765_s24, %s23483_s24   ;;  %s17682_s23 = sphi %s17763_s23, %s23482_s23   ;;  %s17678_s22 = sphi %s17761_s22, %s23481_s22   ;;  %s17674_s21 = sphi %s17759_s21, %s23480_s21  }
   0x7   : > { %s17784_s27 = sadd.s32 1, %s17686_s24   ;;  %s289_s28 = sadd.s32 1, %s17682_s23 }
   0x8   : > { %s286_s29 = ssub.s32 %s17686_s24, %s17784_s27  ;;  %p299_p0 = scmp.ne.s32.totalorder %s17682_s23, %s17678_s22 }
   0x9   : > { %p287_p1 = scmp.eq.s32.totalorder %s286_s29, 0  ;;  %p300_p2 = scmp.eq.s32.totalorder %s17780_s25, 1 }
   0xa   : > { %p305_p3 = scmp.ne.s32.totalorder %s17678_s22, %s17674_s21  ;;  %p306_p4 = scmp.eq.s32.totalorder %s15371_s26, 1 }
   0xb   : > { %s17795_s30 = scalar_select %p287_p1, %s17682_s23, %s289_s28  }
   0xc   : > { %p17797_p5 = por %p300_p2, %p299_p0  ;;  %p17801_p6 = por %p306_p4, %p305_p3 }
   0xd   : > { %p15374_p7 = scmp.ge.s32.totalorder %s17686_s24, 1  ;;  %p365_p8 = scmp.lt.s32.totalorder %s17686_s24, 3 }
   0xf   : > { %p366_p9 = pnand %p15374_p7, %p365_p8 }
  0x11   : > { %369 = sbr.rel (%p366_p9) target bundleno = 2365 (0x93d), region = 68 }
  0x18   : > { %s23054_s1 = sld [smem:[#allocation167_spill]]  ;;  %vm5105_vm0 = vcmask 1043456   ;;  %v479_v1 = vlaneseq  ;;  %vm2310_vm1 = vcmask 24576   ;;  %v17688_v2 = vmov 1966171168   ;;  %p406_p10 = scmp.lt.s32.totalorder %s17780_s25, 1 }
  0x19   : > { %v17811_v3 = vunpack.c.l.s4 %v17688_v2  ;;  %v22805_v6 = vmov 0.0   ;;  %s23056_s0 = sld [smem:[#allocation166_spill]]  ;;  %vm5040_vm2 = vcmask 31744   ;;  %vm11145_vm3 = vcmask 57344   ;;  %s404_s26 = sand.u32 1, %s17678_s22  }
  0x1a   : > { %v17820_v5 = vshrl.u32 %v479_v1, 7  ;;  %2311 = vst.msk [vmem:[#allocation2] sm:$0x1] %vm2310_vm1, %v22805_v6  ;;  %2312 = vst.msk [vmem:[#allocation2 + $0x1] sm:$0x1] %vm2310_vm1, %v22805_v6  ;;  %s407_s19 = scalar_select %p406_p10, %s17780_s25, 1 }
  0x1b   : > { %2313 = vst.msk [vmem:[#allocation2 + $0x2] sm:$0x1] %vm2310_vm1, %v22805_v6  ;;  %2314 = vst.msk [vmem:[#allocation2 + $0x3] sm:$0x1] %vm2310_vm1, %v22805_v6  ;;  %v478_v7 = vunpack.c.0.s8 %v17811_v3  ;;  %vm11867_vm4 = vcmask 64512   ;;  %vm17691_vm5 = vmmov 0  }
  0x1c   : > { %23055 = vst [vmem:[#allocation7_spill] sm:$0xff] %v17820_v5  ;;  %2315 = vst.msk [vmem:[#allocation2 + $0x4] sm:$0x1] %vm2310_vm1, %v22805_v6  ;;  %s15846_s20 = sshll.u32 %s407_s19, 8  ;;  %vm15215_vm6 = vcmask 261120   ;;  %vm15289_vm7 = vcmask 73728  }
  0x1d   : > { %2316 = vst.msk [vmem:[#allocation2 + $0x5] sm:$0x1] %vm2310_vm1, %v22805_v6  ;;  %2317 = vst.msk [vmem:[#allocation2 + $0x6] sm:$0x1] %vm2310_vm1, %v22805_v6  ;;  %v18477_v8 = vsub.s32 %v478_v7, %v17820_v5  ;;  %s15843_s28 = sshll.u32 %s17780_s25, 4  ;;  %s15304_s19 = scalar_lea.sflag [#allocation5], %s404_s26 }
  0x1e   : > { %v2301_v0 = vld [vmem:[%s23054_s1 + $0x8] sm:$0xf]  ;;  %v17816_v4 = vld [vmem:[%s23054_s1 + $0xc] sm:$0xf]  ;;  %2318 = vst.msk [vmem:[#allocation2 + $0x7] sm:$0x1] %vm2310_vm1, %v22805_v6  ;;  %s22749_s18 = scalar_lea.hbm %s22804_s12, %s15843_s28 }
  0x1f   : > { %16362 = vmatprep.subr.msk.mxu0 %vm5105_vm0, %v2301_v0  ;;  %2319 = vst.msk [vmem:[#allocation2 + $0x8] sm:$0x1] %vm2310_vm1, %v22805_v6  ;;  %2320 = vst.msk [vmem:[#allocation2 + $0x9] sm:$0x1] %vm2310_vm1, %v22805_v6  ;;  %s18482_s29 = scalar_lea.vmem %s23056_s0, %s15846_s20  ;;  %s17693_s25 = smov [#allocation4]  }
  0x20   : > { %16363 = vmatpush3.msk.msra.mxu0 %vm5105_vm0, %v2301_v0  ;;  %2321 = vst.msk [vmem:[#allocation2 + $0xa] sm:$0x1] %vm2310_vm1, %v22805_v6  ;;  %2322 = vst.msk [vmem:[#allocation2 + $0xb] sm:$0x1] %vm2310_vm1, %v22805_v6  ;;  %v411_v9 = vld [vmem:[%s18482_s29] sm:$0xff]  ;;  %v412_v10 = vld [vmem:[%s18482_s29 + $0x8] sm:$0xff] }
  0x21   : > { %2323 = vst.msk [vmem:[#allocation2 + $0xc] sm:$0x1] %vm2310_vm1, %v22805_v6  ;;  %2324 = vst.msk [vmem:[#allocation2 + $0xd] sm:$0x1] %vm2310_vm1, %v22805_v6  ;;  %16412 = vmatprep.subr.msk.mxu0 %vm5105_vm0, %v17816_v4  ;;  %v18487_v11 = vld [vmem:[%s18482_s29 + $0x10] sm:$0xff]  ;;  %v475_v12 = vcombine.high %v411_v9, %v411_v9  ;;  %v482_v13 = vrot.slane %v411_v9, %v18477_v8  ;;  %v18491_v15 = vrot.slane %v412_v10, %v18477_v8  ;;  %v18494_v17 = vld [vmem:[%s18482_s29 + $0x18] sm:$0xff] }
  0x22   : > { %2325 = vst.msk [vmem:[#allocation2 + $0xe] sm:$0x1] %vm2310_vm1, %v22805_v6  ;;  %2326 = vst.msk [vmem:[#allocation2 + $0xf] sm:$0x1] %vm2310_vm1, %v22805_v6  ;;  %v2894_v14 = vld [vmem:[#allocation2 + $0x2] sm:$0x1]  ;;  %v524_v16 = vcombine.high %v412_v10, %v412_v10  ;;  %v573_v18 = vcombine.high %v18487_v11, %v18487_v11  ;;  %v18502_v25 = vrot.slane %v18487_v11, %v18477_v8 }
  0x23   : > { %2327 = vst.msk [vmem:[#allocation2 + $0x10] sm:$0x1] %vm2310_vm1, %v22805_v6  ;;  %2328 = vst.msk [vmem:[#allocation2 + $0x11] sm:$0x1] %vm2310_vm1, %v22805_v6  ;;  %v2895_v19 = vld [vmem:[#allocation2 + $0x3] sm:$0x1]  ;;  %v489_v22 = vrot.slane %v475_v12, %v18477_v8  ;;  %v490_v23 = vcombine.high %v482_v13, %v482_v13  ;;  %v498_v24 = vrot.slane %v482_v13, %v18477_v8 }
  0x24   : > { %2329 = vst.msk [vmem:[#allocation2 + $0x12] sm:$0x1] %vm2310_vm1, %v22805_v6  ;;  %2330 = vst.msk [vmem:[#allocation2 + $0x13] sm:$0x1] %vm2310_vm1, %v22805_v6  ;;  %v2896_v20 = vld [vmem:[#allocation2 + $0x4] sm:$0x1]  ;;  %v5351_v29 = vcombine.low %v2894_v14, %v2895_v19  ;;  %v18506_v31 = vrot.slane %v18491_v15, %v18477_v8  ;;  %v18510_v32 = vrot.slane %v18494_v17, %v18477_v8 }
  0x25   : > { %2331 = vst.msk [vmem:[#allocation2 + $0x14] sm:$0x1] %vm2310_vm1, %v22805_v6  ;;  %2332 = vst.msk [vmem:[#allocation2 + $0x15] sm:$0x1] %vm2310_vm1, %v22805_v6  ;;  %v2897_v21 = vld [vmem:[#allocation2 + $0x5] sm:$0x1]  ;;  %v491_v37 = vcombine.high %v489_v22, %v489_v22  ;;  %v505_v38 = vrot.slane %v489_v22, %v18477_v8  ;;  %v622_v39 = vcombine.high %v18494_v17, %v18494_v17 }
  0x26   : > { %2333 = vst.msk [vmem:[#allocation2 + $0x16] sm:$0x1] %vm2310_vm1, %v22805_v6  ;;  %2334 = vst.msk [vmem:[#allocation2 + $0x17] sm:$0x1] %vm2310_vm1, %v22805_v6  ;;  %v2898_v26 = vld [vmem:[#allocation2 + $0x6] sm:$0x1]  ;;  %v5352_v30 = vcombine.low %v2896_v20, %v2897_v21  ;;  %v18523_v44 = vrot.slane %v5351_v29, %v18477_v8  ;;  %v512_v53 = vrot.slane %v490_v23, %v18477_v8 }
  0x27   : > { %2335 = vst.msk [vmem:[#allocation2 + $0x18] sm:$0x1] %vm2310_vm1, %v22805_v6  ;;  %2336 = vst.msk [vmem:[#allocation2 + $0x19] sm:$0x1] %vm2310_vm1, %v22805_v6  ;;  %v2899_v27 = vld [vmem:[#allocation2 + $0x7] sm:$0x1]  ;;  %v538_v57 = vrot.slane %v524_v16, %v18477_v8  ;;  %v519_v1 = vrot.slane %v491_v37, %v18477_v8  ;;  %v520_v9 = vcombine.high %v498_v24, %v498_v24 }
  0x28   : > { %2337 = vst.msk [vmem:[#allocation2 + $0x1a] sm:$0x1] %vm2310_vm1, %v22805_v6  ;;  %2338 = vst.msk [vmem:[#allocation2 + $0x1b] sm:$0x1] %vm2310_vm1, %v22805_v6  ;;  %v2900_v28 = vld [vmem:[#allocation2 + $0x8] sm:$0x1]  ;;  %v5353_v36 = vcombine.low %v2898_v26, %v2899_v27  ;;  %v18526_v45 = vrot.slane %v5352_v30, %v18477_v8  ;;  %v521_v13 = vcombine.high %v505_v38, %v505_v38 }
  0x29   : > { %2339 = vst.msk [vmem:[#allocation2 + $0x1c] sm:$0x1] %vm2310_vm1, %v22805_v6  ;;  %2340 = vst.msk [vmem:[#allocation2 + $0x1d] sm:$0x1] %vm2310_vm1, %v22805_v6  ;;  %v18512_v33 = vld [vmem:[#allocation2 + $0x9] sm:$0x1]  ;;  %v522_v14 = vcombine.high %v512_v53, %v512_v53  ;;  %v523_v21 = vcombine.high %v519_v1, %v519_v1  ;;  %v540_v26 = vcombine.high %v538_v57, %v538_v57 }
  0x2a   : > { %2341 = vst.msk [vmem:[#allocation2 + $0x1e] sm:$0x1] %vm2310_vm1, %v22805_v6  ;;  %2342 = vst.msk [vmem:[#allocation2 + $0x1f] sm:$0x1] %vm2310_vm1, %v22805_v6  ;;  %v18514_v34 = vld [vmem:[#allocation2 + $0xa] sm:$0x1]  ;;  %v5399_v46 = vcombine.low %v2900_v28, %v18512_v33  ;;  %v18532_v48 = vrot.slane %v5353_v36, %v18477_v8  ;;  %v7226_v56 = vcombine.low %v18523_v44, %v18526_v45 }
  0x2b   : > { %2343 = vst.msk [vmem:[#allocation2 + $0x20] sm:$0x1] %vm2310_vm1, %v22805_v6  ;;  %2344 = vst.msk [vmem:[#allocation2 + $0x21] sm:$0x1] %vm2310_vm1, %v22805_v6  ;;  %v2903_v35 = vld [vmem:[#allocation2 + $0xb] sm:$0x1]  ;;  %v554_v28 = vrot.slane %v538_v57, %v18477_v8  ;;  %v569_v29 = vcombine.high %v18506_v31, %v18506_v31  ;;  %v587_v30 = vrot.slane %v573_v18, %v18477_v8 }
  0x2c   : > { %2345 = vst.msk [vmem:[#allocation2 + $0x22] sm:$0x1] %vm2310_vm1, %v22805_v6  ;;  %2346 = vst.msk [vmem:[#allocation2 + $0x23] sm:$0x1] %vm2310_vm1, %v22805_v6  ;;  %v2904_v40 = vld [vmem:[#allocation2 + $0xc] sm:$0x1]  ;;  %v5400_v49 = vcombine.low %v18514_v34, %v2903_v35  ;;  %v5409_v55 = vrot.slane %v5399_v46, %v18477_v8  ;;  %v7234_v0 = vrot.slane %v7226_v56, %v18477_v8 }
  0x2d   : > { %2347 = vst.msk [vmem:[#allocation2 + $0x24] sm:$0x1] %vm2310_vm1, %v22805_v6  ;;  %2348 = vst.msk [vmem:[#allocation2 + $0x25] sm:$0x1] %vm2310_vm1, %v22805_v6  ;;  %v2905_v41 = vld [vmem:[#allocation2 + $0xd] sm:$0x1]  ;;  %v568_v36 = vrot.slane %v540_v26, %v18477_v8  ;;  %v588_v37 = vcombine.high %v18502_v25, %v18502_v25  ;;  %v589_v11 = vcombine.high %v587_v30, %v587_v30 }
  0x2e   : > { %2349 = vst.msk [vmem:[#allocation2 + $0x26] sm:$0x1] %vm2310_vm1, %v22805_v6  ;;  %2350 = vst.msk [vmem:[#allocation2 + $0x27] sm:$0x1] %vm2310_vm1, %v22805_v6  ;;  %v2906_v42 = vld [vmem:[#allocation2 + $0xe] sm:$0x1]  ;;  %v5401_v50 = vcombine.low %v2904_v40, %v2905_v41  ;;  %v5416_v59 = vrot.slane %v5400_v49, %v18477_v8  ;;  %v7227_v63 = vcombine.low %v18532_v48, %v5409_v55 }
  0x2f   : > { %2351 = vst.msk [vmem:[#allocation2 + $0x28] sm:$0x1] %vm2310_vm1, %v22805_v6  ;;  %2352 = vst.msk [vmem:[#allocation2 + $0x29] sm:$0x1] %vm2310_vm1, %v22805_v6  ;;  %v2907_v47 = vld [vmem:[#allocation2 + $0xf] sm:$0x1]  ;;  %v570_v40 = vcombine.high %v554_v28, %v554_v28  ;;  %v596_v18 = vrot.slane %v18502_v25, %v18477_v8  ;;  %v603_v49 = vrot.slane %v587_v30, %v18477_v8 }
  0x30   : > { %2353 = vst.msk [vmem:[#allocation2 + $0x2a] sm:$0x1] %vm2310_vm1, %v22805_v6  ;;  %2354 = vst.msk [vmem:[#allocation2 + $0x2b] sm:$0x1] %vm2310_vm1, %v22805_v6  ;;  %v2908_v51 = vld [vmem:[#allocation2 + $0x10] sm:$0x1]  ;;  %v5402_v54 = vcombine.low %v2906_v42, %v2907_v47  ;;  %v5423_v60 = vrot.slane %v5401_v50, %v18477_v8  ;;  %v5431_v2 = vcombine.low %v5409_v55, %v5416_v59 }
  0x31   : > { %2355 = vst.msk [vmem:[#allocation2 + $0x2c] sm:$0x1] %vm2310_vm1, %v22805_v6  ;;  %2356 = vst.msk [vmem:[#allocation2 + $0x2d] sm:$0x1] %vm2310_vm1, %v22805_v6  ;;  %v2909_v52 = vld [vmem:[#allocation2 + $0x11] sm:$0x1]  ;;  %v7241_v12 = vrot.slane %v7227_v63, %v18477_v8  ;;  %v572_v47 = vcombine.high %v568_v36, %v568_v36  ;;  %v610_v50 = vrot.slane %v588_v37, %v18477_v8 }
  0x32   : > { %2357 = vst.msk [vmem:[#allocation2 + $0x2e] sm:$0x1] %vm2310_vm1, %v22805_v6  ;;  %2358 = vst.msk [vmem:[#allocation2 + $0x2f] sm:$0x1] %vm2310_vm1, %v22805_v6  ;;  %v7243_v61 = vcombine.low %v2908_v51, %v2909_v52  ;;  %v5430_v62 = vrot.slane %v5402_v54, %v18477_v8  ;;  %v7251_v7 = vcombine.low %v5416_v59, %v5423_v60  ;;  %v18592_v51 = vld [vmem:[%s23054_s1 + $0x10] sm:$0xf] }
  0x33   : > { %2359 = vst.msk [vmem:[#allocation2 + $0x30] sm:$0x1] %vm2310_vm1, %v22805_v6  ;;  %2360 = vst.msk [vmem:[#allocation2 + $0x31] sm:$0x1] %vm2310_vm1, %v22805_v6  ;;  %v18554_v16 = vrot.slane %v5431_v2, %v18477_v8  ;;  %v7242_v23 = vcombine.low %v7234_v0, %v7241_v12  ;;  %v618_v54 = vcombine.high %v596_v18, %v596_v18  ;;  %v18624_v12 = vld [vmem:[%s18482_s29 + $0x20] sm:$0xff]  ;;  %s17628_s0 = sshll.u32 %s17693_s25, 4  ;;  %s17629_s0 = int_to_ptr.vmem [resolvable:$false] %s17628_s0 }
  0x34   : > { %2361 = vst.msk [vmem:[#allocation2 + $0x32] sm:$0x1] %vm2310_vm1, %v22805_v6  ;;  %2362 = vst.msk [vmem:[#allocation2 + $0x33] sm:$0x1] %vm2310_vm1, %v22805_v6  ;;  %v7250_v3 = vrot.slane %v7243_v61, %v18477_v8  ;;  %v5432_v10 = vcombine.low %v5423_v60, %v5430_v62  ;;  %v7259_v20 = vrot.slane %v7251_v7, %v18477_v8 }
  0x35   : > { %2363 = vst.msk [vmem:[#allocation2 + $0x34] sm:$0x1] %vm2310_vm1, %v22805_v6  ;;  %2364 = vst.msk [vmem:[#allocation2 + $0x35] sm:$0x1] %vm2310_vm1, %v22805_v6  ;;  %16364 = vmatprep.mubr.msk.f32.mxu0 %vm5040_vm2, %v7242_v23  ;;  %v645_v55 = vrot.slane %v18510_v32, %v18477_v8  ;;  %v636_v56 = vrot.slane %v622_v39, %v18477_v8  ;;  %v619_v60 = vcombine.high %v603_v49, %v603_v49 }
  0x36   : > { %2365 = vst.msk [vmem:[#allocation2 + $0x36] sm:$0x1] %vm2310_vm1, %v22805_v6  ;;  %2366 = vst.msk [vmem:[#allocation2 + $0x37] sm:$0x1] %vm2310_vm1, %v22805_v6  ;;  %v7252_v19 = vcombine.low %v5430_v62, %v7250_v3  ;;  %v18559_v22 = vrot.slane %v5432_v10, %v18477_v8  ;;  %v620_v61 = vcombine.high %v610_v50, %v610_v50 }
  0x37   : > { %2367 = vst.msk [vmem:[#allocation2 + $0x38] sm:$0x1] %vm2310_vm1, %v22805_v6  ;;  %2368 = vst.msk [vmem:[#allocation2 + $0x39] sm:$0x1] %vm2310_vm1, %v22805_v6  ;;  %v637_v17 = vcombine.high %v18510_v32, %v18510_v32  ;;  %v652_v2 = vrot.slane %v636_v56, %v18477_v8  ;;  %v667_v10 = vcombine.high %v645_v55, %v645_v55 }
  0x38   : > { %2369 = vst.msk [vmem:[#allocation2 + $0x3a] sm:$0x1] %vm2310_vm1, %v22805_v6  ;;  %2370 = vst.msk [vmem:[#allocation2 + $0x3b] sm:$0x1] %vm2310_vm1, %v22805_v6  ;;  %v7266_v27 = vrot.slane %v7252_v19, %v18477_v8  ;;  %v671_v37 = vcombine.high %v18624_v12, %v18624_v12 }
  0x39   : > { %2371 = vst.msk [vmem:[#allocation2 + $0x3c] sm:$0x1] %vm2310_vm1, %v22805_v6  ;;  %2372 = vst.msk [vmem:[#allocation2 + $0x3d] sm:$0x1] %vm2310_vm1, %v22805_v6 }
  0x3a   : > { %2373 = vst.msk [vmem:[#allocation2 + $0x3e] sm:$0x1] %vm2310_vm1, %v22805_v6  ;;  %2374 = vst.msk [vmem:[#allocation2 + $0x3f] sm:$0x1] %vm2310_vm1, %v22805_v6 }
  0x3b   : > { %2375 = vst.msk [vmem:[#allocation2 + $0x40] sm:$0x1] %vm2310_vm1, %v22805_v6  ;;  %2376 = vst.msk [vmem:[#allocation2 + $0x41] sm:$0x1] %vm2310_vm1, %v22805_v6 }
  0x3c   : > { %2377 = vst.msk [vmem:[#allocation2 + $0x42] sm:$0x1] %vm2310_vm1, %v22805_v6  ;;  %2378 = vst.msk [vmem:[#allocation2 + $0x43] sm:$0x1] %vm2310_vm1, %v22805_v6 }
  0x3d   : > { %2379 = vst.msk [vmem:[#allocation2 + $0x44] sm:$0x1] %vm2310_vm1, %v22805_v6  ;;  %2380 = vst.msk [vmem:[#allocation2 + $0x45] sm:$0x1] %vm2310_vm1, %v22805_v6 }
  0x3e   : > { %2381 = vst.msk [vmem:[#allocation2 + $0x46] sm:$0x1] %vm2310_vm1, %v22805_v6  ;;  %2382 = vst.msk [vmem:[#allocation2 + $0x47] sm:$0x1] %vm2310_vm1, %v22805_v6 }
  0x3f   : > { %2383 = vst.msk [vmem:[#allocation2 + $0x48] sm:$0x1] %vm2310_vm1, %v22805_v6  ;;  %2384 = vst.msk [vmem:[#allocation2 + $0x49] sm:$0x1] %vm2310_vm1, %v22805_v6 }
  0x40   : > { %2385 = vst.msk [vmem:[#allocation2 + $0x4a] sm:$0x1] %vm2310_vm1, %v22805_v6  ;;  %2386 = vst.msk [vmem:[#allocation2 + $0x4b] sm:$0x1] %vm2310_vm1, %v22805_v6 }
  0x41   : > { %2387 = vst.msk [vmem:[#allocation2 + $0x4c] sm:$0x1] %vm2310_vm1, %v22805_v6  ;;  %2388 = vst.msk [vmem:[#allocation2 + $0x4d] sm:$0x1] %vm2310_vm1, %v22805_v6 }
  0x42   : > { %2389 = vst.msk [vmem:[#allocation2 + $0x4e] sm:$0x1] %vm2310_vm1, %v22805_v6  ;;  %2390 = vst.msk [vmem:[#allocation2 + $0x4f] sm:$0x1] %vm2310_vm1, %v22805_v6 }
  0x43   : > { %2391 = vst.msk [vmem:[#allocation2 + $0x50] sm:$0x1] %vm2310_vm1, %v22805_v6  ;;  %2392 = vst.msk [vmem:[#allocation2 + $0x51] sm:$0x1] %vm2310_vm1, %v22805_v6 }
  0x44   : > { %2393 = vst.msk [vmem:[#allocation2 + $0x52] sm:$0x1] %vm2310_vm1, %v22805_v6  ;;  %2394 = vst.msk [vmem:[#allocation2 + $0x53] sm:$0x1] %vm2310_vm1, %v22805_v6 }
  0x45   : > { %2395 = vst.msk [vmem:[#allocation2 + $0x54] sm:$0x1] %vm2310_vm1, %v22805_v6  ;;  %2396 = vst.msk [vmem:[#allocation2 + $0x55] sm:$0x1] %vm2310_vm1, %v22805_v6 }
  0x46   : > { %2397 = vst.msk [vmem:[#allocation2 + $0x56] sm:$0x1] %vm2310_vm1, %v22805_v6  ;;  %2398 = vst.msk [vmem:[#allocation2 + $0x57] sm:$0x1] %vm2310_vm1, %v22805_v6 }
  0x47   : > { %2399 = vst.msk [vmem:[#allocation2 + $0x58] sm:$0x1] %vm2310_vm1, %v22805_v6  ;;  %2400 = vst.msk [vmem:[#allocation2 + $0x59] sm:$0x1] %vm2310_vm1, %v22805_v6 }
  0x48   : > { %2401 = vst.msk [vmem:[#allocation2 + $0x5a] sm:$0x1] %vm2310_vm1, %v22805_v6  ;;  %2402 = vst.msk [vmem:[#allocation2 + $0x5b] sm:$0x1] %vm2310_vm1, %v22805_v6 }
  0x49   : > { %2403 = vst.msk [vmem:[#allocation2 + $0x5c] sm:$0x1] %vm2310_vm1, %v22805_v6  ;;  %2404 = vst.msk [vmem:[#allocation2 + $0x5d] sm:$0x1] %vm2310_vm1, %v22805_v6 }
  0x4a   : > { %2405 = vst.msk [vmem:[#allocation2 + $0x5e] sm:$0x1] %vm2310_vm1, %v22805_v6  ;;  %2406 = vst.msk [vmem:[#allocation2 + $0x5f] sm:$0x1] %vm2310_vm1, %v22805_v6 }
  0x4b   : > { %2407 = vst.msk [vmem:[#allocation2 + $0x60] sm:$0x1] %vm2310_vm1, %v22805_v6  ;;  %2408 = vst.msk [vmem:[#allocation2 + $0x61] sm:$0x1] %vm2310_vm1, %v22805_v6 }
  0x4c   : > { %2409 = vst.msk [vmem:[#allocation2 + $0x62] sm:$0x1] %vm2310_vm1, %v22805_v6  ;;  %2410 = vst.msk [vmem:[#allocation2 + $0x63] sm:$0x1] %vm2310_vm1, %v22805_v6 }
  0x4d   : > { %2411 = vst.msk [vmem:[#allocation2 + $0x64] sm:$0x1] %vm2310_vm1, %v22805_v6  ;;  %2412 = vst.msk [vmem:[#allocation2 + $0x65] sm:$0x1] %vm2310_vm1, %v22805_v6 }
  0x4e   : > { %2413 = vst.msk [vmem:[#allocation2 + $0x66] sm:$0x1] %vm2310_vm1, %v22805_v6  ;;  %2414 = vst.msk [vmem:[#allocation2 + $0x67] sm:$0x1] %vm2310_vm1, %v22805_v6 }
  0x4f   : > { %2415 = vst.msk [vmem:[#allocation2 + $0x68] sm:$0x1] %vm2310_vm1, %v22805_v6  ;;  %2416 = vst.msk [vmem:[#allocation2 + $0x69] sm:$0x1] %vm2310_vm1, %v22805_v6 }
  0x50   : > { %2417 = vst.msk [vmem:[#allocation2 + $0x6a] sm:$0x1] %vm2310_vm1, %v22805_v6  ;;  %2418 = vst.msk [vmem:[#allocation2 + $0x6b] sm:$0x1] %vm2310_vm1, %v22805_v6 }
  0x51   : > { %2419 = vst.msk [vmem:[#allocation2 + $0x6c] sm:$0x1] %vm2310_vm1, %v22805_v6  ;;  %2420 = vst.msk [vmem:[#allocation2 + $0x6d] sm:$0x1] %vm2310_vm1, %v22805_v6 }
  0x52   : > { %2421 = vst.msk [vmem:[#allocation2 + $0x6e] sm:$0x1] %vm2310_vm1, %v22805_v6  ;;  %2422 = vst.msk [vmem:[#allocation2 + $0x6f] sm:$0x1] %vm2310_vm1, %v22805_v6 }
  0x53   : > { %2423 = vst.msk [vmem:[#allocation2 + $0x70] sm:$0x1] %vm2310_vm1, %v22805_v6  ;;  %2424 = vst.msk [vmem:[#allocation2 + $0x71] sm:$0x1] %vm2310_vm1, %v22805_v6 }
  0x54   : > { %2425 = vst.msk [vmem:[#allocation2 + $0x72] sm:$0x1] %vm2310_vm1, %v22805_v6  ;;  %2426 = vst.msk [vmem:[#allocation2 + $0x73] sm:$0x1] %vm2310_vm1, %v22805_v6 }
  0x55   : > { %2427 = vst.msk [vmem:[#allocation2 + $0x74] sm:$0x1] %vm2310_vm1, %v22805_v6  ;;  %2428 = vst.msk [vmem:[#allocation2 + $0x75] sm:$0x1] %vm2310_vm1, %v22805_v6 }
  0x56   : > { %2429 = vst.msk [vmem:[#allocation2 + $0x76] sm:$0x1] %vm2310_vm1, %v22805_v6  ;;  %2430 = vst.msk [vmem:[#allocation2 + $0x77] sm:$0x1] %vm2310_vm1, %v22805_v6 }
  0x57   : > { %2431 = vst.msk [vmem:[#allocation2 + $0x78] sm:$0x1] %vm2310_vm1, %v22805_v6  ;;  %2432 = vst.msk [vmem:[#allocation2 + $0x79] sm:$0x1] %vm2310_vm1, %v22805_v6 }
  0x58   : > { %2433 = vst.msk [vmem:[#allocation2 + $0x7a] sm:$0x1] %vm2310_vm1, %v22805_v6  ;;  %2434 = vst.msk [vmem:[#allocation2 + $0x7b] sm:$0x1] %vm2310_vm1, %v22805_v6 }
  0x59   : > { %2435 = vst.msk [vmem:[#allocation2 + $0x7c] sm:$0x1] %vm2310_vm1, %v22805_v6  ;;  %2436 = vst.msk [vmem:[#allocation2 + $0x7d] sm:$0x1] %vm2310_vm1, %v22805_v6 }
  0x5a   : > { %2437 = vst.msk [vmem:[#allocation2 + $0x7e] sm:$0x1] %vm2310_vm1, %v22805_v6  ;;  %2438 = vst.msk [vmem:[#allocation2 + $0x7f] sm:$0x1] %vm2310_vm1, %v22805_v6 }
  0x5b   : > { %2439 = vst.msk [vmem:[#allocation2 + $0x80] sm:$0x1] %vm2310_vm1, %v22805_v6  ;;  %2440 = vst.msk [vmem:[#allocation2 + $0x81] sm:$0x1] %vm2310_vm1, %v22805_v6 }
  0x5c   : > { %2441 = vst.msk [vmem:[#allocation2 + $0x82] sm:$0x1] %vm2310_vm1, %v22805_v6  ;;  %2442 = vst.msk [vmem:[#allocation2 + $0x83] sm:$0x1] %vm2310_vm1, %v22805_v6 }
  0x5d   : > { %2443 = vst.msk [vmem:[#allocation2 + $0x84] sm:$0x1] %vm2310_vm1, %v22805_v6  ;;  %2444 = vst.msk [vmem:[#allocation2 + $0x85] sm:$0x1] %vm2310_vm1, %v22805_v6 }
  0x5e   : > { %2445 = vst.msk [vmem:[#allocation2 + $0x86] sm:$0x1] %vm2310_vm1, %v22805_v6  ;;  %2446 = vst.msk [vmem:[#allocation2 + $0x87] sm:$0x1] %vm2310_vm1, %v22805_v6 }
  0x5f   : > { %2447 = vst.msk [vmem:[#allocation2 + $0x88] sm:$0x1] %vm2310_vm1, %v22805_v6  ;;  %2448 = vst.msk [vmem:[#allocation2 + $0x89] sm:$0x1] %vm2310_vm1, %v22805_v6 }
  0x60   : > { %2449 = vst.msk [vmem:[#allocation2 + $0x8a] sm:$0x1] %vm2310_vm1, %v22805_v6  ;;  %2450 = vst.msk [vmem:[#allocation2 + $0x8b] sm:$0x1] %vm2310_vm1, %v22805_v6 }
  0x61   : > { %2451 = vst.msk [vmem:[#allocation2 + $0x8c] sm:$0x1] %vm2310_vm1, %v22805_v6  ;;  %2452 = vst.msk [vmem:[#allocation2 + $0x8d] sm:$0x1] %vm2310_vm1, %v22805_v6 }
  0x62   : > { %2453 = vst.msk [vmem:[#allocation2 + $0x8e] sm:$0x1] %vm2310_vm1, %v22805_v6  ;;  %2454 = vst.msk [vmem:[#allocation2 + $0x8f] sm:$0x1] %vm2310_vm1, %v22805_v6 }
  0x63   : > { %2455 = vst.msk [vmem:[#allocation2 + $0x90] sm:$0x1] %vm2310_vm1, %v22805_v6  ;;  %2456 = vst.msk [vmem:[#allocation2 + $0x91] sm:$0x1] %vm2310_vm1, %v22805_v6 }
  0x64   : > { %2457 = vst.msk [vmem:[#allocation2 + $0x92] sm:$0x1] %vm2310_vm1, %v22805_v6  ;;  %2458 = vst.msk [vmem:[#allocation2 + $0x93] sm:$0x1] %vm2310_vm1, %v22805_v6 }
  0x65   : > { %2459 = vst.msk [vmem:[#allocation2 + $0x94] sm:$0x1] %vm2310_vm1, %v22805_v6  ;;  %2460 = vst.msk [vmem:[#allocation2 + $0x95] sm:$0x1] %vm2310_vm1, %v22805_v6 }
  0x66   : > { %2461 = vst.msk [vmem:[#allocation2 + $0x96] sm:$0x1] %vm2310_vm1, %v22805_v6  ;;  %2462 = vst.msk [vmem:[#allocation2 + $0x97] sm:$0x1] %vm2310_vm1, %v22805_v6 }
  0x67   : > { %2463 = vst.msk [vmem:[#allocation2 + $0x98] sm:$0x1] %vm2310_vm1, %v22805_v6  ;;  %2464 = vst.msk [vmem:[#allocation2 + $0x99] sm:$0x1] %vm2310_vm1, %v22805_v6 }
  0x68   : > { %2465 = vst.msk [vmem:[#allocation2 + $0x9a] sm:$0x1] %vm2310_vm1, %v22805_v6  ;;  %2466 = vst.msk [vmem:[#allocation2 + $0x9b] sm:$0x1] %vm2310_vm1, %v22805_v6 }
  0x69   : > { %2467 = vst.msk [vmem:[#allocation2 + $0x9c] sm:$0x1] %vm2310_vm1, %v22805_v6  ;;  %2468 = vst.msk [vmem:[#allocation2 + $0x9d] sm:$0x1] %vm2310_vm1, %v22805_v6 }
  0x6a   : > { %2469 = vst.msk [vmem:[#allocation2 + $0x9e] sm:$0x1] %vm2310_vm1, %v22805_v6  ;;  %2470 = vst.msk [vmem:[#allocation2 + $0x9f] sm:$0x1] %vm2310_vm1, %v22805_v6 }
  0x6b   : > { %2471 = vst.msk [vmem:[#allocation2 + $0xa0] sm:$0x1] %vm2310_vm1, %v22805_v6  ;;  %2472 = vst.msk [vmem:[#allocation2 + $0xa1] sm:$0x1] %vm2310_vm1, %v22805_v6 }
  0x6c   : > { %2473 = vst.msk [vmem:[#allocation2 + $0xa2] sm:$0x1] %vm2310_vm1, %v22805_v6  ;;  %2474 = vst.msk [vmem:[#allocation2 + $0xa3] sm:$0x1] %vm2310_vm1, %v22805_v6 }
  0x6d   : > { %2475 = vst.msk [vmem:[#allocation2 + $0xa4] sm:$0x1] %vm2310_vm1, %v22805_v6  ;;  %2476 = vst.msk [vmem:[#allocation2 + $0xa5] sm:$0x1] %vm2310_vm1, %v22805_v6 }
  0x6e   : > { %2477 = vst.msk [vmem:[#allocation2 + $0xa6] sm:$0x1] %vm2310_vm1, %v22805_v6  ;;  %2478 = vst.msk [vmem:[#allocation2 + $0xa7] sm:$0x1] %vm2310_vm1, %v22805_v6 }
  0x6f   : > { %2479 = vst.msk [vmem:[#allocation2 + $0xa8] sm:$0x1] %vm2310_vm1, %v22805_v6  ;;  %2480 = vst.msk [vmem:[#allocation2 + $0xa9] sm:$0x1] %vm2310_vm1, %v22805_v6 }
  0x70   : > { %2481 = vst.msk [vmem:[#allocation2 + $0xaa] sm:$0x1] %vm2310_vm1, %v22805_v6  ;;  %2482 = vst.msk [vmem:[#allocation2 + $0xab] sm:$0x1] %vm2310_vm1, %v22805_v6 }
  0x71   : > { %2483 = vst.msk [vmem:[#allocation2 + $0xac] sm:$0x1] %vm2310_vm1, %v22805_v6  ;;  %2484 = vst.msk [vmem:[#allocation2 + $0xad] sm:$0x1] %vm2310_vm1, %v22805_v6 }
  0x72   : > { %2485 = vst.msk [vmem:[#allocation2 + $0xae] sm:$0x1] %vm2310_vm1, %v22805_v6  ;;  %2486 = vst.msk [vmem:[#allocation2 + $0xaf] sm:$0x1] %vm2310_vm1, %v22805_v6 }
  0x73   : > { %2487 = vst.msk [vmem:[#allocation2 + $0xb0] sm:$0x1] %vm2310_vm1, %v22805_v6  ;;  %2488 = vst.msk [vmem:[#allocation2 + $0xb1] sm:$0x1] %vm2310_vm1, %v22805_v6 }
  0x74   : > { %2489 = vst.msk [vmem:[#allocation2 + $0xb2] sm:$0x1] %vm2310_vm1, %v22805_v6  ;;  %2490 = vst.msk [vmem:[#allocation2 + $0xb3] sm:$0x1] %vm2310_vm1, %v22805_v6 }
  0x75   : > { %2491 = vst.msk [vmem:[#allocation2 + $0xb4] sm:$0x1] %vm2310_vm1, %v22805_v6  ;;  %2492 = vst.msk [vmem:[#allocation2 + $0xb5] sm:$0x1] %vm2310_vm1, %v22805_v6 }
  0x76   : > { %2493 = vst.msk [vmem:[#allocation2 + $0xb6] sm:$0x1] %vm2310_vm1, %v22805_v6  ;;  %2494 = vst.msk [vmem:[#allocation2 + $0xb7] sm:$0x1] %vm2310_vm1, %v22805_v6 }
  0x77   : > { %2495 = vst.msk [vmem:[#allocation2 + $0xb8] sm:$0x1] %vm2310_vm1, %v22805_v6  ;;  %2496 = vst.msk [vmem:[#allocation2 + $0xb9] sm:$0x1] %vm2310_vm1, %v22805_v6 }
  0x78   : > { %2497 = vst.msk [vmem:[#allocation2 + $0xba] sm:$0x1] %vm2310_vm1, %v22805_v6  ;;  %2498 = vst.msk [vmem:[#allocation2 + $0xbb] sm:$0x1] %vm2310_vm1, %v22805_v6 }
  0x79   : > { %2499 = vst.msk [vmem:[#allocation2 + $0xbc] sm:$0x1] %vm2310_vm1, %v22805_v6  ;;  %2500 = vst.msk [vmem:[#allocation2 + $0xbd] sm:$0x1] %vm2310_vm1, %v22805_v6 }
  0x7a   : > { %2501 = vst.msk [vmem:[#allocation2 + $0xbe] sm:$0x1] %vm2310_vm1, %v22805_v6  ;;  %2502 = vst.msk [vmem:[#allocation2 + $0xbf] sm:$0x1] %vm2310_vm1, %v22805_v6 }
  0x7b   : > { %2503 = vst.msk [vmem:[#allocation2 + $0xc0] sm:$0x1] %vm2310_vm1, %v22805_v6  ;;  %2504 = vst.msk [vmem:[#allocation2 + $0xc1] sm:$0x1] %vm2310_vm1, %v22805_v6 }
  0x7c   : > { %2505 = vst.msk [vmem:[#allocation2 + $0xc2] sm:$0x1] %vm2310_vm1, %v22805_v6  ;;  %2506 = vst.msk [vmem:[#allocation2 + $0xc3] sm:$0x1] %vm2310_vm1, %v22805_v6 }
  0x7d   : > { %2507 = vst.msk [vmem:[#allocation2 + $0xc4] sm:$0x1] %vm2310_vm1, %v22805_v6  ;;  %2508 = vst.msk [vmem:[#allocation2 + $0xc5] sm:$0x1] %vm2310_vm1, %v22805_v6 }
  0x7e   : > { %2509 = vst.msk [vmem:[#allocation2 + $0xc6] sm:$0x1] %vm2310_vm1, %v22805_v6  ;;  %2510 = vst.msk [vmem:[#allocation2 + $0xc7] sm:$0x1] %vm2310_vm1, %v22805_v6 }
  0x7f   : > { %2511 = vst.msk [vmem:[#allocation2 + $0xc8] sm:$0x1] %vm2310_vm1, %v22805_v6  ;;  %2512 = vst.msk [vmem:[#allocation2 + $0xc9] sm:$0x1] %vm2310_vm1, %v22805_v6 }
  0x80   : > { %2513 = vst.msk [vmem:[#allocation2 + $0xca] sm:$0x1] %vm2310_vm1, %v22805_v6  ;;  %2514 = vst.msk [vmem:[#allocation2 + $0xcb] sm:$0x1] %vm2310_vm1, %v22805_v6 }
  0x81   : > { %2515 = vst.msk [vmem:[#allocation2 + $0xcc] sm:$0x1] %vm2310_vm1, %v22805_v6  ;;  %2516 = vst.msk [vmem:[#allocation2 + $0xcd] sm:$0x1] %vm2310_vm1, %v22805_v6 }
  0x82   : > { %2517 = vst.msk [vmem:[#allocation2 + $0xce] sm:$0x1] %vm2310_vm1, %v22805_v6  ;;  %2518 = vst.msk [vmem:[#allocation2 + $0xcf] sm:$0x1] %vm2310_vm1, %v22805_v6 }
  0x83   : > { %2519 = vst.msk [vmem:[#allocation2 + $0xd0] sm:$0x1] %vm2310_vm1, %v22805_v6  ;;  %2520 = vst.msk [vmem:[#allocation2 + $0xd1] sm:$0x1] %vm2310_vm1, %v22805_v6 }
  0x84   : > { %2521 = vst.msk [vmem:[#allocation2 + $0xd2] sm:$0x1] %vm2310_vm1, %v22805_v6  ;;  %2522 = vst.msk [vmem:[#allocation2 + $0xd3] sm:$0x1] %vm2310_vm1, %v22805_v6 }
  0x85   : > { %2523 = vst.msk [vmem:[#allocation2 + $0xd4] sm:$0x1] %vm2310_vm1, %v22805_v6  ;;  %2524 = vst.msk [vmem:[#allocation2 + $0xd5] sm:$0x1] %vm2310_vm1, %v22805_v6 }
  0x86   : > { %2525 = vst.msk [vmem:[#allocation2 + $0xd6] sm:$0x1] %vm2310_vm1, %v22805_v6  ;;  %2526 = vst.msk [vmem:[#allocation2 + $0xd7] sm:$0x1] %vm2310_vm1, %v22805_v6 }
  0x87   : > { %2527 = vst.msk [vmem:[#allocation2 + $0xd8] sm:$0x1] %vm2310_vm1, %v22805_v6  ;;  %2528 = vst.msk [vmem:[#allocation2 + $0xd9] sm:$0x1] %vm2310_vm1, %v22805_v6 }
  0x88   : > { %2529 = vst.msk [vmem:[#allocation2 + $0xda] sm:$0x1] %vm2310_vm1, %v22805_v6  ;;  %2530 = vst.msk [vmem:[#allocation2 + $0xdb] sm:$0x1] %vm2310_vm1, %v22805_v6 }
  0x89   : > { %2531 = vst.msk [vmem:[#allocation2 + $0xdc] sm:$0x1] %vm2310_vm1, %v22805_v6  ;;  %2532 = vst.msk [vmem:[#allocation2 + $0xdd] sm:$0x1] %vm2310_vm1, %v22805_v6 }
  0x8a   : > { %2533 = vst.msk [vmem:[#allocation2 + $0xde] sm:$0x1] %vm2310_vm1, %v22805_v6  ;;  %2534 = vst.msk [vmem:[#allocation2 + $0xdf] sm:$0x1] %vm2310_vm1, %v22805_v6 }
  0x8b   : > { %2535 = vst.msk [vmem:[#allocation2 + $0xe0] sm:$0x1] %vm2310_vm1, %v22805_v6  ;;  %2536 = vst.msk [vmem:[#allocation2 + $0xe1] sm:$0x1] %vm2310_vm1, %v22805_v6 }
  0x8c   : > { %2537 = vst.msk [vmem:[#allocation2 + $0xe2] sm:$0x1] %vm2310_vm1, %v22805_v6  ;;  %2538 = vst.msk [vmem:[#allocation2 + $0xe3] sm:$0x1] %vm2310_vm1, %v22805_v6 }
  0x8d   : > { %2539 = vst.msk [vmem:[#allocation2 + $0xe4] sm:$0x1] %vm2310_vm1, %v22805_v6  ;;  %2540 = vst.msk [vmem:[#allocation2 + $0xe5] sm:$0x1] %vm2310_vm1, %v22805_v6 }
  0x8e   : > { %2541 = vst.msk [vmem:[#allocation2 + $0xe6] sm:$0x1] %vm2310_vm1, %v22805_v6  ;;  %2542 = vst.msk [vmem:[#allocation2 + $0xe7] sm:$0x1] %vm2310_vm1, %v22805_v6 }
  0x8f   : > { %2543 = vst.msk [vmem:[#allocation2 + $0xe8] sm:$0x1] %vm2310_vm1, %v22805_v6  ;;  %2544 = vst.msk [vmem:[#allocation2 + $0xe9] sm:$0x1] %vm2310_vm1, %v22805_v6 }
  0x90   : > { %2545 = vst.msk [vmem:[#allocation2 + $0xea] sm:$0x1] %vm2310_vm1, %v22805_v6  ;;  %2546 = vst.msk [vmem:[#allocation2 + $0xeb] sm:$0x1] %vm2310_vm1, %v22805_v6 }
  0x91   : > { %2547 = vst.msk [vmem:[#allocation2 + $0xec] sm:$0x1] %vm2310_vm1, %v22805_v6  ;;  %2548 = vst.msk [vmem:[#allocation2 + $0xed] sm:$0x1] %vm2310_vm1, %v22805_v6 }
  0x92   : > { %2549 = vst.msk [vmem:[#allocation2 + $0xee] sm:$0x1] %vm2310_vm1, %v22805_v6  ;;  %2550 = vst.msk [vmem:[#allocation2 + $0xef] sm:$0x1] %vm2310_vm1, %v22805_v6 }
  0x93   : > { %2551 = vst.msk [vmem:[#allocation2 + $0xf0] sm:$0x1] %vm2310_vm1, %v22805_v6  ;;  %2552 = vst.msk [vmem:[#allocation2 + $0xf1] sm:$0x1] %vm2310_vm1, %v22805_v6 }
  0x94   : > { %2553 = vst.msk [vmem:[#allocation2 + $0xf2] sm:$0x1] %vm2310_vm1, %v22805_v6  ;;  %2554 = vst.msk [vmem:[#allocation2 + $0xf3] sm:$0x1] %vm2310_vm1, %v22805_v6 }
  0x95   : > { %2555 = vst.msk [vmem:[#allocation2 + $0xf4] sm:$0x1] %vm2310_vm1, %v22805_v6  ;;  %2556 = vst.msk [vmem:[#allocation2 + $0xf5] sm:$0x1] %vm2310_vm1, %v22805_v6 }
  0x96   : > { %2557 = vst.msk [vmem:[#allocation2 + $0xf6] sm:$0x1] %vm2310_vm1, %v22805_v6  ;;  %2558 = vst.msk [vmem:[#allocation2 + $0xf7] sm:$0x1] %vm2310_vm1, %v22805_v6 }
  0x97   : > { %2559 = vst.msk [vmem:[#allocation2 + $0xf8] sm:$0x1] %vm2310_vm1, %v22805_v6  ;;  %2560 = vst.msk [vmem:[#allocation2 + $0xf9] sm:$0x1] %vm2310_vm1, %v22805_v6 }
  0x98   : > { %2561 = vst.msk [vmem:[#allocation2 + $0xfa] sm:$0x1] %vm2310_vm1, %v22805_v6  ;;  %2562 = vst.msk [vmem:[#allocation2 + $0xfb] sm:$0x1] %vm2310_vm1, %v22805_v6 }
  0x99   : > { %2563 = vst.msk [vmem:[#allocation2 + $0xfc] sm:$0x1] %vm2310_vm1, %v22805_v6  ;;  %2564 = vst.msk [vmem:[#allocation2 + $0xfd] sm:$0x1] %vm2310_vm1, %v22805_v6 }
  0x9a   : > { %2565 = vst.msk [vmem:[#allocation2 + $0xfe] sm:$0x1] %vm2310_vm1, %v22805_v6  ;;  %2566 = vst.msk [vmem:[#allocation2 + $0xff] sm:$0x1] %vm2310_vm1, %v22805_v6 }
  0x9b   : > { %2567 = vst.msk [vmem:[#allocation2 + $0x100] sm:$0x1] %vm2310_vm1, %v22805_v6  ;;  %2568 = vst.msk [vmem:[#allocation2 + $0x101] sm:$0x1] %vm2310_vm1, %v22805_v6 }
  0x9c   : > { %2569 = vst.msk [vmem:[#allocation2 + $0x102] sm:$0x1] %vm2310_vm1, %v22805_v6  ;;  %2570 = vst.msk [vmem:[#allocation2 + $0x103] sm:$0x1] %vm2310_vm1, %v22805_v6 }
  0x9d   : > { %2571 = vst.msk [vmem:[#allocation2 + $0x104] sm:$0x1] %vm2310_vm1, %v22805_v6  ;;  %2572 = vst.msk [vmem:[#allocation2 + $0x105] sm:$0x1] %vm2310_vm1, %v22805_v6 }
  0x9e   : > { %2573 = vst.msk [vmem:[#allocation2 + $0x106] sm:$0x1] %vm2310_vm1, %v22805_v6  ;;  %2574 = vst.msk [vmem:[#allocation2 + $0x107] sm:$0x1] %vm2310_vm1, %v22805_v6 }
  0x9f   : > { %2575 = vst.msk [vmem:[#allocation2 + $0x108] sm:$0x1] %vm2310_vm1, %v22805_v6  ;;  %2576 = vst.msk [vmem:[#allocation2 + $0x109] sm:$0x1] %vm2310_vm1, %v22805_v6 }
  0xa0   : > { %2577 = vst.msk [vmem:[#allocation2 + $0x10a] sm:$0x1] %vm2310_vm1, %v22805_v6  ;;  %2578 = vst.msk [vmem:[#allocation2 + $0x10b] sm:$0x1] %vm2310_vm1, %v22805_v6 }
  0xa1   : > { %2579 = vst.msk [vmem:[#allocation2 + $0x10c] sm:$0x1] %vm2310_vm1, %v22805_v6  ;;  %2580 = vst.msk [vmem:[#allocation2 + $0x10d] sm:$0x1] %vm2310_vm1, %v22805_v6 }
  0xa2   : > { %2581 = vst.msk [vmem:[#allocation2 + $0x10e] sm:$0x1] %vm2310_vm1, %v22805_v6  ;;  %2582 = vst.msk [vmem:[#allocation2 + $0x10f] sm:$0x1] %vm2310_vm1, %v22805_v6 }
  0xa3   : > { %2583 = vst.msk [vmem:[#allocation2 + $0x110] sm:$0x1] %vm2310_vm1, %v22805_v6  ;;  %2584 = vst.msk [vmem:[#allocation2 + $0x111] sm:$0x1] %vm2310_vm1, %v22805_v6 }
  0xa4   : > { %2585 = vst.msk [vmem:[#allocation2 + $0x112] sm:$0x1] %vm2310_vm1, %v22805_v6  ;;  %2586 = vst.msk [vmem:[#allocation2 + $0x113] sm:$0x1] %vm2310_vm1, %v22805_v6 }
  0xa5   : > { %2587 = vst.msk [vmem:[#allocation2 + $0x114] sm:$0x1] %vm2310_vm1, %v22805_v6  ;;  %2588 = vst.msk [vmem:[#allocation2 + $0x115] sm:$0x1] %vm2310_vm1, %v22805_v6 }
  0xa6   : > { %2589 = vst.msk [vmem:[#allocation2 + $0x116] sm:$0x1] %vm2310_vm1, %v22805_v6  ;;  %2590 = vst.msk [vmem:[#allocation2 + $0x117] sm:$0x1] %vm2310_vm1, %v22805_v6 }
  0xa7   : > { %2591 = vst.msk [vmem:[#allocation2 + $0x118] sm:$0x1] %vm2310_vm1, %v22805_v6  ;;  %2592 = vst.msk [vmem:[#allocation2 + $0x119] sm:$0x1] %vm2310_vm1, %v22805_v6 }
  0xa8   : > { %2593 = vst.msk [vmem:[#allocation2 + $0x11a] sm:$0x1] %vm2310_vm1, %v22805_v6  ;;  %2594 = vst.msk [vmem:[#allocation2 + $0x11b] sm:$0x1] %vm2310_vm1, %v22805_v6 }
  0xa9   : > { %2595 = vst.msk [vmem:[#allocation2 + $0x11c] sm:$0x1] %vm2310_vm1, %v22805_v6  ;;  %2596 = vst.msk [vmem:[#allocation2 + $0x11d] sm:$0x1] %vm2310_vm1, %v22805_v6 }
  0xaa   : > { %2597 = vst.msk [vmem:[#allocation2 + $0x11e] sm:$0x1] %vm2310_vm1, %v22805_v6  ;;  %2598 = vst.msk [vmem:[#allocation2 + $0x11f] sm:$0x1] %vm2310_vm1, %v22805_v6 }
  0xab   : > { %2599 = vst.msk [vmem:[#allocation2 + $0x120] sm:$0x1] %vm2310_vm1, %v22805_v6  ;;  %2600 = vst.msk [vmem:[#allocation2 + $0x121] sm:$0x1] %vm2310_vm1, %v22805_v6 }
  0xac   : > { %2601 = vst.msk [vmem:[#allocation2 + $0x122] sm:$0x1] %vm2310_vm1, %v22805_v6  ;;  %2602 = vst.msk [vmem:[#allocation2 + $0x123] sm:$0x1] %vm2310_vm1, %v22805_v6 }
  0xad   : > { %2603 = vst.msk [vmem:[#allocation2 + $0x124] sm:$0x1] %vm2310_vm1, %v22805_v6  ;;  %2604 = vst.msk [vmem:[#allocation2 + $0x125] sm:$0x1] %vm2310_vm1, %v22805_v6 }
  0xae   : > { %2605 = vst.msk [vmem:[#allocation2 + $0x126] sm:$0x1] %vm2310_vm1, %v22805_v6  ;;  %2606 = vst.msk [vmem:[#allocation2 + $0x127] sm:$0x1] %vm2310_vm1, %v22805_v6 }
  0xaf   : > { %2607 = vst.msk [vmem:[#allocation2 + $0x128] sm:$0x1] %vm2310_vm1, %v22805_v6  ;;  %2608 = vst.msk [vmem:[#allocation2 + $0x129] sm:$0x1] %vm2310_vm1, %v22805_v6 }
  0xb0   : > { %2609 = vst.msk [vmem:[#allocation2 + $0x12a] sm:$0x1] %vm2310_vm1, %v22805_v6  ;;  %2610 = vst.msk [vmem:[#allocation2 + $0x12b] sm:$0x1] %vm2310_vm1, %v22805_v6 }
  0xb1   : > { %2611 = vst.msk [vmem:[#allocation2 + $0x12c] sm:$0x1] %vm2310_vm1, %v22805_v6  ;;  %2612 = vst.msk [vmem:[#allocation2 + $0x12d] sm:$0x1] %vm2310_vm1, %v22805_v6 }
  0xb2   : > { %2613 = vst.msk [vmem:[#allocation2 + $0x12e] sm:$0x1] %vm2310_vm1, %v22805_v6  ;;  %2614 = vst.msk [vmem:[#allocation2 + $0x12f] sm:$0x1] %vm2310_vm1, %v22805_v6 }
  0xb3   : > { %2615 = vst.msk [vmem:[#allocation2 + $0x130] sm:$0x1] %vm2310_vm1, %v22805_v6  ;;  %2616 = vst.msk [vmem:[#allocation2 + $0x131] sm:$0x1] %vm2310_vm1, %v22805_v6 }
  0xb4   : > { %2617 = vst.msk [vmem:[#allocation2 + $0x132] sm:$0x1] %vm2310_vm1, %v22805_v6  ;;  %2618 = vst.msk [vmem:[#allocation2 + $0x133] sm:$0x1] %vm2310_vm1, %v22805_v6 }
  0xb5   : > { %2619 = vst.msk [vmem:[#allocation2 + $0x134] sm:$0x1] %vm2310_vm1, %v22805_v6  ;;  %2620 = vst.msk [vmem:[#allocation2 + $0x135] sm:$0x1] %vm2310_vm1, %v22805_v6 }
  0xb6   : > { %2621 = vst.msk [vmem:[#allocation2 + $0x136] sm:$0x1] %vm2310_vm1, %v22805_v6  ;;  %2622 = vst.msk [vmem:[#allocation2 + $0x137] sm:$0x1] %vm2310_vm1, %v22805_v6 }
  0xb7   : > { %2623 = vst.msk [vmem:[#allocation2 + $0x138] sm:$0x1] %vm2310_vm1, %v22805_v6  ;;  %2624 = vst.msk [vmem:[#allocation2 + $0x139] sm:$0x1] %vm2310_vm1, %v22805_v6 }
  0xb8   : > { %2625 = vst.msk [vmem:[#allocation2 + $0x13a] sm:$0x1] %vm2310_vm1, %v22805_v6  ;;  %2626 = vst.msk [vmem:[#allocation2 + $0x13b] sm:$0x1] %vm2310_vm1, %v22805_v6 }
  0xb9   : > { %2627 = vst.msk [vmem:[#allocation2 + $0x13c] sm:$0x1] %vm2310_vm1, %v22805_v6  ;;  %2628 = vst.msk [vmem:[#allocation2 + $0x13d] sm:$0x1] %vm2310_vm1, %v22805_v6 }
  0xba   : > { %2629 = vst.msk [vmem:[#allocation2 + $0x13e] sm:$0x1] %vm2310_vm1, %v22805_v6  ;;  %2630 = vst.msk [vmem:[#allocation2 + $0x13f] sm:$0x1] %vm2310_vm1, %v22805_v6 }
  0xbb   : > { %2631 = vst.msk [vmem:[#allocation2 + $0x140] sm:$0x1] %vm2310_vm1, %v22805_v6  ;;  %2632 = vst.msk [vmem:[#allocation2 + $0x141] sm:$0x1] %vm2310_vm1, %v22805_v6 }
  0xbc   : > { %2633 = vst.msk [vmem:[#allocation2 + $0x142] sm:$0x1] %vm2310_vm1, %v22805_v6  ;;  %2634 = vst.msk [vmem:[#allocation2 + $0x143] sm:$0x1] %vm2310_vm1, %v22805_v6 }
  0xbd   : > { %2636 = vst.msk [vmem:[#allocation2 + $0x13] sm:$0x1] %vm2310_vm1, %v498_v24  ;;  %2644 = vst.msk [vmem:[#allocation2 + $0x1b] sm:$0x1] %vm2310_vm1, %v18506_v31  ;;  %v539_v24 = vcombine.high %v18491_v15, %v18491_v15  ;;  %v2910_v31 = vld [vmem:[#allocation2 + $0x12] sm:$0x1] }
  0xbe   : > { %2640 = vst.msk [vmem:[#allocation2 + $0x17] sm:$0x1] %vm2310_vm1, %v505_v38  ;;  %2637 = vst.msk [vmem:[#allocation2 + $0x14] sm:$0x1] %vm2310_vm1, %v512_v53  ;;  %v7267_v38 = vcombine.low %v7259_v20, %v7266_v27  ;;  %v617_v53 = vrot.slane %v589_v11, %v18477_v8  ;;  %v668_v20 = vcombine.high %v652_v2, %v652_v2 }
  0xbf   : > { %2641 = vst.msk [vmem:[#allocation2 + $0x18] sm:$0x1] %vm2310_vm1, %v519_v1  ;;  %23057 = vst [vmem:[#allocation8_spill] sm:$0xff] %v18554_v16  ;;  %v561_v15 = vrot.slane %v539_v24, %v18477_v8  ;;  %v638_v1 = vcombine.high %v636_v56, %v636_v56  ;;  %v19971_v16 = vld [vmem:[#allocation2 + $0x1] sm:$0x1] }
  0xc0   : > { %2638 = vst.msk [vmem:[#allocation2 + $0x15] sm:$0x1] %vm2310_vm1, %v520_v9  ;;  %23058 = vst [vmem:[#allocation9_spill] sm:$0xff] %v18559_v22  ;;  %16365 = vmatmul.mubr.msk.f32.vlgmr.msra.gmra.mrb[0].mxu0 %vm5040_vm2, %v7267_v38  ;;  %v621_v0 = vcombine.high %v617_v53, %v617_v53  ;;  %v659_v9 = vrot.slane %v637_v17, %v18477_v8  ;;  %v18651_v38 = vrot.slane %v18624_v12, %v18477_v8 }
  0xc1   : > { %2639 = vst.msk [vmem:[#allocation2 + $0x16] sm:$0x1] %vm2310_vm1, %v522_v14  ;;  %2642 = vst.msk [vmem:[#allocation2 + $0x19] sm:$0x1] %vm2310_vm1, %v521_v13  ;;  %v571_v46 = vcombine.high %v561_v15, %v561_v15  ;;  %16413 = vmatpush3.msk.msra.mxu0 %vm5105_vm0, %v17816_v4  ;;  %v666_v19 = vrot.slane %v638_v1, %v18477_v8 }
  0xc2   : > { %2643 = vst.msk [vmem:[#allocation2 + $0x1a] sm:$0x1] %vm2310_vm1, %v523_v21  ;;  %2646 = vst.msk [vmem:[#allocation2 + $0x1d] sm:$0x1] %vm2310_vm1, %v569_v29  ;;  %16462 = vmatprep.subr.msk.mxu0 %vm5105_vm0, %v18592_v51  ;;  %v669_v26 = vcombine.high %v659_v9, %v659_v9 }
  0xc3   : > { %2648 = vst.msk [vmem:[#allocation2 + $0x1f] sm:$0x1] %vm2310_vm1, %v554_v28  ;;  %2645 = vst.msk [vmem:[#allocation2 + $0x1c] sm:$0x1] %vm2310_vm1, %v561_v15 }
  0xc4   : > { %v2911_v41 = vld [vmem:[#allocation2 + $0x13] sm:$0x1]  ;;  %2649 = vst.msk [vmem:[#allocation2 + $0x20] sm:$0x1] %vm2310_vm1, %v568_v36  ;;  %2650 = vst.msk [vmem:[#allocation2 + $0x21] sm:$0x1] %vm2310_vm1, %v570_v40  ;;  %v670_v36 = vcombine.high %v666_v19, %v666_v19 }
  0xc5   : > { %v2912_v42 = vld [vmem:[#allocation2 + $0x14] sm:$0x1]  ;;  %v2915_v25 = vld [vmem:[#allocation2 + $0x17] sm:$0x1]  ;;  %2652 = vst.msk [vmem:[#allocation2 + $0x25] sm:$0x1] %vm2310_vm1, %v596_v18  ;;  %v5448_v39 = vcombine.low %v2910_v31, %v2911_v41 }
  0xc6   : > { %v2916_v52 = vld [vmem:[#allocation2 + $0x18] sm:$0x1]  ;;  %v18606_v59 = vld [vmem:[#allocation2 + $0x1b] sm:$0x1]  ;;  %2647 = vst.msk [vmem:[#allocation2 + $0x1e] sm:$0x1] %vm2310_vm1, %v571_v46 }
  0xc7   : > { %v2913_v57 = vld [vmem:[#allocation2 + $0x15] sm:$0x1]  ;;  %2651 = vst.msk [vmem:[#allocation2 + $0x22] sm:$0x1] %vm2310_vm1, %v572_v47  ;;  %2653 = vst.msk [vmem:[#allocation2 + $0x26] sm:$0x1] %vm2310_vm1, %v610_v50  ;;  %v18642_v27 = vrot.slane %v5448_v39, %v18477_v8 }
  0xc8   : > { %2656 = vst.msk [vmem:[#allocation2 + $0x29] sm:$0x1] %vm2310_vm1, %v603_v49  ;;  %v2914_v62 = vld [vmem:[#allocation2 + $0x16] sm:$0x1]  ;;  %v2917_v63 = vld [vmem:[#allocation2 + $0x19] sm:$0x1]  ;;  %v5449_v4 = vcombine.low %v2912_v42, %v2913_v57 }
  0xc9   : > { %2654 = vst.msk [vmem:[#allocation2 + $0x27] sm:$0x1] %vm2310_vm1, %v618_v54  ;;  %2657 = vst.msk [vmem:[#allocation2 + $0x2a] sm:$0x1] %vm2310_vm1, %v617_v53  ;;  %v2918_v3 = vld [vmem:[#allocation2 + $0x1a] sm:$0x1]  ;;  %v5450_v32 = vcombine.low %v2914_v62, %v2915_v25  ;;  %v5451_v7 = vcombine.low %v2916_v52, %v2917_v63 }
  0xca   : > { %2660 = vst.msk [vmem:[#allocation2 + $0x2d] sm:$0x1] %vm2310_vm1, %v645_v55  ;;  %2655 = vst.msk [vmem:[#allocation2 + $0x28] sm:$0x1] %vm2310_vm1, %v620_v61  ;;  %v18627_v13 = vrot.slane %v5449_v4, %v18477_v8  ;;  %v5497_v14 = vcombine.low %v2918_v3, %v18606_v59  ;;  %v2921_v24 = vld [vmem:[#allocation2 + $0x1d] sm:$0x1] }
  0xcb   : > { %2658 = vst.msk [vmem:[#allocation2 + $0x2b] sm:$0x1] %vm2310_vm1, %v619_v60  ;;  %2659 = vst.msk [vmem:[#allocation2 + $0x2c] sm:$0x1] %vm2310_vm1, %v621_v0  ;;  %v18634_v21 = vrot.slane %v5450_v32, %v18477_v8  ;;  %v18637_v23 = vrot.slane %v5451_v7, %v18477_v8  ;;  %v2920_v29 = vld [vmem:[#allocation2 + $0x1c] sm:$0x1] }
  0xcc   : > { %2664 = vst.msk [vmem:[#allocation2 + $0x31] sm:$0x1] %vm2310_vm1, %v652_v2  ;;  %2661 = vst.msk [vmem:[#allocation2 + $0x2e] sm:$0x1] %vm2310_vm1, %v659_v9  ;;  %v5507_v28 = vrot.slane %v5497_v14, %v18477_v8  ;;  %v2923_v30 = vld [vmem:[#allocation2 + $0x1f] sm:$0x1]  ;;  %v3619_v31 = vcombine.low %v18606_v59, %v2920_v29  ;;  %v5498_v42 = vcombine.low %v2920_v29, %v2921_v24 }
  0xcd   : > { %2662 = vst.msk [vmem:[#allocation2 + $0x2f] sm:$0x1] %vm2310_vm1, %v667_v10  ;;  %v2924_v15 = vld [vmem:[#allocation2 + $0x20] sm:$0x1]  ;;  %2665 = vst.msk [vmem:[#allocation2 + $0x32] sm:$0x1] %vm2310_vm1, %v666_v19  ;;  %v7268_v40 = vcombine.low %v18627_v13, %v18634_v21  ;;  %v5480_v52 = vcombine.low %v18642_v27, %v18627_v13  ;;  %v5481_v53 = vcombine.low %v18634_v21, %v18637_v23 }
  0xce   : > { %2666 = vst.msk [vmem:[#allocation2 + $0x33] sm:$0x1] %vm2310_vm1, %v668_v20  ;;  %v2925_v11 = vld [vmem:[#allocation2 + $0x21] sm:$0x1]  ;;  %v2927_v18 = vld [vmem:[#allocation2 + $0x23] sm:$0x1]  ;;  %v3621_v41 = vcombine.low %v2923_v30, %v2924_v15  ;;  %v7269_v46 = vcombine.low %v18637_v23, %v5507_v28  ;;  %v18665_v57 = vrot.slane %v3619_v31, %v18477_v8  ;;  %v5514_v63 = vrot.slane %v5498_v42, %v18477_v8 }
  0xcf   : > { %2663 = vst.msk [vmem:[#allocation2 + $0x30] sm:$0x1] %vm2310_vm1, %v669_v26  ;;  %v2922_v47 = vld [vmem:[#allocation2 + $0x1e] sm:$0x1]  ;;  %v2926_v49 = vld [vmem:[#allocation2 + $0x22] sm:$0x1]  ;;  %v5500_v50 = vcombine.low %v2924_v15, %v2925_v11  ;;  %v7276_v54 = vrot.slane %v7268_v40, %v18477_v8 }
  0xd0   : > { %v2930_v25 = vld [vmem:[#allocation2 + $0x26] sm:$0x1]  ;;  %2667 = vst.msk [vmem:[#allocation2 + $0x34] sm:$0x1] %vm2310_vm1, %v670_v36  ;;  %v3620_v55 = vcombine.low %v2921_v24, %v2922_v47  ;;  %v3622_v56 = vcombine.low %v2925_v11, %v2926_v49  ;;  %v2931_v59 = vld [vmem:[#allocation2 + $0x27] sm:$0x1]  ;;  %v7283_v17 = vrot.slane %v7269_v46, %v18477_v8  ;;  %v18669_v39 = vrot.slane %v3621_v41, %v18477_v8 }
  0xd1   : > { %v2933_v60 = vld [vmem:[#allocation2 + $0x29] sm:$0x1]  ;;  %v2934_v61 = vld [vmem:[#allocation2 + $0x2a] sm:$0x1]  ;;  %v5499_v62 = vcombine.low %v2922_v47, %v2923_v30  ;;  %v2932_v4 = vld [vmem:[#allocation2 + $0x28] sm:$0x1]  ;;  %v5528_v32 = vrot.slane %v5500_v50, %v18477_v8  ;;  %v7285_v7 = vcombine.low %v2926_v49, %v2927_v18  ;;  %v5529_v14 = vcombine.low %v5507_v28, %v5514_v63 }
  0xd2   : > { %v2935_v0 = vld [vmem:[#allocation2 + $0x2b] sm:$0x1]  ;;  %v2937_v1 = vld [vmem:[#allocation2 + $0x2d] sm:$0x1]  ;;  %v18673_v2 = vrot.slane %v3620_v55, %v18477_v8  ;;  %v18676_v3 = vrot.slane %v3622_v56, %v18477_v8  ;;  %v2936_v9 = vld [vmem:[#allocation2 + $0x2c] sm:$0x1]  ;;  %v18679_v10 = vcombine.low %v7276_v54, %v7283_v17  ;;  %v5547_v19 = vcombine.low %v2930_v25, %v2931_v59 }
  0xd3   : > { %v5521_v13 = vrot.slane %v5499_v62, %v18477_v8  ;;  %v7292_v20 = vrot.slane %v7285_v7, %v18477_v8  ;;  %v5548_v24 = vcombine.low %v2932_v4, %v2933_v60  ;;  %v5549_v26 = vcombine.low %v2934_v61, %v2935_v0  ;;  %v2938_v29 = vld [vmem:[#allocation2 + $0x2e] sm:$0x1]  ;;  %v2941_v15 = vld [vmem:[#allocation2 + $0x31] sm:$0x1]  ;;  %v2945_v25 = vld [vmem:[#allocation2 + $0x35] sm:$0x1] }
  0xd4   : > { %23059 = vst [vmem:[#allocation10_spill] sm:$0xff] %v18679_v10  ;;  %v5595_v27 = vcombine.low %v2936_v9, %v2937_v1  ;;  %v2939_v30 = vld [vmem:[#allocation2 + $0x2f] sm:$0x1]  ;;  %16367 = vmatprep.mubr.msk.f32.mxu0 %vm5040_vm2, %v18679_v10  ;;  %v5537_v40 = vrot.slane %v5529_v14, %v18477_v8  ;;  %v5563_v18 = vrot.slane %v5547_v19, %v18477_v8  ;;  %v2942_v28 = vld [vmem:[#allocation2 + $0x32] sm:$0x1] }
  0xd5   : > { %v5530_v36 = vcombine.low %v5521_v13, %v5528_v32  ;;  %v7293_v11 = vcombine.low %v5514_v63, %v5521_v13  ;;  %v2943_v41 = vld [vmem:[#allocation2 + $0x33] sm:$0x1]  ;;  %v7294_v42 = vcombine.low %v5528_v32, %v7292_v20  ;;  %v5570_v46 = vrot.slane %v5548_v24, %v18477_v8  ;;  %v2928_v32 = vld [vmem:[#allocation2 + $0x24] sm:$0x1]  ;;  %v2929_v7 = vld [vmem:[#allocation2 + $0x25] sm:$0x1] }
  0xd6   : > { %v2940_v31 = vld [vmem:[#allocation2 + $0x30] sm:$0x1]  ;;  %v5577_v47 = vrot.slane %v5549_v26, %v18477_v8  ;;  %v5605_v49 = vrot.slane %v5595_v27, %v18477_v8  ;;  %v5596_v56 = vcombine.low %v2938_v29, %v2939_v30  ;;  %v5598_v62 = vcombine.low %v2942_v28, %v2943_v41  ;;  %v416_v41 = vld [vmem:[%s18482_s29 + $0x28] sm:$0xff] }
  0xd7   : > { %v2944_v50 = vld [vmem:[#allocation2 + $0x34] sm:$0x1]  ;;  %v5544_v54 = vrot.slane %v5530_v36, %v18477_v8  ;;  %v7301_v55 = vrot.slane %v7293_v11, %v18477_v8  ;;  %v5597_v59 = vcombine.low %v2940_v31, %v2941_v15  ;;  %v7308_v60 = vrot.slane %v7294_v42, %v18477_v8 }
  0xd8   : > { %v7310_v61 = vcombine.low %v5563_v18, %v5570_v46  ;;  %v7311_v17 = vcombine.low %v5577_v47, %v5605_v49  ;;  %v5612_v63 = vrot.slane %v5596_v56, %v18477_v8  ;;  %v7327_v0 = vcombine.low %v2944_v50, %v2945_v25  ;;  %v417_v56 = vld [vmem:[%s18482_s29 + $0x30] sm:$0xff] }
  0xd9   : > { %v5619_v4 = vrot.slane %v5597_v59, %v18477_v8  ;;  %v5488_v1 = vrot.slane %v5480_v52, %v18477_v8  ;;  %v18696_v9 = vcombine.low %v7301_v55, %v7308_v60  ;;  %v5626_v19 = vrot.slane %v5598_v62, %v18477_v8 }
  0xda   : > { %v7318_v13 = vrot.slane %v7310_v61, %v18477_v8  ;;  %v7325_v14 = vrot.slane %v7311_v17, %v18477_v8  ;;  %v7334_v20 = vrot.slane %v7327_v0, %v18477_v8  ;;  %v5495_v26 = vrot.slane %v5481_v53, %v18477_v8 }
  0xdb   : > { %23060 = vst [vmem:[#allocation11_spill] sm:$0xff] %v18696_v9  ;;  %v7335_v24 = vcombine.low %v5612_v63, %v5619_v4  ;;  %v18706_v52 = vcombine.low %v5537_v40, %v5544_v54  ;;  %16368 = vmatmul.mubr.msk.f32.gmra.mrb[2].mxu0 %vm5040_vm2, %v18696_v9  ;;  %v5546_v29 = vcombine.low %v2928_v32, %v2929_v7 }
  0xdc   : > { %v18710_v27 = vcombine.low %v7318_v13, %v7325_v14  ;;  %v5579_v30 = vcombine.low %v5570_v46, %v5577_v47  ;;  %v5627_v15 = vcombine.low %v5605_v49, %v5612_v63  ;;  %v7336_v36 = vcombine.low %v5626_v19, %v7334_v20 }
  0xdd   : > { %23061 = vst [vmem:[#allocation12_spill] sm:$0xff] %v18706_v52  ;;  %v7343_v11 = vrot.slane %v7335_v24, %v18477_v8  ;;  %v18713_v31 = vcombine.low %v5488_v1, %v5495_v26  ;;  %v5628_v28 = vcombine.low %v5619_v4, %v5626_v19  ;;  %v5556_v21 = vrot.slane %v5546_v29, %v18477_v8  ;;  %v418_v1 = vld [vmem:[%s18482_s29 + $0x38] sm:$0xff]  ;;  %v2946_v29 = vld [vmem:[#allocation2 + $0x36] sm:$0x1] }
  0xde   : > { %23062 = vst [vmem:[#allocation13_spill] sm:$0xff] %v18710_v27  ;;  %16370 = vmatprep.mubr.msk.f32.mxu0 %vm5040_vm2, %v18710_v27  ;;  %v5593_v23 = vrot.slane %v5579_v30, %v18477_v8  ;;  %v5635_v53 = vrot.slane %v5627_v15, %v18477_v8  ;;  %v685_v40 = vrot.slane %v671_v37, %v18477_v8 }
  0xdf   : > { %23063 = vst [vmem:[#allocation14_spill] sm:$0xff] %v18713_v31  ;;  %v7350_v42 = vrot.slane %v7336_v36, %v18477_v8  ;;  %v5642_v46 = vrot.slane %v5628_v28, %v18477_v8  ;;  %v686_v47 = vcombine.high %v18651_v38, %v18651_v38  ;;  %v694_v49 = vrot.slane %v18651_v38, %v18477_v8 }
  0xe0   : > { %v5578_v50 = vcombine.low %v5556_v21, %v5563_v18  ;;  %v687_v25 = vcombine.high %v685_v40, %v685_v40  ;;  %v701_v54 = vrot.slane %v685_v40, %v18477_v8  ;;  %v720_v55 = vcombine.high %v416_v41, %v416_v41 }
  0xe1   : > { %v18733_v59 = vcombine.low %v7343_v11, %v7350_v42  ;;  %v18735_v12 = vcombine.low %v5635_v53, %v5642_v46  ;;  %v708_v37 = vrot.slane %v686_v47, %v18477_v8  ;;  %v716_v60 = vcombine.high %v694_v49, %v694_v49  ;;  %2668 = vst.msk [vmem:[#allocation2 + $0x37] sm:$0x1] %vm2310_vm1, %v694_v49  ;;  %v419_v53 = vld [vmem:[%s18482_s29 + $0x40] sm:$0xff] }
  0xe2   : > { %v5586_v61 = vrot.slane %v5578_v50, %v18477_v8  ;;  %v715_v38 = vrot.slane %v687_v25, %v18477_v8  ;;  %v717_v18 = vcombine.high %v701_v54, %v701_v54  ;;  %2672 = vst.msk [vmem:[#allocation2 + $0x3b] sm:$0x1] %vm2310_vm1, %v701_v54  ;;  %v727_v17 = vrot.slane %v416_v41, %v18477_v8 }
  0xe3   : > { %23064 = vst [vmem:[#allocation15_spill] sm:$0xff] %v18733_v59  ;;  %23065 = vst [vmem:[#allocation16_spill] sm:$0xff] %v18735_v12  ;;  %16371 = vmatmul.mubr.msk.f32.gmra.mrb[4].mxu0 %vm5040_vm2, %v18733_v59  ;;  %v718_v62 = vcombine.high %v708_v37, %v708_v37  ;;  %v734_v63 = vrot.slane %v720_v55, %v18477_v8  ;;  %v769_v4 = vcombine.high %v417_v56, %v417_v56 }
  0xe4   : > { %2669 = vst.msk [vmem:[#allocation2 + $0x38] sm:$0x1] %vm2310_vm1, %v708_v37  ;;  %2670 = vst.msk [vmem:[#allocation2 + $0x39] sm:$0x1] %vm2310_vm1, %v716_v60  ;;  %v776_v0 = vrot.slane %v417_v56, %v18477_v8  ;;  %16414 = vmatprep.mubr.msk.f32.mxu0 %vm5040_vm2, %v18713_v31  ;;  %v18752_v32 = vcombine.low %v5586_v61, %v5593_v23  ;;  %v719_v7 = vcombine.high %v715_v38, %v715_v38 }
  0xe5   : > { %2673 = vst.msk [vmem:[#allocation2 + $0x3c] sm:$0x1] %vm2310_vm1, %v715_v38  ;;  %2674 = vst.msk [vmem:[#allocation2 + $0x3d] sm:$0x1] %vm2310_vm1, %v717_v18  ;;  %v735_v13 = vcombine.high %v727_v17, %v727_v17  ;;  %v743_v14 = vrot.slane %v727_v17, %v18477_v8  ;;  %v736_v19 = vcombine.high %v734_v63, %v734_v63 }
  0xe6   : > { %23066 = vst [vmem:[#allocation17_spill] sm:$0xff] %v18752_v32  ;;  %2671 = vst.msk [vmem:[#allocation2 + $0x3a] sm:$0x1] %vm2310_vm1, %v718_v62  ;;  %v750_v20 = vrot.slane %v734_v63, %v18477_v8  ;;  %v783_v24 = vrot.slane %v769_v4, %v18477_v8  ;;  %v784_v26 = vcombine.high %v776_v0, %v776_v0 }
  0xe7   : > { %v757_v30 = vrot.slane %v735_v13, %v18477_v8  ;;  %v765_v15 = vcombine.high %v743_v14, %v743_v14  ;;  %2675 = vst.msk [vmem:[#allocation2 + $0x3e] sm:$0x1] %vm2310_vm1, %v719_v7  ;;  %2676 = vst.msk [vmem:[#allocation2 + $0x3f] sm:$0x1] %vm2310_vm1, %v743_v14  ;;  %v792_v36 = vrot.slane %v776_v0, %v18477_v8  ;;  %16415 = vmatmul.mubr.msk.f32.vlgmr.msra.gmra.mrb[0].mxu0 %vm5040_vm2, %v18706_v52 }
  0xe8   : > { %v818_v11 = vcombine.high %v418_v1, %v418_v1  ;;  %v18767_v28 = vrot.slane %v736_v19, %v18477_v8  ;;  %v766_v41 = vcombine.high %v750_v20, %v750_v20  ;;  %2680 = vst.msk [vmem:[#allocation2 + $0x43] sm:$0x1] %vm2310_vm1, %v750_v20  ;;  %v785_v21 = vcombine.high %v783_v24, %v783_v24  ;;  %v2947_v40 = vld [vmem:[#allocation2 + $0x37] sm:$0x1] }
  0xe9   : > { %v799_v23 = vrot.slane %v783_v24, %v18477_v8  ;;  %16463 = vmatpush3.msk.msra.mxu0 %vm5105_vm0, %v18592_v51  ;;  %16417 = vmatprep.mubr.msk.f32.mxu0 %vm5040_vm2, %v18752_v32  ;;  %v767_v42 = vcombine.high %v757_v30, %v757_v30  ;;  %2677 = vst.msk [vmem:[#allocation2 + $0x40] sm:$0x1] %vm2310_vm1, %v757_v30  ;;  %2678 = vst.msk [vmem:[#allocation2 + $0x41] sm:$0x1] %vm2310_vm1, %v765_v15  ;;  %v2951_v56 = vld [vmem:[#allocation2 + $0x3b] sm:$0x1] }
  0xea   : > { %v806_v46 = vrot.slane %v784_v26, %v18477_v8  ;;  %v814_v47 = vcombine.high %v792_v36, %v792_v36  ;;  %2684 = vst.msk [vmem:[#allocation2 + $0x49] sm:$0x1] %vm2310_vm1, %v792_v36  ;;  %v5644_v49 = vcombine.low %v2946_v29, %v2947_v40  ;;  %2681 = vst.msk [vmem:[#allocation2 + $0x44] sm:$0x1] %vm2310_vm1, %v18767_v28  ;;  %v2964_v30 = vld [vmem:[#allocation2 + $0x48] sm:$0x1] }
  0xeb   : > { %2682 = vst.msk [vmem:[#allocation2 + $0x45] sm:$0x1] %vm2310_vm1, %v766_v41  ;;  %v813_v51 = vrot.slane %v785_v21, %v18477_v8  ;;  %v815_v50 = vcombine.high %v799_v23, %v799_v23  ;;  %2688 = vst.msk [vmem:[#allocation2 + $0x4d] sm:$0x1] %vm2310_vm1, %v799_v23  ;;  %v825_v25 = vrot.slane %v418_v1, %v18477_v8  ;;  %v2948_v54 = vld [vmem:[#allocation2 + $0x38] sm:$0x1]  ;;  %16418 = vmatmul.mubr.msk.f32.gmra.mrb[2].mxu0 %vm5040_vm2, %v18735_v12 }
  0xec   : > { %v2949_v55 = vld [vmem:[#allocation2 + $0x39] sm:$0x1]  ;;  %2679 = vst.msk [vmem:[#allocation2 + $0x42] sm:$0x1] %vm2310_vm1, %v767_v42  ;;  %v816_v37 = vcombine.high %v806_v46, %v806_v46  ;;  %2685 = vst.msk [vmem:[#allocation2 + $0x4a] sm:$0x1] %vm2310_vm1, %v806_v46  ;;  %v832_v60 = vrot.slane %v818_v11, %v18477_v8  ;;  %v867_v61 = vcombine.high %v419_v53, %v419_v53 }
  0xed   : > { %2686 = vst.msk [vmem:[#allocation2 + $0x4b] sm:$0x1] %vm2310_vm1, %v814_v47  ;;  %v18791_v38 = vrot.slane %v419_v53, %v18477_v8  ;;  %v2952_v18 = vld [vmem:[#allocation2 + $0x3c] sm:$0x1]  ;;  %v2953_v17 = vld [vmem:[#allocation2 + $0x3d] sm:$0x1]  ;;  %v5645_v62 = vcombine.low %v2948_v54, %v2949_v55  ;;  %v5654_v63 = vrot.slane %v5644_v49, %v18477_v8  ;;  %v817_v4 = vcombine.high %v813_v51, %v813_v51 }
  0xee   : > { %2689 = vst.msk [vmem:[#allocation2 + $0x4e] sm:$0x1] %vm2310_vm1, %v813_v51  ;;  %2690 = vst.msk [vmem:[#allocation2 + $0x4f] sm:$0x1] %vm2310_vm1, %v815_v50  ;;  %v833_v0 = vcombine.high %v825_v25, %v825_v25  ;;  %v2950_v1 = vld [vmem:[#allocation2 + $0x3a] sm:$0x1]  ;;  %v5647_v7 = vcombine.low %v2952_v18, %v2953_v17  ;;  %v834_v13 = vcombine.high %v832_v60, %v832_v60 }
  0xef   : > { %2687 = vst.msk [vmem:[#allocation2 + $0x4c] sm:$0x1] %vm2310_vm1, %v816_v37  ;;  %v841_v14 = vrot.slane %v825_v25, %v18477_v8  ;;  %v848_v19 = vrot.slane %v832_v60, %v18477_v8  ;;  %v5646_v20 = vcombine.low %v2950_v1, %v2951_v56  ;;  %v18802_v24 = vrot.slane %v5645_v62, %v18477_v8  ;;  %v2954_v26 = vld [vmem:[#allocation2 + $0x3e] sm:$0x1]  ;;  %v2955_v29 = vld [vmem:[#allocation2 + $0x3f] sm:$0x1] }
  0xf0   : > { %v855_v15 = vrot.slane %v833_v0, %v18477_v8  ;;  %2691 = vst.msk [vmem:[#allocation2 + $0x50] sm:$0x1] %vm2310_vm1, %v817_v4  ;;  %v18807_v36 = vrot.slane %v867_v61, %v18477_v8  ;;  %v18810_v11 = vrot.slane %v5647_v7, %v18477_v8  ;;  %v2959_v41 = vld [vmem:[#allocation2 + $0x43] sm:$0x1]  ;;  %v5693_v21 = vcombine.low %v2954_v26, %v2955_v29  ;;  %v2956_v46 = vld [vmem:[#allocation2 + $0x40] sm:$0x1] }
  0xf1   : > { %v18813_v23 = vrot.slane %v834_v13, %v18477_v8  ;;  %v863_v53 = vcombine.high %v841_v14, %v841_v14  ;;  %2692 = vst.msk [vmem:[#allocation2 + $0x51] sm:$0x1] %vm2310_vm1, %v841_v14  ;;  %2696 = vst.msk [vmem:[#allocation2 + $0x55] sm:$0x1] %vm2310_vm1, %v848_v19  ;;  %v18818_v40 = vrot.slane %v5646_v20, %v18477_v8  ;;  %v2957_v47 = vld [vmem:[#allocation2 + $0x41] sm:$0x1] }
  0xf2   : > { %v5676_v42 = vcombine.low %v5654_v63, %v18802_v24  ;;  %v2965_v49 = vld [vmem:[#allocation2 + $0x49] sm:$0x1]  ;;  %v864_v51 = vcombine.high %v848_v19, %v848_v19  ;;  %v865_v50 = vcombine.high %v855_v15, %v855_v15  ;;  %2693 = vst.msk [vmem:[#allocation2 + $0x52] sm:$0x1] %vm2310_vm1, %v855_v15  ;;  %v2960_v25 = vld [vmem:[#allocation2 + $0x44] sm:$0x1]  ;;  %v5694_v55 = vcombine.low %v2956_v46, %v2957_v47 }
  0xf3   : > { %v2961_v54 = vld [vmem:[#allocation2 + $0x45] sm:$0x1]  ;;  %v18823_v56 = vrot.slane %v5693_v21, %v18477_v8  ;;  %v2969_v37 = vld [vmem:[#allocation2 + $0x4d] sm:$0x1]  ;;  %v5742_v60 = vcombine.low %v2964_v30, %v2965_v49  ;;  %2694 = vst.msk [vmem:[#allocation2 + $0x53] sm:$0x1] %vm2310_vm1, %v863_v53  ;;  %v882_v61 = vcombine.high %v18791_v38, %v18791_v38  ;;  %v5677_v18 = vcombine.low %v18818_v40, %v18810_v11 }
  0xf4   : > { %2697 = vst.msk [vmem:[#allocation2 + $0x56] sm:$0x1] %vm2310_vm1, %v18813_v23  ;;  %v5684_v17 = vrot.slane %v5676_v42, %v18477_v8  ;;  %v2958_v62 = vld [vmem:[#allocation2 + $0x42] sm:$0x1]  ;;  %v5696_v63 = vcombine.low %v2960_v25, %v2961_v54  ;;  %v2966_v4 = vld [vmem:[#allocation2 + $0x4a] sm:$0x1]  ;;  %v883_v1 = vcombine.high %v18807_v36, %v18807_v36  ;;  %v18838_v13 = vrot.slane %v5694_v55, %v18477_v8 }
  0xf5   : > { %v2967_v0 = vld [vmem:[#allocation2 + $0x4b] sm:$0x1]  ;;  %2695 = vst.msk [vmem:[#allocation2 + $0x54] sm:$0x1] %vm2310_vm1, %v865_v50  ;;  %2698 = vst.msk [vmem:[#allocation2 + $0x57] sm:$0x1] %vm2310_vm1, %v864_v51  ;;  %v5695_v7 = vcombine.low %v2958_v62, %v2959_v41  ;;  %v5752_v26 = vrot.slane %v5742_v60, %v18477_v8  ;;  %v5691_v29 = vrot.slane %v5677_v18, %v18477_v8 }
  0xf6   : > { %v2970_v14 = vld [vmem:[#allocation2 + $0x4e] sm:$0x1]  ;;  %v2971_v19 = vld [vmem:[#allocation2 + $0x4f] sm:$0x1]  ;;  %v5743_v20 = vcombine.low %v2966_v4, %v2967_v0  ;;  %v18843_v30 = vrot.slane %v5696_v63, %v18477_v8  ;;  %v2968_v15 = vld [vmem:[#allocation2 + $0x4c] sm:$0x1]  ;;  %v890_v53 = vrot.slane %v18791_v38, %v18477_v8  ;;  %v5725_v42 = vcombine.low %v18823_v56, %v18838_v13 }
  0xf7   : > { %v5745_v21 = vcombine.low %v2970_v14, %v2971_v19  ;;  %v18848_v41 = vrot.slane %v5695_v7, %v18477_v8  ;;  %v5744_v46 = vcombine.low %v2968_v15, %v2969_v37  ;;  %v2972_v49 = vld [vmem:[#allocation2 + $0x50] sm:$0x1]  ;;  %v18855_v51 = vcombine.low %v5684_v17, %v5691_v29 }
  0xf8   : > { %v18853_v47 = vrot.slane %v5743_v20, %v18477_v8  ;;  %v2973_v25 = vld [vmem:[#allocation2 + $0x51] sm:$0x1]  ;;  %v897_v38 = vrot.slane %v18807_v36, %v18477_v8  ;;  %v904_v54 = vrot.slane %v882_v61, %v18477_v8  ;;  %2700 = vst.msk [vmem:[#allocation2 + $0x5b] sm:$0x1] %vm2310_vm1, %v890_v53  ;;  %v5733_v37 = vrot.slane %v5725_v42, %v18477_v8  ;;  %v2977_v62 = vld [vmem:[#allocation2 + $0x55] sm:$0x1] }
  0xf9   : > { %23067 = vst [vmem:[#allocation18_spill] sm:$0xff] %v18855_v51  ;;  %v18858_v50 = vrot.slane %v5745_v21, %v18477_v8  ;;  %v5726_v55 = vcombine.low %v18848_v41, %v18843_v30  ;;  %v18868_v60 = vrot.slane %v5744_v46, %v18477_v8  ;;  %v2974_v17 = vld [vmem:[#allocation2 + $0x52] sm:$0x1]  ;;  %16420 = vmatprep.mubr.msk.f32.mxu0 %vm5040_vm2, %v18855_v51  ;;  %v420_v21 = vld [vmem:[%s18482_s29 + $0x48] sm:$0xff] }
  0xfa   : > { %v5774_v18 = vcombine.low %v5752_v26, %v18853_v47  ;;  %v2975_v36 = vld [vmem:[#allocation2 + $0x53] sm:$0x1]  ;;  %v5791_v63 = vcombine.low %v2972_v49, %v2973_v25  ;;  %v911_v4 = vrot.slane %v883_v1, %v18477_v8  ;;  %v912_v0 = vcombine.high %v890_v53, %v890_v53  ;;  %2701 = vst.msk [vmem:[#allocation2 + $0x5c] sm:$0x1] %vm2310_vm1, %v904_v54 }
  0xfb   : > { %23068 = vst [vmem:[#allocation19_spill] sm:$0xff] %v18858_v50  ;;  %v2978_v61 = vld [vmem:[#allocation2 + $0x56] sm:$0x1]  ;;  %v913_v7 = vcombine.high %v897_v38, %v897_v38  ;;  %2704 = vst.msk [vmem:[#allocation2 + $0x5f] sm:$0x1] %vm2310_vm1, %v897_v38  ;;  %v5740_v14 = vrot.slane %v5726_v55, %v18477_v8  ;;  %v5775_v19 = vcombine.low %v18868_v60, %v18858_v50 }
  0xfc   : > { %v5782_v20 = vrot.slane %v5774_v18, %v18477_v8  ;;  %v2976_v26 = vld [vmem:[#allocation2 + $0x54] sm:$0x1]  ;;  %v2979_v29 = vld [vmem:[#allocation2 + $0x57] sm:$0x1]  ;;  %v5792_v15 = vcombine.low %v2974_v17, %v2975_v36  ;;  %v18882_v53 = vrot.slane %v5791_v63, %v18477_v8  ;;  %v914_v46 = vcombine.high %v904_v54, %v904_v54  ;;  %2702 = vst.msk [vmem:[#allocation2 + $0x5d] sm:$0x1] %vm2310_vm1, %v912_v0 }
  0xfd   : > { %v5793_v42 = vcombine.low %v2976_v26, %v2977_v62  ;;  %v5794_v1 = vcombine.low %v2978_v61, %v2979_v29  ;;  %2705 = vst.msk [vmem:[#allocation2 + $0x60] sm:$0x1] %vm2310_vm1, %v911_v4  ;;  %2706 = vst.msk [vmem:[#allocation2 + $0x61] sm:$0x1] %vm2310_vm1, %v913_v7  ;;  %v421_v49 = vld [vmem:[%s18482_s29 + $0x50] sm:$0xff]  ;;  %v18888_v25 = vcombine.low %v5733_v37, %v5740_v14 }
  0xfe   : > { %23069 = vst [vmem:[#allocation20_spill] sm:$0xff] %v18882_v53  ;;  %v5789_v38 = vrot.slane %v5775_v19, %v18477_v8  ;;  %v18892_v55 = vrot.slane %v5792_v15, %v18477_v8  ;;  %v2982_v18 = vld [vmem:[#allocation2 + $0x5a] sm:$0x1]  ;;  %v915_v17 = vcombine.high %v911_v4, %v911_v4  ;;  %2703 = vst.msk [vmem:[#allocation2 + $0x5e] sm:$0x1] %vm2310_vm1, %v914_v46 }
  0xff   : > { %23070 = vst [vmem:[#allocation21_spill] sm:$0xff] %v18888_v25  ;;  %v18895_v62 = vrot.slane %v5793_v42, %v18477_v8  ;;  %v18898_v54 = vrot.slane %v5794_v1, %v18477_v8  ;;  %v916_v36 = vcombine.high %v420_v21, %v420_v21  ;;  %v923_v61 = vrot.slane %v420_v21, %v18477_v8  ;;  %v2983_v4 = vld [vmem:[#allocation2 + $0x5b] sm:$0x1] }
 0x100   : > { %23071 = vst [vmem:[#allocation22_spill] sm:$0xff] %v18892_v55  ;;  %16421 = vmatmul.mubr.msk.f32.gmra.mrb[4].mxu0 %vm5040_vm2, %v18888_v25  ;;  %v18904_v37 = vcombine.low %v5782_v20, %v5789_v38  ;;  %v5823_v63 = vcombine.low %v18882_v53, %v18892_v55  ;;  %2707 = vst.msk [vmem:[#allocation2 + $0x62] sm:$0x1] %vm2310_vm1, %v915_v17  ;;  %v965_v0 = vcombine.high %v421_v49, %v421_v49  ;;  %v17455_v53 = vld [vmem:[#allocation2 + $0x8] sm:$0x1] }
 0x101   : > { %23072 = vst [vmem:[#allocation23_spill] sm:$0xff] %v18895_v62  ;;  %23073 = vst [vmem:[#allocation24_spill] sm:$0xff] %v18898_v54  ;;  %v972_v7 = vrot.slane %v421_v49, %v18477_v8  ;;  %v5824_v14 = vcombine.low %v18895_v62, %v18898_v54  ;;  %v5840_v19 = vcombine.low %v2982_v18, %v2983_v4  ;;  %v2984_v15 = vld [vmem:[#allocation2 + $0x5c] sm:$0x1] }
 0x102   : > { %23074 = vst [vmem:[#allocation25_spill] sm:$0xff] %v18904_v37  ;;  %v930_v26 = vrot.slane %v916_v36, %v18477_v8  ;;  %v931_v29 = vcombine.high %v923_v61, %v923_v61  ;;  %16423 = vmatprep.mubr.msk.f32.mxu0 %vm5040_vm2, %v18904_v37  ;;  %v5831_v20 = vrot.slane %v5823_v63, %v18477_v8  ;;  %v2987_v49 = vld [vmem:[#allocation2 + $0x5f] sm:$0x1] }
 0x103   : > { %v939_v21 = vrot.slane %v923_v61, %v18477_v8  ;;  %v979_v42 = vrot.slane %v965_v0, %v18477_v8  ;;  %v980_v1 = vcombine.high %v972_v7, %v972_v7  ;;  %v5838_v46 = vrot.slane %v5824_v14, %v18477_v8  ;;  %v2985_v36 = vld [vmem:[#allocation2 + $0x5d] sm:$0x1] }
 0x104   : > { %v5850_v38 = vrot.slane %v5840_v19, %v18477_v8  ;;  %v932_v18 = vcombine.high %v930_v26, %v930_v26  ;;  %v946_v17 = vrot.slane %v930_v26, %v18477_v8  ;;  %v2988_v4 = vld [vmem:[#allocation2 + $0x60] sm:$0x1]  ;;  %v2989_v6 = vld [vmem:[#allocation2 + $0x61] sm:$0x1]  ;;  %v953_v63 = vrot.slane %v931_v29, %v18477_v8  ;;  %v422_v26 = vld [vmem:[%s18482_s29 + $0x58] sm:$0xff] }
 0x105   : > { %v961_v35 = vcombine.high %v939_v21, %v939_v21  ;;  %2708 = vst.msk [vmem:[#allocation2 + $0x63] sm:$0x1] %vm2310_vm1, %v939_v21  ;;  %v981_v61 = vcombine.high %v979_v42, %v979_v42  ;;  %v988_v0 = vrot.slane %v972_v7, %v18477_v8  ;;  %v18924_v58 = vcombine.low %v5831_v20, %v5838_v46  ;;  %v2986_v5 = vld [vmem:[#allocation2 + $0x5e] sm:$0x1]  ;;  %v18949_v46 = vld [vmem:[%s18482_s29 + $0x68] sm:$0xff] }
 0x106   : > { %v5841_v14 = vcombine.low %v2984_v15, %v2985_v36  ;;  %v5843_v43 = vcombine.low %v2988_v4, %v2989_v6  ;;  %v18927_v19 = vrot.slane %v932_v18, %v18477_v8  ;;  %2712 = vst.msk [vmem:[#allocation2 + $0x67] sm:$0x1] %vm2310_vm1, %v946_v17  ;;  %v962_v29 = vcombine.high %v946_v17, %v946_v17 }
 0x107   : > { %23075 = vst [vmem:[#allocation26_spill] sm:$0xff] %v18924_v58  ;;  %v963_v37 = vcombine.high %v953_v63, %v953_v63  ;;  %2709 = vst.msk [vmem:[#allocation2 + $0x64] sm:$0x1] %vm2310_vm1, %v953_v63  ;;  %v995_v7 = vrot.slane %v979_v42, %v18477_v8  ;;  %v1002_v20 = vrot.slane %v980_v1, %v18477_v8  ;;  %16424 = vmatmul.mubr.msk.f32.gmra.mrb[6].mxu0 %vm5040_vm2, %v18924_v58  ;;  %v423_v42 = vld [vmem:[%s18482_s29 + $0x60] sm:$0xff] }
 0x108   : > { %2710 = vst.msk [vmem:[#allocation2 + $0x65] sm:$0x1] %vm2310_vm1, %v961_v35  ;;  %2716 = vst.msk [vmem:[#allocation2 + $0x6d] sm:$0x1] %vm2310_vm1, %v988_v0  ;;  %v5842_v6 = vcombine.low %v2986_v5, %v2987_v49  ;;  %v18939_v15 = vrot.slane %v5841_v14, %v18477_v8  ;;  %v18942_v21 = vrot.slane %v5843_v43, %v18477_v8  ;;  %v2990_v36 = vld [vmem:[#allocation2 + $0x62] sm:$0x1] }
 0x109   : > { %2713 = vst.msk [vmem:[#allocation2 + $0x68] sm:$0x1] %vm2310_vm1, %v18927_v19  ;;  %v1009_v35 = vrot.slane %v981_v61, %v18477_v8  ;;  %2711 = vst.msk [vmem:[#allocation2 + $0x66] sm:$0x1] %vm2310_vm1, %v963_v37  ;;  %v1010_v1 = vcombine.high %v988_v0, %v988_v0  ;;  %v1011_v5 = vcombine.high %v995_v7, %v995_v7 }
 0x10a   : > { %23076 = vst [vmem:[#allocation27_spill] sm:$0xff] %v18939_v15  ;;  %23077 = vst [vmem:[#allocation28_spill] sm:$0xff] %v18942_v21  ;;  %v1012_v49 = vcombine.high %v1002_v20, %v1002_v20  ;;  %v1014_v43 = vcombine.high %v422_v26, %v422_v26  ;;  %v18956_v18 = vrot.slane %v5842_v6, %v18477_v8 }
 0x10b   : > { %2714 = vst.msk [vmem:[#allocation2 + $0x69] sm:$0x1] %vm2310_vm1, %v962_v29  ;;  %2717 = vst.msk [vmem:[#allocation2 + $0x6e] sm:$0x1] %vm2310_vm1, %v1002_v20  ;;  %v5872_v17 = vcombine.low %v5850_v38, %v18939_v15  ;;  %v1013_v4 = vcombine.high %v1009_v35, %v1009_v35  ;;  %v1021_v37 = vrot.slane %v422_v26, %v18477_v8 }
 0x10c   : > { %2720 = vst.msk [vmem:[#allocation2 + $0x71] sm:$0x1] %vm2310_vm1, %v995_v7  ;;  %23078 = vst [vmem:[#allocation29_spill] sm:$0xff] %v18956_v18  ;;  %v1028_v63 = vrot.slane %v1014_v43, %v18477_v8  ;;  %v1063_v61 = vcombine.high %v423_v42, %v423_v42  ;;  %v1070_v0 = vrot.slane %v423_v42, %v18477_v8  ;;  %v2991_v26 = vld [vmem:[#allocation2 + $0x63] sm:$0x1] }
 0x10d   : > { %2721 = vst.msk [vmem:[#allocation2 + $0x72] sm:$0x1] %vm2310_vm1, %v1009_v35  ;;  %2718 = vst.msk [vmem:[#allocation2 + $0x6f] sm:$0x1] %vm2310_vm1, %v1010_v1  ;;  %v5873_v14 = vcombine.low %v18956_v18, %v18942_v21  ;;  %v5880_v29 = vrot.slane %v5872_v17, %v18477_v8  ;;  %v3000_v7 = vld [vmem:[#allocation2 + $0x6c] sm:$0x1]  ;;  %v1029_v20 = vcombine.high %v1021_v37, %v1021_v37 }
 0x10e   : > { %2719 = vst.msk [vmem:[#allocation2 + $0x70] sm:$0x1] %vm2310_vm1, %v1012_v49  ;;  %2722 = vst.msk [vmem:[#allocation2 + $0x73] sm:$0x1] %vm2310_vm1, %v1011_v5  ;;  %v1037_v6 = vrot.slane %v1021_v37, %v18477_v8  ;;  %v2995_v35 = vld [vmem:[#allocation2 + $0x67] sm:$0x1]  ;;  %v5889_v1 = vcombine.low %v2990_v36, %v2991_v26  ;;  %v1030_v5 = vcombine.high %v1028_v63, %v1028_v63 }
 0x10f   : > { %2723 = vst.msk [vmem:[#allocation2 + $0x74] sm:$0x1] %vm2310_vm1, %v1013_v4  ;;  %v1044_v42 = vrot.slane %v1028_v63, %v18477_v8  ;;  %v1077_v49 = vrot.slane %v1063_v61, %v18477_v8  ;;  %v5887_v43 = vrot.slane %v5873_v14, %v18477_v8  ;;  %v2992_v38 = vld [vmem:[#allocation2 + $0x64] sm:$0x1]  ;;  %v2993_v58 = vld [vmem:[#allocation2 + $0x65] sm:$0x1]  ;;  %v1051_v17 = vrot.slane %v1029_v20, %v18477_v8 }
 0x110   : > { %v3001_v25 = vld [vmem:[#allocation2 + $0x6d] sm:$0x1]  ;;  %v1059_v51 = vcombine.high %v1037_v6, %v1037_v6  ;;  %2724 = vst.msk [vmem:[#allocation2 + $0x75] sm:$0x1] %vm2310_vm1, %v1037_v6  ;;  %v1078_v37 = vcombine.high %v1070_v0, %v1070_v0  ;;  %v2996_v12 = vld [vmem:[#allocation2 + $0x68] sm:$0x1]  ;;  %v5890_v4 = vcombine.low %v2992_v38, %v2993_v58  ;;  %v18979_v36 = vrot.slane %v5889_v1, %v18477_v8 }
 0x111   : > { %v5938_v26 = vcombine.low %v3000_v7, %v3001_v25  ;;  %v18982_v63 = vrot.slane %v1030_v5, %v18477_v8  ;;  %2728 = vst.msk [vmem:[#allocation2 + $0x79] sm:$0x1] %vm2310_vm1, %v1044_v42  ;;  %v18985_v61 = vcombine.low %v5880_v29, %v5887_v43  ;;  %v2994_v14 = vld [vmem:[#allocation2 + $0x66] sm:$0x1]  ;;  %v1060_v32 = vcombine.high %v1044_v42, %v1044_v42 }
 0x112   : > { %23079 = vst [vmem:[#allocation30_spill] sm:$0xff] %v18979_v36  ;;  %v2997_v59 = vld [vmem:[#allocation2 + $0x69] sm:$0x1]  ;;  %v3002_v20 = vld [vmem:[#allocation2 + $0x6e] sm:$0x1]  ;;  %v1061_v52 = vcombine.high %v1051_v17, %v1051_v17  ;;  %v1079_v58 = vcombine.high %v1077_v49, %v1077_v49  ;;  %v5891_v38 = vcombine.low %v2994_v14, %v2995_v35  ;;  %v18990_v25 = vrot.slane %v5890_v4, %v18477_v8 }
 0x113   : > { %23080 = vst [vmem:[#allocation31_spill] sm:$0xff] %v18985_v61  ;;  %2725 = vst.msk [vmem:[#allocation2 + $0x76] sm:$0x1] %vm2310_vm1, %v1051_v17  ;;  %v5892_v6 = vcombine.low %v2996_v12, %v2997_v59  ;;  %v3005_v7 = vld [vmem:[#allocation2 + $0x71] sm:$0x1]  ;;  %v5948_v29 = vrot.slane %v5938_v26, %v18477_v8  ;;  %16426 = vmatprep.mubr.msk.f32.mxu0 %vm5040_vm2, %v18985_v61  ;;  %v1086_v59 = vrot.slane %v1070_v0, %v18477_v8 }
 0x114   : > { %2726 = vst.msk [vmem:[#allocation2 + $0x77] sm:$0x1] %vm2310_vm1, %v1059_v51  ;;  %23081 = vst [vmem:[#allocation32_spill] sm:$0xff] %v18990_v25  ;;  %v3006_v1 = vld [vmem:[#allocation2 + $0x72] sm:$0x1]  ;;  %v1093_v12 = vrot.slane %v1077_v49, %v18477_v8  ;;  %v1100_v51 = vrot.slane %v1078_v37, %v18477_v8  ;;  %v1107_v35 = vrot.slane %v1079_v58, %v18477_v8 }
 0x115   : > { %2729 = vst.msk [vmem:[#allocation2 + $0x7a] sm:$0x1] %vm2310_vm1, %v18982_v63  ;;  %v3003_v5 = vld [vmem:[#allocation2 + $0x6f] sm:$0x1]  ;;  %v3004_v42 = vld [vmem:[#allocation2 + $0x70] sm:$0x1]  ;;  %v19004_v17 = vrot.slane %v5891_v38, %v18477_v8  ;;  %v19007_v4 = vrot.slane %v5892_v6, %v18477_v8  ;;  %v5921_v26 = vcombine.low %v18979_v36, %v18990_v25  ;;  %v1108_v61 = vcombine.high %v1086_v59, %v1086_v59 }
 0x116   : > { %v3007_v43 = vld [vmem:[#allocation2 + $0x73] sm:$0x1]  ;;  %2727 = vst.msk [vmem:[#allocation2 + $0x78] sm:$0x1] %vm2310_vm1, %v1061_v52  ;;  %2730 = vst.msk [vmem:[#allocation2 + $0x7b] sm:$0x1] %vm2310_vm1, %v1060_v32  ;;  %v5939_v52 = vcombine.low %v3002_v20, %v3003_v5  ;;  %v5940_v14 = vcombine.low %v3004_v42, %v3005_v7  ;;  %v1109_v49 = vcombine.high %v1093_v12, %v1093_v12 }
 0x117   : > { %23082 = vst [vmem:[#allocation33_spill] sm:$0xff] %v19004_v17  ;;  %23083 = vst [vmem:[#allocation34_spill] sm:$0xff] %v19007_v4  ;;  %v3008_v32 = vld [vmem:[#allocation2 + $0x74] sm:$0x1]  ;;  %v5941_v0 = vcombine.low %v3006_v1, %v3007_v43  ;;  %v5922_v37 = vcombine.low %v19004_v17, %v19007_v4  ;;  %v5929_v58 = vrot.slane %v5921_v26, %v18477_v8  ;;  %v3009_v38 = vld [vmem:[#allocation2 + $0x75] sm:$0x1] }
 0x118   : > { %2732 = vst.msk [vmem:[#allocation2 + $0x7f] sm:$0x1] %vm2310_vm1, %v1086_v59  ;;  %2733 = vst.msk [vmem:[#allocation2 + $0x80] sm:$0x1] %vm2310_vm1, %v1100_v51  ;;  %v19019_v20 = vrot.slane %v5939_v52, %v18477_v8  ;;  %v1110_v6 = vcombine.high %v1100_v51, %v1100_v51  ;;  %v19022_v7 = vld [vmem:[%s18482_s29 + $0x70] sm:$0xff]  ;;  %v19025_v1 = vrot.slane %v5940_v14, %v18477_v8 }
 0x119   : > { %2736 = vst.msk [vmem:[#allocation2 + $0x83] sm:$0x1] %vm2310_vm1, %v1093_v12  ;;  %2737 = vst.msk [vmem:[#allocation2 + $0x84] sm:$0x1] %vm2310_vm1, %v1107_v35  ;;  %v19028_v5 = vrot.slane %v5941_v0, %v18477_v8  ;;  %v5987_v42 = vcombine.low %v3008_v32, %v3009_v38  ;;  %v1111_v43 = vcombine.high %v1107_v35, %v1107_v35  ;;  %v3013_v52 = vld [vmem:[#allocation2 + $0x79] sm:$0x1] }
 0x11a   : > { %23084 = vst [vmem:[#allocation35_spill] sm:$0xff] %v19019_v20  ;;  %23085 = vst [vmem:[#allocation36_spill] sm:$0xff] %v19025_v1  ;;  %v5936_v59 = vrot.slane %v5922_v37, %v18477_v8  ;;  %v5970_v12 = vcombine.low %v5948_v29, %v19019_v20  ;;  %v3010_v26 = vld [vmem:[#allocation2 + $0x76] sm:$0x1]  ;;  %v1119_v14 = vrot.slane %v18949_v46, %v18477_v8  ;;  %v17440_v22 = vld [vmem:[#allocation2 + $0x73] sm:$0x1] }
 0x11b   : > { %23086 = vst [vmem:[#allocation37_spill] sm:$0xff] %v19028_v5  ;;  %2734 = vst.msk [vmem:[#allocation2 + $0x81] sm:$0x1] %vm2310_vm1, %v1108_v61  ;;  %v3011_v51 = vld [vmem:[#allocation2 + $0x77] sm:$0x1]  ;;  %v23087_v32 = vcombine.high %v18949_v46, %v18949_v46  ;;  %v5971_v35 = vcombine.low %v19025_v1, %v19028_v5  ;;  %v19044_v29 = vrot.slane %v5987_v42, %v18477_v8 }
 0x11c   : > { %2738 = vst.msk [vmem:[#allocation2 + $0x85] sm:$0x1] %vm2310_vm1, %v1109_v49  ;;  %2735 = vst.msk [vmem:[#allocation2 + $0x82] sm:$0x1] %vm2310_vm1, %v1110_v6  ;;  %v3014_v0 = vld [vmem:[#allocation2 + $0x7a] sm:$0x1]  ;;  %v5988_v49 = vcombine.low %v3010_v26, %v3011_v51  ;;  %v1161_v37 = vcombine.high %v19022_v7, %v19022_v7  ;;  %v19049_v38 = vcombine.low %v5929_v58, %v5936_v59 }
 0x11d   : > { %v1126_v61 = vrot.slane %v23087_v32, %v18477_v8  ;;  %23088 = vst [vmem:[#allocation38_spill] sm:$0xff] %v19044_v29  ;;  %2739 = vst.msk [vmem:[#allocation2 + $0x86] sm:$0x1] %vm2310_vm1, %v1111_v43  ;;  %v5978_v6 = vrot.slane %v5970_v12, %v18477_v8  ;;  %v3012_v4 = vld [vmem:[#allocation2 + $0x78] sm:$0x1]  ;;  %v1127_v32 = vcombine.high %v1119_v14, %v1119_v14 }
 0x11e   : > { %23089 = vst [vmem:[#allocation39_spill] sm:$0xff] %v19049_v38  ;;  %v3015_v46 = vld [vmem:[#allocation2 + $0x7b] sm:$0x1]  ;;  %v5985_v5 = vrot.slane %v5971_v35, %v18477_v8  ;;  %v5989_v1 = vcombine.low %v3012_v4, %v3013_v52  ;;  %v19054_v42 = vrot.slane %v5988_v49, %v18477_v8  ;;  %v3018_v51 = vld [vmem:[#allocation2 + $0x7e] sm:$0x1]  ;;  %16427 = vmatmul.mubr.msk.f32.gmra.mrb[8].mxu0 %vm5040_vm2, %v19049_v38 }
 0x11f   : > { %v1128_v20 = vcombine.high %v1126_v61, %v1126_v61  ;;  %v5990_v26 = vcombine.low %v3014_v0, %v3015_v46  ;;  %v3019_v43 = vld [vmem:[#allocation2 + $0x7f] sm:$0x1]  ;;  %v3020_v58 = vld [vmem:[#allocation2 + $0x80] sm:$0x1]  ;;  %v1135_v59 = vrot.slane %v1119_v14, %v18477_v8  ;;  %v1142_v12 = vrot.slane %v1126_v61, %v18477_v8 }
 0x120   : > { %23090 = vst [vmem:[#allocation40_spill] sm:$0xff] %v19054_v42  ;;  %v1149_v25 = vrot.slane %v1127_v32, %v18477_v8  ;;  %v19064_v4 = vcombine.low %v5978_v6, %v5985_v5  ;;  %v19067_v52 = vrot.slane %v5989_v1, %v18477_v8  ;;  %v6019_v0 = vcombine.low %v19044_v29, %v19054_v42  ;;  %v3023_v14 = vld [vmem:[#allocation2 + $0x83] sm:$0x1]  ;;  %v3024_v49 = vld [vmem:[#allocation2 + $0x84] sm:$0x1]  ;;  %v426_v1 = vld [vmem:[%s18482_s29 + $0x78] sm:$0xff] }
 0x121   : > { %v19062_v17 = vrot.slane %v1128_v20, %v18477_v8  ;;  %v19070_v35 = vrot.slane %v5990_v26, %v18477_v8  ;;  %v6036_v32 = vcombine.low %v3018_v51, %v3019_v43  ;;  %v1157_v38 = vcombine.high %v1135_v59, %v1135_v59  ;;  %2740 = vst.msk [vmem:[#allocation2 + $0x87] sm:$0x1] %vm2310_vm1, %v1135_v59  ;;  %v17463_v10 = vld [vmem:[#allocation2 + $0x80] sm:$0x1] }
 0x122   : > { %23091 = vst [vmem:[#allocation41_spill] sm:$0xff] %v19064_v4  ;;  %23092 = vst [vmem:[#allocation42_spill] sm:$0xff] %v19067_v52  ;;  %v3021_v61 = vld [vmem:[#allocation2 + $0x81] sm:$0x1]  ;;  %v1158_v20 = vcombine.high %v1142_v12, %v1142_v12  ;;  %v1159_v21 = vcombine.high %v1149_v25, %v1149_v25  ;;  %16429 = vmatprep.mubr.msk.f32.mxu0 %vm5040_vm2, %v19064_v4  ;;  %v6027_v6 = vrot.slane %v6019_v0, %v18477_v8 }
 0x123   : > { %23093 = vst [vmem:[#allocation43_spill] sm:$0xff] %v19070_v35  ;;  %v3025_v46 = vld [vmem:[#allocation2 + $0x85] sm:$0x1]  ;;  %2741 = vst.msk [vmem:[#allocation2 + $0x88] sm:$0x1] %vm2310_vm1, %v1149_v25  ;;  %v6020_v5 = vcombine.low %v19067_v52, %v19070_v35  ;;  %v6037_v51 = vcombine.low %v3020_v58, %v3021_v61  ;;  %v6046_v25 = vrot.slane %v6036_v32, %v18477_v8  ;;  %v428_v52 = vld [vmem:[%s18482_s29 + $0x88] sm:$0xff] }
 0x124   : > { %2744 = vst.msk [vmem:[#allocation2 + $0x8b] sm:$0x1] %vm2310_vm1, %v1142_v12  ;;  %2745 = vst.msk [vmem:[#allocation2 + $0x8c] sm:$0x1] %vm2310_vm1, %v19062_v17  ;;  %v3022_v26 = vld [vmem:[#allocation2 + $0x82] sm:$0x1]  ;;  %v6039_v43 = vcombine.low %v3024_v49, %v3025_v46  ;;  %v1168_v12 = vrot.slane %v19022_v7, %v18477_v8  ;;  %v1175_v4 = vrot.slane %v1161_v37, %v18477_v8 }
 0x125   : > { %v6038_v59 = vcombine.low %v3022_v26, %v3023_v14  ;;  %2742 = vst.msk [vmem:[#allocation2 + $0x89] sm:$0x1] %vm2310_vm1, %v1157_v38  ;;  %2743 = vst.msk [vmem:[#allocation2 + $0x8a] sm:$0x1] %vm2310_vm1, %v1159_v21  ;;  %v6034_v35 = vrot.slane %v6020_v5, %v18477_v8  ;;  %v19094_v0 = vrot.slane %v6037_v51, %v18477_v8  ;;  %v3026_v37 = vld [vmem:[#allocation2 + $0x86] sm:$0x1] }
 0x126   : > { %2746 = vst.msk [vmem:[#allocation2 + $0x8d] sm:$0x1] %vm2310_vm1, %v1158_v20  ;;  %v19097_v58 = vrot.slane %v6039_v43, %v18477_v8  ;;  %v1210_v14 = vcombine.high %v426_v1, %v426_v1  ;;  %v1176_v21 = vcombine.high %v1168_v12, %v1168_v12  ;;  %v1177_v49 = vcombine.high %v1175_v4, %v1175_v4 }
 0x127   : > { %23094 = vst [vmem:[#allocation44_spill] sm:$0xff] %v19094_v0  ;;  %v19100_v38 = vrot.slane %v6038_v59, %v18477_v8  ;;  %v1184_v61 = vrot.slane %v1168_v12, %v18477_v8  ;;  %v19103_v46 = vcombine.low %v6027_v6, %v6034_v35  ;;  %v6068_v7 = vcombine.low %v6046_v25, %v19094_v0 }
 0x128   : > { %23095 = vst [vmem:[#allocation45_spill] sm:$0xff] %v19097_v58  ;;  %v1191_v32 = vrot.slane %v1175_v4, %v18477_v8  ;;  %v1217_v20 = vrot.slane %v426_v1, %v18477_v8  ;;  %v1198_v26 = vrot.slane %v1176_v21, %v18477_v8  ;;  %v1205_v51 = vrot.slane %v1177_v49, %v18477_v8  ;;  %v3027_v6 = vld [vmem:[#allocation2 + $0x87] sm:$0x1] }
 0x129   : > { %23096 = vst [vmem:[#allocation46_spill] sm:$0xff] %v19100_v38  ;;  %23097 = vst [vmem:[#allocation47_spill] sm:$0xff] %v19103_v46  ;;  %v6069_v5 = vcombine.low %v19100_v38, %v19097_v58  ;;  %v1206_v43 = vcombine.high %v1184_v61, %v1184_v61  ;;  %16430 = vmatmul.mubr.msk.f32.gmra.mrb[10].mxu0 %vm5040_vm2, %v19103_v46  ;;  %v6076_v35 = vrot.slane %v6068_v7, %v18477_v8  ;;  %v2304_v7 = vld [vmem:[%s23054_s1 + $0x14] sm:$0xf] }
 0x12a   : > { %2748 = vst.msk [vmem:[#allocation2 + $0x91] sm:$0x1] %vm2310_vm1, %v1184_v61  ;;  %v3028_v59 = vld [vmem:[#allocation2 + $0x88] sm:$0x1]  ;;  %v1207_v25 = vcombine.high %v1191_v32, %v1191_v32  ;;  %2752 = vst.msk [vmem:[#allocation2 + $0x95] sm:$0x1] %vm2310_vm1, %v1191_v32  ;;  %v1224_v1 = vrot.slane %v1210_v14, %v18477_v8  ;;  %v1225_v12 = vcombine.high %v1217_v20, %v1217_v20  ;;  %16512 = vmatprep.subr.msk.mxu0 %vm5105_vm0, %v2304_v7 }
 0x12b   : > { %v3031_v4 = vld [vmem:[#allocation2 + $0x8b] sm:$0x1]  ;;  %v6083_v21 = vrot.slane %v6069_v5, %v18477_v8  ;;  %v3032_v49 = vld [vmem:[#allocation2 + $0x8c] sm:$0x1]  ;;  %v6085_v58 = vcombine.low %v3026_v37, %v3027_v6  ;;  %v1208_v0 = vcombine.high %v1198_v26, %v1198_v26  ;;  %2749 = vst.msk [vmem:[#allocation2 + $0x92] sm:$0x1] %vm2310_vm1, %v1198_v26  ;;  %v1209_v61 = vcombine.high %v1205_v51, %v1205_v51 }
 0x12c   : > { %2750 = vst.msk [vmem:[#allocation2 + $0x93] sm:$0x1] %vm2310_vm1, %v1206_v43  ;;  %2753 = vst.msk [vmem:[#allocation2 + $0x96] sm:$0x1] %vm2310_vm1, %v1205_v51  ;;  %v3029_v32 = vld [vmem:[#allocation2 + $0x89] sm:$0x1]  ;;  %v1226_v37 = vcombine.high %v1224_v1, %v1224_v1  ;;  %v1233_v5 = vrot.slane %v1217_v20, %v18477_v8  ;;  %v1240_v26 = vrot.slane %v1224_v1, %v18477_v8 }
 0x12d   : > { %v3030_v14 = vld [vmem:[#allocation2 + $0x8a] sm:$0x1]  ;;  %v3033_v46 = vld [vmem:[#allocation2 + $0x8d] sm:$0x1]  ;;  %2754 = vst.msk [vmem:[#allocation2 + $0x97] sm:$0x1] %vm2310_vm1, %v1207_v25  ;;  %v1247_v43 = vrot.slane %v1225_v12, %v18477_v8  ;;  %v19130_v51 = vcombine.low %v6076_v35, %v6083_v21  ;;  %v6086_v6 = vcombine.low %v3028_v59, %v3029_v32  ;;  %v19137_v20 = vrot.slane %v6085_v58, %v18477_v8 }
 0x12e   : > { %v6087_v38 = vcombine.low %v3030_v14, %v3031_v4  ;;  %v6088_v42 = vcombine.low %v3032_v49, %v3033_v46  ;;  %2751 = vst.msk [vmem:[#allocation2 + $0x94] sm:$0x1] %vm2310_vm1, %v1208_v0  ;;  %2755 = vst.msk [vmem:[#allocation2 + $0x98] sm:$0x1] %vm2310_vm1, %v1209_v61  ;;  %v427_v25 = vld [vmem:[%s18482_s29 + $0x80] sm:$0xff]  ;;  %v19140_v12 = vrot.slane %v1226_v37, %v18477_v8  ;;  %v19146_v0 = vld [vmem:[%s18482_s29 + $0x90] sm:$0xff] }
 0x12f   : > { %23098 = vst [vmem:[#allocation48_spill] sm:$0xff] %v19130_v51  ;;  %23099 = vst [vmem:[#allocation49_spill] sm:$0xff] %v19137_v20  ;;  %v3036_v1 = vld [vmem:[#allocation2 + $0x90] sm:$0x1]  ;;  %v1255_v7 = vcombine.high %v1233_v5, %v1233_v5  ;;  %v1256_v35 = vcombine.high %v1240_v26, %v1240_v26  ;;  %16432 = vmatprep.mubr.msk.f32.mxu0 %vm5040_vm2, %v19130_v51  ;;  %v19151_v58 = vrot.slane %v6086_v6, %v18477_v8 }
 0x130   : > { %2756 = vst.msk [vmem:[#allocation2 + $0x99] sm:$0x1] %vm2310_vm1, %v1233_v5  ;;  %2757 = vst.msk [vmem:[#allocation2 + $0x9a] sm:$0x1] %vm2310_vm1, %v1247_v43  ;;  %v19154_v46 = vrot.slane %v6087_v38, %v18477_v8  ;;  %v19157_v59 = vrot.slane %v6088_v42, %v18477_v8  ;;  %v1257_v4 = vcombine.high %v1247_v43, %v1247_v43 }
 0x131   : > { %2760 = vst.msk [vmem:[#allocation2 + $0x9d] sm:$0x1] %vm2310_vm1, %v1240_v26  ;;  %23100 = vst [vmem:[#allocation50_spill] sm:$0xff] %v19151_v58  ;;  %v3037_v21 = vld [vmem:[#allocation2 + $0x91] sm:$0x1]  ;;  %v1259_v49 = vcombine.high %v427_v25, %v427_v25  ;;  %v1266_v61 = vrot.slane %v427_v25, %v18477_v8  ;;  %v1308_v32 = vcombine.high %v428_v52, %v428_v52 }
 0x132   : > { %23101 = vst [vmem:[#allocation51_spill] sm:$0xff] %v19154_v46  ;;  %23102 = vst [vmem:[#allocation52_spill] sm:$0xff] %v19157_v59  ;;  %v19165_v14 = vrot.slane %v428_v52, %v18477_v8  ;;  %v6117_v42 = vcombine.low %v19137_v20, %v19151_v58  ;;  %v6118_v38 = vcombine.low %v19154_v46, %v19157_v59  ;;  %v3041_v37 = vld [vmem:[#allocation2 + $0x95] sm:$0x1]  ;;  %v3038_v43 = vld [vmem:[#allocation2 + $0x92] sm:$0x1] }
 0x133   : > { %2758 = vst.msk [vmem:[#allocation2 + $0x9b] sm:$0x1] %vm2310_vm1, %v1255_v7  ;;  %2761 = vst.msk [vmem:[#allocation2 + $0x9e] sm:$0x1] %vm2310_vm1, %v19140_v12  ;;  %v6134_v5 = vcombine.low %v3036_v1, %v3037_v21  ;;  %v3039_v6 = vld [vmem:[#allocation2 + $0x93] sm:$0x1]  ;;  %v1273_v7 = vrot.slane %v1259_v49, %v18477_v8  ;;  %v1274_v52 = vcombine.high %v1266_v61, %v1266_v61 }
 0x134   : > { %2762 = vst.msk [vmem:[#allocation2 + $0x9f] sm:$0x1] %vm2310_vm1, %v1256_v35  ;;  %2759 = vst.msk [vmem:[#allocation2 + $0x9c] sm:$0x1] %vm2310_vm1, %v1257_v4  ;;  %v3042_v25 = vld [vmem:[#allocation2 + $0x96] sm:$0x1]  ;;  %v1282_v35 = vrot.slane %v1266_v61, %v18477_v8  ;;  %v1322_v51 = vrot.slane %v1308_v32, %v18477_v8  ;;  %v6125_v58 = vrot.slane %v6117_v42, %v18477_v8 }
 0x135   : > { %v6132_v59 = vrot.slane %v6118_v38, %v18477_v8  ;;  %v3043_v1 = vld [vmem:[#allocation2 + $0x97] sm:$0x1]  ;;  %v6135_v21 = vcombine.low %v3038_v43, %v3039_v6  ;;  %v6144_v4 = vrot.slane %v6134_v5, %v18477_v8  ;;  %v3040_v46 = vld [vmem:[#allocation2 + $0x94] sm:$0x1]  ;;  %v3044_v20 = vld [vmem:[#allocation2 + $0x98] sm:$0x1]  ;;  %v1275_v29 = vcombine.high %v1273_v7, %v1273_v7 }
 0x136   : > { %v6137_v26 = vcombine.low %v3042_v25, %v3043_v1  ;;  %v1289_v36 = vrot.slane %v1273_v7, %v18477_v8  ;;  %v1296_v49 = vrot.slane %v1274_v52, %v18477_v8  ;;  %2764 = vst.msk [vmem:[#allocation2 + $0xa3] sm:$0x1] %vm2310_vm1, %v1282_v35  ;;  %v6136_v32 = vcombine.low %v3040_v46, %v3041_v37 }
 0x137   : > { %v19183_v61 = vcombine.low %v6125_v58, %v6132_v59  ;;  %v19186_v42 = vrot.slane %v6135_v21, %v18477_v8  ;;  %v3045_v38 = vld [vmem:[#allocation2 + $0x99] sm:$0x1]  ;;  %v3046_v43 = vld [vmem:[#allocation2 + $0x9a] sm:$0x1]  ;;  %v1304_v6 = vcombine.high %v1282_v35, %v1282_v35  ;;  %v1303_v7 = vrot.slane %v1275_v29, %v18477_v8 }
 0x138   : > { %v19189_v5 = vrot.slane %v6137_v26, %v18477_v8  ;;  %v3049_v25 = vld [vmem:[#allocation2 + $0x9d] sm:$0x1]  ;;  %v6183_v1 = vcombine.low %v3044_v20, %v3045_v38  ;;  %v1305_v15 = vcombine.high %v1289_v36, %v1289_v36  ;;  %2765 = vst.msk [vmem:[#allocation2 + $0xa4] sm:$0x1] %vm2310_vm1, %v1296_v49  ;;  %2768 = vst.msk [vmem:[#allocation2 + $0xa7] sm:$0x1] %vm2310_vm1, %v1289_v36 }
 0x139   : > { %23103 = vst [vmem:[#allocation53_spill] sm:$0xff] %v19183_v61  ;;  %23104 = vst [vmem:[#allocation54_spill] sm:$0xff] %v19186_v42  ;;  %16433 = vmatmul.mubr.msk.f32.gmra.mrb[12].mxu0 %vm5040_vm2, %v19183_v61  ;;  %v19197_v58 = vrot.slane %v6136_v32, %v18477_v8  ;;  %v6166_v46 = vcombine.low %v6144_v4, %v19186_v42  ;;  %v1306_v52 = vcombine.high %v1296_v49, %v1296_v49 }
 0x13a   : > { %23105 = vst [vmem:[#allocation55_spill] sm:$0xff] %v19189_v5  ;;  %v3047_v59 = vld [vmem:[#allocation2 + $0x9b] sm:$0x1]  ;;  %v3050_v37 = vld [vmem:[#allocation2 + $0x9e] sm:$0x1]  ;;  %v1323_v29 = vcombine.high %v19165_v14, %v19165_v14  ;;  %v19204_v21 = vrot.slane %v6183_v1, %v18477_v8  ;;  %v1307_v4 = vcombine.high %v1303_v7, %v1303_v7 }
 0x13b   : > { %23106 = vst [vmem:[#allocation56_spill] sm:$0xff] %v19197_v58  ;;  %v3051_v26 = vld [vmem:[#allocation2 + $0x9f] sm:$0x1]  ;;  %2766 = vst.msk [vmem:[#allocation2 + $0xa5] sm:$0x1] %vm2310_vm1, %v1304_v6  ;;  %v6184_v35 = vcombine.low %v3046_v43, %v3047_v59  ;;  %v6167_v32 = vcombine.low %v19197_v58, %v19189_v5  ;;  %v6174_v49 = vrot.slane %v6166_v46, %v18477_v8 }
 0x13c   : > { %v3048_v20 = vld [vmem:[#allocation2 + $0x9c] sm:$0x1]  ;;  %v6186_v36 = vcombine.low %v3050_v37, %v3051_v26  ;;  %23107 = vst [vmem:[#allocation57_spill] sm:$0xff] %v19204_v21  ;;  %2769 = vst.msk [vmem:[#allocation2 + $0xa8] sm:$0x1] %vm2310_vm1, %v1303_v7  ;;  %v1324_v43 = vcombine.high %v1322_v51, %v1322_v51  ;;  %v1338_v7 = vrot.slane %v1322_v51, %v18477_v8 }
 0x13d   : > { %2770 = vst.msk [vmem:[#allocation2 + $0xa9] sm:$0x1] %vm2310_vm1, %v1305_v15  ;;  %v6185_v38 = vcombine.low %v3048_v20, %v3049_v25  ;;  %2767 = vst.msk [vmem:[#allocation2 + $0xa6] sm:$0x1] %vm2310_vm1, %v1306_v52  ;;  %v3054_v6 = vld [vmem:[#allocation2 + $0xa2] sm:$0x1]  ;;  %v19213_v59 = vrot.slane %v6184_v35, %v18477_v8  ;;  %v1331_v15 = vrot.slane %v19165_v14, %v18477_v8 }
 0x13e   : > { %v19216_v1 = vrot.slane %v6186_v36, %v18477_v8  ;;  %2771 = vst.msk [vmem:[#allocation2 + $0xaa] sm:$0x1] %vm2310_vm1, %v1307_v4  ;;  %v6181_v46 = vrot.slane %v6167_v32, %v18477_v8  ;;  %v3055_v37 = vld [vmem:[#allocation2 + $0xa3] sm:$0x1]  ;;  %v1345_v26 = vrot.slane %v1323_v29, %v18477_v8  ;;  %v19228_v52 = vrot.slane %v1324_v43, %v18477_v8  ;;  %v430_v20 = vld [vmem:[%s18482_s29 + $0x98] sm:$0xff] }
 0x13f   : > { %23108 = vst [vmem:[#allocation58_spill] sm:$0xff] %v19213_v59  ;;  %v19224_v25 = vrot.slane %v6185_v38, %v18477_v8  ;;  %v6215_v35 = vcombine.low %v19204_v21, %v19213_v59  ;;  %v6232_v14 = vcombine.low %v3054_v6, %v3055_v37  ;;  %v1353_v36 = vcombine.high %v1331_v15, %v1331_v15  ;;  %v3056_v29 = vld [vmem:[#allocation2 + $0xa4] sm:$0x1]  ;;  %v3059_v37 = vld [vmem:[#allocation2 + $0xa7] sm:$0x1] }
 0x140   : > { %23109 = vst [vmem:[#allocation59_spill] sm:$0xff] %v19216_v1  ;;  %v1354_v51 = vcombine.high %v1338_v7, %v1338_v7  ;;  %2772 = vst.msk [vmem:[#allocation2 + $0xab] sm:$0x1] %vm2310_vm1, %v1331_v15  ;;  %v19235_v4 = vcombine.low %v6174_v49, %v6181_v46  ;;  %v1355_v38 = vcombine.high %v1345_v26, %v1345_v26 }
 0x141   : > { %23110 = vst [vmem:[#allocation60_spill] sm:$0xff] %v19224_v25  ;;  %2776 = vst.msk [vmem:[#allocation2 + $0xaf] sm:$0x1] %vm2310_vm1, %v1338_v7  ;;  %v6216_v32 = vcombine.low %v19224_v25, %v19216_v1  ;;  %v1364_v6 = vrot.slane %v19146_v0, %v18477_v8  ;;  %v6223_v43 = vrot.slane %v6215_v35, %v18477_v8 }
 0x142   : > { %23111 = vst [vmem:[#allocation61_spill] sm:$0xff] %v19235_v4  ;;  %2773 = vst.msk [vmem:[#allocation2 + $0xac] sm:$0x1] %vm2310_vm1, %v1345_v26  ;;  %v3057_v15 = vld [vmem:[#allocation2 + $0xa5] sm:$0x1]  ;;  %v6242_v49 = vrot.slane %v6232_v14, %v18477_v8  ;;  %v23112_v7 = vcombine.high %v19146_v0, %v19146_v0  ;;  %v1406_v26 = vcombine.high %v430_v20, %v430_v20  ;;  %16435 = vmatprep.mubr.msk.f32.mxu0 %vm5040_vm2, %v19235_v4 }
 0x143   : > { %2777 = vst.msk [vmem:[#allocation2 + $0xb0] sm:$0x1] %vm2310_vm1, %v19228_v52  ;;  %2774 = vst.msk [vmem:[#allocation2 + $0xad] sm:$0x1] %vm2310_vm1, %v1353_v36  ;;  %v6230_v61 = vrot.slane %v6216_v32, %v18477_v8  ;;  %v3060_v35 = vld [vmem:[#allocation2 + $0xa8] sm:$0x1]  ;;  %v6233_v59 = vcombine.low %v3056_v29, %v3057_v15  ;;  %v1372_v14 = vcombine.high %v1364_v6, %v1364_v6 }
 0x144   : > { %2778 = vst.msk [vmem:[#allocation2 + $0xb1] sm:$0x1] %vm2310_vm1, %v1354_v51  ;;  %v1371_v46 = vrot.slane %v23112_v7, %v18477_v8  ;;  %v3061_v1 = vld [vmem:[#allocation2 + $0xa9] sm:$0x1]  ;;  %2775 = vst.msk [vmem:[#allocation2 + $0xae] sm:$0x1] %vm2310_vm1, %v1355_v38  ;;  %v1380_v36 = vrot.slane %v1364_v6, %v18477_v8  ;;  %v1413_v7 = vrot.slane %v430_v20, %v18477_v8 }
 0x145   : > { %v3058_v51 = vld [vmem:[#allocation2 + $0xa6] sm:$0x1]  ;;  %v6235_v25 = vcombine.low %v3060_v35, %v3061_v1  ;;  %v19259_v21 = vcombine.low %v6223_v43, %v6230_v61  ;;  %v19262_v32 = vrot.slane %v6233_v59, %v18477_v8  ;;  %v3062_v42 = vld [vmem:[#allocation2 + $0xaa] sm:$0x1]  ;;  %v1394_v29 = vrot.slane %v1372_v14, %v18477_v8 }
 0x146   : > { %v1373_v5 = vcombine.high %v1371_v46, %v1371_v46  ;;  %v1387_v0 = vrot.slane %v1371_v46, %v18477_v8  ;;  %v6234_v4 = vcombine.low %v3058_v51, %v3059_v37  ;;  %2780 = vst.msk [vmem:[#allocation2 + $0xb5] sm:$0x1] %vm2310_vm1, %v1380_v36  ;;  %v1402_v6 = vcombine.high %v1380_v36, %v1380_v36 }
 0x147   : > { %23113 = vst [vmem:[#allocation62_spill] sm:$0xff] %v19259_v21  ;;  %23114 = vst [vmem:[#allocation63_spill] sm:$0xff] %v19262_v32  ;;  %v19267_v38 = vrot.slane %v6235_v25, %v18477_v8  ;;  %16436 = vmatmul.mubr.msk.f32.gmra.mrb[14].mxu0 %vm5040_vm2, %v19259_v21  ;;  %v6264_v59 = vcombine.low %v6242_v49, %v19262_v32  ;;  %v3063_v20 = vld [vmem:[#allocation2 + $0xab] sm:$0x1]  ;;  %v1404_v43 = vcombine.high %v1394_v29, %v1394_v29 }
 0x148   : > { %v1401_v1 = vrot.slane %v1373_v5, %v18477_v8  ;;  %v1403_v15 = vcombine.high %v1387_v0, %v1387_v0  ;;  %2784 = vst.msk [vmem:[#allocation2 + $0xb9] sm:$0x1] %vm2310_vm1, %v1387_v0  ;;  %v19274_v61 = vrot.slane %v6234_v4, %v18477_v8  ;;  %2781 = vst.msk [vmem:[#allocation2 + $0xb6] sm:$0x1] %vm2310_vm1, %v1394_v29  ;;  %v3067_v5 = vld [vmem:[#allocation2 + $0xaf] sm:$0x1] }
 0x149   : > { %23115 = vst [vmem:[#allocation64_spill] sm:$0xff] %v19267_v38  ;;  %v1420_v25 = vrot.slane %v1406_v26, %v18477_v8  ;;  %v3064_v37 = vld [vmem:[#allocation2 + $0xac] sm:$0x1]  ;;  %v6281_v35 = vcombine.low %v3062_v42, %v3063_v20  ;;  %2782 = vst.msk [vmem:[#allocation2 + $0xb7] sm:$0x1] %vm2310_vm1, %v1402_v6  ;;  %v1421_v14 = vcombine.high %v1413_v7, %v1413_v7 }
 0x14a   : > { %23116 = vst [vmem:[#allocation65_spill] sm:$0xff] %v19274_v61  ;;  %v3068_v46 = vld [vmem:[#allocation2 + $0xb0] sm:$0x1]  ;;  %2785 = vst.msk [vmem:[#allocation2 + $0xba] sm:$0x1] %vm2310_vm1, %v1401_v1  ;;  %v1405_v4 = vcombine.high %v1401_v1, %v1401_v1  ;;  %v1429_v49 = vrot.slane %v1413_v7, %v18477_v8  ;;  %v6265_v36 = vcombine.low %v19274_v61, %v19267_v38 }
 0x14b   : > { %2786 = vst.msk [vmem:[#allocation2 + $0xbb] sm:$0x1] %vm2310_vm1, %v1403_v15  ;;  %v6272_v26 = vrot.slane %v6264_v59, %v18477_v8  ;;  %v3065_v51 = vld [vmem:[#allocation2 + $0xad] sm:$0x1]  ;;  %v3069_v0 = vld [vmem:[#allocation2 + $0xb1] sm:$0x1]  ;;  %v1422_v42 = vcombine.high %v1420_v25, %v1420_v25  ;;  %v1436_v29 = vrot.slane %v1420_v25, %v18477_v8  ;;  %v19289_v20 = vrot.slane %v6281_v35, %v18477_v8 }
 0x14c   : > { %2783 = vst.msk [vmem:[#allocation2 + $0xb8] sm:$0x1] %vm2310_vm1, %v1404_v43  ;;  %v3066_v6 = vld [vmem:[#allocation2 + $0xae] sm:$0x1]  ;;  %v6282_v15 = vcombine.low %v3064_v37, %v3065_v51  ;;  %v6284_v1 = vcombine.low %v3068_v46, %v3069_v0  ;;  %v3072_v7 = vld [vmem:[#allocation2 + $0xb4] sm:$0x1]  ;;  %v1443_v21 = vrot.slane %v1421_v14, %v18477_v8  ;;  %v6279_v43 = vrot.slane %v6265_v36, %v18477_v8 }
 0x14d   : > { %23117 = vst [vmem:[#allocation66_spill] sm:$0xff] %v19289_v20  ;;  %2787 = vst.msk [vmem:[#allocation2 + $0xbc] sm:$0x1] %vm2310_vm1, %v1405_v4  ;;  %v431_v59 = vld [vmem:[%s18482_s29 + $0xa0] sm:$0xff]  ;;  %v6283_v38 = vcombine.low %v3066_v6, %v3067_v5  ;;  %v19297_v25 = vrot.slane %v1422_v42, %v18477_v8  ;;  %v1451_v37 = vcombine.high %v1429_v49, %v1429_v49  ;;  %v19301_v46 = vld [vmem:[%s18482_s29 + $0xa8] sm:$0xff] }
 0x14e   : > { %2788 = vst.msk [vmem:[#allocation2 + $0xbd] sm:$0x1] %vm2310_vm1, %v1429_v49  ;;  %2792 = vst.msk [vmem:[#allocation2 + $0xc1] sm:$0x1] %vm2310_vm1, %v1436_v29  ;;  %v19304_v35 = vrot.slane %v6282_v15, %v18477_v8  ;;  %v19307_v14 = vrot.slane %v6284_v1, %v18477_v8  ;;  %v3073_v4 = vld [vmem:[#allocation2 + $0xb5] sm:$0x1]  ;;  %v1452_v51 = vcombine.high %v1436_v29, %v1436_v29 }
 0x14f   : > { %v1453_v0 = vcombine.high %v1443_v21, %v1443_v21  ;;  %2789 = vst.msk [vmem:[#allocation2 + $0xbe] sm:$0x1] %vm2310_vm1, %v1443_v21  ;;  %v19311_v5 = vld [vmem:[%s18482_s29 + $0xb0] sm:$0xff]  ;;  %v19313_v36 = vcombine.low %v6272_v26, %v6279_v43  ;;  %v19316_v49 = vrot.slane %v6283_v38, %v18477_v8  ;;  %v6330_v42 = vcombine.low %v3072_v7, %v3073_v4  ;;  %v3077_v1 = vld [vmem:[#allocation2 + $0xb9] sm:$0x1] }
 0x150   : > { %23118 = vst [vmem:[#allocation67_spill] sm:$0xff] %v19304_v35  ;;  %23119 = vst [vmem:[#allocation68_spill] sm:$0xff] %v19307_v14  ;;  %v1455_v6 = vcombine.high %v431_v59, %v431_v59  ;;  %v6313_v29 = vcombine.low %v19289_v20, %v19304_v35  ;;  %v3074_v15 = vld [vmem:[#allocation2 + $0xb6] sm:$0x1]  ;;  %v1462_v21 = vrot.slane %v431_v59, %v18477_v8  ;;  %v3075_v43 = vld [vmem:[#allocation2 + $0xb7] sm:$0x1] }
 0x151   : > { %23120 = vst [vmem:[#allocation69_spill] sm:$0xff] %v19313_v36  ;;  %23121 = vst [vmem:[#allocation70_spill] sm:$0xff] %v19316_v49  ;;  %v1504_v38 = vcombine.high %v19301_v46, %v19301_v46  ;;  %v19330_v26 = vrot.slane %v19301_v46, %v18477_v8  ;;  %16438 = vmatprep.mubr.msk.f32.mxu0 %vm5040_vm2, %v19313_v36  ;;  %v6314_v7 = vcombine.low %v19316_v49, %v19307_v14 }
 0x152   : > { %2790 = vst.msk [vmem:[#allocation2 + $0xbf] sm:$0x1] %vm2310_vm1, %v1451_v37  ;;  %2793 = vst.msk [vmem:[#allocation2 + $0xc2] sm:$0x1] %vm2310_vm1, %v19297_v25  ;;  %v3078_v37 = vld [vmem:[#allocation2 + $0xba] sm:$0x1]  ;;  %v1469_v59 = vrot.slane %v1455_v6, %v18477_v8  ;;  %v6321_v35 = vrot.slane %v6313_v29, %v18477_v8  ;;  %v6331_v20 = vcombine.low %v3074_v15, %v3075_v43 }
 0x153   : > { %2791 = vst.msk [vmem:[#allocation2 + $0xc0] sm:$0x1] %vm2310_vm1, %v1453_v0  ;;  %2794 = vst.msk [vmem:[#allocation2 + $0xc3] sm:$0x1] %vm2310_vm1, %v1452_v51  ;;  %v3079_v4 = vld [vmem:[#allocation2 + $0xbb] sm:$0x1]  ;;  %v6340_v51 = vrot.slane %v6330_v42, %v18477_v8  ;;  %v1470_v61 = vcombine.high %v1462_v21, %v1462_v21  ;;  %v6328_v36 = vrot.slane %v6314_v7, %v18477_v8 }
 0x154   : > { %v3076_v46 = vld [vmem:[#allocation2 + $0xb8] sm:$0x1]  ;;  %v6333_v32 = vcombine.low %v3078_v37, %v3079_v4  ;;  %v3080_v14 = vld [vmem:[#allocation2 + $0xbc] sm:$0x1]  ;;  %v1471_v18 = vcombine.high %v1469_v59, %v1469_v59  ;;  %v1478_v27 = vrot.slane %v1462_v21, %v18477_v8  ;;  %v19344_v42 = vrot.slane %v6331_v20, %v18477_v8 }
 0x155   : > { %v6332_v58 = vcombine.low %v3076_v46, %v3077_v1  ;;  %v3081_v49 = vld [vmem:[#allocation2 + $0xbd] sm:$0x1]  ;;  %v1485_v29 = vrot.slane %v1469_v59, %v18477_v8  ;;  %v19350_v15 = vcombine.low %v6321_v35, %v6328_v36  ;;  %v3085_v7 = vld [vmem:[#allocation2 + $0xc1] sm:$0x1]  ;;  %v1492_v37 = vrot.slane %v1470_v61, %v18477_v8 }
 0x156   : > { %23122 = vst [vmem:[#allocation71_spill] sm:$0xff] %v19344_v42  ;;  %v19347_v6 = vrot.slane %v6333_v32, %v18477_v8  ;;  %v6379_v0 = vcombine.low %v3080_v14, %v3081_v49  ;;  %v3082_v1 = vld [vmem:[#allocation2 + $0xbe] sm:$0x1]  ;;  %v1499_v21 = vrot.slane %v1471_v18, %v18477_v8  ;;  %2796 = vst.msk [vmem:[#allocation2 + $0xc7] sm:$0x1] %vm2310_vm1, %v1478_v27 }
 0x157   : > { %23124 = vst [vmem:[#allocation73_spill] sm:$0xff] %v19350_v15  ;;  %v19353_v43 = vrot.slane %v6332_v58, %v18477_v8  ;;  %v6362_v20 = vcombine.low %v6340_v51, %v19344_v42  ;;  %v1500_v35 = vcombine.high %v1478_v27, %v1478_v27  ;;  %v1501_v36 = vcombine.high %v1485_v29, %v1485_v29  ;;  %v2300_v27 = vld [vmem:[%s23054_s1 + $0x4] sm:$0xf] }
 0x158   : > { %23123 = vst [vmem:[#allocation72_spill] sm:$0xff] %v19347_v6  ;;  %v19360_v14 = vrot.slane %v6379_v0, %v18477_v8  ;;  %2800 = vst.msk [vmem:[#allocation2 + $0xcb] sm:$0x1] %vm2310_vm1, %v1485_v29  ;;  %16439 = vmatmul.mubr.msk.f32.gmra.mrb[16].mxu0 %vm5040_vm2, %v19350_v15  ;;  %v1502_v59 = vcombine.high %v1492_v37, %v1492_v37  ;;  %v1503_v51 = vcombine.high %v1499_v21, %v1499_v21 }
 0x159   : > { %23125 = vst [vmem:[#allocation74_spill] sm:$0xff] %v19353_v43  ;;  %v3083_v32 = vld [vmem:[#allocation2 + $0xbf] sm:$0x1]  ;;  %v3086_v4 = vld [vmem:[#allocation2 + $0xc2] sm:$0x1]  ;;  %v6363_v58 = vcombine.low %v19353_v43, %v19347_v6  ;;  %v6370_v0 = vrot.slane %v6362_v20, %v18477_v8  ;;  %16262 = vmatprep.subr.msk.mxu1 %vm5105_vm0, %v2300_v27  ;;  %v1527_v20 = vrot.slane %v19330_v26, %v18477_v8 }
 0x15a   : > { %23126 = vst [vmem:[#allocation75_spill] sm:$0xff] %v19360_v14  ;;  %v3084_v18 = vld [vmem:[#allocation2 + $0xc0] sm:$0x1]  ;;  %v3087_v61 = vld [vmem:[#allocation2 + $0xc3] sm:$0x1]  ;;  %v6380_v49 = vcombine.low %v3082_v1, %v3083_v32  ;;  %v1518_v1 = vrot.slane %v1504_v38, %v18477_v8  ;;  %16263 = vmatpush3.msk.msra.mxu1 %vm5105_vm0, %v2300_v27 }
 0x15b   : > { %2797 = vst.msk [vmem:[#allocation2 + $0xc8] sm:$0x1] %vm2310_vm1, %v1492_v37  ;;  %2801 = vst.msk [vmem:[#allocation2 + $0xcc] sm:$0x1] %vm2310_vm1, %v1499_v21  ;;  %v6381_v46 = vcombine.low %v3084_v18, %v3085_v7  ;;  %v6382_v29 = vcombine.low %v3086_v4, %v3087_v61  ;;  %v6377_v37 = vrot.slane %v6363_v58, %v18477_v8  ;;  %v3090_v4 = vld [vmem:[#allocation2 + $0xc6] sm:$0x1] }
 0x15c   : > { %2798 = vst.msk [vmem:[#allocation2 + $0xc9] sm:$0x1] %vm2310_vm1, %v1500_v35  ;;  %2802 = vst.msk [vmem:[#allocation2 + $0xcd] sm:$0x1] %vm2310_vm1, %v1501_v36  ;;  %v19379_v21 = vrot.slane %v6380_v49, %v18477_v8  ;;  %v1519_v7 = vcombine.high %v19330_v26, %v19330_v26  ;;  %v1520_v35 = vcombine.high %v1518_v1, %v1518_v1  ;;  %v434_v49 = vld [vmem:[%s18482_s29 + $0xb8] sm:$0xff] }
 0x15d   : > { %2799 = vst.msk [vmem:[#allocation2 + $0xca] sm:$0x1] %vm2310_vm1, %v1502_v59  ;;  %2803 = vst.msk [vmem:[#allocation2 + $0xce] sm:$0x1] %vm2310_vm1, %v1503_v51  ;;  %v19389_v38 = vrot.slane %v6381_v46, %v18477_v8  ;;  %v19392_v32 = vrot.slane %v6382_v29, %v18477_v8  ;;  %v1534_v36 = vrot.slane %v1518_v1, %v18477_v8  ;;  %v3091_v51 = vld [vmem:[#allocation2 + $0xc7] sm:$0x1] }
 0x15e   : > { %23127 = vst [vmem:[#allocation76_spill] sm:$0xff] %v19379_v21  ;;  %v19395_v58 = vcombine.low %v6370_v0, %v6377_v37  ;;  %v6411_v18 = vcombine.low %v19360_v14, %v19379_v21  ;;  %v1541_v26 = vrot.slane %v1519_v7, %v18477_v8  ;;  %v1549_v61 = vcombine.high %v1527_v20, %v1527_v20 }
 0x15f   : > { %23128 = vst [vmem:[#allocation77_spill] sm:$0xff] %v19389_v38  ;;  %23129 = vst [vmem:[#allocation78_spill] sm:$0xff] %v19392_v32  ;;  %v6412_v59 = vcombine.low %v19389_v38, %v19392_v32  ;;  %v19405_v27 = vrot.slane %v1520_v35, %v18477_v8  ;;  %v1550_v46 = vcombine.high %v1534_v36, %v1534_v36  ;;  %v3095_v15 = vld [vmem:[#allocation2 + $0xcb] sm:$0x1] }
 0x160   : > { %23130 = vst [vmem:[#allocation79_spill] sm:$0xff] %v19395_v58  ;;  %2804 = vst.msk [vmem:[#allocation2 + $0xcf] sm:$0x1] %vm2310_vm1, %v1527_v20  ;;  %v1560_v0 = vrot.slane %v19311_v5, %v18477_v8  ;;  %16441 = vmatprep.mubr.msk.f32.mxu0 %vm5040_vm2, %v19395_v58  ;;  %v6419_v29 = vrot.slane %v6411_v18, %v18477_v8  ;;  %v6428_v1 = vcombine.low %v3090_v4, %v3091_v51 }
 0x161   : > { %2808 = vst.msk [vmem:[#allocation2 + $0xd3] sm:$0x1] %vm2310_vm1, %v1534_v36  ;;  %v1551_v37 = vcombine.high %v1541_v26, %v1541_v26  ;;  %2805 = vst.msk [vmem:[#allocation2 + $0xd0] sm:$0x1] %vm2310_vm1, %v1541_v26  ;;  %v23131_v7 = vcombine.high %v19311_v5, %v19311_v5  ;;  %v6426_v35 = vrot.slane %v6412_v59, %v18477_v8 }
 0x162   : > { %2806 = vst.msk [vmem:[#allocation2 + $0xd1] sm:$0x1] %vm2310_vm1, %v1549_v61  ;;  %v3092_v36 = vld [vmem:[#allocation2 + $0xc8] sm:$0x1]  ;;  %v3096_v32 = vld [vmem:[#allocation2 + $0xcc] sm:$0x1]  ;;  %v1568_v4 = vcombine.high %v1560_v0, %v1560_v0  ;;  %v1576_v18 = vrot.slane %v1560_v0, %v18477_v8  ;;  %v1602_v26 = vcombine.high %v434_v49, %v434_v49  ;;  %v6438_v58 = vrot.slane %v6428_v1, %v18477_v8 }
 0x163   : > { %v1567_v20 = vrot.slane %v23131_v7, %v18477_v8  ;;  %2809 = vst.msk [vmem:[#allocation2 + $0xd4] sm:$0x1] %vm2310_vm1, %v19405_v27  ;;  %2810 = vst.msk [vmem:[#allocation2 + $0xd5] sm:$0x1] %vm2310_vm1, %v1550_v46  ;;  %v3093_v61 = vld [vmem:[#allocation2 + $0xc9] sm:$0x1]  ;;  %v1609_v7 = vrot.slane %v434_v49, %v18477_v8  ;;  %v19428_v21 = vcombine.low %v6419_v29, %v6426_v35 }
 0x164   : > { %v3097_v51 = vld [vmem:[#allocation2 + $0xcd] sm:$0x1]  ;;  %2807 = vst.msk [vmem:[#allocation2 + $0xd2] sm:$0x1] %vm2310_vm1, %v1551_v37  ;;  %v3094_v38 = vld [vmem:[#allocation2 + $0xca] sm:$0x1]  ;;  %v6429_v6 = vcombine.low %v3092_v36, %v3093_v61  ;;  %v1590_v0 = vrot.slane %v1568_v4, %v18477_v8  ;;  %v1598_v43 = vcombine.high %v1576_v18, %v1576_v18 }
 0x165   : > { %v1569_v5 = vcombine.high %v1567_v20, %v1567_v20  ;;  %v1583_v59 = vrot.slane %v1567_v20, %v18477_v8  ;;  %23132 = vst [vmem:[#allocation80_spill] sm:$0xff] %v19428_v21  ;;  %v6431_v46 = vcombine.low %v3096_v32, %v3097_v51  ;;  %v3098_v14 = vld [vmem:[#allocation2 + $0xce] sm:$0x1]  ;;  %2812 = vst.msk [vmem:[#allocation2 + $0xd9] sm:$0x1] %vm2310_vm1, %v1576_v18  ;;  %16442 = vmatmul.mubr.msk.f32.gmra.mrb[18].mxu0 %vm5040_vm2, %v19428_v21  ;;  %v435_v4 = vld [vmem:[%s18482_s29 + $0xc0] sm:$0xff] }
 0x166   : > { %v6430_v42 = vcombine.low %v3094_v38, %v3095_v15  ;;  %v19437_v49 = vrot.slane %v6429_v6, %v18477_v8  ;;  %v1600_v20 = vcombine.high %v1590_v0, %v1590_v0  ;;  %2813 = vst.msk [vmem:[#allocation2 + $0xda] sm:$0x1] %vm2310_vm1, %v1590_v0  ;;  %v1616_v15 = vrot.slane %v1602_v26, %v18477_v8 }
 0x167   : > { %v1597_v1 = vrot.slane %v1569_v5, %v18477_v8  ;;  %v1599_v37 = vcombine.high %v1583_v59, %v1583_v59  ;;  %2816 = vst.msk [vmem:[#allocation2 + $0xdd] sm:$0x1] %vm2310_vm1, %v1583_v59  ;;  %v19440_v32 = vrot.slane %v6431_v46, %v18477_v8  ;;  %v3099_v29 = vld [vmem:[#allocation2 + $0xcf] sm:$0x1]  ;;  %2814 = vst.msk [vmem:[#allocation2 + $0xdb] sm:$0x1] %vm2310_vm1, %v1598_v43 }
 0x168   : > { %23133 = vst [vmem:[#allocation81_spill] sm:$0xff] %v19437_v49  ;;  %v19445_v38 = vrot.slane %v6430_v42, %v18477_v8  ;;  %v6477_v35 = vcombine.low %v3098_v14, %v3099_v29  ;;  %v1617_v36 = vcombine.high %v1609_v7, %v1609_v7  ;;  %v6460_v18 = vcombine.low %v6438_v58, %v19437_v49  ;;  %v3100_v61 = vld [vmem:[#allocation2 + $0xd0] sm:$0x1]  ;;  %v3103_v5 = vld [vmem:[#allocation2 + $0xd3] sm:$0x1] }
 0x169   : > { %23134 = vst [vmem:[#allocation82_spill] sm:$0xff] %v19440_v32  ;;  %2817 = vst.msk [vmem:[#allocation2 + $0xde] sm:$0x1] %vm2310_vm1, %v1597_v1  ;;  %v1601_v6 = vcombine.high %v1597_v1, %v1597_v1  ;;  %v3101_v51 = vld [vmem:[#allocation2 + $0xd1] sm:$0x1]  ;;  %v1618_v26 = vcombine.high %v1616_v15, %v1616_v15  ;;  %v1625_v42 = vrot.slane %v1609_v7, %v18477_v8 }
 0x16a   : > { %23135 = vst [vmem:[#allocation83_spill] sm:$0xff] %v19445_v38  ;;  %2818 = vst.msk [vmem:[#allocation2 + $0xdf] sm:$0x1] %vm2310_vm1, %v1599_v37  ;;  %v1632_v14 = vrot.slane %v1616_v15, %v18477_v8  ;;  %v6461_v43 = vcombine.low %v19445_v38, %v19440_v32  ;;  %v3104_v59 = vld [vmem:[#allocation2 + $0xd4] sm:$0x1]  ;;  %v6478_v0 = vcombine.low %v3100_v61, %v3101_v51 }
 0x16b   : > { %2815 = vst.msk [vmem:[#allocation2 + $0xdc] sm:$0x1] %vm2310_vm1, %v1600_v20  ;;  %v3105_v46 = vld [vmem:[#allocation2 + $0xd5] sm:$0x1]  ;;  %v19458_v1 = vrot.slane %v6477_v35, %v18477_v8  ;;  %v3108_v58 = vld [vmem:[#allocation2 + $0xd8] sm:$0x1]  ;;  %v1639_v37 = vrot.slane %v1617_v36, %v18477_v8  ;;  %v6468_v29 = vrot.slane %v6460_v18, %v18477_v8  ;;  %v19464_v15 = vrot.slane %v1618_v26, %v18477_v8 }
 0x16c   : > { %2819 = vst.msk [vmem:[#allocation2 + $0xe0] sm:$0x1] %vm2310_vm1, %v1601_v6  ;;  %v3102_v7 = vld [vmem:[#allocation2 + $0xd2] sm:$0x1]  ;;  %v6480_v20 = vcombine.low %v3104_v59, %v3105_v46  ;;  %v1647_v21 = vcombine.high %v1625_v42, %v1625_v42  ;;  %2820 = vst.msk [vmem:[#allocation2 + $0xe1] sm:$0x1] %vm2310_vm1, %v1625_v42  ;;  %v6475_v35 = vrot.slane %v6461_v43, %v18477_v8 }
 0x16d   : > { %23136 = vst [vmem:[#allocation84_spill] sm:$0xff] %v19458_v1  ;;  %2824 = vst.msk [vmem:[#allocation2 + $0xe5] sm:$0x1] %vm2310_vm1, %v1632_v14  ;;  %v6479_v61 = vcombine.low %v3102_v7, %v3103_v5  ;;  %v19470_v51 = vrot.slane %v6478_v0, %v18477_v8  ;;  %v3109_v36 = vld [vmem:[#allocation2 + $0xd9] sm:$0x1]  ;;  %v1648_v6 = vcombine.high %v1632_v14, %v1632_v14  ;;  %v19474_v18 = vld [vmem:[%s18482_s29 + $0xc8] sm:$0xff] }
 0x16e   : > { %2821 = vst.msk [vmem:[#allocation2 + $0xe2] sm:$0x1] %vm2310_vm1, %v1639_v37  ;;  %v19477_v26 = vrot.slane %v6480_v20, %v18477_v8  ;;  %v6526_v59 = vcombine.low %v3108_v58, %v3109_v36  ;;  %v1649_v46 = vcombine.high %v1639_v37, %v1639_v37  ;;  %2822 = vst.msk [vmem:[#allocation2 + $0xe3] sm:$0x1] %vm2310_vm1, %v1647_v21  ;;  %v3110_v0 = vld [vmem:[#allocation2 + $0xda] sm:$0x1] }
 0x16f   : > { %23137 = vst [vmem:[#allocation85_spill] sm:$0xff] %v19470_v51  ;;  %2825 = vst.msk [vmem:[#allocation2 + $0xe6] sm:$0x1] %vm2310_vm1, %v19464_v15  ;;  %v1651_v5 = vcombine.high %v435_v4, %v435_v4  ;;  %v19482_v42 = vcombine.low %v6468_v29, %v6475_v35  ;;  %v19485_v43 = vrot.slane %v6479_v61, %v18477_v8  ;;  %v3113_v7 = vld [vmem:[#allocation2 + $0xdd] sm:$0x1] }
 0x170   : > { %23138 = vst [vmem:[#allocation86_spill] sm:$0xff] %v19477_v26  ;;  %v6509_v14 = vcombine.low %v19458_v1, %v19470_v51  ;;  %2826 = vst.msk [vmem:[#allocation2 + $0xe7] sm:$0x1] %vm2310_vm1, %v1648_v6  ;;  %v1658_v58 = vrot.slane %v435_v4, %v18477_v8  ;;  %v3111_v37 = vld [vmem:[#allocation2 + $0xdb] sm:$0x1]  ;;  %v6536_v36 = vrot.slane %v6526_v59, %v18477_v8 }
 0x171   : > { %23139 = vst [vmem:[#allocation87_spill] sm:$0xff] %v19482_v42  ;;  %23140 = vst [vmem:[#allocation88_spill] sm:$0xff] %v19485_v43  ;;  %v3114_v21 = vld [vmem:[#allocation2 + $0xde] sm:$0x1]  ;;  %v3115_v20 = vld [vmem:[#allocation2 + $0xdf] sm:$0x1]  ;;  %v1665_v29 = vrot.slane %v1651_v5, %v18477_v8  ;;  %v1700_v35 = vcombine.high %v19474_v18, %v19474_v18  ;;  %v1707_v61 = vrot.slane %v19474_v18, %v18477_v8  ;;  %16444 = vmatprep.mubr.msk.f32.mxu0 %vm5040_vm2, %v19482_v42 }
 0x172   : > { %2823 = vst.msk [vmem:[#allocation2 + $0xe4] sm:$0x1] %vm2310_vm1, %v1649_v46  ;;  %v6510_v4 = vcombine.low %v19485_v43, %v19477_v26  ;;  %v6517_v6 = vrot.slane %v6509_v14, %v18477_v8  ;;  %v3112_v51 = vld [vmem:[#allocation2 + $0xdc] sm:$0x1]  ;;  %v6527_v59 = vcombine.low %v3110_v0, %v3111_v37  ;;  %v6529_v32 = vcombine.low %v3114_v21, %v3115_v20 }
 0x173   : > { %v6528_v46 = vcombine.low %v3112_v51, %v3113_v7  ;;  %v3116_v1 = vld [vmem:[#allocation2 + $0xe0] sm:$0x1]  ;;  %v1666_v5 = vcombine.high %v1658_v58, %v1658_v58  ;;  %v1667_v49 = vcombine.high %v1665_v29, %v1665_v29  ;;  %v1674_v38 = vrot.slane %v1658_v58, %v18477_v8  ;;  %v3117_v26 = vld [vmem:[#allocation2 + $0xe1] sm:$0x1] }
 0x174   : > { %v6524_v54 = vrot.slane %v6510_v4, %v18477_v8  ;;  %v19506_v18 = vrot.slane %v6527_v59, %v18477_v8  ;;  %v19509_v42 = vrot.slane %v6529_v32, %v18477_v8  ;;  %v1681_v14 = vrot.slane %v1665_v29, %v18477_v8  ;;  %v3121_v4 = vld [vmem:[#allocation2 + $0xe5] sm:$0x1] }
 0x175   : > { %v19513_v0 = vrot.slane %v6528_v46, %v18477_v8  ;;  %v3118_v51 = vld [vmem:[#allocation2 + $0xe2] sm:$0x1]  ;;  %v6575_v7 = vcombine.low %v3116_v1, %v3117_v26  ;;  %v1688_v37 = vrot.slane %v1666_v5, %v18477_v8  ;;  %v1695_v58 = vrot.slane %v1667_v49, %v18477_v8  ;;  %2828 = vst.msk [vmem:[#allocation2 + $0xeb] sm:$0x1] %vm2310_vm1, %v1674_v38  ;;  %v3119_v32 = vld [vmem:[#allocation2 + $0xe3] sm:$0x1] }
 0x176   : > { %23141 = vst [vmem:[#allocation89_spill] sm:$0xff] %v19506_v18  ;;  %23142 = vst [vmem:[#allocation90_spill] sm:$0xff] %v19509_v42  ;;  %v19518_v21 = vcombine.low %v6517_v6, %v6524_v54  ;;  %v6558_v20 = vcombine.low %v6536_v36, %v19506_v18  ;;  %v3122_v59 = vld [vmem:[#allocation2 + $0xe6] sm:$0x1]  ;;  %v1696_v43 = vcombine.high %v1674_v38, %v1674_v38 }
 0x177   : > { %23143 = vst [vmem:[#allocation91_spill] sm:$0xff] %v19513_v0  ;;  %v1697_v29 = vcombine.high %v1681_v14, %v1681_v14  ;;  %2832 = vst.msk [vmem:[#allocation2 + $0xef] sm:$0x1] %vm2310_vm1, %v1681_v14  ;;  %v6559_v1 = vcombine.low %v19513_v0, %v19509_v42  ;;  %v3123_v26 = vld [vmem:[#allocation2 + $0xe7] sm:$0x1]  ;;  %v6576_v46 = vcombine.low %v3118_v51, %v3119_v32 }
 0x178   : > { %23144 = vst [vmem:[#allocation92_spill] sm:$0xff] %v19518_v21  ;;  %v19525_v49 = vrot.slane %v6575_v7, %v18477_v8  ;;  %v1698_v5 = vcombine.high %v1688_v37, %v1688_v37  ;;  %2829 = vst.msk [vmem:[#allocation2 + $0xec] sm:$0x1] %vm2310_vm1, %v1688_v37  ;;  %16445 = vmatmul.mubr.msk.f32.gmra.mrb[20].mxu0 %vm5040_vm2, %v19518_v21  ;;  %v6566_v54 = vrot.slane %v6558_v20, %v18477_v8  ;;  %v437_v20 = vld [vmem:[%s18482_s29 + $0xd0] sm:$0xff] }
 0x179   : > { %2833 = vst.msk [vmem:[#allocation2 + $0xf0] sm:$0x1] %vm2310_vm1, %v1695_v58  ;;  %v3120_v38 = vld [vmem:[#allocation2 + $0xe4] sm:$0x1]  ;;  %v6578_v36 = vcombine.low %v3122_v59, %v3123_v26  ;;  %2830 = vst.msk [vmem:[#allocation2 + $0xed] sm:$0x1] %vm2310_vm1, %v1696_v43  ;;  %v1699_v6 = vcombine.high %v1695_v58, %v1695_v58  ;;  %v1714_v14 = vrot.slane %v1700_v35, %v18477_v8 }
 0x17a   : > { %23145 = vst [vmem:[#allocation93_spill] sm:$0xff] %v19525_v49  ;;  %2834 = vst.msk [vmem:[#allocation2 + $0xf1] sm:$0x1] %vm2310_vm1, %v1697_v29  ;;  %v6573_v51 = vrot.slane %v6559_v1, %v18477_v8  ;;  %v6577_v7 = vcombine.low %v3120_v38, %v3121_v4  ;;  %v19537_v37 = vrot.slane %v6576_v46, %v18477_v8  ;;  %v3126_v43 = vld [vmem:[#allocation2 + $0xea] sm:$0x1] }
 0x17b   : > { %2831 = vst.msk [vmem:[#allocation2 + $0xee] sm:$0x1] %vm2310_vm1, %v1698_v5  ;;  %v1715_v32 = vcombine.high %v1707_v61, %v1707_v61  ;;  %v19542_v59 = vrot.slane %v6578_v36, %v18477_v8  ;;  %v1716_v26 = vcombine.high %v1714_v14, %v1714_v14  ;;  %v1723_v58 = vrot.slane %v1707_v61, %v18477_v8  ;;  %v438_v5 = vld [vmem:[%s18482_s29 + $0xd8] sm:$0xff] }
 0x17c   : > { %23146 = vst [vmem:[#allocation94_spill] sm:$0xff] %v19537_v37  ;;  %v1730_v35 = vrot.slane %v1714_v14, %v18477_v8  ;;  %2835 = vst.msk [vmem:[#allocation2 + $0xf2] sm:$0x1] %vm2310_vm1, %v1699_v6  ;;  %v19547_v4 = vcombine.low %v6566_v54, %v6573_v51  ;;  %v19550_v29 = vrot.slane %v6577_v7, %v18477_v8  ;;  %v3127_v38 = vld [vmem:[#allocation2 + $0xeb] sm:$0x1]  ;;  %v19562_v6 = vld [vmem:[%s18482_s29 + $0xe0] sm:$0xff] }
 0x17d   : > { %23147 = vst [vmem:[#allocation95_spill] sm:$0xff] %v19542_v59  ;;  %v6607_v1 = vcombine.low %v19525_v49, %v19537_v37  ;;  %v1737_v46 = vrot.slane %v1715_v32, %v18477_v8  ;;  %v19557_v36 = vrot.slane %v1716_v26, %v18477_v8  ;;  %v1745_v61 = vcombine.high %v1723_v58, %v1723_v58 }
 0x17e   : > { %23148 = vst [vmem:[#allocation96_spill] sm:$0xff] %v19547_v4  ;;  %23149 = vst [vmem:[#allocation97_spill] sm:$0xff] %v19550_v29  ;;  %v1746_v21 = vcombine.high %v1730_v35, %v1730_v35  ;;  %v1749_v54 = vcombine.high %v437_v20, %v437_v20  ;;  %16447 = vmatprep.mubr.msk.f32.mxu0 %vm5040_vm2, %v19547_v4  ;;  %v6608_v14 = vcombine.low %v19550_v29, %v19542_v59  ;;  %v3131_v37 = vld [vmem:[#allocation2 + $0xef] sm:$0x1] }
 0x17f   : > { %2836 = vst.msk [vmem:[#allocation2 + $0xf3] sm:$0x1] %vm2310_vm1, %v1723_v58  ;;  %2840 = vst.msk [vmem:[#allocation2 + $0xf7] sm:$0x1] %vm2310_vm1, %v1730_v35  ;;  %v6615_v51 = vrot.slane %v6607_v1, %v18477_v8  ;;  %v6624_v7 = vcombine.low %v3126_v43, %v3127_v38  ;;  %v1747_v32 = vcombine.high %v1737_v46, %v1737_v46  ;;  %v3128_v26 = vld [vmem:[#allocation2 + $0xec] sm:$0x1] }
 0x180   : > { %2837 = vst.msk [vmem:[#allocation2 + $0xf4] sm:$0x1] %vm2310_vm1, %v1737_v46  ;;  %v3132_v58 = vld [vmem:[#allocation2 + $0xf0] sm:$0x1]  ;;  %2838 = vst.msk [vmem:[#allocation2 + $0xf5] sm:$0x1] %vm2310_vm1, %v1745_v61  ;;  %v1756_v35 = vrot.slane %v437_v20, %v18477_v8  ;;  %v1763_v4 = vrot.slane %v1749_v54, %v18477_v8  ;;  %v1798_v59 = vcombine.high %v438_v5, %v438_v5 }
 0x181   : > { %2841 = vst.msk [vmem:[#allocation2 + $0xf8] sm:$0x1] %vm2310_vm1, %v19557_v36  ;;  %2842 = vst.msk [vmem:[#allocation2 + $0xf9] sm:$0x1] %vm2310_vm1, %v1746_v21  ;;  %v1805_v43 = vrot.slane %v438_v5, %v18477_v8  ;;  %v6622_v1 = vrot.slane %v6608_v14, %v18477_v8  ;;  %v3129_v46 = vld [vmem:[#allocation2 + $0xed] sm:$0x1]  ;;  %v6634_v29 = vrot.slane %v6624_v7, %v18477_v8 }
 0x182   : > { %v3133_v38 = vld [vmem:[#allocation2 + $0xf1] sm:$0x1]  ;;  %2839 = vst.msk [vmem:[#allocation2 + $0xf6] sm:$0x1] %vm2310_vm1, %v1747_v32  ;;  %v19584_v21 = vrot.slane %v19562_v6, %v18477_v8  ;;  %v3130_v20 = vld [vmem:[#allocation2 + $0xee] sm:$0x1]  ;;  %v6625_v54 = vcombine.low %v3128_v26, %v3129_v46  ;;  %v1764_v49 = vcombine.high %v1756_v35, %v1756_v35  ;;  %v1765_v5 = vcombine.high %v1763_v4, %v1763_v4 }
 0x183   : > { %v6627_v42 = vcombine.low %v3132_v58, %v3133_v38  ;;  %v19586_v18 = vcombine.low %v6615_v51, %v6622_v1  ;;  %v6626_v14 = vcombine.low %v3130_v20, %v3131_v37  ;;  %v3134_v0 = vld [vmem:[#allocation2 + $0xf2] sm:$0x1]  ;;  %v1772_v7 = vrot.slane %v1756_v35, %v18477_v8 }
 0x184   : > { %v1779_v32 = vrot.slane %v1763_v4, %v18477_v8  ;;  %v19591_v9 = vrot.slane %v6625_v54, %v18477_v8  ;;  %v1786_v31 = vrot.slane %v1764_v49, %v18477_v8  ;;  %v1793_v26 = vrot.slane %v1765_v5, %v18477_v8 }
 0x185   : > { %23150 = vst [vmem:[#allocation98_spill] sm:$0xff] %v19586_v18  ;;  %v19594_v61 = vrot.slane %v6627_v42, %v18477_v8  ;;  %16448 = vmatmul.mubr.msk.f32.gmra.mrb[22].mxu0 %vm5040_vm2, %v19586_v18  ;;  %v19601_v37 = vrot.slane %v6626_v14, %v18477_v8  ;;  %v1794_v58 = vcombine.high %v1772_v7, %v1772_v7  ;;  %2844 = vst.msk [vmem:[#allocation2 + $0xfd] sm:$0x1] %vm2310_vm1, %v1772_v7 }
 0x186   : > { %23151 = vst [vmem:[#allocation99_spill] sm:$0xff] %v19591_v9  ;;  %v3135_v51 = vld [vmem:[#allocation2 + $0xf3] sm:$0x1]  ;;  %v1795_v35 = vcombine.high %v1779_v32, %v1779_v32  ;;  %2848 = vst.msk [vmem:[#allocation2 + $0x101] sm:$0x1] %vm2310_vm1, %v1779_v32  ;;  %v1812_v42 = vrot.slane %v1798_v59, %v18477_v8  ;;  %v6656_v4 = vcombine.low %v6634_v29, %v19591_v9 }
 0x187   : > { %23152 = vst [vmem:[#allocation100_spill] sm:$0xff] %v19594_v61  ;;  %23153 = vst [vmem:[#allocation101_spill] sm:$0xff] %v19601_v37  ;;  %v3136_v49 = vld [vmem:[#allocation2 + $0xf4] sm:$0x1]  ;;  %v3139_v1 = vld [vmem:[#allocation2 + $0xf7] sm:$0x1]  ;;  %v6673_v46 = vcombine.low %v3134_v0, %v3135_v51  ;;  %v1796_v38 = vcombine.high %v1786_v31, %v1786_v31  ;;  %v1797_v20 = vcombine.high %v1793_v26, %v1793_v26 }
 0x188   : > { %2845 = vst.msk [vmem:[#allocation2 + $0xfe] sm:$0x1] %vm2310_vm1, %v1786_v31  ;;  %2849 = vst.msk [vmem:[#allocation2 + $0x102] sm:$0x1] %vm2310_vm1, %v1793_v26  ;;  %v6657_v54 = vcombine.low %v19601_v37, %v19594_v61  ;;  %v3137_v5 = vld [vmem:[#allocation2 + $0xf5] sm:$0x1]  ;;  %v1813_v59 = vcombine.high %v1805_v43, %v1805_v43  ;;  %v1814_v29 = vcombine.high %v1812_v42, %v1812_v42 }
 0x189   : > { %v3140_v14 = vld [vmem:[#allocation2 + $0xf8] sm:$0x1]  ;;  %v3141_v7 = vld [vmem:[#allocation2 + $0xf9] sm:$0x1]  ;;  %2846 = vst.msk [vmem:[#allocation2 + $0xff] sm:$0x1] %vm2310_vm1, %v1794_v58  ;;  %v1821_v0 = vrot.slane %v1805_v43, %v18477_v8  ;;  %v6664_v32 = vrot.slane %v6656_v4, %v18477_v8  ;;  %v6674_v51 = vcombine.low %v3136_v49, %v3137_v5  ;;  %v19616_v18 = vrot.slane %v6673_v46, %v18477_v8 }
 0x18a   : > { %2850 = vst.msk [vmem:[#allocation2 + $0x103] sm:$0x1] %vm2310_vm1, %v1795_v35  ;;  %v3138_v31 = vld [vmem:[#allocation2 + $0xf6] sm:$0x1]  ;;  %v6676_v26 = vcombine.low %v3140_v14, %v3141_v7  ;;  %2847 = vst.msk [vmem:[#allocation2 + $0x100] sm:$0x1] %vm2310_vm1, %v1796_v38  ;;  %v6671_v58 = vrot.slane %v6657_v54, %v18477_v8  ;;  %v1828_v61 = vrot.slane %v1812_v42, %v18477_v8 }
 0x18b   : > { %23154 = vst [vmem:[#allocation102_spill] sm:$0xff] %v19616_v18  ;;  %2851 = vst.msk [vmem:[#allocation2 + $0x104] sm:$0x1] %vm2310_vm1, %v1797_v20  ;;  %v6675_v35 = vcombine.low %v3138_v31, %v3139_v1  ;;  %v1835_v43 = vrot.slane %v1813_v59, %v18477_v8  ;;  %v19625_v4 = vrot.slane %v6674_v51, %v18477_v8  ;;  %v3144_v46 = vld [vmem:[#allocation2 + $0xfc] sm:$0x1]  ;;  %v440_v5 = vld [vmem:[%s18482_s29 + $0xe8] sm:$0xff] }
 0x18c   : > { %2852 = vst.msk [vmem:[#allocation2 + $0x105] sm:$0x1] %vm2310_vm1, %v1821_v0  ;;  %v19628_v49 = vrot.slane %v6676_v26, %v18477_v8  ;;  %v19631_v38 = vrot.slane %v1814_v29, %v18477_v8  ;;  %v1843_v20 = vcombine.high %v1821_v0, %v1821_v0  ;;  %v19634_v54 = vcombine.low %v6664_v32, %v6671_v58  ;;  %v3145_v59 = vld [vmem:[#allocation2 + $0xfd] sm:$0x1] }
 0x18d   : > { %23155 = vst [vmem:[#allocation103_spill] sm:$0xff] %v19625_v4  ;;  %v19637_v42 = vrot.slane %v6675_v35, %v18477_v8  ;;  %v1844_v1 = vcombine.high %v1828_v61, %v1828_v61  ;;  %v1845_v14 = vcombine.high %v1835_v43, %v1835_v43  ;;  %2853 = vst.msk [vmem:[#allocation2 + $0x106] sm:$0x1] %vm2310_vm1, %v1835_v43  ;;  %v3149_v26 = vld [vmem:[#allocation2 + $0x101] sm:$0x1] }
 0x18e   : > { %23156 = vst [vmem:[#allocation104_spill] sm:$0xff] %v19628_v49  ;;  %23157 = vst [vmem:[#allocation105_spill] sm:$0xff] %v19634_v54  ;;  %v6705_v7 = vcombine.low %v19616_v18, %v19625_v4  ;;  %v23159_v29 = vcombine.high %v19562_v6, %v19562_v6  ;;  %v1862_v32 = vcombine.high %v19584_v21, %v19584_v21  ;;  %16450 = vmatprep.mubr.msk.f32.mxu0 %vm5040_vm2, %v19634_v54 }
 0x18f   : > { %23158 = vst [vmem:[#allocation106_spill] sm:$0xff] %v19637_v42  ;;  %2856 = vst.msk [vmem:[#allocation2 + $0x109] sm:$0x1] %vm2310_vm1, %v1828_v61  ;;  %v1870_v61 = vrot.slane %v19584_v21, %v18477_v8  ;;  %v6706_v31 = vcombine.low %v19637_v42, %v19628_v49  ;;  %v3146_v51 = vld [vmem:[#allocation2 + $0xfe] sm:$0x1]  ;;  %v6722_v35 = vcombine.low %v3144_v46, %v3145_v59 }
 0x190   : > { %2854 = vst.msk [vmem:[#allocation2 + $0x107] sm:$0x1] %vm2310_vm1, %v1843_v20  ;;  %2857 = vst.msk [vmem:[#allocation2 + $0x10a] sm:$0x1] %vm2310_vm1, %v19631_v38  ;;  %v1861_v0 = vrot.slane %v23159_v29, %v18477_v8  ;;  %v3150_v58 = vld [vmem:[#allocation2 + $0x102] sm:$0x1]  ;;  %v1896_v6 = vcombine.high %v440_v5, %v440_v5  ;;  %v1903_v43 = vrot.slane %v440_v5, %v18477_v8 }
 0x191   : > { %2855 = vst.msk [vmem:[#allocation2 + $0x108] sm:$0x1] %vm2310_vm1, %v1845_v14  ;;  %2858 = vst.msk [vmem:[#allocation2 + $0x10b] sm:$0x1] %vm2310_vm1, %v1844_v1  ;;  %v6713_v20 = vrot.slane %v6705_v7, %v18477_v8  ;;  %v3147_v21 = vld [vmem:[#allocation2 + $0xff] sm:$0x1]  ;;  %v1884_v49 = vrot.slane %v1862_v32, %v18477_v8  ;;  %v6720_v46 = vrot.slane %v6706_v31, %v18477_v8 }
 0x192   : > { %v3151_v29 = vld [vmem:[#allocation2 + $0x103] sm:$0x1]  ;;  %v1863_v4 = vcombine.high %v1861_v0, %v1861_v0  ;;  %v1877_v54 = vrot.slane %v1861_v0, %v18477_v8  ;;  %2860 = vst.msk [vmem:[#allocation2 + $0x10f] sm:$0x1] %vm2310_vm1, %v1870_v61  ;;  %v3148_v59 = vld [vmem:[#allocation2 + $0x100] sm:$0x1]  ;;  %v6723_v14 = vcombine.low %v3146_v51, %v3147_v21  ;;  %v6732_v1 = vrot.slane %v6722_v35, %v18477_v8 }
 0x193   : > { %v6725_v42 = vcombine.low %v3150_v58, %v3151_v29  ;;  %v3152_v18 = vld [vmem:[#allocation2 + $0x104] sm:$0x1]  ;;  %v6724_v5 = vcombine.low %v3148_v59, %v3149_v26  ;;  %v3153_v9 = vld [vmem:[#allocation2 + $0x105] sm:$0x1]  ;;  %v1892_v37 = vcombine.high %v1870_v61, %v1870_v61  ;;  %2861 = vst.msk [vmem:[#allocation2 + $0x110] sm:$0x1] %vm2310_vm1, %v1884_v49  ;;  %v19670_v0 = vcombine.low %v6713_v20, %v6720_v46 }
 0x194   : > { %v1891_v7 = vrot.slane %v1863_v4, %v18477_v8  ;;  %v1893_v55 = vcombine.high %v1877_v54, %v1877_v54  ;;  %2864 = vst.msk [vmem:[#allocation2 + $0x113] sm:$0x1] %vm2310_vm1, %v1877_v54  ;;  %v19673_v32 = vrot.slane %v6723_v14, %v18477_v8  ;;  %v6771_v51 = vcombine.low %v3152_v18, %v3153_v9  ;;  %v3154_v58 = vld [vmem:[#allocation2 + $0x106] sm:$0x1] }
 0x195   : > { %23160 = vst [vmem:[#allocation107_spill] sm:$0xff] %v19670_v0  ;;  %v19676_v31 = vrot.slane %v6725_v42, %v18477_v8  ;;  %v19679_v26 = vrot.slane %v6724_v5, %v18477_v8  ;;  %v1894_v61 = vcombine.high %v1884_v49, %v1884_v49  ;;  %2862 = vst.msk [vmem:[#allocation2 + $0x111] sm:$0x1] %vm2310_vm1, %v1892_v37  ;;  %16451 = vmatmul.mubr.msk.f32.gmra.mrb[24].mxu0 %vm5040_vm2, %v19670_v0  ;;  %v3162_v49 = vld [vmem:[#allocation2 + $0x10e] sm:$0x1] }
 0x196   : > { %23161 = vst [vmem:[#allocation108_spill] sm:$0xff] %v19673_v32  ;;  %v3157_v4 = vld [vmem:[#allocation2 + $0x109] sm:$0x1]  ;;  %2865 = vst.msk [vmem:[#allocation2 + $0x114] sm:$0x1] %vm2310_vm1, %v1891_v7  ;;  %v1895_v54 = vcombine.high %v1891_v7, %v1891_v7  ;;  %v1910_v35 = vrot.slane %v1896_v6, %v18477_v8  ;;  %v6754_v9 = vcombine.low %v6732_v1, %v19673_v32 }
 0x197   : > { %23162 = vst [vmem:[#allocation109_spill] sm:$0xff] %v19676_v31  ;;  %23163 = vst [vmem:[#allocation110_spill] sm:$0xff] %v19679_v26  ;;  %v3155_v18 = vld [vmem:[#allocation2 + $0x107] sm:$0x1]  ;;  %v3158_v42 = vld [vmem:[#allocation2 + $0x10a] sm:$0x1]  ;;  %v19689_v20 = vrot.slane %v6771_v51, %v18477_v8  ;;  %v1911_v21 = vcombine.high %v1903_v43, %v1903_v43  ;;  %v1919_v37 = vrot.slane %v1903_v43, %v18477_v8 }
 0x198   : > { %2866 = vst.msk [vmem:[#allocation2 + $0x115] sm:$0x1] %vm2310_vm1, %v1893_v55  ;;  %v6755_v55 = vcombine.low %v19679_v26, %v19676_v31  ;;  %v3156_v29 = vld [vmem:[#allocation2 + $0x108] sm:$0x1]  ;;  %v3159_v46 = vld [vmem:[#allocation2 + $0x10b] sm:$0x1]  ;;  %v6772_v6 = vcombine.low %v3154_v58, %v3155_v18  ;;  %v1912_v59 = vcombine.high %v1910_v35, %v1910_v35  ;;  %v1926_v14 = vrot.slane %v1910_v35, %v18477_v8 }
 0x199   : > { %23164 = vst [vmem:[#allocation111_spill] sm:$0xff] %v19689_v20  ;;  %2863 = vst.msk [vmem:[#allocation2 + $0x112] sm:$0x1] %vm2310_vm1, %v1894_v61  ;;  %v6762_v1 = vrot.slane %v6754_v9, %v18477_v8  ;;  %v6773_v5 = vcombine.low %v3156_v29, %v3157_v4  ;;  %v6774_v7 = vcombine.low %v3158_v42, %v3159_v46  ;;  %v3163_v43 = vld [vmem:[#allocation2 + $0x10f] sm:$0x1]  ;;  %v442_v35 = vld [vmem:[%s18482_s29 + $0xf8] sm:$0xff] }
 0x19a   : > { %2867 = vst.msk [vmem:[#allocation2 + $0x116] sm:$0x1] %vm2310_vm1, %v1895_v54  ;;  %v1933_v51 = vrot.slane %v1911_v21, %v18477_v8  ;;  %2868 = vst.msk [vmem:[#allocation2 + $0x117] sm:$0x1] %vm2310_vm1, %v1919_v37  ;;  %v6769_v58 = vrot.slane %v6755_v55, %v18477_v8  ;;  %v19702_v18 = vrot.slane %v6772_v6, %v18477_v8  ;;  %v441_v54 = vld [vmem:[%s18482_s29 + $0xf0] sm:$0xff]  ;;  %s405_s29 = scalar_lea.vmem [#allocation4], %s404_s26 }
 0x19b   : > { %v6820_v61 = vcombine.low %v3162_v49, %v3163_v43  ;;  %v19705_v0 = vrot.slane %v1912_v59, %v18477_v8  ;;  %2872 = vst.msk [vmem:[#allocation2 + $0x11b] sm:$0x1] %vm2310_vm1, %v1926_v14  ;;  %v19711_v4 = vrot.slane %v6773_v5, %v18477_v8  ;;  %v19714_v9 = vrot.slane %v6774_v7, %v18477_v8  ;;  %v3164_v42 = vld [vmem:[#allocation2 + $0x110] sm:$0x1]  ;;  %v3167_v46 = vld [vmem:[#allocation2 + $0x113] sm:$0x1] }
 0x19c   : > { %23165 = vst [vmem:[#allocation112_spill] sm:$0xff] %v19702_v18  ;;  %v1941_v21 = vcombine.high %v1919_v37, %v1919_v37  ;;  %v1942_v55 = vcombine.high %v1926_v14, %v1926_v14  ;;  %2869 = vst.msk [vmem:[#allocation2 + $0x118] sm:$0x1] %vm2310_vm1, %v1933_v51  ;;  %v19717_v29 = vcombine.low %v6762_v1, %v6769_v58  ;;  %v3165_v7 = vld [vmem:[#allocation2 + $0x111] sm:$0x1]  ;;  %s15316_s15 = sshll.u32 %s405_s29, 4  ;;  %s22751_s15 = int_to_ptr.vmem [resolvable:$true] %s15316_s15 }
 0x19d   : > { %23166 = vst [vmem:[#allocation113_spill] sm:$0xff] %v19711_v4  ;;  %23167 = vst [vmem:[#allocation114_spill] sm:$0xff] %v19714_v9  ;;  %v6803_v49 = vcombine.low %v19689_v20, %v19702_v18  ;;  %v6830_v6 = vrot.slane %v6820_v61, %v18477_v8  ;;  %v1943_v59 = vcombine.high %v1933_v51, %v1933_v51  ;;  %v3168_v37 = vld [vmem:[#allocation2 + $0x114] sm:$0x1]  ;;  %s17624_s20 = scalar_lea.vmem %s22751_s15, 16  ;;  %p17631_p0 = scmp.lt.s32.totalorder %s22751_s15, %s17629_s0 }
 0x19e   : > { %23168 = vst [vmem:[#allocation115_spill] sm:$0xff] %v19717_v29  ;;  %2873 = vst.msk [vmem:[#allocation2 + $0x11c] sm:$0x1] %vm2310_vm1, %v19705_v0  ;;  %v6804_v5 = vcombine.low %v19711_v4, %v19714_v9  ;;  %v1945_v1 = vcombine.high %v441_v54, %v441_v54  ;;  %v1952_v43 = vrot.slane %v441_v54, %v18477_v8  ;;  %16453 = vmatprep.mubr.msk.f32.mxu0 %vm5040_vm2, %v19717_v29  ;;  %p17625_p11 = scmp.ne.s32.totalorder %s22751_s15, %s17624_s20 }
 0x19f   : > { %v3169_v14 = vld [vmem:[#allocation2 + $0x115] sm:$0x1]  ;;  %2870 = vst.msk [vmem:[#allocation2 + $0x119] sm:$0x1] %vm2310_vm1, %v1941_v21  ;;  %2874 = vst.msk [vmem:[#allocation2 + $0x11d] sm:$0x1] %vm2310_vm1, %v1942_v55  ;;  %v1994_v58 = vcombine.high %v442_v35, %v442_v35  ;;  %v6811_v51 = vrot.slane %v6803_v49, %v18477_v8  ;;  %v6821_v61 = vcombine.low %v3164_v42, %v3165_v7 }
 0x1a0   : > { %v6823_v18 = vcombine.low %v3168_v37, %v3169_v14  ;;  %2871 = vst.msk [vmem:[#allocation2 + $0x11a] sm:$0x1] %vm2310_vm1, %v1943_v59  ;;  %v2001_v9 = vrot.slane %v442_v35, %v18477_v8  ;;  %v6818_v4 = vrot.slane %v6804_v5, %v18477_v8  ;;  %v3166_v21 = vld [vmem:[#allocation2 + $0x112] sm:$0x1]  ;;  %v1959_v55 = vrot.slane %v1945_v1, %v18477_v8  ;;  %p17626_p12 = pnand %p17625_p11, %p17797_p5 }
 0x1a1   : > { %v3170_v31 = vld [vmem:[#allocation2 + $0x116] sm:$0x1]  ;;  %v1960_v20 = vcombine.high %v1952_v43, %v1952_v43  ;;  %v1968_v54 = vrot.slane %v1952_v43, %v18477_v8  ;;  %v6822_v32 = vcombine.low %v3166_v21, %v3167_v46  ;;  %v19738_v29 = vrot.slane %v6821_v61, %v18477_v8  ;;  %v3171_v49 = vld [vmem:[#allocation2 + $0x117] sm:$0x1] }
 0x1a2   : > { %v19741_v42 = vrot.slane %v6823_v18, %v18477_v8  ;;  %v2008_v59 = vrot.slane %v1994_v58, %v18477_v8  ;;  %v19744_v35 = vcombine.low %v6811_v51, %v6818_v4  ;;  %v6869_v5 = vcombine.low %v3170_v31, %v3171_v49  ;;  %v3175_v4 = vld [vmem:[#allocation2 + $0x11b] sm:$0x1]  ;;  %p17627_p13 = pneg %p17626_p12 }
 0x1a3   : > { %23169 = vst [vmem:[#allocation116_spill] sm:$0xff] %v19738_v29  ;;  %v1961_v7 = vcombine.high %v1959_v55, %v1959_v55  ;;  %v1975_v37 = vrot.slane %v1959_v55, %v18477_v8  ;;  %2876 = vst.msk [vmem:[#allocation2 + $0x121] sm:$0x1] %vm2310_vm1, %v1968_v54  ;;  %v19749_v14 = vrot.slane %v6822_v32, %v18477_v8  ;;  %v3172_v1 = vld [vmem:[#allocation2 + $0x118] sm:$0x1] }
 0x1a4   : > { %23170 = vst [vmem:[#allocation117_spill] sm:$0xff] %v19741_v42  ;;  %23171 = vst [vmem:[#allocation118_spill] sm:$0xff] %v19744_v35  ;;  %v6852_v46 = vcombine.low %v6830_v6, %v19738_v29  ;;  %v1982_v18 = vrot.slane %v1960_v20, %v18477_v8  ;;  %v1990_v43 = vcombine.high %v1968_v54, %v1968_v54  ;;  %16454 = vmatmul.mubr.msk.f32.gmra.mrb[26].mxu0 %vm5040_vm2, %v19744_v35 }
 0x1a5   : > { %23172 = vst [vmem:[#allocation119_spill] sm:$0xff] %v19749_v14  ;;  %v3176_v58 = vld [vmem:[#allocation2 + $0x11c] sm:$0x1]  ;;  %v19756_v31 = vrot.slane %v6869_v5, %v18477_v8  ;;  %v1989_v51 = vrot.slane %v1961_v7, %v18477_v8  ;;  %v1991_v61 = vcombine.high %v1975_v37, %v1975_v37  ;;  %2880 = vst.msk [vmem:[#allocation2 + $0x125] sm:$0x1] %vm2310_vm1, %v1975_v37 }
 0x1a6   : > { %v2009_v32 = vcombine.high %v2001_v9, %v2001_v9  ;;  %v6853_v6 = vcombine.low %v19749_v14, %v19741_v42  ;;  %v6860_v20 = vrot.slane %v6852_v46, %v18477_v8  ;;  %v3173_v21 = vld [vmem:[#allocation2 + $0x119] sm:$0x1]  ;;  %v3177_v55 = vld [vmem:[#allocation2 + $0x11d] sm:$0x1]  ;;  %v1992_v54 = vcombine.high %v1982_v18, %v1982_v18  ;;  %2877 = vst.msk [vmem:[#allocation2 + $0x122] sm:$0x1] %vm2310_vm1, %v1982_v18 }
 0x1a7   : > { %23173 = vst [vmem:[#allocation120_spill] sm:$0xff] %v19756_v31  ;;  %2878 = vst.msk [vmem:[#allocation2 + $0x123] sm:$0x1] %vm2310_vm1, %v1990_v43  ;;  %v2010_v49 = vcombine.high %v2008_v59, %v2008_v59  ;;  %v3174_v5 = vld [vmem:[#allocation2 + $0x11a] sm:$0x1]  ;;  %v6870_v35 = vcombine.low %v3172_v1, %v3173_v21  ;;  %v6872_v7 = vcombine.low %v3176_v58, %v3177_v55 }
 0x1a8   : > { %2881 = vst.msk [vmem:[#allocation2 + $0x126] sm:$0x1] %vm2310_vm1, %v1989_v51  ;;  %2882 = vst.msk [vmem:[#allocation2 + $0x127] sm:$0x1] %vm2310_vm1, %v1991_v61  ;;  %v1993_v37 = vcombine.high %v1989_v51, %v1989_v51  ;;  %v2017_v42 = vrot.slane %v2001_v9, %v18477_v8  ;;  %v6867_v46 = vrot.slane %v6853_v6, %v18477_v8  ;;  %v3180_v14 = vld [vmem:[#allocation2 + $0x120] sm:$0x1] }
 0x1a9   : > { %v6871_v29 = vcombine.low %v3174_v5, %v3175_v4  ;;  %2879 = vst.msk [vmem:[#allocation2 + $0x124] sm:$0x1] %vm2310_vm1, %v1992_v54  ;;  %v2024_v18 = vrot.slane %v2008_v59, %v18477_v8  ;;  %v2031_v43 = vrot.slane %v2009_v32, %v18477_v8  ;;  %v19773_v1 = vrot.slane %v6870_v35, %v18477_v8  ;;  %v17367_v55 = vld [vmem:[#allocation2 + $0x15] sm:$0x1]  ;;  %v17368_v54 = vld [vmem:[#allocation2 + $0x16] sm:$0x1] }
 0x1aa   : > { %v19776_v58 = vrot.slane %v6872_v7, %v18477_v8  ;;  %v19779_v51 = vrot.slane %v2010_v49, %v18477_v8  ;;  %v2039_v9 = vcombine.high %v2017_v42, %v2017_v42  ;;  %2883 = vst.msk [vmem:[#allocation2 + $0x128] sm:$0x1] %vm2310_vm1, %v1993_v37  ;;  %2884 = vst.msk [vmem:[#allocation2 + $0x129] sm:$0x1] %vm2310_vm1, %v2017_v42  ;;  %v3181_v61 = vld [vmem:[#allocation2 + $0x121] sm:$0x1] }
 0x1ab   : > { %23174 = vst [vmem:[#allocation121_spill] sm:$0xff] %v19773_v1  ;;  %v19783_v4 = vcombine.low %v6860_v20, %v6867_v46  ;;  %v19786_v59 = vrot.slane %v6871_v29, %v18477_v8  ;;  %v2040_v32 = vcombine.high %v2024_v18, %v2024_v18  ;;  %v2041_v35 = vcombine.high %v2031_v43, %v2031_v43  ;;  %v17365_v42 = vld [vmem:[#allocation2 + $0x13] sm:$0x1]  ;;  %v17366_v20 = vld [vmem:[#allocation2 + $0x14] sm:$0x1] }
 0x1ac   : > { %23175 = vst [vmem:[#allocation122_spill] sm:$0xff] %v19776_v58  ;;  %2885 = vst.msk [vmem:[#allocation2 + $0x12a] sm:$0x1] %vm2310_vm1, %v2031_v43  ;;  %v6901_v6 = vcombine.low %v19756_v31, %v19773_v1  ;;  %v8238_v21 = vcombine.low %v3180_v14, %v3181_v61  ;;  %v3570_v29 = vcombine.low %v17365_v42, %v17366_v20  ;;  %v17369_v14 = vld [vmem:[#allocation2 + $0x17] sm:$0x1] }
 0x1ad   : > { %23176 = vst [vmem:[#allocation123_spill] sm:$0xff] %v19783_v4  ;;  %23177 = vst [vmem:[#allocation124_spill] sm:$0xff] %v19786_v59  ;;  %v3571_v49 = vcombine.low %v17367_v55, %v17368_v54  ;;  %16456 = vmatprep.mubr.msk.f32.mxu0 %vm5040_vm2, %v19783_v4  ;;  %v6902_v5 = vcombine.low %v19786_v59, %v19776_v58  ;;  %v17370_v7 = vld [vmem:[#allocation2 + $0x18] sm:$0x1]  ;;  %v17371_v46 = vld [vmem:[#allocation2 + $0x19] sm:$0x1]  ;;  %v3652_v1 = vcombine.low %v18669_v39, %v18676_v3 }
 0x1ae   : > { %2888 = vst.msk [vmem:[#allocation2 + $0x12d] sm:$0x1] %vm2310_vm1, %v2024_v18  ;;  %2886 = vst.msk [vmem:[#allocation2 + $0x12b] sm:$0x1] %vm2310_vm1, %v2039_v9  ;;  %v3572_v37 = vcombine.low %v17369_v14, %v17370_v7  ;;  %v17372_v18 = vld [vmem:[#allocation2 + $0x1a] sm:$0x1]  ;;  %v3651_v9 = vcombine.low %v18665_v57, %v18673_v2  ;;  %v6909_v61 = vrot.slane %v6901_v6, %v18477_v8 }
 0x1af   : > { %2889 = vst.msk [vmem:[#allocation2 + $0x12e] sm:$0x1] %vm2310_vm1, %v19779_v51  ;;  %2887 = vst.msk [vmem:[#allocation2 + $0x12c] sm:$0x1] %vm2310_vm1, %v2041_v35  ;;  %v3573_v43 = vcombine.low %v17371_v46, %v17372_v18  ;;  %v3182_v42 = vld [vmem:[#allocation2 + $0x122] sm:$0x1]  ;;  %v8248_v54 = vrot.slane %v8238_v21, %v18477_v8  ;;  %v3580_v35 = vrot.slane %v3570_v29, %v18477_v8 }
 0x1b0   : > { %2890 = vst.msk [vmem:[#allocation2 + $0x12f] sm:$0x1] %vm2310_vm1, %v2040_v32  ;;  %v3183_v20 = vld [vmem:[#allocation2 + $0x123] sm:$0x1]  ;;  %v3185_v55 = vld [vmem:[#allocation2 + $0x125] sm:$0x1]  ;;  %v3587_v32 = vrot.slane %v3571_v49, %v18477_v8  ;;  %v6916_v4 = vrot.slane %v6902_v5, %v18477_v8  ;;  %v3594_v46 = vrot.slane %v3572_v37, %v18477_v8  ;;  %v3659_v21 = vrot.slane %v3651_v9, %v18477_v8 }
 0x1b1   : > { %v3186_v14 = vld [vmem:[#allocation2 + $0x126] sm:$0x1]  ;;  %v3187_v7 = vld [vmem:[#allocation2 + $0x127] sm:$0x1]  ;;  %v8239_v58 = vcombine.low %v3182_v42, %v3183_v20  ;;  %v3601_v57 = vrot.slane %v3573_v43, %v18477_v8  ;;  %v3184_v2 = vld [vmem:[#allocation2 + $0x124] sm:$0x1]  ;;  %v3666_v39 = vrot.slane %v3652_v1, %v18477_v8 }
 0x1b2   : > { %v8241_v6 = vcombine.low %v3186_v14, %v3187_v7  ;;  %v3602_v18 = vcombine.low %v3580_v35, %v3587_v32  ;;  %v19813_v29 = vcombine.low %v6909_v61, %v6916_v4  ;;  %v8240_v49 = vcombine.low %v3184_v2, %v3185_v55  ;;  %v3188_v59 = vld [vmem:[#allocation2 + $0x128] sm:$0x1]  ;;  %v3189_v42 = vld [vmem:[#allocation2 + $0x129] sm:$0x1]  ;;  %v17373_v55 = vld [vmem:[#allocation2 + $0x26] sm:$0x1] }
 0x1b3   : > { %v19816_v5 = vrot.slane %v8239_v58, %v18477_v8  ;;  %v3603_v20 = vcombine.low %v3594_v46, %v3601_v57  ;;  %v3190_v43 = vld [vmem:[#allocation2 + $0x12a] sm:$0x1]  ;;  %v8287_v35 = vcombine.low %v3188_v59, %v3189_v42  ;;  %v17374_v7 = vld [vmem:[#allocation2 + $0x25] sm:$0x1] }
 0x1b4   : > { %23178 = vst [vmem:[#allocation125_spill] sm:$0xff] %v19813_v29  ;;  %v19819_v37 = vrot.slane %v8241_v6, %v18477_v8  ;;  %v3610_v32 = vrot.slane %v3602_v18, %v18477_v8  ;;  %16457 = vmatmul.mubr.msk.f32.gmra.mrb[28].mxu0 %vm5040_vm2, %v19813_v29  ;;  %v19826_v3 = vrot.slane %v8240_v49, %v18477_v8  ;;  %v17375_v18 = vld [vmem:[#allocation2 + $0x27] sm:$0x1]  ;;  %v17376_v49 = vld [vmem:[#allocation2 + $0x28] sm:$0x1] }
 0x1b5   : > { %23179 = vst [vmem:[#allocation126_spill] sm:$0xff] %v19816_v5  ;;  %v3193_v14 = vld [vmem:[#allocation2 + $0x12d] sm:$0x1]  ;;  %v8270_v58 = vcombine.low %v8248_v54, %v19816_v5  ;;  %v3191_v4 = vld [vmem:[#allocation2 + $0x12b] sm:$0x1]  ;;  %v3617_v61 = vrot.slane %v3603_v20, %v18477_v8  ;;  %v3668_v46 = vcombine.low %v17374_v7, %v17373_v55  ;;  %v19831_v1 = vrot.slane %v8287_v35, %v18477_v8 }
 0x1b6   : > { %23180 = vst [vmem:[#allocation127_spill] sm:$0xff] %v19819_v37  ;;  %23181 = vst [vmem:[#allocation128_spill] sm:$0xff] %v19826_v3  ;;  %v3194_v9 = vld [vmem:[#allocation2 + $0x12e] sm:$0x1]  ;;  %v3192_v59 = vld [vmem:[#allocation2 + $0x12c] sm:$0x1]  ;;  %v8288_v2 = vcombine.low %v3190_v43, %v3191_v4  ;;  %v19833_v6 = vcombine.low %v3659_v21, %v3666_v39  ;;  %v3669_v42 = vcombine.low %v17375_v18, %v17376_v49 }
 0x1b7   : > { %v3195_v57 = vld [vmem:[#allocation2 + $0x12f] sm:$0x1]  ;;  %23182 = vst [vmem:[#allocation129_spill] sm:$0xff] %v19831_v1  ;;  %v8271_v54 = vcombine.low %v19826_v3, %v19819_v37  ;;  %v8278_v29 = vrot.slane %v8270_v58, %v18477_v8  ;;  %v8289_v20 = vcombine.low %v3192_v59, %v3193_v14  ;;  %v19841_v7 = vcombine.low %v3610_v32, %v3617_v61  ;;  %v17377_v43 = vld [vmem:[#allocation2 + $0x29] sm:$0x1] }
 0x1b8   : > { %v8290_v5 = vcombine.low %v3194_v9, %v3195_v57  ;;  %v19839_v55 = vrot.slane %v8288_v2, %v18477_v8  ;;  %v17378_v35 = vld [vmem:[#allocation2 + $0x2a] sm:$0x1]  ;;  %v17379_v21 = vld [vmem:[#allocation2 + $0x2b] sm:$0x1]  ;;  %v17380_v39 = vld [vmem:[#allocation2 + $0x2c] sm:$0x1]  ;;  %v3678_v14 = vrot.slane %v3668_v46, %v18477_v8  ;;  %v3685_v9 = vrot.slane %v3669_v42, %v18477_v8 }
 0x1b9   : > { %v3670_v4 = vcombine.low %v17377_v43, %v17378_v35  ;;  %v3671_v31 = vcombine.low %v17379_v21, %v17380_v39  ;;  %v8285_v18 = vrot.slane %v8271_v54, %v18477_v8  ;;  %v19845_v49 = vrot.slane %v8289_v20, %v18477_v8  ;;  %v17381_v54 = vld [vmem:[#allocation2 + $0x2d] sm:$0x1]  ;;  %v17382_v20 = vld [vmem:[#allocation2 + $0x2e] sm:$0x1]  ;;  %v17383_v43 = vld [vmem:[#allocation2 + $0x2f] sm:$0x1] }
 0x1ba   : > { %23183 = vst [vmem:[#allocation130_spill] sm:$0xff] %v19839_v55  ;;  %v19848_v58 = vrot.slane %v8290_v5, %v18477_v8  ;;  %v8319_v32 = vcombine.low %v19831_v1, %v19839_v55  ;;  %v3717_v5 = vcombine.low %v17381_v54, %v17382_v20  ;;  %v17384_v35 = vld [vmem:[#allocation2 + $0x30] sm:$0x1]  ;;  %v3700_v39 = vcombine.low %v3678_v14, %v3685_v9  ;;  %v17385_v42 = vld [vmem:[#allocation2 + $0x31] sm:$0x1] }
 0x1bb   : > { %23184 = vst [vmem:[#allocation131_spill] sm:$0xff] %v19845_v49  ;;  %v3692_v61 = vrot.slane %v3670_v4, %v18477_v8  ;;  %v3699_v59 = vrot.slane %v3671_v31, %v18477_v8  ;;  %v19856_v57 = vcombine.low %v8278_v29, %v8285_v18  ;;  %v3718_v46 = vcombine.low %v17383_v43, %v17384_v35  ;;  %v17386_v37 = vld [vmem:[#allocation2 + $0x32] sm:$0x1]  ;;  %v17387_v29 = vld [vmem:[#allocation2 + $0x33] sm:$0x1] }
 0x1bc   : > { %23185 = vst [vmem:[#allocation132_spill] sm:$0xff] %v19848_v58  ;;  %v8320_v2 = vcombine.low %v19845_v49, %v19848_v58  ;;  %v8327_v21 = vrot.slane %v8319_v32, %v18477_v8  ;;  %v3719_v4 = vcombine.low %v17385_v42, %v17386_v37  ;;  %v17388_v18 = vld [vmem:[#allocation2 + $0x34] sm:$0x1]  ;;  %v3727_v54 = vrot.slane %v3717_v5, %v18477_v8  ;;  %v17389_v9 = vld [vmem:[#allocation2 + $0x37] sm:$0x1] }
 0x1bd   : > { %23186 = vst [vmem:[#allocation133_spill] sm:$0xff] %v19856_v57  ;;  %v3701_v55 = vcombine.low %v3692_v61, %v3699_v59  ;;  %16459 = vmatprep.mubr.msk.f32.mxu0 %vm5040_vm2, %v19856_v57  ;;  %v3720_v58 = vcombine.low %v17387_v29, %v17388_v18  ;;  %v3734_v20 = vrot.slane %v3718_v46, %v18477_v8  ;;  %v17390_v37 = vld [vmem:[#allocation2 + $0x38] sm:$0x1]  ;;  %v17391_v42 = vld [vmem:[#allocation2 + $0x39] sm:$0x1] }
 0x1be   : > { %v8334_v31 = vrot.slane %v8320_v2, %v18477_v8  ;;  %v3708_v43 = vrot.slane %v3700_v39, %v18477_v8  ;;  %v3741_v32 = vrot.slane %v3719_v4, %v18477_v8  ;;  %v3766_v61 = vcombine.low %v17389_v9, %v17390_v37  ;;  %v17392_v29 = vld [vmem:[#allocation2 + $0x3a] sm:$0x1]  ;;  %v17393_v46 = vld [vmem:[#allocation2 + $0x3b] sm:$0x1]  ;;  %v17394_v57 = vld [vmem:[#allocation2 + $0x3c] sm:$0x1] }
 0x1bf   : > { %v3715_v14 = vrot.slane %v3701_v55, %v18477_v8  ;;  %v3748_v2 = vrot.slane %v3720_v58, %v18477_v8  ;;  %v3749_v35 = vcombine.low %v3727_v54, %v3734_v20  ;;  %v3767_v18 = vcombine.low %v17391_v42, %v17392_v29  ;;  %v17395_v49 = vld [vmem:[#allocation2 + $0x3d] sm:$0x1]  ;;  %v17396_v55 = vld [vmem:[#allocation2 + $0x3e] sm:$0x1]  ;;  %v17397_v20 = vld [vmem:[#allocation2 + $0x3f] sm:$0x1] }
 0x1c0   : > { %v19869_v59 = vcombine.low %v8327_v21, %v8334_v31  ;;  %v3768_v39 = vcombine.low %v17393_v46, %v17394_v57  ;;  %v3769_v1 = vcombine.low %v17395_v49, %v17396_v55  ;;  %v3776_v4 = vrot.slane %v3766_v61, %v18477_v8  ;;  %v17399_v9 = vld [vmem:[#allocation2 + $0x41] sm:$0x1]  ;;  %v17400_v37 = vld [vmem:[#allocation2 + $0x42] sm:$0x1]  ;;  %v17403_v29 = vld [vmem:[#allocation2 + $0x49] sm:$0x1] }
 0x1c1   : > { %v19872_v5 = vcombine.low %v3708_v43, %v3715_v14  ;;  %v3750_v21 = vcombine.low %v3741_v32, %v3748_v2  ;;  %v3757_v58 = vrot.slane %v3749_v35, %v18477_v8  ;;  %v3783_v31 = vrot.slane %v3767_v18, %v18477_v8  ;;  %v17398_v43 = vld [vmem:[#allocation2 + $0x40] sm:$0x1]  ;;  %v17401_v35 = vld [vmem:[#allocation2 + $0x43] sm:$0x1]  ;;  %v17404_v18 = vld [vmem:[#allocation2 + $0x4a] sm:$0x1] }
 0x1c2   : > { %23187 = vst [vmem:[#allocation134_spill] sm:$0xff] %v19869_v59  ;;  %16460 = vmatmul.mubr.msk.f32.gmra.mrb[30].mxu0 %vm5040_vm2, %v19869_v59  ;;  %v768_v54 = vcombine.high %v18767_v28, %v18767_v28  ;;  %v3790_v57 = vrot.slane %v3768_v39, %v18477_v8  ;;  %v3797_v49 = vrot.slane %v3769_v1, %v18477_v8  ;;  %v17402_v28 = vld [vmem:[#allocation2 + $0x44] sm:$0x1] }
 0x1c3   : > { %23188 = vst [vmem:[#allocation135_spill] sm:$0xff] %v19872_v5  ;;  %16464 = vmatprep.mubr.msk.f32.mxu0 %vm5040_vm2, %v19841_v7  ;;  %v3815_v14 = vcombine.low %v17397_v20, %v17398_v43  ;;  %v3816_v32 = vcombine.low %v17399_v9, %v17400_v37  ;;  %v3764_v61 = vrot.slane %v3750_v21, %v18477_v8  ;;  %v17405_v20 = vld [vmem:[#allocation2 + $0x4b] sm:$0x1]  ;;  %v17406_v43 = vld [vmem:[#allocation2 + $0x4c] sm:$0x1] }
 0x1c4   : > { %v3798_v2 = vcombine.low %v3776_v4, %v3783_v31  ;;  %2683 = vst.msk [vmem:[#allocation2 + $0x46] sm:$0x1] %vm2310_vm1, %v768_v54  ;;  %v3817_v42 = vcombine.low %v17401_v35, %v17402_v28  ;;  %v3864_v46 = vcombine.low %v17403_v29, %v17404_v18  ;;  %v3799_v39 = vcombine.low %v3790_v57, %v3797_v49  ;;  %v2305_v4 = vld [vmem:[%s23054_s1 + $0x18] sm:$0xf]  ;;  %v17407_v57 = vld [vmem:[#allocation2 + $0x4d] sm:$0x1] }
 0x1c5   : > { %v3825_v1 = vrot.slane %v3815_v14, %v18477_v8  ;;  %v3832_v55 = vrot.slane %v3816_v32, %v18477_v8  ;;  %v3865_v59 = vcombine.low %v17405_v20, %v17406_v43  ;;  %v19894_v21 = vcombine.low %v3757_v58, %v3764_v61  ;;  %v17408_v49 = vld [vmem:[#allocation2 + $0x4e] sm:$0x1]  ;;  %v17409_v9 = vld [vmem:[%s23054_s1 + $0x14] sm:$0xf]  ;;  %v17410_v32 = vld [vmem:[#allocation2 + $0x4f] sm:$0x1] }
 0x1c6   : > { %16465 = vmatmul.mubr.msk.f32.vlgmr.msra.gmra.mrb[0].mxu0 %vm5040_vm2, %v19833_v6  ;;  %v3806_v31 = vrot.slane %v3798_v2, %v18477_v8  ;;  %v19898_v54 = vrot.slane %v3817_v42, %v18477_v8  ;;  %v3866_v14 = vcombine.low %v17407_v57, %v17408_v49  ;;  %v3813_v58 = vrot.slane %v3799_v39, %v18477_v8  ;;  %v17411_v61 = vld [vmem:[#allocation2 + $0x50] sm:$0x1] }
 0x1c7   : > { %23189 = vst [vmem:[#allocation136_spill] sm:$0xff] %v19894_v21  ;;  %16513 = vmatpush3.msk.msra.mxu0 %vm5105_vm0, %v17409_v9  ;;  %16467 = vmatprep.mubr.msk.f32.mxu0 %vm5040_vm2, %v19872_v5  ;;  %v3847_v37 = vcombine.low %v3825_v1, %v3832_v55  ;;  %v3867_v2 = vcombine.low %v17410_v32, %v17411_v61  ;;  %v17412_v1 = vld [vmem:[#allocation2 + $0x51] sm:$0x1]  ;;  %v17413_v55 = vld [vmem:[#allocation2 + $0x52] sm:$0x1] }
 0x1c8   : > { %v3874_v35 = vrot.slane %v3864_v46, %v18477_v8  ;;  %v3881_v28 = vrot.slane %v3865_v59, %v18477_v8  ;;  %v3888_v42 = vrot.slane %v3866_v14, %v18477_v8  ;;  %v866_v29 = vcombine.high %v18813_v23, %v18813_v23  ;;  %16562 = vmatprep.subr.msk.mxu0 %vm5105_vm0, %v2305_v4  ;;  %v17414_v46 = vld [vmem:[#allocation2 + $0x53] sm:$0x1]  ;;  %v17415_v23 = vld [vmem:[#allocation2 + $0x54] sm:$0x1]  ;;  %v17416_v4 = vld [vmem:[#allocation2 + $0x55] sm:$0x1] }
 0x1c9   : > { %v19913_v18 = vcombine.low %v3806_v31, %v3813_v58  ;;  %v19916_v20 = vrot.slane %v3847_v37, %v18477_v8  ;;  %v3895_v39 = vrot.slane %v3867_v2, %v18477_v8  ;;  %v3913_v43 = vcombine.low %v17412_v1, %v17413_v55  ;;  %v17417_v31 = vld [vmem:[#allocation2 + $0x56] sm:$0x1]  ;;  %v17418_v14 = vld [vmem:[#allocation2 + $0x5b] sm:$0x1]  ;;  %v17419_v9 = vld [vmem:[#allocation2 + $0x5c] sm:$0x1] }
 0x1ca   : > { %16468 = vmatmul.mubr.msk.f32.gmra.mrb[2].mxu0 %vm5040_vm2, %v19894_v21  ;;  %v3896_v59 = vcombine.low %v3874_v35, %v3881_v28  ;;  %2699 = vst.msk [vmem:[#allocation2 + $0x58] sm:$0x1] %vm2310_vm1, %v866_v29  ;;  %v3914_v57 = vcombine.low %v17414_v46, %v17415_v23  ;;  %v3915_v49 = vcombine.low %v17416_v4, %v17417_v31  ;;  %v17420_v2 = vld [vmem:[#allocation2 + $0x5d] sm:$0x1]  ;;  %v17421_v35 = vld [vmem:[#allocation2 + $0x5e] sm:$0x1] }
 0x1cb   : > { %23190 = vst [vmem:[#allocation137_spill] sm:$0xff] %v19913_v18  ;;  %v3962_v58 = vcombine.low %v17418_v14, %v17419_v9  ;;  %16470 = vmatprep.mubr.msk.f32.mxu0 %vm5040_vm2, %v19913_v18  ;;  %v19924_v37 = vld [vmem:[#allocation2 + $0x46] sm:$0x1]  ;;  %v3897_v32 = vcombine.low %v3888_v42, %v3895_v39  ;;  %v3923_v61 = vrot.slane %v3913_v43, %v18477_v8  ;;  %v17422_v29 = vld [vmem:[#allocation2 + $0x5f] sm:$0x1] }
 0x1cc   : > { %v3963_v28 = vcombine.low %v17420_v2, %v17421_v35  ;;  %v17423_v1 = vld [vmem:[#allocation2 + $0x60] sm:$0x1]  ;;  %v17424_v46 = vld [vmem:[#allocation2 + $0x45] sm:$0x1]  ;;  %v3904_v4 = vrot.slane %v3896_v59, %v18477_v8  ;;  %v3930_v31 = vrot.slane %v3914_v57, %v18477_v8  ;;  %v19931_v14 = vrot.slane %v3915_v49, %v18477_v8  ;;  %v17425_v43 = vld [vmem:[#allocation2 + $0x61] sm:$0x1] }
 0x1cd   : > { %v3964_v55 = vcombine.low %v17422_v29, %v17423_v1  ;;  %v3818_v23 = vcombine.low %v17424_v46, %v19924_v37  ;;  %v19936_v42 = vld [vmem:[%s23054_s1] sm:$0xf]  ;;  %v3911_v39 = vrot.slane %v3897_v32, %v18477_v8  ;;  %v3972_v35 = vrot.slane %v3962_v58, %v18477_v8  ;;  %v17428_v58 = vld [vmem:[#allocation2 + $0x64] sm:$0x1] }
 0x1ce   : > { %v17426_v9 = vld [vmem:[#allocation2 + $0x62] sm:$0x1]  ;;  %v3979_v29 = vrot.slane %v3963_v28, %v18477_v8  ;;  %16312 = vmatprep.subr.msk.mxu1 %vm5105_vm0, %v19936_v42  ;;  %v3945_v57 = vcombine.low %v3923_v61, %v3930_v31  ;;  %v964_v1 = vcombine.high %v18927_v19, %v18927_v19  ;;  %v17429_v61 = vld [vmem:[#allocation2 + $0x65] sm:$0x1]  ;;  %v17431_v31 = vld [vmem:[#allocation2 + $0x67] sm:$0x1] }
 0x1cf   : > { %v3965_v2 = vcombine.low %v17425_v43, %v17426_v9  ;;  %v3846_v59 = vrot.slane %v3818_v23, %v18477_v8  ;;  %v3986_v49 = vrot.slane %v3964_v55, %v18477_v8  ;;  %v19947_v46 = vcombine.low %v3904_v4, %v3911_v39  ;;  %v17427_v9 = vld [vmem:[#allocation2 + $0x63] sm:$0x1]  ;;  %v17430_v55 = vld [vmem:[#allocation2 + $0x66] sm:$0x1]  ;;  %v17432_v19 = vld [vmem:[#allocation2 + $0x68] sm:$0x1] }
 0x1d0   : > { %v3994_v43 = vcombine.low %v3972_v35, %v3979_v29  ;;  %v4011_v3 = vcombine.low %v17427_v9, %v17428_v58  ;;  %v19952_v26 = vrot.slane %v3945_v57, %v18477_v8  ;;  %2715 = vst.msk [vmem:[#allocation2 + $0x6a] sm:$0x1] %vm2310_vm1, %v964_v1  ;;  %v4012_v23 = vcombine.low %v17429_v61, %v17430_v55  ;;  %v17433_v9 = vld [vmem:[#allocation2 + $0x6d] sm:$0x1]  ;;  %v17435_v58 = vld [vmem:[#allocation2 + $0x57] sm:$0x1] }
 0x1d1   : > { %23191 = vst [vmem:[#allocation138_spill] sm:$0xff] %v19947_v46  ;;  %v3993_v32 = vrot.slane %v3965_v2, %v18477_v8  ;;  %v3848_v28 = vcombine.low %v19898_v54, %v3846_v59  ;;  %v4013_v4 = vcombine.low %v17431_v31, %v17432_v19  ;;  %v19955_v39 = vld [vmem:[#allocation2 + $0x58] sm:$0x1]  ;;  %v17434_v54 = vld [vmem:[#allocation2 + $0x6e] sm:$0x1] }
 0x1d2   : > { %v4002_v35 = vrot.slane %v3994_v43, %v18477_v8  ;;  %v4021_v29 = vrot.slane %v4011_v3, %v18477_v8  ;;  %v4060_v59 = vcombine.low %v17433_v9, %v17434_v54  ;;  %v3916_v1 = vcombine.low %v17435_v58, %v19955_v39  ;;  %v17438_v19 = vld [vmem:[#allocation2 + $0x71] sm:$0x1]  ;;  %v17439_v3 = vld [vmem:[#allocation2 + $0x72] sm:$0x1]  ;;  %v17441_v9 = vld [vmem:[#allocation2 + $0x74] sm:$0x1] }
 0x1d3   : > { %v3995_v2 = vcombine.low %v3986_v49, %v3993_v32  ;;  %v3862_v57 = vrot.slane %v3848_v28, %v18477_v8  ;;  %v4028_v61 = vrot.slane %v4012_v23, %v18477_v8  ;;  %v19963_v55 = vrot.slane %v4013_v4, %v18477_v8  ;;  %v17436_v49 = vld [vmem:[#allocation2 + $0x6f] sm:$0x1]  ;;  %v17437_v32 = vld [vmem:[#allocation2 + $0x70] sm:$0x1] }
 0x1d4   : > { %v4061_v43 = vcombine.low %v17436_v49, %v17437_v32  ;;  %v4062_v62 = vcombine.low %v17438_v19, %v17439_v3  ;;  %v4063_v54 = vcombine.low %v17440_v22, %v17441_v9  ;;  %v3944_v58 = vrot.slane %v3916_v1, %v18477_v8  ;;  %v17447_v9 = vld [vmem:[#allocation2 + $0x7a] sm:$0x1] }
 0x1d5   : > { %v4009_v31 = vrot.slane %v3995_v2, %v18477_v8  ;;  %v19967_v28 = vcombine.low %v19916_v20, %v3862_v57  ;;  %v4043_v23 = vcombine.low %v4021_v29, %v4028_v61  ;;  %v4070_v4 = vrot.slane %v4060_v59, %v18477_v8  ;;  %v17442_v59 = vld [vmem:[#allocation2 + $0x75] sm:$0x1] }
 0x1d6   : > { %v4077_v49 = vrot.slane %v4061_v43, %v18477_v8  ;;  %v4084_v32 = vrot.slane %v4062_v62, %v18477_v8  ;;  %v4091_v19 = vrot.slane %v4063_v54, %v18477_v8  ;;  %v3946_v22 = vcombine.low %v19931_v14, %v3944_v58  ;;  %v17445_v43 = vld [vmem:[#allocation2 + $0x78] sm:$0x1]  ;;  %v17446_v14 = vld [vmem:[#allocation2 + $0x79] sm:$0x1] }
 0x1d7   : > { %23192 = vst [vmem:[#allocation139_spill] sm:$0xff] %v19967_v28  ;;  %v19973_v2 = vcombine.low %v4002_v35, %v4009_v31  ;;  %16471 = vmatmul.mubr.msk.f32.gmra.mrb[4].mxu0 %vm5040_vm2, %v19967_v28  ;;  %v19982_v20 = vrot.slane %v4043_v23, %v18477_v8  ;;  %v1062_v29 = vcombine.high %v18982_v63, %v18982_v63  ;;  %v17443_v35 = vld [vmem:[#allocation2 + $0x76] sm:$0x1]  ;;  %v19988_v62 = vld [vmem:[#allocation2 + $0x6a] sm:$0x1] }
 0x1d8   : > { %v4109_v57 = vcombine.low %v17442_v59, %v17443_v35  ;;  %16473 = vmatprep.mubr.msk.f32.mxu0 %vm5040_vm2, %v19947_v46  ;;  %23194 = vst [vmem:[#allocation141_spill] sm:$0xff] %v19988_v62  ;;  %v4092_v1 = vcombine.low %v4070_v4, %v4077_v49  ;;  %v4093_v61 = vcombine.low %v4084_v32, %v4091_v19  ;;  %v17444_v31 = vld [vmem:[#allocation2 + $0x77] sm:$0x1]  ;;  %v17448_v23 = vld [vmem:[#allocation2 + $0x69] sm:$0x1] }
 0x1d9   : > { %23193 = vst [vmem:[#allocation140_spill] sm:$0xff] %v19973_v2  ;;  %v4110_v3 = vcombine.low %v17444_v31, %v17445_v43  ;;  %v4111_v54 = vcombine.low %v17446_v14, %v17447_v9  ;;  %v3960_v58 = vrot.slane %v3946_v22, %v18477_v8  ;;  %v4014_v63 = vcombine.low %v17448_v23, %v19988_v62  ;;  %v17449_v35 = vld [vmem:[#allocation2 + $0x2] sm:$0x1]  ;;  %v17451_v43 = vld [vmem:[#allocation2 + $0x4] sm:$0x1] }
 0x1da   : > { %2731 = vst.msk [vmem:[#allocation2 + $0x7c] sm:$0x1] %vm2310_vm1, %v1062_v29  ;;  %v4119_v59 = vrot.slane %v4109_v57, %v18477_v8  ;;  %v3472_v50 = vcombine.low %v19971_v16, %v17449_v35  ;;  %v4100_v4 = vrot.slane %v4092_v1, %v18477_v8  ;;  %v4107_v49 = vrot.slane %v4093_v61, %v18477_v8  ;;  %v17450_v29 = vld [vmem:[#allocation2 + $0x3] sm:$0x1]  ;;  %v17452_v14 = vld [vmem:[#allocation2 + $0x5] sm:$0x1] }
 0x1db   : > { %v4126_v32 = vrot.slane %v4110_v3, %v18477_v8  ;;  %v19999_v19 = vrot.slane %v4111_v54, %v18477_v8  ;;  %v20002_v22 = vcombine.low %v19952_v26, %v3960_v58  ;;  %v4042_v31 = vrot.slane %v4014_v63, %v18477_v8  ;;  %v17453_v9 = vld [vmem:[#allocation2 + $0x6] sm:$0x1]  ;;  %v17454_v61 = vld [vmem:[#allocation2 + $0x7] sm:$0x1] }
 0x1dc   : > { %v3473_v57 = vcombine.low %v17450_v29, %v17451_v43  ;;  %v3474_v23 = vcombine.low %v17452_v14, %v17453_v9  ;;  %v20005_v35 = vcombine.low %v4100_v4, %v4107_v49  ;;  %v3475_v3 = vcombine.low %v17454_v61, %v17455_v53  ;;  %v17456_v29 = vld [vmem:[#allocation2 + $0xb] sm:$0x1]  ;;  %v17457_v43 = vld [vmem:[#allocation2 + $0xc] sm:$0x1]  ;;  %v17458_v53 = vld [vmem:[#allocation2 + $0xd] sm:$0x1] }
 0x1dd   : > { %23195 = vst [vmem:[#allocation142_spill] sm:$0xff] %v20002_v22  ;;  %v4141_v1 = vcombine.low %v4119_v59, %v4126_v32  ;;  %v3482_v54 = vrot.slane %v3472_v50, %v18477_v8  ;;  %16474 = vmatmul.mubr.msk.f32.gmra.mrb[6].mxu0 %vm5040_vm2, %v20002_v22  ;;  %v4044_v26 = vcombine.low %v19963_v55, %v4042_v31  ;;  %v17459_v4 = vld [vmem:[#allocation2 + $0xe] sm:$0x1]  ;;  %v17460_v32 = vld [vmem:[#allocation2 + $0xf] sm:$0x1] }
 0x1de   : > { %23196 = vst [vmem:[#allocation143_spill] sm:$0xff] %v20005_v35  ;;  %v3489_v58 = vrot.slane %v3473_v57, %v18477_v8  ;;  %v3496_v63 = vrot.slane %v3474_v23, %v18477_v8  ;;  %v3522_v14 = vcombine.low %v17456_v29, %v17457_v43  ;;  %16476 = vmatprep.mubr.msk.f32.mxu0 %vm5040_vm2, %v19973_v2  ;;  %v17461_v55 = vld [vmem:[#allocation2 + $0x10] sm:$0x1] }
 0x1df   : > { %v20016_v59 = vrot.slane %v4141_v1, %v18477_v8  ;;  %v3503_v50 = vrot.slane %v3475_v3, %v18477_v8  ;;  %v3523_v49 = vcombine.low %v17458_v53, %v17459_v4  ;;  %v3524_v31 = vcombine.low %v17460_v32, %v17461_v55  ;;  %v17462_v4 = vld [vmem:[#allocation2 + $0x7f] sm:$0x1] }
 0x1e0   : > { %v4058_v57 = vrot.slane %v4044_v26, %v18477_v8  ;;  %v3504_v9 = vcombine.low %v3482_v54, %v3489_v58  ;;  %v23197_v23 = vcombine.low %v18512_v33, %v18514_v34  ;;  %v3538_v29 = vrot.slane %v3522_v14, %v18477_v8  ;;  %v17464_v54 = vld [vmem:[#allocation2 + $0x7b] sm:$0x1] }
 0x1e1   : > { %v20025_v1 = vld [vmem:[#allocation2 + $0x7c] sm:$0x1]  ;;  %v3505_v43 = vcombine.low %v3496_v63, %v3503_v50  ;;  %v3545_v3 = vrot.slane %v3523_v49, %v18477_v8  ;;  %v3552_v53 = vrot.slane %v3524_v31, %v18477_v8  ;;  %v4158_v32 = vcombine.low %v17462_v4, %v17463_v10  ;;  %v17465_v63 = vld [vmem:[#allocation2 + $0x81] sm:$0x1]  ;;  %v17466_v50 = vld [vmem:[#allocation2 + $0x82] sm:$0x1] }
 0x1e2   : > { %v3531_v61 = vrot.slane %v23197_v23, %v18477_v8  ;;  %v20030_v26 = vcombine.low %v19982_v20, %v4058_v57  ;;  %v4112_v58 = vcombine.low %v17464_v54, %v20025_v1  ;;  %v3512_v33 = vrot.slane %v3504_v9, %v18477_v8  ;;  %v17467_v23 = vld [vmem:[#allocation2 + $0x83] sm:$0x1]  ;;  %v17468_v31 = vld [vmem:[#allocation2 + $0x84] sm:$0x1]  ;;  %v17469_v57 = vld [vmem:[#allocation2 + $0x85] sm:$0x1] }
 0x1e3   : > { %v3519_v14 = vrot.slane %v3505_v43, %v18477_v8  ;;  %v3554_v55 = vcombine.low %v3545_v3, %v3552_v53  ;;  %v4159_v49 = vcombine.low %v17465_v63, %v17466_v50  ;;  %v4160_v62 = vcombine.low %v17467_v23, %v17468_v31  ;;  %v17470_v4 = vld [vmem:[#allocation2 + $0x86] sm:$0x1]  ;;  %v17471_v63 = vld [vmem:[#allocation2 + $0x87] sm:$0x1]  ;;  %v17472_v50 = vld [vmem:[#allocation2 + $0x88] sm:$0x1] }
 0x1e4   : > { %23198 = vst [vmem:[#allocation144_spill] sm:$0xff] %v20030_v26  ;;  %v3553_v34 = vcombine.low %v3531_v61, %v3538_v29  ;;  %16477 = vmatmul.mubr.msk.f32.gmra.mrb[8].mxu0 %vm5040_vm2, %v20030_v26  ;;  %v4140_v10 = vrot.slane %v4112_v58, %v18477_v8  ;;  %v4161_v9 = vcombine.low %v17469_v57, %v17470_v4  ;;  %v17476_v57 = vld [vmem:[#allocation2 + $0x92] sm:$0x1] }
 0x1e5   : > { %v4168_v61 = vrot.slane %v4158_v32, %v18477_v8  ;;  %16479 = vmatprep.mubr.msk.f32.mxu0 %vm5040_vm2, %v20005_v35  ;;  %v3520_v29 = vcombine.low %v3512_v33, %v3519_v14  ;;  %v3568_v43 = vrot.slane %v3554_v55, %v18477_v8  ;;  %v4175_v3 = vrot.slane %v4159_v49, %v18477_v8  ;;  %v17473_v14 = vld [vmem:[#allocation2 + $0x89] sm:$0x1]  ;;  %v17474_v55 = vld [vmem:[#allocation2 + $0x8a] sm:$0x1] }
 0x1e6   : > { %v3561_v20 = vrot.slane %v3553_v34, %v18477_v8  ;;  %v4182_v53 = vrot.slane %v4160_v62, %v18477_v8  ;;  %v4142_v54 = vcombine.low %v19999_v19, %v4140_v10  ;;  %v4189_v58 = vrot.slane %v4161_v9, %v18477_v8  ;;  %v17475_v10 = vld [vmem:[#allocation2 + $0x91] sm:$0x1]  ;;  %v17477_v9 = vld [vmem:[#allocation2 + $0x8b] sm:$0x1] }
 0x1e7   : > { %v1160_v34 = vcombine.high %v19062_v17, %v19062_v17  ;;  %v4207_v32 = vcombine.low %v17471_v63, %v17472_v50  ;;  %16264 = vmatprep.mubr.msk.f32.mxu1 %vm5040_vm2, %v3520_v29  ;;  %v4190_v33 = vcombine.low %v4168_v61, %v4175_v3  ;;  %v4208_v31 = vcombine.low %v17473_v14, %v17474_v55  ;;  %v17480_v3 = vld [vmem:[#allocation2 + $0x94] sm:$0x1]  ;;  %v17482_v63 = vld [vmem:[#allocation2 + $0x96] sm:$0x1] }
 0x1e8   : > { %v3569_v23 = vcombine.low %v3561_v20, %v3568_v43  ;;  %v4156_v49 = vrot.slane %v4142_v54, %v18477_v8  ;;  %v4191_v62 = vcombine.low %v4182_v53, %v4189_v58  ;;  %v4256_v17 = vcombine.low %v17475_v10, %v17476_v57  ;;  %v17478_v20 = vld [vmem:[#allocation2 + $0x8c] sm:$0x1]  ;;  %v17479_v43 = vld [vmem:[#allocation2 + $0x93] sm:$0x1]  ;;  %v17486_v10 = vld [vmem:[#allocation2 + $0x9a] sm:$0x1] }
 0x1e9   : > { %2747 = vst.msk [vmem:[#allocation2 + $0x8e] sm:$0x1] %vm2310_vm1, %v1160_v34  ;;  %v4217_v19 = vrot.slane %v4207_v32, %v18477_v8  ;;  %v4198_v4 = vrot.slane %v4190_v33, %v18477_v8  ;;  %v4209_v61 = vcombine.low %v17477_v9, %v17478_v20  ;;  %v4224_v29 = vrot.slane %v4208_v31, %v18477_v8  ;;  %v17481_v34 = vld [vmem:[#allocation2 + $0x95] sm:$0x1]  ;;  %v17483_v32 = vld [vmem:[#allocation2 + $0x97] sm:$0x1] }
 0x1ea   : > { %16265 = vmatmul.mubr.msk.f32.vlgmr.msra.gmra.mrb[0].mxu1 %vm5040_vm2, %v3569_v23  ;;  %v4257_v54 = vcombine.low %v17479_v43, %v17480_v3  ;;  %v20057_v53 = vcombine.low %v20016_v59, %v4156_v49  ;;  %v4205_v58 = vrot.slane %v4191_v62, %v18477_v8  ;;  %v4258_v50 = vcombine.low %v17481_v34, %v17482_v63  ;;  %v17484_v23 = vld [vmem:[#allocation2 + $0x98] sm:$0x1]  ;;  %v17488_v9 = vld [vmem:[#allocation2 + $0x9c] sm:$0x1]  ;;  %v17490_v43 = vld [vmem:[#allocation2 + $0xa4] sm:$0x1] }
 0x1eb   : > { %16267 = vmatprep.mubr.msk.f32.mxu1 %vm5040_vm2, %v19841_v7  ;;  %v4259_v33 = vcombine.low %v17483_v32, %v17484_v23  ;;  %v4239_v14 = vcombine.low %v4217_v19, %v4224_v29  ;;  %v4266_v55 = vrot.slane %v4256_v17, %v18477_v8  ;;  %v1258_v59 = vcombine.high %v19140_v12, %v19140_v12  ;;  %v17485_v19 = vld [vmem:[#allocation2 + $0x99] sm:$0x1]  ;;  %v17492_v34 = vld [vmem:[#allocation2 + $0x9e] sm:$0x1]  ;;  %v17493_v32 = vld [vmem:[#allocation2 + $0xa5] sm:$0x1] }
 0x1ec   : > { %23199 = vst [vmem:[#allocation145_spill] sm:$0xff] %v20057_v53  ;;  %v4273_v31 = vrot.slane %v4257_v54, %v18477_v8  ;;  %16313 = vmatpush3.msk.msra.mxu1 %vm5105_vm0, %v19936_v42  ;;  %16480 = vmatmul.mubr.msk.f32.gmra.mrb[10].mxu0 %vm5040_vm2, %v20057_v53  ;;  %v20070_v7 = vcombine.low %v4198_v4, %v4205_v58  ;;  %v17487_v42 = vld [vmem:[#allocation2 + $0x9b] sm:$0x1]  ;;  %v17491_v58 = vld [vmem:[#allocation2 + $0x9d] sm:$0x1] }
 0x1ed   : > { %v4280_v49 = vrot.slane %v4258_v50, %v18477_v8  ;;  %v4287_v62 = vrot.slane %v4259_v33, %v18477_v8  ;;  %v4305_v57 = vcombine.low %v17485_v19, %v17486_v10  ;;  %v20075_v17 = vrot.slane %v4209_v61, %v18477_v8  ;;  %2763 = vst.msk [vmem:[#allocation2 + $0xa0] sm:$0x1] %vm2310_vm1, %v1258_v59  ;;  %v17489_v61 = vld [vmem:[#allocation2 + $0xa3] sm:$0x1]  ;;  %v17494_v23 = vld [vmem:[#allocation2 + $0xa6] sm:$0x1] }
 0x1ee   : > { %23200 = vst [vmem:[#allocation146_spill] sm:$0xff] %v20070_v7  ;;  %16268 = vmatmul.mubr.msk.f32.gmra.mrb[2].mxu1 %vm5040_vm2, %v19833_v6  ;;  %v4288_v12 = vcombine.low %v4266_v55, %v4273_v31  ;;  %v4306_v4 = vcombine.low %v17487_v42, %v17488_v9  ;;  %16482 = vmatprep.mubr.msk.f32.mxu0 %vm5040_vm2, %v20070_v7  ;;  %v20094_v55 = vld [vmem:[%s23054_s1 + $0x8] sm:$0xf]  ;;  %v17496_v31 = vld [vmem:[#allocation2 + $0x8d] sm:$0x1] }
 0x1ef   : > { %v4289_v20 = vcombine.low %v4280_v49, %v4287_v62  ;;  %v4315_v29 = vrot.slane %v4305_v57, %v18477_v8  ;;  %16270 = vmatprep.mubr.msk.f32.mxu1 %vm5040_vm2, %v19872_v5  ;;  %v4354_v3 = vcombine.low %v17489_v61, %v17490_v43  ;;  %v20088_v6 = vrot.slane %v4239_v14, %v18477_v8  ;;  %v17497_v49 = vld [vmem:[#allocation2 + $0xa7] sm:$0x1]  ;;  %v17498_v62 = vld [vmem:[#allocation2 + $0xa8] sm:$0x1]  ;;  %v17499_v10 = vld [vmem:[#allocation2 + $0xa9] sm:$0x1] }
 0x1f0   : > { %v20085_v54 = vld [vmem:[#allocation2 + $0x8e] sm:$0x1]  ;;  %v4307_v63 = vcombine.low %v17491_v58, %v17492_v34  ;;  %v4322_v50 = vrot.slane %v4306_v4, %v18477_v8  ;;  %v4355_v33 = vcombine.low %v17493_v32, %v17494_v23  ;;  %16935 = vmatprep.subr.msk.mxu1 %vm5105_vm0, %v20094_v55  ;;  %v4296_v59 = vrot.slane %v4288_v12, %v18477_v8  ;;  %v17500_v57 = vld [vmem:[#allocation2 + $0xaa] sm:$0x1]  ;;  %v23325_v5 = vld [vmem:[#allocation80_spill] sm:$0xff] }
 0x1f1   : > { %v4210_v14 = vcombine.low %v17496_v31, %v20085_v54  ;;  %v4356_v19 = vcombine.low %v17497_v49, %v17498_v62  ;;  %v4357_v42 = vcombine.low %v17499_v10, %v17500_v57  ;;  %v4303_v9 = vrot.slane %v4289_v20, %v18477_v8  ;;  %v17503_v49 = vld [vmem:[#allocation2 + $0xad] sm:$0x1]  ;;  %v17506_v10 = vld [vmem:[#allocation2 + $0xb0] sm:$0x1] }
 0x1f2   : > { %16271 = vmatmul.mubr.msk.f32.gmra.mrb[4].mxu1 %vm5040_vm2, %v19894_v21  ;;  %v4364_v4 = vrot.slane %v4354_v3, %v18477_v8  ;;  %v4371_v61 = vrot.slane %v4355_v33, %v18477_v8  ;;  %v1356_v43 = vcombine.high %v19228_v52, %v19228_v52  ;;  %v4337_v58 = vcombine.low %v4315_v29, %v4322_v50  ;;  %v17501_v3 = vld [vmem:[#allocation2 + $0xab] sm:$0x1]  ;;  %v17502_v33 = vld [vmem:[#allocation2 + $0xac] sm:$0x1]  ;;  %v17504_v52 = vld [vmem:[#allocation2 + $0xae] sm:$0x1] }
 0x1f3   : > { %v4238_v12 = vrot.slane %v4210_v14, %v18477_v8  ;;  %v4378_v34 = vrot.slane %v4356_v19, %v18477_v8  ;;  %v4385_v32 = vrot.slane %v4357_v42, %v18477_v8  ;;  %16273 = vmatprep.mubr.msk.f32.mxu1 %vm5040_vm2, %v19913_v18  ;;  %v4329_v20 = vrot.slane %v4307_v63, %v18477_v8  ;;  %v17505_v19 = vld [vmem:[#allocation2 + $0xaf] sm:$0x1]  ;;  %v17507_v42 = vld [vmem:[#allocation2 + $0xb5] sm:$0x1]  ;;  %v17508_v18 = vld [vmem:[#allocation2 + $0xb6] sm:$0x1] }
 0x1f4   : > { %v4386_v23 = vcombine.low %v4364_v4, %v4371_v61  ;;  %2779 = vst.msk [vmem:[#allocation2 + $0xb2] sm:$0x1] %vm2310_vm1, %v1356_v43  ;;  %v4403_v31 = vcombine.low %v17501_v3, %v17502_v33  ;;  %v4404_v62 = vcombine.low %v17503_v49, %v17504_v52  ;;  %v20115_v50 = vld [vmem:[#allocation2 + $0xa0] sm:$0x1]  ;;  %v4405_v57 = vcombine.low %v17505_v19, %v17506_v10  ;;  %v17509_v61 = vld [vmem:[#allocation2 + $0x9f] sm:$0x1] }
 0x1f5   : > { %v4240_v29 = vcombine.low %v20075_v17, %v4238_v12  ;;  %v4387_v14 = vcombine.low %v4378_v34, %v4385_v32  ;;  %v4452_v63 = vcombine.low %v17507_v42, %v17508_v18  ;;  %v20117_v4 = vcombine.low %v4296_v59, %v4303_v9  ;;  %v17510_v32 = vld [vmem:[#allocation2 + $0xb7] sm:$0x1]  ;;  %v17511_v18 = vld [vmem:[#allocation2 + $0xb8] sm:$0x1]  ;;  %v17512_v49 = vld [vmem:[#allocation2 + $0xb9] sm:$0x1] }
 0x1f6   : > { %v4308_v43 = vcombine.low %v17509_v61, %v20115_v50  ;;  %v4413_v3 = vrot.slane %v4403_v31, %v18477_v8  ;;  %v4420_v33 = vrot.slane %v4404_v62, %v18477_v8  ;;  %16274 = vmatmul.mubr.msk.f32.gmra.mrb[6].mxu1 %vm5040_vm2, %v19967_v28  ;;  %v4345_v12 = vrot.slane %v4337_v58, %v18477_v8  ;;  %v17513_v52 = vld [vmem:[#allocation2 + $0xba] sm:$0x1]  ;;  %v17514_v19 = vld [vmem:[#allocation2 + $0xbb] sm:$0x1]  ;;  %v17515_v10 = vld [vmem:[#allocation2 + $0xbc] sm:$0x1] }
 0x1f7   : > { %23201 = vst [vmem:[#allocation147_spill] sm:$0xff] %v20117_v4  ;;  %v4254_v17 = vrot.slane %v4240_v29, %v18477_v8  ;;  %v4394_v34 = vrot.slane %v4386_v23, %v18477_v8  ;;  %v4453_v59 = vcombine.low %v17510_v32, %v17511_v18  ;;  %16276 = vmatprep.mubr.msk.f32.mxu1 %vm5040_vm2, %v19947_v46 }
 0x1f8   : > { %v4336_v9 = vrot.slane %v4308_v43, %v18477_v8  ;;  %v4401_v31 = vrot.slane %v4387_v14, %v18477_v8  ;;  %v4454_v62 = vcombine.low %v17512_v49, %v17513_v52  ;;  %v4455_v29 = vcombine.low %v17514_v19, %v17515_v10 }
 0x1f9   : > { %v20132_v58 = vcombine.low %v20088_v6, %v4254_v17  ;;  %v4427_v23 = vrot.slane %v4405_v57, %v18477_v8  ;;  %v4462_v42 = vrot.slane %v4452_v63, %v18477_v8  ;;  %v4469_v61 = vrot.slane %v4453_v59, %v18477_v8  ;;  %v17516_v63 = vld [vmem:[#allocation2 + $0xbd] sm:$0x1]  ;;  %v17517_v59 = vld [vmem:[#allocation2 + $0xbe] sm:$0x1] }
 0x1fa   : > { %v4338_v32 = vcombine.low %v4329_v20, %v4336_v9  ;;  %v4435_v18 = vcombine.low %v4413_v3, %v4420_v33  ;;  %v4476_v43 = vrot.slane %v4454_v62, %v18477_v8  ;;  %v4483_v14 = vrot.slane %v4455_v29, %v18477_v8  ;;  %16277 = vmatmul.mubr.msk.f32.gmra.mrb[8].mxu1 %vm5040_vm2, %v20002_v22  ;;  %v17518_v3 = vld [vmem:[#allocation2 + $0xbf] sm:$0x1]  ;;  %v17519_v33 = vld [vmem:[#allocation2 + $0xc0] sm:$0x1]  ;;  %v17520_v62 = vld [vmem:[#allocation2 + $0xb1] sm:$0x1] }
 0x1fb   : > { %23202 = vst [vmem:[#allocation148_spill] sm:$0xff] %v20132_v58  ;;  %16483 = vmatmul.mubr.msk.f32.gmra.mrb[12].mxu0 %vm5040_vm2, %v20132_v58  ;;  %v20143_v6 = vld [vmem:[#allocation2 + $0xb2] sm:$0x1]  ;;  %v4484_v17 = vcombine.low %v4462_v42, %v4469_v61  ;;  %v1454_v57 = vcombine.high %v19297_v25, %v19297_v25  ;;  %v4501_v20 = vcombine.low %v17516_v63, %v17517_v59  ;;  %v17521_v61 = vld [vmem:[#allocation2 + $0xc7] sm:$0x1] }
 0x1fc   : > { %v4502_v9 = vcombine.low %v17518_v3, %v17519_v33  ;;  %16485 = vmatprep.mubr.msk.f32.mxu0 %vm5040_vm2, %v20117_v4  ;;  %v4352_v49 = vrot.slane %v4338_v32, %v18477_v8  ;;  %v20150_v52 = vcombine.low %v4394_v34, %v4401_v31  ;;  %v4406_v19 = vcombine.low %v17520_v62, %v20143_v6  ;;  %v17522_v63 = vld [vmem:[#allocation2 + $0xc8] sm:$0x1]  ;;  %v17526_v3 = vld [vmem:[#allocation2 + $0xca] sm:$0x1]  ;;  %v17528_v62 = vld [vmem:[#allocation2 + $0xcc] sm:$0x1] }
 0x1fd   : > { %v4485_v10 = vcombine.low %v4476_v43, %v4483_v14  ;;  %v4492_v29 = vrot.slane %v4484_v17, %v18477_v8  ;;  %2795 = vst.msk [vmem:[#allocation2 + $0xc4] sm:$0x1] %vm2310_vm1, %v1454_v57  ;;  %v20156_v25 = vrot.slane %v4501_v20, %v18477_v8  ;;  %v4550_v59 = vcombine.low %v17521_v61, %v17522_v63  ;;  %v17523_v14 = vld [vmem:[#allocation2 + $0xc1] sm:$0x1]  ;;  %v17524_v17 = vld [vmem:[#allocation2 + $0xc2] sm:$0x1] }
 0x1fe   : > { %23203 = vst [vmem:[#allocation149_spill] sm:$0xff] %v20150_v52  ;;  %v20159_v42 = vrot.slane %v4502_v9, %v18477_v8  ;;  %16279 = vmatprep.mubr.msk.f32.mxu1 %vm5040_vm2, %v19973_v2  ;;  %v20163_v34 = vcombine.low %v4345_v12, %v4352_v49  ;;  %v4434_v31 = vrot.slane %v4406_v19, %v18477_v8  ;;  %v17525_v20 = vld [vmem:[#allocation2 + $0xc9] sm:$0x1]  ;;  %v17527_v9 = vld [vmem:[#allocation2 + $0xcb] sm:$0x1] }
 0x1ff   : > { %v4443_v32 = vrot.slane %v4435_v18, %v18477_v8  ;;  %v4499_v43 = vrot.slane %v4485_v10, %v18477_v8  ;;  %16280 = vmatmul.mubr.msk.f32.gmra.mrb[10].mxu1 %vm5040_vm2, %v20030_v26  ;;  %v4503_v57 = vcombine.low %v17523_v14, %v17524_v17  ;;  %v4551_v33 = vcombine.low %v17525_v20, %v17526_v3  ;;  %v17529_v12 = vld [vmem:[#allocation2 + $0xcd] sm:$0x1]  ;;  %v17530_v49 = vld [vmem:[#allocation2 + $0xce] sm:$0x1]  ;;  %v17540_v26 = vld [vmem:[#allocation2 + $0xdc] sm:$0x1] }
 0x200   : > { %23204 = vst [vmem:[#allocation150_spill] sm:$0xff] %v20163_v34  ;;  %v4552_v61 = vcombine.low %v17527_v9, %v17528_v62  ;;  %v4553_v63 = vcombine.low %v17529_v12, %v17530_v49  ;;  %16282 = vmatprep.mubr.msk.f32.mxu1 %vm5040_vm2, %v20005_v35  ;;  %16486 = vmatmul.mubr.msk.f32.gmra.mrb[14].mxu0 %vm5040_vm2, %v20163_v34  ;;  %v17535_v12 = vld [vmem:[#allocation2 + $0xd3] sm:$0x1]  ;;  %v17536_v49 = vld [vmem:[#allocation2 + $0xd4] sm:$0x1] }
 0x201   : > { %v4436_v18 = vcombine.low %v4427_v23, %v4434_v31  ;;  %v4533_v19 = vcombine.low %v20156_v25, %v20159_v42  ;;  %v4560_v10 = vrot.slane %v4550_v59, %v18477_v8  ;;  %v1552_v14 = vcombine.high %v19405_v27, %v19405_v27  ;;  %16488 = vmatprep.mubr.msk.f32.mxu0 %vm5040_vm2, %v20150_v52  ;;  %v17531_v25 = vld [vmem:[#allocation2 + $0xcf] sm:$0x1]  ;;  %v17532_v42 = vld [vmem:[#allocation2 + $0xd0] sm:$0x1]  ;;  %v17533_v31 = vld [vmem:[#allocation2 + $0xd1] sm:$0x1] }
 0x202   : > { %v20181_v17 = vcombine.low %v4492_v29, %v4499_v43  ;;  %v4567_v20 = vrot.slane %v4551_v33, %v18477_v8  ;;  %v4574_v3 = vrot.slane %v4552_v61, %v18477_v8  ;;  %v4581_v9 = vrot.slane %v4553_v63, %v18477_v8  ;;  %v17534_v27 = vld [vmem:[#allocation2 + $0xd2] sm:$0x1]  ;;  %v17537_v61 = vld [vmem:[#allocation2 + $0xd9] sm:$0x1]  ;;  %v17538_v63 = vld [vmem:[#allocation2 + $0xda] sm:$0x1] }
 0x203   : > { %v4450_v23 = vrot.slane %v4436_v18, %v18477_v8  ;;  %2811 = vst.msk [vmem:[#allocation2 + $0xd6] sm:$0x1] %vm2310_vm1, %v1552_v14  ;;  %v4599_v59 = vcombine.low %v17531_v25, %v17532_v42  ;;  %v4600_v62 = vcombine.low %v17533_v31, %v17534_v27  ;;  %v4601_v29 = vcombine.low %v17535_v12, %v17536_v49  ;;  %v17539_v18 = vld [vmem:[#allocation2 + $0xdb] sm:$0x1]  ;;  %v17542_v12 = vld [vmem:[#allocation2 + $0xdd] sm:$0x1] }
 0x204   : > { %23205 = vst [vmem:[#allocation151_spill] sm:$0xff] %v20181_v17  ;;  %16283 = vmatmul.mubr.msk.f32.gmra.mrb[12].mxu1 %vm5040_vm2, %v20057_v53  ;;  %v4582_v43 = vcombine.low %v4560_v10, %v4567_v20  ;;  %v4583_v33 = vcombine.low %v4574_v3, %v4581_v9  ;;  %v4648_v35 = vcombine.low %v17537_v61, %v17538_v63  ;;  %v20194_v42 = vld [vmem:[#allocation2 + $0xc4] sm:$0x1]  ;;  %v17541_v20 = vld [vmem:[#allocation2 + $0xc3] sm:$0x1] }
 0x205   : > { %v4649_v14 = vcombine.low %v17539_v18, %v17540_v26  ;;  %16285 = vmatprep.mubr.msk.f32.mxu1 %vm5040_vm2, %v20070_v7  ;;  %v20192_v25 = vcombine.low %v4443_v32, %v4450_v23  ;;  %v4525_v31 = vrot.slane %v4503_v57, %v18477_v8  ;;  %v20198_v27 = vrot.slane %v4599_v59, %v18477_v8  ;;  %v17543_v32 = vld [vmem:[#allocation2 + $0xde] sm:$0x1]  ;;  %v17544_v59 = vld [vmem:[#allocation2 + $0xdf] sm:$0x1]  ;;  %v17545_v49 = vld [vmem:[#allocation2 + $0xe0] sm:$0x1] }
 0x206   : > { %v20201_v10 = vrot.slane %v4600_v62, %v18477_v8  ;;  %v4504_v3 = vcombine.low %v17541_v20, %v20194_v42  ;;  %v4590_v26 = vrot.slane %v4582_v43, %v18477_v8  ;;  %v4597_v9 = vrot.slane %v4583_v33, %v18477_v8  ;;  %v17559_v53 = vld [vmem:[#allocation2 + $0xf1] sm:$0x1] }
 0x207   : > { %23206 = vst [vmem:[#allocation152_spill] sm:$0xff] %v20192_v25  ;;  %v4650_v23 = vcombine.low %v17542_v12, %v17543_v32  ;;  %16489 = vmatmul.mubr.msk.f32.gmra.mrb[16].mxu0 %vm5040_vm2, %v20192_v25  ;;  %v4541_v57 = vrot.slane %v4533_v19, %v18477_v8  ;;  %v4651_v61 = vcombine.low %v17544_v59, %v17545_v49  ;;  %v17546_v32 = vld [vmem:[#allocation2 + $0xe1] sm:$0x1]  ;;  %v3197_v22 = vld [vmem:[#allocation2 + $0x131] sm:$0x1] }
 0x208   : > { %v4658_v62 = vrot.slane %v4648_v35, %v18477_v8  ;;  %v4665_v63 = vrot.slane %v4649_v14, %v18477_v8  ;;  %16491 = vmatprep.mubr.msk.f32.mxu0 %vm5040_vm2, %v20181_v17  ;;  %v4532_v43 = vrot.slane %v4504_v3, %v18477_v8  ;;  %v4623_v33 = vrot.slane %v4601_v29, %v18477_v8  ;;  %v17547_v14 = vld [vmem:[#allocation2 + $0xe2] sm:$0x1] }
 0x209   : > { %v4672_v18 = vrot.slane %v4650_v23, %v18477_v8  ;;  %v1650_v20 = vcombine.high %v19464_v15, %v19464_v15  ;;  %v4631_v19 = vcombine.low %v20198_v27, %v20201_v10  ;;  %v4679_v12 = vrot.slane %v4651_v61, %v18477_v8  ;;  %16286 = vmatmul.mubr.msk.f32.gmra.mrb[14].mxu1 %vm5040_vm2, %v20132_v58  ;;  %v17548_v15 = vld [vmem:[#allocation2 + $0xe3] sm:$0x1]  ;;  %v17549_v23 = vld [vmem:[#allocation2 + $0xe4] sm:$0x1]  ;;  %v17550_v27 = vld [vmem:[#allocation2 + $0xeb] sm:$0x1] }
 0x20a   : > { %v4680_v35 = vcombine.low %v4658_v62, %v4665_v63  ;;  %v4697_v59 = vcombine.low %v17546_v32, %v17547_v14  ;;  %v4534_v3 = vcombine.low %v4525_v31, %v4532_v43  ;;  %v20223_v49 = vcombine.low %v4590_v26, %v4597_v9  ;;  %v20225_v29 = vld [vmem:[#allocation2 + $0xd6] sm:$0x1]  ;;  %v17551_v10 = vld [vmem:[#allocation2 + $0xec] sm:$0x1]  ;;  %16288 = vmatprep.mubr.msk.f32.mxu1 %vm5040_vm2, %v20117_v4  ;;  %v17552_v62 = vld [vmem:[#allocation2 + $0xd5] sm:$0x1] }
 0x20b   : > { %2827 = vst.msk [vmem:[#allocation2 + $0xe8] sm:$0x1] %vm2310_vm1, %v1650_v20  ;;  %v4698_v7 = vcombine.low %v17548_v15, %v17549_v23  ;;  %v4746_v61 = vcombine.low %v17550_v27, %v17551_v10  ;;  %v4602_v63 = vcombine.low %v17552_v62, %v20225_v29  ;;  %v4681_v32 = vcombine.low %v4672_v18, %v4679_v12  ;;  %v17553_v31 = vld [vmem:[#allocation2 + $0xe5] sm:$0x1]  ;;  %v17554_v26 = vld [vmem:[#allocation2 + $0xe6] sm:$0x1] }
 0x20c   : > { %23207 = vst [vmem:[#allocation153_spill] sm:$0xff] %v20223_v49  ;;  %v4699_v9 = vcombine.low %v17553_v31, %v17554_v26  ;;  %v4707_v43 = vrot.slane %v4697_v59, %v18477_v8  ;;  %v4548_v20 = vrot.slane %v4534_v3, %v18477_v8  ;;  %v4688_v14 = vrot.slane %v4680_v35, %v18477_v8  ;;  %v17555_v23 = vld [vmem:[#allocation2 + $0xed] sm:$0x1]  ;;  %v17556_v27 = vld [vmem:[#allocation2 + $0xee] sm:$0x1] }
 0x20d   : > { %v4714_v15 = vrot.slane %v4698_v7, %v18477_v8  ;;  %v4747_v10 = vcombine.low %v17555_v23, %v17556_v27  ;;  %v4630_v4 = vrot.slane %v4602_v63, %v18477_v8  ;;  %v4695_v58 = vrot.slane %v4681_v32, %v18477_v8  ;;  %v17557_v62 = vld [vmem:[#allocation2 + $0xef] sm:$0x1]  ;;  %v17558_v18 = vld [vmem:[#allocation2 + $0xf0] sm:$0x1]  ;;  %v17560_v31 = vld [vmem:[#allocation2 + $0xf2] sm:$0x1]  ;;  %16289 = vmatmul.mubr.msk.f32.gmra.mrb[16].mxu1 %vm5040_vm2, %v20163_v34 }
 0x20e   : > { %v4748_v12 = vcombine.low %v17557_v62, %v17558_v18  ;;  %v4749_v26 = vcombine.low %v17559_v53, %v17560_v31  ;;  %v20239_v59 = vcombine.low %v4541_v57, %v4548_v20  ;;  %v4756_v7 = vrot.slane %v4746_v61, %v18477_v8  ;;  %16291 = vmatprep.mubr.msk.f32.mxu1 %vm5040_vm2, %v20150_v52  ;;  %v17561_v20 = vld [vmem:[#allocation2 + $0xf3] sm:$0x1]  ;;  %v17564_v62 = vld [vmem:[#allocation2 + $0xf6] sm:$0x1] }
 0x20f   : > { %v4729_v35 = vcombine.low %v4707_v43, %v4714_v15  ;;  %v4763_v3 = vrot.slane %v4747_v10, %v18477_v8  ;;  %v4632_v63 = vcombine.low %v4623_v33, %v4630_v4  ;;  %v4639_v32 = vrot.slane %v4631_v19, %v18477_v8  ;;  %v17562_v15 = vld [vmem:[#allocation2 + $0xf4] sm:$0x1]  ;;  %v17563_v10 = vld [vmem:[#allocation2 + $0xf5] sm:$0x1] }
 0x210   : > { %23208 = vst [vmem:[#allocation154_spill] sm:$0xff] %v20239_v59  ;;  %v4770_v23 = vrot.slane %v4748_v12, %v18477_v8  ;;  %v4777_v53 = vrot.slane %v4749_v26, %v18477_v8  ;;  %16492 = vmatmul.mubr.msk.f32.gmra.mrb[18].mxu0 %vm5040_vm2, %v20239_v59  ;;  %v20251_v57 = vrot.slane %v4699_v9, %v18477_v8  ;;  %v17565_v9 = vld [vmem:[#allocation2 + $0xf7] sm:$0x1]  ;;  %v17566_v12 = vld [vmem:[#allocation2 + $0xf8] sm:$0x1] }
 0x211   : > { %v4778_v43 = vcombine.low %v4756_v7, %v4763_v3  ;;  %v1748_v61 = vcombine.high %v19557_v36, %v19557_v36  ;;  %v4795_v27 = vcombine.low %v17561_v20, %v17562_v15  ;;  %16494 = vmatprep.mubr.msk.f32.mxu0 %vm5040_vm2, %v20223_v49  ;;  %v4646_v4 = vrot.slane %v4632_v63, %v18477_v8  ;;  %v17567_v36 = vld [vmem:[#allocation2 + $0xe7] sm:$0x1]  ;;  %v17568_v20 = vld [vmem:[#allocation2 + $0xfd] sm:$0x1]  ;;  %v17569_v63 = vld [vmem:[#allocation2 + $0xfe] sm:$0x1] }
 0x212   : > { %v20258_v33 = vld [vmem:[#allocation2 + $0xe8] sm:$0x1]  ;;  %v4779_v19 = vcombine.low %v4770_v23, %v4777_v53  ;;  %v4796_v18 = vcombine.low %v17563_v10, %v17564_v62  ;;  %v4797_v31 = vcombine.low %v17565_v9, %v17566_v12  ;;  %v20260_v26 = vcombine.low %v4688_v14, %v4695_v58  ;;  %16292 = vmatmul.mubr.msk.f32.gmra.mrb[18].mxu1 %vm5040_vm2, %v20192_v25  ;;  %v17571_v10 = vld [vmem:[#allocation2 + $0x100] sm:$0x1]  ;;  %v17572_v9 = vld [vmem:[#allocation2 + $0x101] sm:$0x1] }
 0x213   : > { %v4700_v7 = vcombine.low %v17567_v36, %v20258_v33  ;;  %v4737_v3 = vrot.slane %v4729_v35, %v18477_v8  ;;  %2843 = vst.msk [vmem:[#allocation2 + $0xfa] sm:$0x1] %vm2310_vm1, %v1748_v61  ;;  %v4844_v15 = vcombine.low %v17568_v20, %v17569_v63  ;;  %v20267_v23 = vcombine.low %v4639_v32, %v4646_v4  ;;  %v17570_v61 = vld [vmem:[#allocation2 + $0xff] sm:$0x1]  ;;  %v17573_v12 = vld [vmem:[#allocation2 + $0x102] sm:$0x1] }
 0x214   : > { %23209 = vst [vmem:[#allocation155_spill] sm:$0xff] %v20260_v26  ;;  %v4786_v53 = vrot.slane %v4778_v43, %v18477_v8  ;;  %v4805_v58 = vrot.slane %v4795_v27, %v18477_v8  ;;  %v4812_v14 = vrot.slane %v4796_v18, %v18477_v8  ;;  %16294 = vmatprep.mubr.msk.f32.mxu1 %vm5040_vm2, %v20181_v17  ;;  %v17574_v20 = vld [vmem:[#allocation2 + $0x103] sm:$0x1]  ;;  %v17575_v32 = vld [vmem:[#allocation2 + $0x104] sm:$0x1]  ;;  %v23310_v34 = vld [vmem:[#allocation100_spill] sm:$0xff] }
 0x215   : > { %23210 = vst [vmem:[#allocation156_spill] sm:$0xff] %v20267_v23  ;;  %v4728_v35 = vrot.slane %v4700_v7, %v18477_v8  ;;  %v4845_v62 = vcombine.low %v17570_v61, %v17571_v10  ;;  %v4846_v36 = vcombine.low %v17572_v9, %v17573_v12  ;;  %v4847_v4 = vcombine.low %v17574_v20, %v17575_v32  ;;  %v17577_v12 = vld [vmem:[#allocation2 + $0x106] sm:$0x1]  ;;  %v17578_v20 = vld [vmem:[#allocation2 + $0x107] sm:$0x1] }
 0x216   : > { %16495 = vmatmul.mubr.msk.f32.gmra.mrb[20].mxu0 %vm5040_vm2, %v20267_v23  ;;  %v4793_v43 = vrot.slane %v4779_v19, %v18477_v8  ;;  %v20279_v27 = vrot.slane %v4797_v31, %v18477_v8  ;;  %v4854_v18 = vrot.slane %v4844_v15, %v18477_v8  ;;  %v1846_v7 = vcombine.high %v19631_v38, %v19631_v38  ;;  %v17576_v31 = vld [vmem:[#allocation2 + $0x105] sm:$0x1]  ;;  %v17579_v32 = vld [vmem:[#allocation2 + $0x108] sm:$0x1]  ;;  %v17580_v17 = vld [vmem:[#allocation2 + $0x109] sm:$0x1] }
 0x217   : > { %16497 = vmatprep.mubr.msk.f32.mxu0 %vm5040_vm2, %v20260_v26  ;;  %v4730_v63 = vcombine.low %v20251_v57, %v4728_v35  ;;  %v4861_v61 = vrot.slane %v4845_v62, %v18477_v8  ;;  %v4868_v10 = vrot.slane %v4846_v36, %v18477_v8  ;;  %v4875_v9 = vrot.slane %v4847_v4, %v18477_v8  ;;  %v17581_v25 = vld [vmem:[#allocation2 + $0x10a] sm:$0x1]  ;;  %v17582_v36 = vld [vmem:[#allocation2 + $0x10f] sm:$0x1] }
 0x218   : > { %v4827_v19 = vcombine.low %v4805_v58, %v4812_v14  ;;  %2859 = vst.msk [vmem:[#allocation2 + $0x10c] sm:$0x1] %vm2310_vm1, %v1846_v7  ;;  %v4893_v15 = vcombine.low %v17576_v31, %v17577_v12  ;;  %v4894_v38 = vcombine.low %v17578_v20, %v17579_v32  ;;  %v4895_v52 = vcombine.low %v17580_v17, %v17581_v25  ;;  %v17583_v58 = vld [vmem:[#allocation2 + $0x110] sm:$0x1]  ;;  %v17584_v25 = vld [vmem:[#allocation2 + $0x111] sm:$0x1] }
 0x219   : > { %16295 = vmatmul.mubr.msk.f32.gmra.mrb[20].mxu1 %vm5040_vm2, %v20239_v59  ;;  %v4744_v57 = vrot.slane %v4730_v63, %v18477_v8  ;;  %v4876_v35 = vcombine.low %v4854_v18, %v4861_v61  ;;  %v4877_v62 = vcombine.low %v4868_v10, %v4875_v9  ;;  %v4942_v14 = vcombine.low %v17582_v36, %v17583_v58  ;;  %v17585_v63 = vld [vmem:[#allocation2 + $0x112] sm:$0x1]  ;;  %v17586_v10 = vld [vmem:[#allocation2 + $0xf9] sm:$0x1]  ;;  %v17587_v20 = vld [vmem:[#allocation2 + $0x113] sm:$0x1] }
 0x21a   : > { %16297 = vmatprep.mubr.msk.f32.mxu1 %vm5040_vm2, %v20223_v49  ;;  %v20296_v4 = vcombine.low %v4786_v53, %v4793_v43  ;;  %v20298_v7 = vld [vmem:[#allocation2 + $0xfa] sm:$0x1]  ;;  %v20301_v31 = vrot.slane %v4893_v15, %v18477_v8  ;;  %v20304_v17 = vrot.slane %v4894_v38, %v18477_v8  ;;  %v4943_v18 = vcombine.low %v17584_v25, %v17585_v63  ;;  %v17588_v15 = vld [vmem:[#allocation2 + $0x114] sm:$0x1]  ;;  %v17589_v36 = vld [vmem:[#allocation2 + $0x115] sm:$0x1] }
 0x21b   : > { %v20306_v61 = vcombine.low %v4737_v3, %v4744_v57  ;;  %v4798_v9 = vcombine.low %v17586_v10, %v20298_v7  ;;  %v4884_v12 = vrot.slane %v4876_v35, %v18477_v8  ;;  %v4891_v53 = vrot.slane %v4877_v62, %v18477_v8  ;;  %v17590_v38 = vld [vmem:[#allocation2 + $0x116] sm:$0x1]  ;;  %v17591_v63 = vld [vmem:[#allocation2 + $0x117] sm:$0x1]  ;;  %v17592_v10 = vld [vmem:[#allocation2 + $0x118] sm:$0x1] }
 0x21c   : > { %23211 = vst [vmem:[#allocation157_spill] sm:$0xff] %v20296_v4  ;;  %v4835_v43 = vrot.slane %v4827_v19, %v18477_v8  ;;  %v4944_v32 = vcombine.low %v17587_v20, %v17588_v15  ;;  %v4945_v58 = vcombine.low %v17589_v36, %v17590_v38  ;;  %v4952_v49 = vrot.slane %v4942_v14, %v18477_v8  ;;  %v17593_v15 = vld [vmem:[#allocation2 + $0x119] sm:$0x1]  ;;  %v17594_v36 = vld [vmem:[#allocation2 + $0x11a] sm:$0x1] }
 0x21d   : > { %23212 = vst [vmem:[#allocation158_spill] sm:$0xff] %v20306_v61  ;;  %16298 = vmatmul.mubr.msk.f32.gmra.mrb[22].mxu1 %vm5040_vm2, %v20267_v23  ;;  %16498 = vmatmul.mubr.msk.f32.gmra.mrb[22].mxu0 %vm5040_vm2, %v20306_v61  ;;  %v4826_v3 = vrot.slane %v4798_v9, %v18477_v8  ;;  %v4917_v57 = vrot.slane %v4895_v52, %v18477_v8 }
 0x21e   : > { %v4959_v19 = vrot.slane %v4943_v18, %v18477_v8  ;;  %v1944_v35 = vcombine.high %v19705_v0, %v19705_v0  ;;  %16500 = vmatprep.mubr.msk.f32.mxu0 %vm5040_vm2, %v20296_v4  ;;  %v4925_v62 = vcombine.low %v20301_v31, %v20304_v17  ;;  %v4966_v14 = vrot.slane %v4944_v32, %v18477_v8  ;;  %v17595_v31 = vld [vmem:[#allocation2 + $0x10b] sm:$0x1] }
 0x21f   : > { %v4973_v25 = vrot.slane %v4945_v58, %v18477_v8  ;;  %v4991_v9 = vcombine.low %v17591_v63, %v17592_v10  ;;  %v4828_v52 = vcombine.low %v20279_v27, %v4826_v3  ;;  %v20329_v20 = vcombine.low %v4884_v12, %v4891_v53  ;;  %v20331_v18 = vld [vmem:[#allocation2 + $0x10c] sm:$0x1]  ;;  %16300 = vmatprep.mubr.msk.f32.mxu1 %vm5040_vm2, %v20260_v26  ;;  %v17596_v58 = vld [vmem:[#allocation2 + $0x11b] sm:$0x1]  ;;  %v17597_v63 = vld [vmem:[#allocation2 + $0x11c] sm:$0x1] }
 0x220   : > { %v4974_v0 = vcombine.low %v4952_v49, %v4959_v19  ;;  %2875 = vst.msk [vmem:[#allocation2 + $0x11e] sm:$0x1] %vm2310_vm1, %v1944_v35  ;;  %v4992_v38 = vcombine.low %v17593_v15, %v17594_v36  ;;  %v4896_v17 = vcombine.low %v17595_v31, %v20331_v18  ;;  %v4993_v27 = vcombine.low %v17596_v58, %v17597_v63  ;;  %v17598_v12 = vld [vmem:[#allocation2 + $0x121] sm:$0x1]  ;;  %v17599_v53 = vld [vmem:[#allocation2 + $0x122] sm:$0x1] }
 0x221   : > { %23213 = vst [vmem:[#allocation159_spill] sm:$0xff] %v20329_v20  ;;  %v4975_v32 = vcombine.low %v4966_v14, %v4973_v25  ;;  %v8601_v3 = vcombine.low %v17598_v12, %v17599_v53  ;;  %16301 = vmatmul.mubr.msk.f32.gmra.mrb[24].mxu1 %vm5040_vm2, %v20306_v61  ;;  %v4842_v49 = vrot.slane %v4828_v52, %v18477_v8  ;;  %v17600_v15 = vld [vmem:[#allocation2 + $0x123] sm:$0x1]  ;;  %v17601_v36 = vld [vmem:[#allocation2 + $0x124] sm:$0x1] }
 0x222   : > { %v4982_v19 = vrot.slane %v4974_v0, %v18477_v8  ;;  %v5001_v35 = vrot.slane %v4991_v9, %v18477_v8  ;;  %v5008_v10 = vrot.slane %v4992_v38, %v18477_v8  ;;  %16303 = vmatprep.mubr.msk.f32.mxu1 %vm5040_vm2, %v20296_v4  ;;  %v4924_v14 = vrot.slane %v4896_v17, %v18477_v8  ;;  %v17602_v58 = vld [vmem:[#allocation2 + $0x125] sm:$0x1]  ;;  %v17603_v63 = vld [vmem:[#allocation2 + $0x126] sm:$0x1]  ;;  %v17604_v0 = vld [vmem:[#allocation2 + $0x127] sm:$0x1] }
 0x223   : > { %v4989_v25 = vrot.slane %v4975_v32, %v18477_v8  ;;  %v8602_v31 = vcombine.low %v17600_v15, %v17601_v36  ;;  %v8603_v12 = vcombine.low %v17602_v58, %v17603_v63  ;;  %v20347_v52 = vcombine.low %v4835_v43, %v4842_v49  ;;  %v17605_v53 = vld [vmem:[#allocation2 + $0x128] sm:$0x1]  ;;  %v2892_v36 = vld [vmem:[#allocation2] sm:$0x1]  ;;  %v17606_v58 = vld [vmem:[#allocation2 + $0x11d] sm:$0x1] }
 0x224   : > { %v8604_v9 = vcombine.low %v17604_v0, %v17605_v53  ;;  %v8611_v38 = vrot.slane %v8601_v3, %v18477_v8  ;;  %v4926_v61 = vcombine.low %v4917_v57, %v4924_v14  ;;  %v4933_v4 = vrot.slane %v4925_v62, %v18477_v8  ;;  %v17609_v53 = vld [vmem:[#allocation2 + $0x12b] sm:$0x1] }
 0x225   : > { %23214 = vst [vmem:[#allocation160_spill] sm:$0xff] %v20347_v52  ;;  %v8618_v17 = vrot.slane %v8602_v31, %v18477_v8  ;;  %v8625_v32 = vrot.slane %v8603_v12, %v18477_v8  ;;  %16501 = vmatmul.mubr.msk.f32.gmra.mrb[24].mxu0 %vm5040_vm2, %v20347_v52  ;;  %v5015_v15 = vrot.slane %v4993_v27, %v18477_v8  ;;  %v17607_v12 = vld [vmem:[#allocation2 + $0x129] sm:$0x1] }
 0x226   : > { %v8632_v43 = vrot.slane %v8604_v9, %v18477_v8  ;;  %v2042_v49 = vcombine.high %v19779_v51, %v19779_v51  ;;  %16503 = vmatprep.mubr.msk.f32.mxu0 %vm5040_vm2, %v20329_v20  ;;  %v4940_v57 = vrot.slane %v4926_v61, %v18477_v8  ;;  %v20362_v62 = vcombine.low %v4982_v19, %v4989_v25  ;;  %v17608_v51 = vld [vmem:[#allocation2 + $0x12a] sm:$0x1]  ;;  %v17610_v9 = vld [vmem:[#allocation2 + $0x12c] sm:$0x1] }
 0x227   : > { %v20364_v3 = vld [vmem:[#allocation2 + $0x11e] sm:$0x1]  ;;  %v5023_v14 = vcombine.low %v5001_v35, %v5008_v10  ;;  %v8633_v31 = vcombine.low %v8611_v38, %v8618_v17  ;;  %v8650_v0 = vcombine.low %v17607_v12, %v17608_v51  ;;  %v8651_v26 = vcombine.low %v17609_v53, %v17610_v9  ;;  %16304 = vmatmul.mubr.msk.f32.gmra.mrb[26].mxu1 %vm5040_vm2, %v20347_v52  ;;  %v17611_v17 = vld [vmem:[#allocation2 + $0x12d] sm:$0x1]  ;;  %v2981_v9 = vld [vmem:[#allocation2 + $0x59] sm:$0x1] }
 0x228   : > { %23215 = vst [vmem:[#allocation161_spill] sm:$0xff] %v20362_v62  ;;  %v4994_v27 = vcombine.low %v17606_v58, %v20364_v3  ;;  %v8634_v63 = vcombine.low %v8625_v32, %v8632_v43  ;;  %2891 = vst.msk [vmem:[#allocation2 + $0x130] sm:$0x1] %vm2310_vm1, %v2042_v49  ;;  %v20370_v61 = vcombine.low %v4933_v4, %v4940_v57  ;;  %16306 = vmatprep.mubr.msk.f32.mxu1 %vm5040_vm2, %v20329_v20  ;;  %v17612_v32 = vld [vmem:[#allocation2 + $0x12e] sm:$0x1]  ;;  %v23297_v20 = vld [vmem:[#allocation89_spill] sm:$0xff] }
 0x229   : > { %v5350_v19 = vcombine.low %v2892_v36, %v19971_v16  ;;  %v5031_v10 = vrot.slane %v5023_v14, %v18477_v8  ;;  %v8641_v25 = vrot.slane %v8633_v31, %v18477_v8  ;;  %v8652_v43 = vcombine.low %v17611_v17, %v17612_v32  ;;  %v2963_v14 = vld [vmem:[#allocation2 + $0x47] sm:$0x1]  ;;  %v2999_v17 = vld [vmem:[#allocation2 + $0x6b] sm:$0x1] }
 0x22a   : > { %23216 = vst [vmem:[#allocation162_spill] sm:$0xff] %v20370_v61  ;;  %v5022_v35 = vrot.slane %v4994_v27, %v18477_v8  ;;  %16504 = vmatmul.mubr.msk.f32.gmra.mrb[26].mxu0 %vm5040_vm2, %v20370_v61  ;;  %v8648_v38 = vrot.slane %v8634_v63, %v18477_v8  ;;  %v8660_v16 = vrot.slane %v8650_v0, %v18477_v8  ;;  %v17613_v27 = vld [vmem:[#allocation2 + $0x12f] sm:$0x1] }
 0x22b   : > { %16506 = vmatprep.mubr.msk.f32.mxu0 %vm5040_vm2, %v20362_v62  ;;  %v8667_v49 = vrot.slane %v8651_v26, %v18477_v8  ;;  %16307 = vmatmul.mubr.msk.f32.gmra.mrb[28].mxu1 %vm5040_vm2, %v20370_v61  ;;  %v5360_v36 = vrot.slane %v5350_v19, %v18477_v8  ;;  %v8674_v63 = vrot.slane %v8652_v43, %v18477_v8 }
 0x22c   : > { %v5024_v4 = vcombine.low %v5015_v15, %v5022_v35  ;;  %16309 = vmatprep.mubr.msk.f32.mxu1 %vm5040_vm2, %v20362_v62  ;;  %v20391_v31 = vcombine.low %v8641_v25, %v8648_v38  ;;  %v7369_v51 = vcombine.low %v19924_v37, %v2963_v14  ;;  %v7352_v37 = vcombine.low %v18802_v24, %v18818_v40  ;;  %v3017_v14 = vld [vmem:[#allocation2 + $0x7d] sm:$0x1] }
 0x22d   : > { %v8682_v12 = vcombine.low %v8660_v16, %v8667_v49  ;;  %v5382_v0 = vcombine.low %v5360_v36, %v18523_v44  ;;  %v7353_v25 = vcombine.low %v18810_v11, %v18823_v56  ;;  %v7411_v38 = vcombine.low %v19955_v39, %v2981_v9  ;;  %v23230_v9 = vld [vmem:[#allocation14_spill] sm:$0xff] }
 0x22e   : > { %v5038_v57 = vrot.slane %v5024_v4, %v18477_v8  ;;  %23217 = vst [vmem:[#allocation163_spill] sm:$0xff] %v20391_v31  ;;  %v7376_v44 = vrot.slane %v7369_v51, %v18477_v8  ;;  %v23219_v32 = vcombine.low %v18526_v45, %v18532_v48  ;;  %v7377_v24 = vcombine.low %v18838_v13, %v18848_v41  ;;  %v23221_v48 = vld [vmem:[#allocation141_spill] sm:$0xff]  ;;  %v23223_v13 = vld [vmem:[#allocation20_spill] sm:$0xff]  ;;  %v23228_v51 = vld [vmem:[#allocation23_spill] sm:$0xff] }
 0x22f   : > { %v20393_v15 = vld [vmem:[#allocation2 + $0x130] sm:$0x1]  ;;  %v8690_v35 = vrot.slane %v8682_v12, %v18477_v8  ;;  %v5390_v4 = vrot.slane %v5382_v0, %v18477_v8  ;;  %v7394_v11 = vcombine.low %v18853_v47, %v18868_v60  ;;  %v7360_v39 = vrot.slane %v7352_v37, %v18477_v8  ;;  %v23225_v47 = vld [vmem:[#allocation8_spill] sm:$0xff]  ;;  %v23226_v60 = vld [vmem:[#allocation9_spill] sm:$0xff] }
 0x230   : > { %v20395_v58 = vcombine.low %v5031_v10, %v5038_v57  ;;  %v8653_v26 = vcombine.low %v17613_v27, %v20393_v15  ;;  %v5397_v43 = vrot.slane %v23219_v32, %v18477_v8  ;;  %v7378_v40 = vcombine.low %v18843_v30, %v7376_v44  ;;  %v23222_v57 = vld [vmem:[#allocation10_spill] sm:$0xff]  ;;  %v23224_v30 = vld [vmem:[#allocation19_spill] sm:$0xff]  ;;  %v23232_v37 = vld [vmem:[#allocation24_spill] sm:$0xff] }
 0x231   : > { %v7367_v49 = vrot.slane %v7353_v25, %v18477_v8  ;;  %v7418_v45 = vrot.slane %v7411_v38, %v18477_v8  ;;  %v7453_v36 = vcombine.low %v23221_v48, %v2999_v17  ;;  %v7395_v41 = vcombine.low %v23224_v30, %v23223_v13  ;;  %v23229_v0 = vld [vmem:[#allocation22_spill] sm:$0xff]  ;;  %v17614_v38 = vld [vmem:[%s23054_s1 + $0x18] sm:$0xf]  ;;  %v23242_v30 = vld [vmem:[#allocation35_spill] sm:$0xff] }
 0x232   : > { %23218 = vst [vmem:[#allocation164_spill] sm:$0xff] %v20395_v58  ;;  %16507 = vmatmul.mubr.msk.f32.gmra.mrb[28].mxu0 %vm5040_vm2, %v20395_v58  ;;  %v8681_v53 = vrot.slane %v8653_v26, %v18477_v8  ;;  %16310 = vmatmul.mubr.msk.f32.gmra.mrb[30].mxu1 %vm5040_vm2, %v20395_v58  ;;  %v5398_v56 = vcombine.low %v5390_v4, %v5397_v43  ;;  %v23233_v4 = vld [vmem:[#allocation13_spill] sm:$0xff]  ;;  %v23235_v43 = vld [vmem:[#allocation27_spill] sm:$0xff]  ;;  %v23240_v48 = vld [vmem:[#allocation12_spill] sm:$0xff] }
 0x233   : > { %16509 = vmatprep.mubr.msk.f32.mxu0 %vm5040_vm2, %v20391_v31  ;;  %v23227_v27 = vcombine.low %v23225_v47, %v23226_v60  ;;  %v7385_v26 = vrot.slane %v7377_v24, %v18477_v8  ;;  %v7402_v12 = vrot.slane %v7394_v11, %v18477_v8  ;;  %v7420_v44 = vcombine.low %v23232_v37, %v7418_v45  ;;  %v23234_v32 = vld [vmem:[#allocation29_spill] sm:$0xff]  ;;  %v23237_v11 = vld [vmem:[#allocation28_spill] sm:$0xff]  ;;  %v23292_v58 = vld [vmem:[#allocation82_spill] sm:$0xff] }
 0x234   : > { %v8683_v19 = vcombine.low %v8674_v63, %v8681_v53  ;;  %16314 = vmatprep.mubr.msk.f32.mxu1 %vm5040_vm2, %v5398_v56  ;;  %v7392_v63 = vrot.slane %v7378_v40, %v18477_v8  ;;  %v7419_v53 = vcombine.low %v23229_v0, %v23228_v51  ;;  %v7495_v25 = vcombine.low %v20025_v1, %v3017_v14  ;;  %v23236_v40 = vld [vmem:[#allocation30_spill] sm:$0xff]  ;;  %v23239_v1 = vld [vmem:[#allocation32_spill] sm:$0xff]  ;;  %v23244_v47 = vld [vmem:[#allocation37_spill] sm:$0xff] }
 0x235   : > { %v7409_v17 = vrot.slane %v7395_v41, %v18477_v8  ;;  %v7436_v24 = vcombine.low %v23235_v43, %v23234_v32  ;;  %v7437_v56 = vcombine.low %v23237_v11, %v23236_v40  ;;  %v23241_v13 = vld [vmem:[#allocation36_spill] sm:$0xff]  ;;  %v23243_v14 = vld [vmem:[#allocation38_spill] sm:$0xff]  ;;  %v23246_v51 = vld [vmem:[#allocation15_spill] sm:$0xff]  ;;  %v7434_v0 = vrot.slane %v7420_v44, %v18477_v8 }
 0x236   : > { %v8697_v10 = vrot.slane %v8683_v19, %v18477_v8  ;;  %16315 = vmatmul.mubr.msk.f32.vlgmr.msra.gmra.mrb[0].mxu1 %vm5040_vm2, %v23227_v27  ;;  %v23231_v19 = vld [vmem:[#allocation11_spill] sm:$0xff]  ;;  %v7478_v41 = vcombine.low %v23242_v30, %v23241_v13  ;;  %v7479_v60 = vcombine.low %v23244_v47, %v23243_v14  ;;  %v23245_v27 = vld [vmem:[#allocation17_spill] sm:$0xff]  ;;  %v23248_v40 = vld [vmem:[#allocation16_spill] sm:$0xff] }
 0x237   : > { %16317 = vmatprep.mubr.msk.f32.mxu1 %vm5040_vm2, %v23230_v9  ;;  %v23247_v9 = vld [vmem:[#allocation34_spill] sm:$0xff]  ;;  %v20489_v37 = vcombine.low %v7402_v12, %v7409_v17  ;;  %v7451_v32 = vrot.slane %v7437_v56, %v18477_v8  ;;  %v23252_v56 = vld [vmem:[#allocation43_spill] sm:$0xff]  ;;  %v23254_v13 = vld [vmem:[#allocation44_spill] sm:$0xff]  ;;  %16936 = vmatpush3.msk.msra.mxu1 %vm5105_vm0, %v20094_v55 }
 0x238   : > { %v20421_v16 = vcombine.low %v8690_v35, %v8697_v10  ;;  %v20452_v35 = vcombine.low %v7360_v39, %v7367_v49  ;;  %v7460_v10 = vrot.slane %v7453_v36, %v18477_v8  ;;  %v3035_v39 = vld [vmem:[#allocation2 + $0x8f] sm:$0x1]  ;;  %v23238_v49 = vld [vmem:[#allocation33_spill] sm:$0xff]  ;;  %v20472_v36 = vcombine.low %v7385_v26, %v7392_v63  ;;  %v23251_v12 = vld [vmem:[#allocation18_spill] sm:$0xff] }
 0x239   : > { %v7461_v45 = vcombine.low %v23239_v1, %v23238_v49  ;;  %v7502_v26 = vrot.slane %v7495_v25, %v18477_v8  ;;  %v7537_v63 = vcombine.low %v20085_v54, %v3035_v39  ;;  %v7486_v44 = vrot.slane %v7478_v41, %v18477_v8  ;;  %v23249_v54 = vld [vmem:[#allocation42_spill] sm:$0xff]  ;;  %v23250_v25 = vld [vmem:[#allocation40_spill] sm:$0xff]  ;;  %v23255_v41 = vld [vmem:[#allocation49_spill] sm:$0xff] }
 0x23a   : > { %23220 = vst [vmem:[#allocation165_spill] sm:$0xff] %v20421_v16  ;;  %16510 = vmatmul.mubr.msk.f32.gmra.mrb[30].mxu0 %vm5040_vm2, %v20421_v16  ;;  %16318 = vmatmul.mubr.msk.f32.gmra.mrb[2].mxu1 %vm5040_vm2, %v23240_v48  ;;  %v7503_v11 = vcombine.low %v23250_v25, %v23249_v54  ;;  %v23256_v14 = vld [vmem:[#allocation45_spill] sm:$0xff]  ;;  %v23287_v31 = vld [vmem:[#allocation48_spill] sm:$0xff] }
 0x23b   : > { %16514 = vmatprep.mubr.msk.f32.mxu0 %vm5040_vm2, %v23222_v57  ;;  %v7427_v57 = vrot.slane %v7419_v53, %v18477_v8  ;;  %16320 = vmatprep.mubr.msk.f32.mxu1 %vm5040_vm2, %v23245_v27  ;;  %v3053_v53 = vld [vmem:[#allocation2 + $0xa1] sm:$0x1]  ;;  %v7469_v43 = vrot.slane %v7461_v45, %v18477_v8  ;;  %v7504_v49 = vcombine.low %v23252_v56, %v7502_v26  ;;  %v3071_v45 = vld [vmem:[#allocation2 + $0xb3] sm:$0x1] }
 0x23c   : > { %v7579_v39 = vcombine.low %v20115_v50, %v3053_v53  ;;  %v7544_v1 = vrot.slane %v7537_v63, %v18477_v8  ;;  %v23253_v50 = vld [vmem:[#allocation46_spill] sm:$0xff]  ;;  %v7521_v47 = vcombine.low %v23256_v14, %v23255_v41  ;;  %v23258_v26 = vld [vmem:[#allocation25_spill] sm:$0xff] }
 0x23d   : > { %v20505_v17 = vcombine.low %v7427_v57, %v7434_v0  ;;  %v7520_v30 = vcombine.low %v23254_v13, %v23253_v50  ;;  %v23257_v57 = vld [vmem:[#allocation21_spill] sm:$0xff]  ;;  %v7511_v0 = vrot.slane %v7503_v11, %v18477_v8  ;;  %v7518_v53 = vrot.slane %v7504_v49, %v18477_v8  ;;  %v23262_v11 = vld [vmem:[#allocation56_spill] sm:$0xff]  ;;  %v3089_v50 = vld [vmem:[#allocation2 + $0xc5] sm:$0x1] }
 0x23e   : > { %16515 = vmatmul.mubr.msk.f32.vlgmr.msra.gmra.mrb[0].mxu0 %vm5040_vm2, %v23231_v19  ;;  %v7462_v19 = vcombine.low %v23247_v9, %v7460_v10  ;;  %16321 = vmatmul.mubr.msk.f32.gmra.mrb[4].mxu1 %vm5040_vm2, %v23248_v40  ;;  %v7493_v10 = vrot.slane %v7479_v60, %v18477_v8  ;;  %v7586_v9 = vrot.slane %v7579_v39, %v18477_v8  ;;  %v23263_v39 = vld [vmem:[#allocation54_spill] sm:$0xff]  ;;  %v23266_v49 = vld [vmem:[#allocation65_spill] sm:$0xff]  ;;  %v23267_v13 = vld [vmem:[#allocation63_spill] sm:$0xff] }
 0x23f   : > { %16563 = vmatpush3.msk.msra.mxu0 %vm5105_vm0, %v17614_v38  ;;  %16517 = vmatprep.mubr.msk.f32.mxu0 %vm5040_vm2, %v23233_v4  ;;  %v7444_v38 = vrot.slane %v7436_v24, %v18477_v8  ;;  %v7535_v25 = vrot.slane %v7521_v47, %v18477_v8  ;;  %v7562_v56 = vcombine.low %v23263_v39, %v23262_v11  ;;  %v23268_v14 = vld [vmem:[#allocation66_spill] sm:$0xff]  ;;  %v23273_v47 = vld [vmem:[#allocation59_spill] sm:$0xff]  ;;  %v23281_v16 = vld [vmem:[#allocation41_spill] sm:$0xff] }
 0x240   : > { %16323 = vmatprep.mubr.msk.f32.mxu1 %vm5040_vm2, %v23251_v12  ;;  %v7476_v24 = vrot.slane %v7462_v19, %v18477_v8  ;;  %v20520_v60 = vcombine.low %v7486_v44, %v7493_v10  ;;  %v7621_v19 = vcombine.low %v20143_v6, %v3071_v45  ;;  %v23261_v10 = vld [vmem:[#allocation52_spill] sm:$0xff]  ;;  %v7528_v6 = vrot.slane %v7520_v30, %v18477_v8  ;;  %v23264_v45 = vld [vmem:[#allocation57_spill] sm:$0xff]  ;;  %v23272_v30 = vld [vmem:[#allocation58_spill] sm:$0xff] }
 0x241   : > { %v20512_v48 = vcombine.low %v7444_v38, %v7451_v32  ;;  %v23259_v38 = vld [vmem:[#allocation51_spill] sm:$0xff]  ;;  %v23260_v32 = vld [vmem:[#allocation50_spill] sm:$0xff]  ;;  %v7546_v54 = vcombine.low %v23261_v10, %v7544_v1  ;;  %v7604_v41 = vcombine.low %v23267_v13, %v23266_v49  ;;  %v23271_v10 = vld [vmem:[#allocation60_spill] sm:$0xff]  ;;  %v7588_v4 = vcombine.low %v23273_v47, %v7586_v9 }
 0x242   : > { %16518 = vmatmul.mubr.msk.f32.gmra.mrb[2].mxu0 %vm5040_vm2, %v23246_v51  ;;  %16324 = vmatmul.mubr.msk.f32.gmra.mrb[6].mxu1 %vm5040_vm2, %v23257_v57  ;;  %v20529_v63 = vcombine.low %v7469_v43, %v7476_v24  ;;  %v7545_v44 = vcombine.low %v23260_v32, %v23259_v38  ;;  %v23265_v43 = vld [vmem:[#allocation55_spill] sm:$0xff]  ;;  %v23269_v38 = vld [vmem:[#allocation64_spill] sm:$0xff]  ;;  %v23270_v32 = vld [vmem:[#allocation26_spill] sm:$0xff]  ;;  %v7587_v51 = vcombine.low %v23272_v30, %v23271_v10 }
 0x243   : > { %16520 = vmatprep.mubr.msk.f32.mxu0 %vm5040_vm2, %v20452_v35  ;;  %16326 = vmatprep.mubr.msk.f32.mxu1 %vm5040_vm2, %v23258_v26  ;;  %v7563_v24 = vcombine.low %v23265_v43, %v23264_v45  ;;  %v7605_v1 = vcombine.low %v23269_v38, %v23268_v14  ;;  %v7628_v11 = vrot.slane %v7621_v19, %v18477_v8  ;;  %v23274_v39 = vld [vmem:[#allocation31_spill] sm:$0xff]  ;;  %v3107_v38 = vld [vmem:[#allocation2 + $0xd7] sm:$0x1] }
 0x244   : > { %v20557_v45 = vcombine.low %v7511_v0, %v7518_v53  ;;  %v7553_v43 = vrot.slane %v7545_v44, %v18477_v8  ;;  %v7560_v49 = vrot.slane %v7546_v54, %v18477_v8  ;;  %v7663_v13 = vcombine.low %v20194_v42, %v3089_v50  ;;  %v23275_v53 = vld [vmem:[#allocation70_spill] sm:$0xff]  ;;  %v23276_v44 = vld [vmem:[#allocation67_spill] sm:$0xff] }
 0x245   : > { %v20564_v9 = vcombine.low %v7528_v6, %v7535_v25  ;;  %v7570_v19 = vrot.slane %v7562_v56, %v18477_v8  ;;  %v7577_v14 = vrot.slane %v7563_v24, %v18477_v8  ;;  %v7612_v10 = vrot.slane %v7604_v41, %v18477_v8  ;;  %v23277_v54 = vld [vmem:[#allocation39_spill] sm:$0xff]  ;;  %v23278_v25 = vld [vmem:[#allocation68_spill] sm:$0xff]  ;;  %v23279_v56 = vld [vmem:[#allocation74_spill] sm:$0xff] }
 0x246   : > { %16521 = vmatmul.mubr.msk.f32.gmra.mrb[4].mxu0 %vm5040_vm2, %v20472_v36  ;;  %16327 = vmatmul.mubr.msk.f32.gmra.mrb[8].mxu1 %vm5040_vm2, %v23270_v32  ;;  %v7619_v0 = vrot.slane %v7605_v1, %v18477_v8  ;;  %v7629_v30 = vcombine.low %v23276_v44, %v23275_v53  ;;  %v7595_v42 = vrot.slane %v7587_v51, %v18477_v8  ;;  %v23280_v47 = vld [vmem:[#allocation71_spill] sm:$0xff] }
 0x247   : > { %16523 = vmatprep.mubr.msk.f32.mxu0 %vm5040_vm2, %v20489_v37  ;;  %16329 = vmatprep.mubr.msk.f32.mxu1 %vm5040_vm2, %v23274_v39  ;;  %v7602_v6 = vrot.slane %v7588_v4, %v18477_v8  ;;  %v7630_v50 = vcombine.low %v23278_v25, %v7628_v11  ;;  %v7646_v24 = vcombine.low %v23280_v47, %v23279_v56  ;;  %v23282_v51 = vld [vmem:[#allocation75_spill] sm:$0xff]  ;;  %v23283_v11 = vld [vmem:[#allocation72_spill] sm:$0xff]  ;;  %v3125_v25 = vld [vmem:[#allocation2 + $0xe9] sm:$0x1] }
 0x248   : > { %v20583_v41 = vcombine.low %v7553_v43, %v7560_v49  ;;  %v7670_v1 = vrot.slane %v7663_v13, %v18477_v8  ;;  %v7705_v53 = vcombine.low %v20225_v29, %v3107_v38  ;;  %v20589_v4 = vcombine.low %v7570_v19, %v7577_v14  ;;  %v20596_v56 = vld [vmem:[%s23054_s1 + $0x1c] sm:$0xf]  ;;  %v23284_v13 = vld [vmem:[#allocation47_spill] sm:$0xff]  ;;  %v23286_v47 = vld [vmem:[#allocation76_spill] sm:$0xff] }
 0x249   : > { %v7647_v44 = vcombine.low %v23283_v11, %v23282_v51  ;;  %v20598_v43 = vcombine.low %v7612_v10, %v7619_v0  ;;  %v7637_v49 = vrot.slane %v7629_v30, %v18477_v8  ;;  %v20603_v29 = vcombine.low %v7595_v42, %v7602_v6  ;;  %v23285_v38 = vld [vmem:[#allocation77_spill] sm:$0xff]  ;;  %v23288_v10 = vld [vmem:[#allocation78_spill] sm:$0xff]  ;;  %16612 = vmatprep.subr.msk.mxu0 %vm5105_vm0, %v20596_v56 }
 0x24a   : > { %16524 = vmatmul.mubr.msk.f32.gmra.mrb[6].mxu0 %vm5040_vm2, %v20505_v17  ;;  %16330 = vmatmul.mubr.msk.f32.gmra.mrb[10].mxu1 %vm5040_vm2, %v23277_v54  ;;  %v7644_v19 = vrot.slane %v7630_v50, %v18477_v8  ;;  %v7654_v14 = vrot.slane %v7646_v24, %v18477_v8  ;;  %v7671_v51 = vcombine.low %v23286_v47, %v23285_v38  ;;  %v3143_v11 = vld [vmem:[#allocation2 + $0xfb] sm:$0x1]  ;;  %v23289_v50 = vld [vmem:[#allocation83_spill] sm:$0xff]  ;;  %v23291_v47 = vld [vmem:[#allocation84_spill] sm:$0xff] }
 0x24b   : > { %16526 = vmatprep.mubr.msk.f32.mxu0 %vm5040_vm2, %v20512_v48  ;;  %16332 = vmatprep.mubr.msk.f32.mxu1 %vm5040_vm2, %v23281_v16  ;;  %v7672_v0 = vcombine.low %v23288_v10, %v7670_v1  ;;  %v7712_v30 = vrot.slane %v7705_v53, %v18477_v8  ;;  %v7747_v42 = vcombine.low %v20258_v33, %v3125_v25  ;;  %v23290_v24 = vld [vmem:[#allocation81_spill] sm:$0xff]  ;;  %v23293_v1 = vld [vmem:[#allocation88_spill] sm:$0xff] }
 0x24c   : > { %v7661_v6 = vrot.slane %v7647_v44, %v18477_v8  ;;  %v7688_v38 = vcombine.low %v23290_v24, %v23289_v50  ;;  %v7689_v62 = vcombine.low %v23292_v58, %v23291_v47  ;;  %v23294_v53 = vld [vmem:[#allocation85_spill] sm:$0xff]  ;;  %v7789_v25 = vcombine.low %v20298_v7, %v3143_v11  ;;  %v23296_v44 = vld [vmem:[#allocation91_spill] sm:$0xff]  ;;  %v23299_v24 = vld [vmem:[#allocation90_spill] sm:$0xff] }
 0x24d   : > { %v7713_v33 = vcombine.low %v23294_v53, %v23293_v1  ;;  %v23295_v10 = vld [vmem:[#allocation53_spill] sm:$0xff]  ;;  %v7679_v61 = vrot.slane %v7671_v51, %v18477_v8  ;;  %v7730_v52 = vcombine.low %v23297_v20, %v23296_v44  ;;  %v20641_v55 = vcombine.low %v7637_v49, %v7644_v19  ;;  %v23301_v11 = vld [vmem:[#allocation86_spill] sm:$0xff]  ;;  %v3161_v1 = vld [vmem:[#allocation2 + $0x10d] sm:$0x1] }
 0x24e   : > { %16527 = vmatmul.mubr.msk.f32.gmra.mrb[8].mxu0 %vm5040_vm2, %v20529_v63  ;;  %16333 = vmatmul.mubr.msk.f32.gmra.mrb[12].mxu1 %vm5040_vm2, %v23284_v13  ;;  %v23298_v50 = vld [vmem:[#allocation93_spill] sm:$0xff]  ;;  %v7686_v7 = vrot.slane %v7672_v0, %v18477_v8  ;;  %v7714_v47 = vcombine.low %v23301_v11, %v7712_v30  ;;  %v7754_v51 = vrot.slane %v7747_v42, %v18477_v8  ;;  %v23302_v0 = vld [vmem:[#allocation62_spill] sm:$0xff] }
 0x24f   : > { %16529 = vmatprep.mubr.msk.f32.mxu0 %vm5040_vm2, %v20520_v60  ;;  %16335 = vmatprep.mubr.msk.f32.mxu1 %vm5040_vm2, %v23287_v31  ;;  %v7731_v23 = vcombine.low %v23299_v24, %v23298_v50  ;;  %v23300_v58 = vld [vmem:[#allocation61_spill] sm:$0xff]  ;;  %v20648_v20 = vcombine.low %v7654_v14, %v7661_v6  ;;  %v7696_v53 = vrot.slane %v7688_v38, %v18477_v8  ;;  %v23304_v11 = vld [vmem:[#allocation94_spill] sm:$0xff] }
 0x250   : > { %v7703_v44 = vrot.slane %v7689_v62, %v18477_v8  ;;  %v3179_v50 = vld [vmem:[#allocation2 + $0x11f] sm:$0x1]  ;;  %v7721_v49 = vrot.slane %v7713_v33, %v18477_v8  ;;  %v7796_v19 = vrot.slane %v7789_v25, %v18477_v8  ;;  %v7738_v30 = vrot.slane %v7730_v52, %v18477_v8  ;;  %v23306_v25 = vld [vmem:[#allocation95_spill] sm:$0xff] }
 0x251   : > { %v7745_v42 = vrot.slane %v7731_v23, %v18477_v8  ;;  %v23303_v24 = vld [vmem:[#allocation97_spill] sm:$0xff]  ;;  %v7831_v6 = vcombine.low %v20331_v18, %v3161_v1  ;;  %v20665_v62 = vcombine.low %v7679_v61, %v7686_v7  ;;  %v7728_v33 = vrot.slane %v7714_v47, %v18477_v8  ;;  %v23308_v1 = vld [vmem:[#allocation99_spill] sm:$0xff]  ;;  %v23311_v61 = vld [vmem:[#allocation106_spill] sm:$0xff] }
 0x252   : > { %16530 = vmatmul.mubr.msk.f32.gmra.mrb[10].mxu0 %vm5040_vm2, %v20557_v45  ;;  %16336 = vmatmul.mubr.msk.f32.gmra.mrb[14].mxu1 %vm5040_vm2, %v23295_v10  ;;  %v7755_v14 = vcombine.low %v23304_v11, %v23303_v24  ;;  %v23305_v38 = vld [vmem:[#allocation69_spill] sm:$0xff]  ;;  %v7756_v59 = vcombine.low %v23306_v25, %v7754_v51  ;;  %v7873_v52 = vcombine.low %v20364_v3, %v3179_v50  ;;  %v23309_v11 = vld [vmem:[#allocation102_spill] sm:$0xff]  ;;  %v23312_v7 = vld [vmem:[#allocation103_spill] sm:$0xff] }
 0x253   : > { %16532 = vmatprep.mubr.msk.f32.mxu0 %vm5040_vm2, %v20564_v9  ;;  %16338 = vmatprep.mubr.msk.f32.mxu1 %vm5040_vm2, %v23300_v58  ;;  %v20672_v23 = vcombine.low %v7696_v53, %v7703_v44  ;;  %v23307_v18 = vld [vmem:[#allocation101_spill] sm:$0xff]  ;;  %v7773_v2 = vcombine.low %v23310_v34, %v23309_v11  ;;  %v7797_v46 = vcombine.low %v23312_v7, %v23311_v61  ;;  %v23313_v47 = vld [vmem:[#allocation104_spill] sm:$0xff]  ;;  %v23316_v50 = vld [vmem:[#allocation79_spill] sm:$0xff] }
 0x254   : > { %v7772_v24 = vcombine.low %v23308_v1, %v23307_v18  ;;  %v7798_v28 = vcombine.low %v23313_v47, %v7796_v19  ;;  %v23314_v51 = vld [vmem:[#allocation73_spill] sm:$0xff]  ;;  %v20683_v3 = vcombine.low %v7738_v30, %v7745_v42  ;;  %v7763_v53 = vrot.slane %v7755_v14, %v18477_v8  ;;  %v23317_v14 = vld [vmem:[#allocation110_spill] sm:$0xff]  ;;  %v23319_v11 = vld [vmem:[#allocation111_spill] sm:$0xff] }
 0x255   : > { %v7838_v44 = vrot.slane %v7831_v6, %v18477_v8  ;;  %v20691_v34 = vcombine.low %v7721_v49, %v7728_v33  ;;  %v7770_v25 = vrot.slane %v7756_v59, %v18477_v8  ;;  %v7880_v19 = vrot.slane %v7873_v52, %v18477_v8  ;;  %v23318_v6 = vld [vmem:[#allocation108_spill] sm:$0xff]  ;;  %v23320_v61 = vld [vmem:[#allocation109_spill] sm:$0xff] }
 0x256   : > { %16533 = vmatmul.mubr.msk.f32.gmra.mrb[12].mxu0 %vm5040_vm2, %v20583_v41  ;;  %16339 = vmatmul.mubr.msk.f32.gmra.mrb[16].mxu1 %vm5040_vm2, %v23302_v0  ;;  %23315 = vst [vmem:[#allocation141_spill] sm:$0xff] %v20683_v3  ;;  %v8981_v18 = vcombine.low %v20393_v15, %v3197_v22  ;;  %v7780_v30 = vrot.slane %v7772_v24, %v18477_v8  ;;  %v23321_v52 = vld [vmem:[#allocation113_spill] sm:$0xff]  ;;  %v23322_v7 = vld [vmem:[#allocation112_spill] sm:$0xff]  ;;  %v23323_v15 = vld [vmem:[#allocation119_spill] sm:$0xff] }
 0x257   : > { %16535 = vmatprep.mubr.msk.f32.mxu0 %vm5040_vm2, %v20589_v4  ;;  %16341 = vmatprep.mubr.msk.f32.mxu1 %vm5040_vm2, %v23305_v38  ;;  %v7787_v42 = vrot.slane %v7773_v2, %v18477_v8  ;;  %v7814_v1 = vcombine.low %v23318_v6, %v23317_v14  ;;  %v7815_v49 = vcombine.low %v23320_v61, %v23319_v11  ;;  %v23324_v47 = vld [vmem:[#allocation116_spill] sm:$0xff]  ;;  %v23326_v2 = vld [vmem:[#allocation114_spill] sm:$0xff]  ;;  %v23328_v14 = vld [vmem:[#allocation117_spill] sm:$0xff] }
 0x258   : > { %v7805_v33 = vrot.slane %v7797_v46, %v18477_v8  ;;  %v7812_v59 = vrot.slane %v7798_v28, %v18477_v8  ;;  %v7839_v22 = vcombine.low %v23322_v7, %v23321_v52  ;;  %v7856_v21 = vcombine.low %v23324_v47, %v23323_v15  ;;  %v23330_v11 = vld [vmem:[#allocation121_spill] sm:$0xff]  ;;  %v23331_v46 = vld [vmem:[#allocation87_spill] sm:$0xff]  ;;  %v23333_v52 = vld [vmem:[#allocation122_spill] sm:$0xff] }
 0x259   : > { %v7840_v24 = vcombine.low %v23326_v2, %v7838_v44  ;;  %v20721_v28 = vcombine.low %v7763_v53, %v7770_v25  ;;  %v7882_v7 = vcombine.low %v23333_v52, %v7880_v19  ;;  %v8988_v15 = vrot.slane %v8981_v18, %v18477_v8  ;;  %v23336_v25 = vld [vmem:[#allocation92_spill] sm:$0xff] }
 0x25a   : > { %16536 = vmatmul.mubr.msk.f32.gmra.mrb[14].mxu0 %vm5040_vm2, %v20603_v29  ;;  %16342 = vmatmul.mubr.msk.f32.gmra.mrb[18].mxu1 %vm5040_vm2, %v23314_v51  ;;  %v23329_v51 = vld [vmem:[#allocation124_spill] sm:$0xff]  ;;  %v20727_v44 = vcombine.low %v7780_v30, %v7787_v42  ;;  %v20731_v47 = vcombine.low %v7805_v33, %v7812_v59  ;;  %v7847_v2 = vrot.slane %v7839_v22, %v18477_v8  ;;  %v23341_v33 = vld [vmem:[#allocation127_spill] sm:$0xff] }
 0x25b   : > { %16538 = vmatprep.mubr.msk.f32.mxu0 %vm5040_vm2, %v20598_v43  ;;  %16344 = vmatprep.mubr.msk.f32.mxu1 %vm5040_vm2, %v23316_v50  ;;  %v23327_v50 = vld [vmem:[#allocation120_spill] sm:$0xff]  ;;  %v7881_v61 = vcombine.low %v23330_v11, %v23329_v51  ;;  %23332 = vst [vmem:[#allocation10_spill] sm:$0xff] %v20721_v28  ;;  %v7829_v51 = vrot.slane %v7815_v49, %v18477_v8  ;;  %v23340_v49 = vld [vmem:[#allocation129_spill] sm:$0xff]  ;;  %v23342_v22 = vld [vmem:[#allocation131_spill] sm:$0xff] }
 0x25c   : > { %v7857_v6 = vcombine.low %v23328_v14, %v23327_v50  ;;  %23334 = vst [vmem:[#allocation20_spill] sm:$0xff] %v20727_v44  ;;  %v7822_v50 = vrot.slane %v7814_v1, %v18477_v8  ;;  %23335 = vst [vmem:[#allocation19_spill] sm:$0xff] %v20731_v47  ;;  %v7864_v53 = vrot.slane %v7856_v21, %v18477_v8  ;;  %v23337_v42 = vld [vmem:[#allocation128_spill] sm:$0xff]  ;;  %v23338_v14 = vld [vmem:[#allocation126_spill] sm:$0xff] }
 0x25d   : > { %v7854_v19 = vrot.slane %v7840_v24, %v18477_v8  ;;  %v7889_v30 = vrot.slane %v7881_v61, %v18477_v8  ;;  %v8964_v1 = vcombine.low %v23338_v14, %v23337_v42  ;;  %v23339_v11 = vld [vmem:[#allocation96_spill] sm:$0xff]  ;;  %v7896_v21 = vrot.slane %v7882_v7, %v18477_v8  ;;  %v23343_v24 = vld [vmem:[#allocation130_spill] sm:$0xff] }
 0x25e   : > { %16539 = vmatmul.mubr.msk.f32.gmra.mrb[16].mxu0 %vm5040_vm2, %v20641_v55  ;;  %16345 = vmatmul.mubr.msk.f32.gmra.mrb[20].mxu1 %vm5040_vm2, %v23325_v5  ;;  %v7871_v18 = vrot.slane %v7857_v6, %v18477_v8  ;;  %v8965_v59 = vcombine.low %v23341_v33, %v23340_v49  ;;  %v8989_v52 = vcombine.low %v23343_v24, %v23342_v22  ;;  %v23344_v6 = vld [vmem:[#allocation132_spill] sm:$0xff]  ;;  %v23346_v42 = vld [vmem:[#allocation98_spill] sm:$0xff]  ;;  %v20800_v5 = vld [vmem:[#allocation2 + $0x140] sm:$0x1] }
 0x25f   : > { %16541 = vmatprep.mubr.msk.f32.mxu0 %vm5040_vm2, %v20648_v20  ;;  %16347 = vmatprep.mubr.msk.f32.mxu1 %vm5040_vm2, %v23331_v46  ;;  %v20754_v61 = vcombine.low %v7822_v50, %v7829_v51  ;;  %v20758_v14 = vld [vmem:[#allocation2 + $0x133] sm:$0x1]  ;;  %v20762_v7 = vld [vmem:[#allocation2 + $0x135] sm:$0x1]  ;;  %v20764_v49 = vld [vmem:[#allocation2 + $0x136] sm:$0x1]  ;;  %v20772_v24 = vcombine.low %v7847_v2, %v7854_v19  ;;  %v8972_v51 = vrot.slane %v8964_v1, %v18477_v8 }
 0x260   : > { %23348 = vst [vmem:[#allocation23_spill] sm:$0xff] %v20764_v49  ;;  %v20766_v33 = vld [vmem:[#allocation2 + $0x137] sm:$0x1]  ;;  %v20768_v22 = vld [vmem:[#allocation2 + $0x138] sm:$0x1]  ;;  %v20774_v50 = vcombine.low %v7864_v53, %v7871_v18  ;;  %v20787_v46 = vcombine.low %v7889_v30, %v7896_v21  ;;  %v8979_v2 = vrot.slane %v8965_v59, %v18477_v8  ;;  %v8997_v53 = vrot.slane %v8989_v52, %v18477_v8 }
 0x261   : > { %23345 = vst [vmem:[#allocation8_spill] sm:$0xff] %v20754_v61  ;;  %23349 = vst [vmem:[#allocation22_spill] sm:$0xff] %v20766_v33  ;;  %v20792_v18 = vld [vmem:[#allocation2 + $0x13d] sm:$0x1]  ;;  %v20794_v1 = vld [vmem:[#allocation2 + $0x13e] sm:$0x1]  ;;  %v9650_v21 = vcombine.low %v20762_v7, %v20764_v49 }
 0x262   : > { %16542 = vmatmul.mubr.msk.f32.gmra.mrb[18].mxu0 %vm5040_vm2, %v20665_v62  ;;  %16348 = vmatmul.mubr.msk.f32.gmra.mrb[22].mxu1 %vm5040_vm2, %v23336_v25  ;;  %v8990_v25 = vcombine.low %v23344_v6, %v8988_v15  ;;  %23350 = vst [vmem:[#allocation14_spill] sm:$0xff] %v20768_v22  ;;  %v20770_v15 = vld [vmem:[#allocation2 + $0x139] sm:$0x1]  ;;  %23352 = vst [vmem:[#allocation24_spill] sm:$0xff] %v20772_v24  ;;  %v23353_v6 = vld [vmem:[#allocation105_spill] sm:$0xff] }
 0x263   : > { %16544 = vmatprep.mubr.msk.f32.mxu0 %vm5040_vm2, %v20672_v23  ;;  %16350 = vmatprep.mubr.msk.f32.mxu1 %vm5040_vm2, %v23339_v11  ;;  %v20760_v11 = vld [vmem:[#allocation2 + $0x134] sm:$0x1]  ;;  %23351 = vst [vmem:[#allocation11_spill] sm:$0xff] %v20770_v15  ;;  %23356 = vst [vmem:[#allocation30_spill] sm:$0xff] %v20794_v1  ;;  %v20812_v52 = vld [vmem:[#allocation2 + $0x142] sm:$0x1] }
 0x264   : > { %23347 = vst [vmem:[#allocation9_spill] sm:$0xff] %v20760_v11  ;;  %v9004_v19 = vrot.slane %v8990_v25, %v18477_v8  ;;  %23358 = vst [vmem:[#allocation33_spill] sm:$0xff] %v20800_v5  ;;  %v9649_v30 = vcombine.low %v20758_v14, %v20760_v11  ;;  %v9651_v25 = vcombine.low %v20766_v33, %v20768_v22  ;;  %v23362_v33 = vld [vmem:[#allocation115_spill] sm:$0xff] }
 0x265   : > { %23360 = vst [vmem:[#allocation12_spill] sm:$0xff] %v20812_v52  ;;  %v9699_v11 = vcombine.low %v20792_v18, %v20794_v1 }
 0x266   : > { %16545 = vmatmul.mubr.msk.f32.gmra.mrb[20].mxu0 %vm5040_vm2, %v20691_v34  ;;  %16351 = vmatmul.mubr.msk.f32.gmra.mrb[24].mxu1 %vm5040_vm2, %v23346_v42  ;;  %v20779_v42 = vld [vmem:[#allocation2 + $0x13a] sm:$0x1] }
 0x267   : > { %16547 = vmatprep.mubr.msk.f32.mxu0 %vm5040_vm2, %v20683_v3  ;;  %16353 = vmatprep.mubr.msk.f32.mxu1 %vm5040_vm2, %v23353_v6  ;;  %23354 = vst [vmem:[#allocation29_spill] sm:$0xff] %v20779_v42  ;;  %v20796_v6 = vld [vmem:[#allocation2 + $0x13f] sm:$0x1]  ;;  %v9652_v59 = vcombine.low %v20770_v15, %v20779_v42  ;;  %v23361_v3 = vld [vmem:[#allocation107_spill] sm:$0xff]  ;;  %v9659_v42 = vrot.slane %v9649_v30, %v18477_v8 }
 0x268   : > { %23357 = vst [vmem:[#allocation28_spill] sm:$0xff] %v20796_v6  ;;  %v9700_v49 = vcombine.low %v20796_v6, %v20800_v5  ;;  %v9666_v15 = vrot.slane %v9650_v21, %v18477_v8  ;;  %v9715_v5 = vrot.slane %v9699_v11, %v18477_v8  ;;  %v20838_v30 = vcombine.low %v8972_v51, %v8979_v2  ;;  %v23364_v6 = vld [vmem:[#allocation123_spill] sm:$0xff] }
 0x269   : > { %v23380_v2 = vld [vmem:[#allocation19_spill] sm:$0xff] }
 0x26a   : > { %16548 = vmatmul.mubr.msk.f32.gmra.mrb[22].mxu0 %vm5040_vm2, %v20721_v28  ;;  %v20783_v28 = vld [vmem:[#allocation2 + $0x13c] sm:$0x1]  ;;  %16354 = vmatmul.mubr.msk.f32.gmra.mrb[26].mxu1 %vm5040_vm2, %v23361_v3  ;;  %v9673_v3 = vrot.slane %v9651_v25, %v18477_v8  ;;  %v9681_v21 = vcombine.low %v9659_v42, %v9666_v15  ;;  %v23378_v15 = vld [vmem:[#allocation11_spill] sm:$0xff] }
 0x26b   : > { %16550 = vmatprep.mubr.msk.f32.mxu0 %vm5040_vm2, %v20727_v44  ;;  %v20781_v44 = vld [vmem:[#allocation2 + $0x13b] sm:$0x1]  ;;  %23355 = vst [vmem:[#allocation27_spill] sm:$0xff] %v20783_v28  ;;  %16356 = vmatprep.mubr.msk.f32.mxu1 %vm5040_vm2, %v23362_v33  ;;  %v23363_v33 = vld [vmem:[#allocation118_spill] sm:$0xff] }
 0x26c   : > { %v20845_v11 = vrot.slane %v9681_v21, %v18477_v8 }
 0x26e   : > { %16551 = vmatmul.mubr.msk.f32.gmra.mrb[24].mxu0 %vm5040_vm2, %v20731_v47  ;;  %v20802_v47 = vld [vmem:[#allocation2 + $0x141] sm:$0x1]  ;;  %16357 = vmatmul.mubr.msk.f32.gmra.mrb[28].mxu1 %vm5040_vm2, %v23363_v33 }
 0x26f   : > { %16553 = vmatprep.mubr.msk.f32.mxu0 %vm5040_vm2, %v20754_v61  ;;  %23359 = vst [vmem:[#allocation32_spill] sm:$0xff] %v20802_v47  ;;  %v9698_v61 = vcombine.low %v20781_v44, %v20783_v28  ;;  %v9701_v22 = vcombine.low %v20802_v47, %v20812_v52  ;;  %v9680_v28 = vrot.slane %v9652_v59, %v18477_v8  ;;  %v23385_v21 = vld [vmem:[#allocation28_spill] sm:$0xff] }
 0x270   : > { %v9722_v52 = vrot.slane %v9700_v49, %v18477_v8  ;;  %16359 = vmatprep.mubr.msk.f32.mxu1 %vm5040_vm2, %v23364_v6  ;;  %v20852_v49 = vcombine.low %v8997_v53, %v9004_v19  ;;  %v23381_v53 = vld [vmem:[#allocation8_spill] sm:$0xff]  ;;  %v23382_v19 = vld [vmem:[#allocation98_spill] sm:$0xff] }
 0x271   : > { %v9708_v1 = vrot.slane %v9698_v61, %v18477_v8  ;;  %v9729_v47 = vrot.slane %v9701_v22, %v18477_v8  ;;  %v9682_v25 = vcombine.low %v9673_v3, %v9680_v28  ;;  %v20881_v22 = vld [vmem:[%s23054_s1 + $0x20] sm:$0xf]  ;;  %s17630_s1 = scalar_lea.vmem %s17629_s0, 32 }
 0x272   : > { %16554 = vmatmul.mubr.msk.f32.gmra.mrb[26].mxu0 %vm5040_vm2, %v20772_v24  ;;  %p17632_p1 = scmp.lt.s32.totalorder %s17630_s1, %s17624_s20 }
 0x273   : > { %16556 = vmatprep.mubr.msk.f32.mxu0 %vm5040_vm2, %v20774_v50  ;;  %v9730_v59 = vcombine.low %v9708_v1, %v9715_v5  ;;  %v9731_v24 = vcombine.low %v9722_v52, %v9729_v47  ;;  %v20848_v61 = vrot.slane %v9682_v25, %v18477_v8  ;;  %v23365_v47 = vld [vmem:[#allocation125_spill] sm:$0xff]  ;;  %v23386_v25 = vld [vmem:[#allocation30_spill] sm:$0xff] }
 0x274   : > { %16360 = vmatmul.mubr.msk.f32.gmra.mrb[30].mxu1 %vm5040_vm2, %v23365_v47  ;;  %p17633_p2 = por %p17632_p1, %p17631_p0 }
 0x275   : > { %v20855_v3 = vrot.slane %v9730_v59, %v18477_v8  ;;  %v20858_v5 = vrot.slane %v9731_v24, %v18477_v8  ;;  %v9697_v28 = vcombine.low %v20845_v11, %v20848_v61  ;;  %16373 = vmatprep.mubr.msk.f32.mxu1 %vm5040_vm2, %v20452_v35  ;;  %v23379_v24 = vld [vmem:[#allocation14_spill] sm:$0xff]  ;;  %v9337_v59 = vcombine.low %v23386_v25, %v23385_v21 }
 0x276   : > { %16557 = vmatmul.mubr.msk.f32.gmra.mrb[28].mxu0 %vm5040_vm2, %v20787_v46  ;;  %v9289_v51 = vcombine.low %v23379_v24, %v23378_v15  ;;  %v23394_v25 = vld [vmem:[#allocation134_spill] sm:$0xff]  ;;  %p17634_p3 = pnand %p17633_p2, %p17627_p13 }
 0x277   : > { %16559 = vmatprep.mubr.msk.f32.mxu0 %vm5040_vm2, %v20838_v30  ;;  %v9746_v42 = vcombine.low %v20855_v3, %v20858_v5 }
 0x278   : > { %16374 = vmatmul.mubr.msk.f32.vlgmr.msra.gmra.mrb[6].mxu1 %vm5040_vm2, %v20472_v36 }
 0x279   : > { %16376 = vmatprep.mubr.msk.f32.mxu1 %vm5040_vm2, %v20489_v37 }
 0x27a   : > { %16560 = vmatmul.mubr.msk.f32.gmra.mrb[30].mxu0 %vm5040_vm2, %v20852_v49 }
 0x27b   : > { %16564 = vmatprep.mubr.msk.f32.mxu0 %vm5040_vm2, %v23245_v27  ;;  %v23368_v27 = vld [vmem:[#allocation141_spill] sm:$0xff] }
 0x27c   : > { %16377 = vmatmul.mubr.msk.f32.gmra.mrb[8].mxu1 %vm5040_vm2, %v20505_v17 }
 0x27d   : > { %16379 = vmatprep.mubr.msk.f32.mxu1 %vm5040_vm2, %v20512_v48 }
 0x27e   : > { %16565 = vmatmul.mubr.msk.f32.vlgmr.msra.gmra.mrb[0].mxu0 %vm5040_vm2, %v23248_v40  ;;  %v23369_v40 = vld [vmem:[#allocation80_spill] sm:$0xff] }
 0x27f   : > { %16613 = vmatpush3.msk.msra.mxu0 %vm5105_vm0, %v20596_v56  ;;  %16567 = vmatprep.mubr.msk.f32.mxu0 %vm5040_vm2, %v23251_v12  ;;  %v23370_v12 = vld [vmem:[#allocation87_spill] sm:$0xff] }
 0x280   : > { %16662 = vmatprep.subr.msk.mxu0 %vm5105_vm0, %v20881_v22  ;;  %16380 = vmatmul.mubr.msk.f32.gmra.mrb[10].mxu1 %vm5040_vm2, %v20529_v63 }
 0x281   : > { %16382 = vmatprep.mubr.msk.f32.mxu1 %vm5040_vm2, %v20520_v60 }
 0x282   : > { %16568 = vmatmul.mubr.msk.f32.gmra.mrb[2].mxu0 %vm5040_vm2, %v23257_v57  ;;  %v23371_v57 = vld [vmem:[#allocation10_spill] sm:$0xff] }
 0x283   : > { %16570 = vmatprep.mubr.msk.f32.mxu0 %vm5040_vm2, %v23258_v26  ;;  %v3198_v26 = vld [vmem:[#allocation2 + $0x132] sm:$0x1] }
 0x284   : > { %16383 = vmatmul.mubr.msk.f32.gmra.mrb[12].mxu1 %vm5040_vm2, %v20557_v45  ;;  %v9286_v56 = vcombine.low %v3198_v26, %v20758_v14  ;;  %v23383_v14 = vld [vmem:[#allocation29_spill] sm:$0xff] }
 0x285   : > { %16385 = vmatprep.mubr.msk.f32.mxu1 %vm5040_vm2, %v20564_v9  ;;  %v9335_v1 = vcombine.low %v23383_v14, %v20781_v44  ;;  %v20994_v44 = vrot.slane %v9289_v51, %v18477_v8 }
 0x286   : > { %16571 = vmatmul.mubr.msk.f32.gmra.mrb[4].mxu0 %vm5040_vm2, %v23270_v32  ;;  %v23372_v32 = vld [vmem:[#allocation20_spill] sm:$0xff]  ;;  %v9296_v26 = vrot.slane %v9286_v56, %v18477_v8 }
 0x287   : > { %16573 = vmatprep.mubr.msk.f32.mxu0 %vm5040_vm2, %v23274_v39  ;;  %v23373_v39 = vld [vmem:[#allocation92_spill] sm:$0xff]  ;;  %v21003_v56 = vrot.slane %v9335_v1, %v18477_v8 }
 0x288   : > { %16386 = vmatmul.mubr.msk.f32.gmra.mrb[14].mxu1 %vm5040_vm2, %v20583_v41 }
 0x289   : > { %16388 = vmatprep.mubr.msk.f32.mxu1 %vm5040_vm2, %v20589_v4 }
 0x28a   : > { %16574 = vmatmul.mubr.msk.f32.gmra.mrb[6].mxu0 %vm5040_vm2, %v23277_v54  ;;  %v23374_v54 = vld [vmem:[#allocation96_spill] sm:$0xff] }
 0x28b   : > { %16576 = vmatprep.mubr.msk.f32.mxu0 %vm5040_vm2, %v23281_v16  ;;  %v23367_v16 = vld [vmem:[#allocation79_spill] sm:$0xff] }
 0x28c   : > { %16389 = vmatmul.mubr.msk.f32.gmra.mrb[16].mxu1 %vm5040_vm2, %v20603_v29 }
 0x28d   : > { %16391 = vmatprep.mubr.msk.f32.mxu1 %vm5040_vm2, %v20598_v43 }
 0x28e   : > { %16577 = vmatmul.mubr.msk.f32.gmra.mrb[8].mxu0 %vm5040_vm2, %v23284_v13  ;;  %v23375_v13 = vld [vmem:[#allocation9_spill] sm:$0xff] }
 0x28f   : > { %16579 = vmatprep.mubr.msk.f32.mxu0 %vm5040_vm2, %v23287_v31  ;;  %v23366_v31 = vld [vmem:[#allocation73_spill] sm:$0xff] }
 0x290   : > { %16392 = vmatmul.mubr.msk.f32.gmra.mrb[18].mxu1 %vm5040_vm2, %v20641_v55 }
 0x291   : > { %16394 = vmatprep.mubr.msk.f32.mxu1 %vm5040_vm2, %v20648_v20 }
 0x292   : > { %16580 = vmatmul.mubr.msk.f32.gmra.mrb[10].mxu0 %vm5040_vm2, %v23295_v10  ;;  %v9287_v10 = vcombine.low %v23375_v13, %v20762_v7  ;;  %v23384_v7 = vld [vmem:[#allocation27_spill] sm:$0xff] }
 0x293   : > { %16582 = vmatprep.mubr.msk.f32.mxu0 %vm5040_vm2, %v23300_v58  ;;  %v23376_v58 = vld [vmem:[#allocation22_spill] sm:$0xff]  ;;  %v9336_v52 = vcombine.low %v23384_v7, %v20792_v18  ;;  %v23390_v18 = vld [vmem:[#allocation24_spill] sm:$0xff]  ;;  %v23391_v13 = vld [vmem:[#allocation107_spill] sm:$0xff] }
 0x294   : > { %16395 = vmatmul.mubr.msk.f32.gmra.mrb[20].mxu1 %vm5040_vm2, %v20665_v62 }
 0x295   : > { %16397 = vmatprep.mubr.msk.f32.mxu1 %vm5040_vm2, %v20672_v23 }
 0x296   : > { %16583 = vmatmul.mubr.msk.f32.gmra.mrb[12].mxu0 %vm5040_vm2, %v23302_v0  ;;  %v23377_v0 = vld [vmem:[#allocation23_spill] sm:$0xff] }
 0x297   : > { %16585 = vmatprep.mubr.msk.f32.mxu0 %vm5040_vm2, %v23305_v38  ;;  %v9288_v38 = vcombine.low %v23377_v0, %v23376_v58  ;;  %v21009_v58 = vrot.slane %v9337_v59, %v18477_v8 }
 0x298   : > { %16398 = vmatmul.mubr.msk.f32.gmra.mrb[22].mxu1 %vm5040_vm2, %v20691_v34 }
 0x299   : > { %16400 = vmatprep.mubr.msk.f32.mxu1 %vm5040_vm2, %v23368_v27 }
 0x29a   : > { %16586 = vmatmul.mubr.msk.f32.gmra.mrb[14].mxu0 %vm5040_vm2, %v23366_v31  ;;  %v23387_v31 = vld [vmem:[#allocation32_spill] sm:$0xff] }
 0x29b   : > { %16588 = vmatprep.mubr.msk.f32.mxu0 %vm5040_vm2, %v23367_v16  ;;  %v23388_v16 = vld [vmem:[#allocation33_spill] sm:$0xff] }
 0x29c   : > { %16401 = vmatmul.mubr.msk.f32.gmra.mrb[24].mxu1 %vm5040_vm2, %v23371_v57 }
 0x29d   : > { %16403 = vmatprep.mubr.msk.f32.mxu1 %vm5040_vm2, %v23372_v32 }
 0x29e   : > { %16589 = vmatmul.mubr.msk.f32.gmra.mrb[16].mxu0 %vm5040_vm2, %v23369_v40  ;;  %v9338_v40 = vcombine.low %v23388_v16, %v23387_v31  ;;  %v23397_v31 = vld [vmem:[#allocation137_spill] sm:$0xff]  ;;  %v23398_v16 = vld [vmem:[#allocation139_spill] sm:$0xff] }
 0x29f   : > { %16591 = vmatprep.mubr.msk.f32.mxu0 %vm5040_vm2, %v23370_v12  ;;  %v23389_v12 = vld [vmem:[#allocation105_spill] sm:$0xff] }
 0x2a0   : > { %16404 = vmatmul.mubr.msk.f32.gmra.mrb[26].mxu1 %vm5040_vm2, %v23380_v2  ;;  %v21012_v0 = vrot.slane %v9338_v40, %v18477_v8  ;;  %v23399_v40 = vld [vmem:[#allocation138_spill] sm:$0xff] }
 0x2a1   : > { %16406 = vmatprep.mubr.msk.f32.mxu1 %vm5040_vm2, %v23381_v53 }
 0x2a2   : > { %16592 = vmatmul.mubr.msk.f32.gmra.mrb[18].mxu0 %vm5040_vm2, %v23373_v39  ;;  %v20988_v39 = vrot.slane %v9287_v10, %v18477_v8  ;;  %v21006_v10 = vrot.slane %v9336_v52, %v18477_v8  ;;  %v23393_v52 = vld [vmem:[#allocation133_spill] sm:$0xff] }
 0x2a3   : > { %16594 = vmatprep.mubr.msk.f32.mxu0 %vm5040_vm2, %v23374_v54  ;;  %v20991_v54 = vrot.slane %v9288_v38, %v18477_v8  ;;  %v23392_v38 = vld [vmem:[#allocation115_spill] sm:$0xff] }
 0x2a4   : > { %16407 = vmatmul.mubr.msk.f32.gmra.mrb[28].mxu1 %vm5040_vm2, %v23390_v18  ;;  %v9318_v15 = vcombine.low %v9296_v26, %v20988_v39  ;;  %v9367_v51 = vcombine.low %v21003_v56, %v21006_v10  ;;  %v23401_v26 = vld [vmem:[#allocation140_spill] sm:$0xff] }
 0x2a5   : > { %16409 = vmatprep.mubr.msk.f32.mxu1 %vm5040_vm2, %v20774_v50  ;;  %v9319_v24 = vcombine.low %v20991_v54, %v20994_v44 }
 0x2a6   : > { %16595 = vmatmul.mubr.msk.f32.gmra.mrb[20].mxu0 %vm5040_vm2, %v23382_v19  ;;  %v9368_v19 = vcombine.low %v21009_v58, %v21012_v0  ;;  %v9326_v14 = vrot.slane %v9318_v15, %v18477_v8  ;;  %v9375_v7 = vrot.slane %v9367_v51, %v18477_v8  ;;  %v23405_v15 = vld [vmem:[#allocation146_spill] sm:$0xff]  ;;  %v23407_v51 = vld [vmem:[#allocation147_spill] sm:$0xff] }
 0x2a7   : > { %16597 = vmatprep.mubr.msk.f32.mxu0 %vm5040_vm2, %v23389_v12  ;;  %v9333_v1 = vrot.slane %v9319_v24, %v18477_v8  ;;  %v23400_v12 = vld [vmem:[#allocation142_spill] sm:$0xff]  ;;  %v23406_v24 = vld [vmem:[#allocation148_spill] sm:$0xff] }
 0x2a8   : > { %16410 = vmatmul.mubr.msk.f32.gmra.mrb[30].mxu1 %vm5040_vm2, %v20787_v46 }
 0x2a9   : > { %v9334_v21 = vcombine.low %v9326_v14, %v9333_v1  ;;  %v23409_v14 = vld [vmem:[#allocation149_spill] sm:$0xff]  ;;  %v23410_v1 = vld [vmem:[#allocation152_spill] sm:$0xff] }
 0x2aa   : > { %16598 = vmatmul.mubr.msk.f32.gmra.mrb[22].mxu0 %vm5040_vm2, %v23391_v13  ;;  %v23402_v13 = vld [vmem:[#allocation144_spill] sm:$0xff] }
 0x2ab   : > { %16600 = vmatprep.mubr.msk.f32.mxu0 %vm5040_vm2, %v23392_v38  ;;  %v23403_v38 = vld [vmem:[#allocation143_spill] sm:$0xff] }
 0x2ae   : > { %16601 = vmatmul.mubr.msk.f32.gmra.mrb[24].mxu0 %vm5040_vm2, %v23363_v33  ;;  %v9382_v33 = vrot.slane %v9368_v19, %v18477_v8  ;;  %v23408_v19 = vld [vmem:[#allocation150_spill] sm:$0xff] }
 0x2af   : > { %16603 = vmatprep.mubr.msk.f32.mxu0 %vm5040_vm2, %v23364_v6  ;;  %v23395_v6 = vld [vmem:[#allocation135_spill] sm:$0xff] }
 0x2b0   : > { %v9383_v59 = vcombine.low %v9375_v7, %v9382_v33  ;;  %v23411_v7 = vld [vmem:[#allocation151_spill] sm:$0xff]  ;;  %v23412_v33 = vld [vmem:[#allocation154_spill] sm:$0xff] }
 0x2b2   : > { %16604 = vmatmul.mubr.msk.f32.gmra.mrb[26].mxu0 %vm5040_vm2, %v23365_v47  ;;  %v23396_v47 = vld [vmem:[#allocation136_spill] sm:$0xff] }
 0x2b3   : > { %16606 = vmatprep.mubr.msk.f32.mxu0 %vm5040_vm2, %v23393_v52  ;;  %v23413_v52 = vld [vmem:[#allocation153_spill] sm:$0xff] }
 0x2b6   : > { %16607 = vmatmul.mubr.msk.f32.gmra.mrb[28].mxu0 %vm5040_vm2, %v23394_v25  ;;  %v23415_v25 = vld [vmem:[#allocation155_spill] sm:$0xff] }
 0x2b7   : > { %16609 = vmatprep.mubr.msk.f32.mxu0 %vm5040_vm2, %v9334_v21  ;;  %v23414_v21 = vld [vmem:[#allocation156_spill] sm:$0xff] }
 0x2ba   : > { %16610 = vmatmul.mubr.msk.f32.gmra.mrb[30].mxu0 %vm5040_vm2, %v9383_v59  ;;  %v23416_v59 = vld [vmem:[#allocation158_spill] sm:$0xff] }
 0x2bb   : > { %16614 = vmatprep.mubr.msk.f32.mxu0 %vm5040_vm2, %v23395_v6  ;;  %v23417_v6 = vld [vmem:[#allocation157_spill] sm:$0xff] }
 0x2be   : > { %16615 = vmatmul.mubr.msk.f32.vlgmr.msra.gmra.mrb[0].mxu0 %vm5040_vm2, %v23396_v47  ;;  %v23418_v47 = vld [vmem:[#allocation160_spill] sm:$0xff] }
 0x2bf   : > { %16663 = vmatpush3.msk.msra.mxu0 %vm5105_vm0, %v20881_v22  ;;  %16617 = vmatprep.mubr.msk.f32.mxu0 %vm5040_vm2, %v23397_v31  ;;  %v23404_v22 = vld [vmem:[#allocation145_spill] sm:$0xff]  ;;  %v23419_v31 = vld [vmem:[#allocation159_spill] sm:$0xff] }
 0x2c2   : > { %16618 = vmatmul.mubr.msk.f32.gmra.mrb[2].mxu0 %vm5040_vm2, %v23398_v16  ;;  %v23420_v16 = vld [vmem:[#allocation162_spill] sm:$0xff] }
 0x2c3   : > { %16620 = vmatprep.mubr.msk.f32.mxu0 %vm5040_vm2, %v23399_v40  ;;  %v23421_v40 = vld [vmem:[#allocation161_spill] sm:$0xff] }
 0x2c6   : > { %16621 = vmatmul.mubr.msk.f32.gmra.mrb[4].mxu0 %vm5040_vm2, %v23400_v12  ;;  %v23422_v12 = vld [vmem:[#allocation164_spill] sm:$0xff] }
 0x2c7   : > { %16623 = vmatprep.mubr.msk.f32.mxu0 %vm5040_vm2, %v23401_v26  ;;  %v23423_v26 = vld [vmem:[#allocation163_spill] sm:$0xff] }
 0x2ca   : > { %16624 = vmatmul.mubr.msk.f32.gmra.mrb[6].mxu0 %vm5040_vm2, %v23402_v13  ;;  %v23424_v13 = vld [vmem:[#allocation165_spill] sm:$0xff] }
 0x2cb   : > { %16626 = vmatprep.mubr.msk.f32.mxu0 %vm5040_vm2, %v23403_v38  ;;  %v23425_v38 = vld [vmem:[#allocation13_spill] sm:$0xff] }
 0x2ce   : > { %16627 = vmatmul.mubr.msk.f32.gmra.mrb[8].mxu0 %vm5040_vm2, %v23404_v22  ;;  %v23426_v22 = vld [vmem:[#allocation15_spill] sm:$0xff] }
 0x2cf   : > { %16629 = vmatprep.mubr.msk.f32.mxu0 %vm5040_vm2, %v23405_v15 }
 0x2d2   : > { %16630 = vmatmul.mubr.msk.f32.gmra.mrb[10].mxu0 %vm5040_vm2, %v23406_v24 }
 0x2d3   : > { %16632 = vmatprep.mubr.msk.f32.mxu0 %vm5040_vm2, %v23407_v51 }
 0x2d6   : > { %16633 = vmatmul.mubr.msk.f32.gmra.mrb[12].mxu0 %vm5040_vm2, %v23408_v19 }
 0x2d7   : > { %16635 = vmatprep.mubr.msk.f32.mxu0 %vm5040_vm2, %v23409_v14 }
 0x2da   : > { %16636 = vmatmul.mubr.msk.f32.gmra.mrb[14].mxu0 %vm5040_vm2, %v23410_v1 }
 0x2db   : > { %16638 = vmatprep.mubr.msk.f32.mxu0 %vm5040_vm2, %v23411_v7  ;;  %v11135_v7 = vld [vmem:[%s22796_s4 + $0x8] sm:$0xff] }
 0x2dc   : > { %16712 = vmatprep.subr.mxu1 %v11135_v7 }
 0x2dd   : > { %16713 = vmatpush3.msra.mxu1 %v11135_v7 }
 0x2de   : > { %16639 = vmatmul.mubr.msk.f32.gmra.mrb[16].mxu0 %vm5040_vm2, %v23412_v33 }
 0x2df   : > { %16641 = vmatprep.mubr.msk.f32.mxu0 %vm5040_vm2, %v23413_v52 }
 0x2e2   : > { %16642 = vmatmul.mubr.msk.f32.gmra.mrb[18].mxu0 %vm5040_vm2, %v23414_v21 }
 0x2e3   : > { %16644 = vmatprep.mubr.msk.f32.mxu0 %vm5040_vm2, %v23415_v25 }
 0x2e6   : > { %16645 = vmatmul.mubr.msk.f32.gmra.mrb[20].mxu0 %vm5040_vm2, %v23416_v59 }
 0x2e7   : > { %16647 = vmatprep.mubr.msk.f32.mxu0 %vm5040_vm2, %v23417_v6 }
 0x2ea   : > { %16648 = vmatmul.mubr.msk.f32.gmra.mrb[22].mxu0 %vm5040_vm2, %v23418_v47 }
 0x2eb   : > { %16650 = vmatprep.mubr.msk.f32.mxu0 %vm5040_vm2, %v23419_v31 }
 0x2ee   : > { %16651 = vmatmul.mubr.msk.f32.gmra.mrb[24].mxu0 %vm5040_vm2, %v23420_v16 }
 0x2ef   : > { %16653 = vmatprep.mubr.msk.f32.mxu0 %vm5040_vm2, %v23421_v40 }
 0x2f2   : > { %16654 = vmatmul.mubr.msk.f32.gmra.mrb[26].mxu0 %vm5040_vm2, %v23422_v12 }
 0x2f3   : > { %16656 = vmatprep.mubr.msk.f32.mxu0 %vm5040_vm2, %v23423_v26 }
 0x2f6   : > { %16657 = vmatmul.mubr.msk.f32.gmra.mrb[28].mxu0 %vm5040_vm2, %v23424_v13 }
 0x2f7   : > { %16659 = vmatprep.mubr.msk.f32.mxu0 %vm5040_vm2, %v9697_v28 }
 0x2fa   : > { %16660 = vmatmul.mubr.msk.f32.gmra.mrb[30].mxu0 %vm5040_vm2, %v9746_v42 }
 0x2fb   : > { %16664 = vmatprep.mubr.msk.f32.mxu0 %vm5040_vm2, %v23425_v38 }
 0x2fe   : > { %16665 = vmatmul.mubr.msk.f32.vlgmr.msra.gmra.mrb[0].mxu0 %vm5040_vm2, %v23426_v22 }
 0x2ff   : > { %16667 = vmatprep.mubr.msk.f32.mxu0 %vm5040_vm2, %v20452_v35 }
 0x302   : > { %16668 = vmatmul.mubr.msk.f32.gmra.mrb[2].mxu0 %vm5040_vm2, %v20472_v36 }
 0x303   : > { %16670 = vmatprep.mubr.msk.f32.mxu0 %vm5040_vm2, %v20489_v37 }
 0x306   : > { %16671 = vmatmul.mubr.msk.f32.gmra.mrb[4].mxu0 %vm5040_vm2, %v20505_v17 }
 0x307   : > { %16673 = vmatprep.mubr.msk.f32.mxu0 %vm5040_vm2, %v20512_v48 }
 0x309   : > { %v21133_v35 = vpop.f32.mrb[0].mxu1 }
 0x30a   : > { %16674 = vmatmul.mubr.msk.f32.gmra.mrb[6].mxu0 %vm5040_vm2, %v20529_v63  ;;  %v21135_v36 = vpop.f32.mrb[1].mxu1  ;;  %v3215_v63 = vld [vmem:[#allocation2 + $0x143] sm:$0x1] }
 0x30b   : > { %16676 = vmatprep.mubr.msk.f32.mxu0 %vm5040_vm2, %v20520_v60 }
 0x30d   : > { %v21141_v37 = vpop.f32.mrb[2].mxu1 }
 0x30e   : > { %16677 = vmatmul.mubr.msk.f32.gmra.mrb[8].mxu0 %vm5040_vm2, %v20557_v45  ;;  %v21143_v17 = vpop.f32.mrb[3].mxu1  ;;  %v23427_v45 = vld [vmem:[#allocation12_spill] sm:$0xff] }
 0x30f   : > { %16679 = vmatprep.mubr.msk.f32.mxu0 %vm5040_vm2, %v20564_v9  ;;  %v10029_v9 = vcombine.low %v23427_v45, %v3215_v63 }
 0x311   : > { %v21149_v48 = vpop.f32.mrb[4].mxu1 }
 0x312   : > { %16680 = vmatmul.mubr.msk.f32.gmra.mrb[10].mxu0 %vm5040_vm2, %v20583_v41  ;;  %v21151_v60 = vpop.f32.mrb[5].mxu1  ;;  %v10036_v41 = vrot.slane %v10029_v9, %v18477_v8 }
 0x313   : > { %16682 = vmatprep.mubr.msk.f32.mxu0 %vm5040_vm2, %v20589_v4  ;;  %v10012_v4 = vcombine.low %v20988_v39, %v20991_v54 }
 0x316   : > { %16683 = vmatmul.mubr.msk.f32.gmra.mrb[12].mxu0 %vm5040_vm2, %v20603_v29  ;;  %v10037_v29 = vcombine.low %v21006_v10, %v21009_v58 }
 0x317   : > { %16685 = vmatprep.mubr.msk.f32.mxu0 %vm5040_vm2, %v20598_v43  ;;  %v10013_v43 = vcombine.low %v20994_v44, %v21003_v56 }
 0x31a   : > { %16686 = vmatmul.mubr.msk.f32.gmra.mrb[14].mxu0 %vm5040_vm2, %v20641_v55  ;;  %v10038_v55 = vcombine.low %v21012_v0, %v10036_v41 }
 0x31b   : > { %16688 = vmatprep.mubr.msk.f32.mxu0 %vm5040_vm2, %v20648_v20  ;;  %v10020_v20 = vrot.slane %v10012_v4, %v18477_v8 }
 0x31e   : > { %16689 = vmatmul.mubr.msk.f32.gmra.mrb[16].mxu0 %vm5040_vm2, %v20665_v62  ;;  %v10027_v62 = vrot.slane %v10013_v43, %v18477_v8 }
 0x31f   : > { %16691 = vmatprep.mubr.msk.f32.mxu0 %vm5040_vm2, %v20672_v23  ;;  %v10045_v23 = vrot.slane %v10037_v29, %v18477_v8  ;;  %v17690_v29 = vmov 1983009808  }
 0x320   : > { %v10028_v11 = vcombine.low %v10020_v20, %v10027_v62 }
 0x322   : > { %16692 = vmatmul.mubr.msk.f32.gmra.mrb[18].mxu0 %vm5040_vm2, %v20691_v34  ;;  %v10052_v34 = vrot.slane %v10038_v55, %v18477_v8  ;;  %v10352_v55 = vunpack.c.l.s4 %v17690_v29 }
 0x323   : > { %16694 = vmatprep.mubr.msk.f32.mxu0 %vm5040_vm2, %v23368_v27 }
 0x324   : > { %v10053_v61 = vcombine.low %v10045_v23, %v10052_v34  ;;  %v10353_v34 = vunpack.c.0.s8 %v10352_v55  ;;  %v21488_v55 = vld [vmem:[%s22795_s3] sm:$0x1] }
 0x326   : > { %16695 = vmatmul.mubr.msk.f32.gmra.mrb[20].mxu0 %vm5040_vm2, %v23371_v57 }
 0x327   : > { %16697 = vmatprep.mubr.msk.f32.mxu0 %vm5040_vm2, %v23372_v32 }
 0x32a   : > { %16698 = vmatmul.mubr.msk.f32.gmra.mrb[22].mxu0 %vm5040_vm2, %v23380_v2 }
 0x32b   : > { %16700 = vmatprep.mubr.msk.f32.mxu0 %vm5040_vm2, %v23381_v53  ;;  %v23428_v53 = vmov 0.0  }
 0x32c   : > { %11161 = vst.msk [vmem:[#allocation3 + $0xf] sm:$0x1] %vm11145_vm3, %v23428_v53  ;;  %11162 = vst.msk [vmem:[#allocation3 + $0x10] sm:$0x1] %vm11145_vm3, %v23428_v53 }
 0x32d   : > { %11163 = vst.msk [vmem:[#allocation3 + $0x11] sm:$0x1] %vm11145_vm3, %v23428_v53  ;;  %11164 = vst.msk [vmem:[#allocation3 + $0x12] sm:$0x1] %vm11145_vm3, %v23428_v53 }
 0x32e   : > { %16701 = vmatmul.mubr.msk.f32.gmra.mrb[24].mxu0 %vm5040_vm2, %v23390_v18  ;;  %11146 = vst.msk [vmem:[#allocation3] sm:$0x1] %vm11145_vm3, %v23428_v53  ;;  %11147 = vst.msk [vmem:[#allocation3 + $0x1] sm:$0x1] %vm11145_vm3, %v23428_v53 }
 0x32f   : > { %16703 = vmatprep.mubr.msk.f32.mxu0 %vm5040_vm2, %v20774_v50  ;;  %11148 = vst.msk [vmem:[#allocation3 + $0x2] sm:$0x1] %vm11145_vm3, %v23428_v53  ;;  %11149 = vst.msk [vmem:[#allocation3 + $0x3] sm:$0x1] %vm11145_vm3, %v23428_v53 }
 0x330   : > { %11150 = vst.msk [vmem:[#allocation3 + $0x4] sm:$0x1] %vm11145_vm3, %v23428_v53  ;;  %11151 = vst.msk [vmem:[#allocation3 + $0x5] sm:$0x1] %vm11145_vm3, %v23428_v53 }
 0x331   : > { %11152 = vst.msk [vmem:[#allocation3 + $0x6] sm:$0x1] %vm11145_vm3, %v23428_v53  ;;  %11153 = vst.msk [vmem:[#allocation3 + $0x7] sm:$0x1] %vm11145_vm3, %v23428_v53 }
 0x332   : > { %16704 = vmatmul.mubr.msk.f32.gmra.mrb[26].mxu0 %vm5040_vm2, %v20787_v46  ;;  %11154 = vst.msk [vmem:[#allocation3 + $0x8] sm:$0x1] %vm11145_vm3, %v23428_v53  ;;  %11155 = vst.msk [vmem:[#allocation3 + $0x9] sm:$0x1] %vm11145_vm3, %v23428_v53 }
 0x333   : > { %16706 = vmatprep.mubr.msk.f32.mxu0 %vm5040_vm2, %v20838_v30  ;;  %11156 = vst.msk [vmem:[#allocation3 + $0xa] sm:$0x1] %vm11145_vm3, %v23428_v53  ;;  %11157 = vst.msk [vmem:[#allocation3 + $0xb] sm:$0x1] %vm11145_vm3, %v23428_v53 }
 0x334   : > { %11158 = vst.msk [vmem:[#allocation3 + $0xc] sm:$0x1] %vm11145_vm3, %v23428_v53  ;;  %11159 = vst.msk [vmem:[#allocation3 + $0xd] sm:$0x1] %vm11145_vm3, %v23428_v53 }
 0x335   : > { %11160 = vst.msk [vmem:[#allocation3 + $0xe] sm:$0x1] %vm11145_vm3, %v23428_v53  ;;  %11165 = vst.msk [vmem:[#allocation3 + $0x13] sm:$0x1] %vm11145_vm3, %v23428_v53  ;;  %v21453_v33 = vld [vmem:[#allocation3 + $0x1] sm:$0x1] }
 0x336   : > { %16707 = vmatmul.mubr.msk.f32.gmra.mrb[28].mxu0 %vm5040_vm2, %v20852_v49  ;;  %11166 = vst.msk [vmem:[#allocation3 + $0x14] sm:$0x1] %vm11145_vm3, %v23428_v53  ;;  %11167 = vst.msk [vmem:[#allocation3 + $0x15] sm:$0x1] %vm11145_vm3, %v23428_v53  ;;  %v11313_v52 = vld [vmem:[#allocation3 + $0x2] sm:$0x1] }
 0x337   : > { %16709 = vmatprep.mubr.msk.f32.mxu0 %vm5040_vm2, %v10028_v11  ;;  %11168 = vst.msk [vmem:[#allocation3 + $0x16] sm:$0x1] %vm11145_vm3, %v23428_v53  ;;  %11169 = vst.msk [vmem:[#allocation3 + $0x17] sm:$0x1] %vm11145_vm3, %v23428_v53  ;;  %v11314_v21 = vld [vmem:[#allocation3 + $0x3] sm:$0x1]  ;;  %v11475_v47 = vcombine.low %v21453_v33, %v11313_v52 }
 0x338   : > { %11170 = vst.msk [vmem:[#allocation3 + $0x18] sm:$0x1] %vm11145_vm3, %v23428_v53  ;;  %11171 = vst.msk [vmem:[#allocation3 + $0x19] sm:$0x1] %vm11145_vm3, %v23428_v53  ;;  %v11315_v25 = vld [vmem:[#allocation3 + $0x4] sm:$0x1] }
 0x339   : > { %11172 = vst.msk [vmem:[#allocation3 + $0x1a] sm:$0x1] %vm11145_vm3, %v23428_v53  ;;  %11173 = vst.msk [vmem:[#allocation3 + $0x1b] sm:$0x1] %vm11145_vm3, %v23428_v53  ;;  %v11316_v59 = vld [vmem:[#allocation3 + $0x5] sm:$0x1]  ;;  %v11476_v40 = vcombine.low %v11314_v21, %v11315_v25  ;;  %v11485_v13 = vrot.slane %v11475_v47, %v18477_v8 }
 0x33a   : > { %16710 = vmatmul.mubr.msk.f32.gmra.mrb[30].mxu0 %vm5040_vm2, %v10053_v61  ;;  %11174 = vst.msk [vmem:[#allocation3 + $0x1c] sm:$0x1] %vm11145_vm3, %v23428_v53  ;;  %11175 = vst.msk [vmem:[#allocation3 + $0x1d] sm:$0x1] %vm11145_vm3, %v23428_v53  ;;  %v11317_v6 = vld [vmem:[#allocation3 + $0x6] sm:$0x1] }
 0x33b   : > { %11176 = vst.msk [vmem:[#allocation3 + $0x1e] sm:$0x1] %vm11145_vm3, %v23428_v53  ;;  %11177 = vst.msk [vmem:[#allocation3 + $0x1f] sm:$0x1] %vm11145_vm3, %v23428_v53  ;;  %v11318_v31 = vld [vmem:[#allocation3 + $0x7] sm:$0x1]  ;;  %v11477_v12 = vcombine.low %v11316_v59, %v11317_v6  ;;  %v11492_v38 = vrot.slane %v11476_v40, %v18477_v8 }
 0x33c   : > { %11178 = vst.msk [vmem:[#allocation3 + $0x20] sm:$0x1] %vm11145_vm3, %v23428_v53  ;;  %11179 = vst.msk [vmem:[#allocation3 + $0x21] sm:$0x1] %vm11145_vm3, %v23428_v53  ;;  %v11319_v16 = vld [vmem:[#allocation3 + $0x8] sm:$0x1] }
 0x33d   : > { %11180 = vst.msk [vmem:[#allocation3 + $0x22] sm:$0x1] %vm11145_vm3, %v23428_v53  ;;  %11181 = vst.msk [vmem:[#allocation3 + $0x23] sm:$0x1] %vm11145_vm3, %v23428_v53  ;;  %v11478_v26 = vcombine.low %v11318_v31, %v11319_v16  ;;  %v11499_v22 = vrot.slane %v11477_v12, %v18477_v8  ;;  %v11507_v45 = vcombine.low %v11485_v13, %v11492_v38  ;;  %v23429_v52 = vld [vmem:[#allocation7_spill] sm:$0xff] }
 0x33e   : > { %11182 = vst.msk [vmem:[#allocation3 + $0x24] sm:$0x1] %vm11145_vm3, %v23428_v53  ;;  %11183 = vst.msk [vmem:[#allocation3 + $0x25] sm:$0x1] %vm11145_vm3, %v23428_v53  ;;  %v21467_v21 = vsub.s32 %v10353_v34, %v23429_v52 }
 0x33f   : > { %11184 = vst.msk [vmem:[#allocation3 + $0x26] sm:$0x1] %vm11145_vm3, %v23428_v53  ;;  %11185 = vst.msk [vmem:[#allocation3 + $0x27] sm:$0x1] %vm11145_vm3, %v23428_v53  ;;  %v11506_v63 = vrot.slane %v11478_v26, %v18477_v8  ;;  %v11515_v41 = vrot.slane %v11507_v45, %v18477_v8 }
 0x340   : > { %11186 = vst.msk [vmem:[#allocation3 + $0x28] sm:$0x1] %vm11145_vm3, %v23428_v53  ;;  %11187 = vst.msk [vmem:[#allocation3 + $0x29] sm:$0x1] %vm11145_vm3, %v23428_v53 }
 0x341   : > { %11188 = vst.msk [vmem:[#allocation3 + $0x2a] sm:$0x1] %vm11145_vm3, %v23428_v53  ;;  %11189 = vst.msk [vmem:[#allocation3 + $0x2b] sm:$0x1] %vm11145_vm3, %v23428_v53  ;;  %v11508_v9 = vcombine.low %v11499_v22, %v11506_v63  ;;  %v21482_v22 = vld [vmem:[%s22794_s2] sm:$0x1] }
 0x342   : > { %11190 = vst.msk [vmem:[#allocation3 + $0x2c] sm:$0x1] %vm11145_vm3, %v23428_v53  ;;  %11191 = vst.msk [vmem:[#allocation3 + $0x2d] sm:$0x1] %vm11145_vm3, %v23428_v53 }
 0x343   : > { %11192 = vst.msk [vmem:[#allocation3 + $0x2e] sm:$0x1] %vm11145_vm3, %v23428_v53  ;;  %11193 = vst.msk [vmem:[#allocation3 + $0x2f] sm:$0x1] %vm11145_vm3, %v23428_v53  ;;  %v11522_v4 = vrot.slane %v11508_v9, %v18477_v8 }
 0x344   : > { %11194 = vst.msk [vmem:[#allocation3 + $0x30] sm:$0x1] %vm11145_vm3, %v23428_v53  ;;  %11195 = vst.msk [vmem:[#allocation3 + $0x31] sm:$0x1] %vm11145_vm3, %v23428_v53 }
 0x345   : > { %11196 = vst.msk [vmem:[#allocation3 + $0x32] sm:$0x1] %vm11145_vm3, %v23428_v53  ;;  %11197 = vst.msk [vmem:[#allocation3 + $0x33] sm:$0x1] %vm11145_vm3, %v23428_v53  ;;  %v11523_v43 = vcombine.low %v11515_v41, %v11522_v4 }
 0x346   : > { %11198 = vst.msk [vmem:[#allocation3 + $0x34] sm:$0x1] %vm11145_vm3, %v23428_v53  ;;  %11199 = vst.msk [vmem:[#allocation3 + $0x35] sm:$0x1] %vm11145_vm3, %v23428_v53 }
 0x347   : > { %11200 = vst.msk [vmem:[#allocation3 + $0x36] sm:$0x1] %vm11145_vm3, %v23428_v53  ;;  %11201 = vst.msk [vmem:[#allocation3 + $0x37] sm:$0x1] %vm11145_vm3, %v23428_v53  ;;  %16714 = vmatprep.mubr.msk.f32.mxu1 %vm11867_vm4, %v11523_v43 }
 0x348   : > { %11202 = vst.msk [vmem:[#allocation3 + $0x38] sm:$0x1] %vm11145_vm3, %v23428_v53  ;;  %11203 = vst.msk [vmem:[#allocation3 + $0x39] sm:$0x1] %vm11145_vm3, %v23428_v53 }
 0x349   : > { %11204 = vst.msk [vmem:[#allocation3 + $0x3a] sm:$0x1] %vm11145_vm3, %v23428_v53  ;;  %11205 = vst.msk [vmem:[#allocation3 + $0x3b] sm:$0x1] %vm11145_vm3, %v23428_v53 }
 0x34a   : > { %11206 = vst.msk [vmem:[#allocation3 + $0x3c] sm:$0x1] %vm11145_vm3, %v23428_v53  ;;  %11207 = vst.msk [vmem:[#allocation3 + $0x3d] sm:$0x1] %vm11145_vm3, %v23428_v53 }
 0x34b   : > { %v21198_v50 = vpop.f32.mrb[6].mxu1  ;;  %11208 = vst.msk [vmem:[#allocation3 + $0x3e] sm:$0x1] %vm11145_vm3, %v23428_v53  ;;  %11209 = vst.msk [vmem:[#allocation3 + $0x3f] sm:$0x1] %vm11145_vm3, %v23428_v53 }
 0x34c   : > { %v21200_v3 = vpop.f32.mrb[7].mxu1  ;;  %11210 = vst.msk [vmem:[#allocation3 + $0x40] sm:$0x1] %vm11145_vm3, %v23428_v53  ;;  %11211 = vst.msk [vmem:[#allocation3 + $0x41] sm:$0x1] %vm11145_vm3, %v23428_v53 }
 0x34d   : > { %11212 = vst.msk [vmem:[#allocation3 + $0x42] sm:$0x1] %vm11145_vm3, %v23428_v53  ;;  %11213 = vst.msk [vmem:[#allocation3 + $0x43] sm:$0x1] %vm11145_vm3, %v23428_v53 }
 0x34e   : > { %11214 = vst.msk [vmem:[#allocation3 + $0x44] sm:$0x1] %vm11145_vm3, %v23428_v53  ;;  %11215 = vst.msk [vmem:[#allocation3 + $0x45] sm:$0x1] %vm11145_vm3, %v23428_v53 }
 0x34f   : > { %v21202_v46 = vpop.f32.mrb[8].mxu1  ;;  %11216 = vst.msk [vmem:[#allocation3 + $0x46] sm:$0x1] %vm11145_vm3, %v23428_v53  ;;  %11217 = vst.msk [vmem:[#allocation3 + $0x47] sm:$0x1] %vm11145_vm3, %v23428_v53 }
 0x350   : > { %v21204_v5 = vpop.f32.mrb[9].mxu1  ;;  %11218 = vst.msk [vmem:[#allocation3 + $0x48] sm:$0x1] %vm11145_vm3, %v23428_v53  ;;  %11219 = vst.msk [vmem:[#allocation3 + $0x49] sm:$0x1] %vm11145_vm3, %v23428_v53 }
 0x351   : > { %11220 = vst.msk [vmem:[#allocation3 + $0x4a] sm:$0x1] %vm11145_vm3, %v23428_v53  ;;  %11221 = vst.msk [vmem:[#allocation3 + $0x4b] sm:$0x1] %vm11145_vm3, %v23428_v53 }
 0x352   : > { %11222 = vst.msk [vmem:[#allocation3 + $0x4c] sm:$0x1] %vm11145_vm3, %v23428_v53  ;;  %11223 = vst.msk [vmem:[#allocation3 + $0x4d] sm:$0x1] %vm11145_vm3, %v23428_v53 }
 0x353   : > { %v21206_v28 = vpop.f32.mrb[10].mxu1  ;;  %11224 = vst.msk [vmem:[#allocation3 + $0x4e] sm:$0x1] %vm11145_vm3, %v23428_v53  ;;  %11225 = vst.msk [vmem:[#allocation3 + $0x4f] sm:$0x1] %vm11145_vm3, %v23428_v53 }
 0x354   : > { %v21208_v30 = vpop.f32.mrb[11].mxu1  ;;  %11226 = vst.msk [vmem:[#allocation3 + $0x50] sm:$0x1] %vm11145_vm3, %v23428_v53  ;;  %11227 = vst.msk [vmem:[#allocation3 + $0x51] sm:$0x1] %vm11145_vm3, %v23428_v53 }
 0x355   : > { %11228 = vst.msk [vmem:[#allocation3 + $0x52] sm:$0x1] %vm11145_vm3, %v23428_v53  ;;  %11229 = vst.msk [vmem:[#allocation3 + $0x53] sm:$0x1] %vm11145_vm3, %v23428_v53 }
 0x356   : > { %11230 = vst.msk [vmem:[#allocation3 + $0x54] sm:$0x1] %vm11145_vm3, %v23428_v53  ;;  %11231 = vst.msk [vmem:[#allocation3 + $0x55] sm:$0x1] %vm11145_vm3, %v23428_v53 }
 0x357   : > { %v21210_v42 = vpop.f32.mrb[12].mxu1  ;;  %11232 = vst.msk [vmem:[#allocation3 + $0x56] sm:$0x1] %vm11145_vm3, %v23428_v53  ;;  %11233 = vst.msk [vmem:[#allocation3 + $0x57] sm:$0x1] %vm11145_vm3, %v23428_v53 }
 0x358   : > { %v21212_v49 = vpop.f32.mrb[13].mxu1  ;;  %11234 = vst.msk [vmem:[#allocation3 + $0x58] sm:$0x1] %vm11145_vm3, %v23428_v53  ;;  %11235 = vst.msk [vmem:[#allocation3 + $0x59] sm:$0x1] %vm11145_vm3, %v23428_v53 }
 0x359   : > { %11236 = vst.msk [vmem:[#allocation3 + $0x5a] sm:$0x1] %vm11145_vm3, %v23428_v53  ;;  %11237 = vst.msk [vmem:[#allocation3 + $0x5b] sm:$0x1] %vm11145_vm3, %v23428_v53 }
 0x35a   : > { %11238 = vst.msk [vmem:[#allocation3 + $0x5c] sm:$0x1] %vm11145_vm3, %v23428_v53  ;;  %11239 = vst.msk [vmem:[#allocation3 + $0x5d] sm:$0x1] %vm11145_vm3, %v23428_v53 }
 0x35b   : > { %v21214_v27 = vpop.f32.mrb[14].mxu1  ;;  %11240 = vst.msk [vmem:[#allocation3 + $0x5e] sm:$0x1] %vm11145_vm3, %v23428_v53  ;;  %11241 = vst.msk [vmem:[#allocation3 + $0x5f] sm:$0x1] %vm11145_vm3, %v23428_v53 }
 0x35c   : > { %v21216_v57 = vpop.f32.mrb[15].mxu1  ;;  %11242 = vst.msk [vmem:[#allocation3 + $0x60] sm:$0x1] %vm11145_vm3, %v23428_v53  ;;  %11243 = vst.msk [vmem:[#allocation3 + $0x61] sm:$0x1] %vm11145_vm3, %v23428_v53 }
 0x35d   : > { %11244 = vst.msk [vmem:[#allocation3 + $0x62] sm:$0x1] %vm11145_vm3, %v23428_v53  ;;  %11245 = vst.msk [vmem:[#allocation3 + $0x63] sm:$0x1] %vm11145_vm3, %v23428_v53 }
 0x35e   : > { %23430 = vst [vmem:[#allocation36_spill] sm:$0xff] %v21467_v21 }
 0x35f   : > { %v21218_v32 = vpop.f32.mrb[16].mxu1 }
 0x360   : > { %v21220_v2 = vpop.f32.mrb[17].mxu1 }
 0x363   : > { %v21422_v39 = vpop.f32.mrb[18].mxu1 }
 0x364   : > { %v21424_v54 = vpop.f32.mrb[19].mxu1 }
 0x367   : > { %v21426_v44 = vpop.f32.mrb[20].mxu1 }
 0x368   : > { %v21428_v18 = vpop.f32.mrb[21].mxu1 }
 0x36b   : > { %v21430_v56 = vpop.f32.mrb[22].mxu1 }
 0x36c   : > { %v21432_v10 = vpop.f32.mrb[23].mxu1 }
 0x36f   : > { %v21434_v58 = vpop.f32.mrb[24].mxu1 }
 0x370   : > { %v21436_v0 = vpop.f32.mrb[25].mxu1 }
 0x373   : > { %v21438_v15 = vpop.f32.mrb[26].mxu1 }
 0x374   : > { %v21440_v24 = vpop.f32.mrb[27].mxu1 }
 0x377   : > { %v21442_v51 = vpop.f32.mrb[28].mxu1 }
 0x378   : > { %v21444_v19 = vpop.f32.mrb[29].mxu1 }
 0x37b   : > { %v21446_v14 = vpop.f32.mrb[30].mxu1 }
 0x37c   : > { %v21448_v1 = vpop.f32.mrb[31].mxu1 }
 0x3d1   : > { %v16666_v20 = vpop.f32.mrb[0].mxu0 }
 0x3d2   : > { %v16937_v62 = vadd.f32 %v16666_v20, %v21133_v35  ;;  %v10127_v23 = vpop.f32.mrb[1].mxu0 }
 0x3d3   : > { %v16938_v11 = vadd.f32 %v10127_v23, %v21135_v36 }
 0x3d5   : > { %v16669_v61 = vpop.f32.mrb[2].mxu0 }
 0x3d6   : > { %v16939_v7 = vadd.f32 %v16669_v61, %v21141_v37  ;;  %v10137_v25 = vpop.f32.mrb[3].mxu0 }
 0x3d7   : > { %v16940_v59 = vadd.f32 %v10137_v25, %v21143_v17 }
 0x3d8   : > { %v10319_v6 = vmax.f32 %v16937_v62, %v16939_v7 }
 0x3d9   : > { %v10318_v47 = vmax.f32 %v16938_v11, %v16940_v59  ;;  %v16672_v31 = vpop.f32.mrb[4].mxu0  ;;  %v21493_v11 = vld [vmem:[%s22796_s4] sm:$0xff] }
 0x3da   : > { %v10367_v16 = vcombine.high %v10319_v6, %v10319_v6  ;;  %v10374_v40 = vrot.slane %v10319_v6, %v21467_v21  ;;  %v21472_v35 = vadd.f32 %v16672_v31, %v21149_v48  ;;  %v10147_v12 = vpop.f32.mrb[5].mxu0  ;;  %16726 = vmatprep.subr.mxu1 %v21493_v11 }
 0x3db   : > { %v10350_v36 = vcombine.high %v10318_v47, %v10318_v47  ;;  %v10357_v26 = vrot.slane %v10318_v47, %v21467_v21  ;;  %v21476_v37 = vadd.f32 %v10147_v12, %v21151_v60 }
 0x3dc   : > { %v10381_v13 = vrot.slane %v10367_v16, %v21467_v21  ;;  %v10382_v38 = vcombine.high %v10374_v40, %v10374_v40  ;;  %v15678_v17 = vrot.slane %v10374_v40, 9 }
 0x3dd   : > { %v10364_v63 = vrot.slane %v10350_v36, %v21467_v21  ;;  %v10365_v48 = vcombine.high %v10357_v26, %v10357_v26  ;;  %v15674_v45 = vrot.slane %v10357_v26, 9  ;;  %v16675_v9 = vpop.f32.mrb[6].mxu0 }
 0x3de   : > { %v10383_v41 = vcombine.high %v10381_v13, %v10381_v13  ;;  %v15679_v4 = vrot.slane %v10382_v38, 9  ;;  %v15680_v43 = vrot.slane %v10381_v13, 9  ;;  %v10882_v29 = vmax.f32 %v10374_v40, %v15678_v17  ;;  %v10157_v60 = vpop.f32.mrb[7].mxu0 }
 0x3df   : > { %v10366_v20 = vcombine.high %v10364_v63, %v10364_v63  ;;  %v15675_v62 = vrot.slane %v10365_v48, 9  ;;  %v15676_v23 = vrot.slane %v10364_v63, 9  ;;  %v10878_v34 = vmax.f32 %v10357_v26, %v15674_v45 }
 0x3e0   : > { %v15681_v61 = vrot.slane %v10383_v41, 9  ;;  %v10883_v7 = vmax.f32 %v10382_v38, %v15679_v4  ;;  %v10884_v52 = vmax.f32 %v10381_v13, %v15680_v43  ;;  %v10946_v25 = vmul.f32 %v10882_v29, %v21482_v22 }
 0x3e1   : > { %v15677_v59 = vrot.slane %v10366_v20, 9  ;;  %v10879_v6 = vmax.f32 %v10365_v48, %v15675_v62  ;;  %v10880_v47 = vmax.f32 %v10364_v63, %v15676_v23  ;;  %v10942_v31 = vmul.f32 %v10878_v34, %v21482_v22  ;;  %v16678_v16 = vpop.f32.mrb[8].mxu0 }
 0x3e2   : > { %v10885_v40 = vmax.f32 %v10383_v41, %v15681_v61  ;;  %v10947_v12 = vmul.f32 %v10883_v7, %v21482_v22  ;;  %v10948_v36 = vmul.f32 %v10884_v52, %v21482_v22  ;;  %v11010_v26 = vadd.f32 %v10946_v25, %v21488_v55  ;;  %v10167_v17 = vpop.f32.mrb[9].mxu0 }
 0x3e3   : > { %v10881_v38 = vmax.f32 %v10366_v20, %v15677_v59  ;;  %v10943_v13 = vmul.f32 %v10879_v6, %v21482_v22  ;;  %v10944_v45 = vmul.f32 %v10880_v47, %v21482_v22  ;;  %v11006_v4 = vadd.f32 %v10942_v31, %v21488_v55 }
 0x3e4   : > { %v10949_v63 = vmul.f32 %v10885_v40, %v21482_v22  ;;  %v11011_v48 = vadd.f32 %v10947_v12, %v21488_v55  ;;  %v11012_v41 = vadd.f32 %v10948_v36, %v21488_v55  ;;  %v11074_v43 = vmax.f32 %v11010_v26, 0.0  ;;  %v21516_v12 = vld [vmem:[#allocation3] sm:$0x1] }
 0x3e5   : > { %v10945_v29 = vmul.f32 %v10881_v38, %v21482_v22  ;;  %v11007_v62 = vadd.f32 %v10943_v13, %v21488_v55  ;;  %v11008_v23 = vadd.f32 %v10944_v45, %v21488_v55  ;;  %v11070_v20 = vmax.f32 %v11006_v4, 0.0  ;;  %v16681_v34 = vpop.f32.mrb[10].mxu0 }
 0x3e6   : > { %v11013_v61 = vadd.f32 %v10949_v63, %v21488_v55  ;;  %v11075_v7 = vmax.f32 %v11011_v48, 0.0  ;;  %v11076_v52 = vmax.f32 %v11012_v41, 0.0  ;;  %11251 = vst.msk [vmem:[#allocation3 + $0xf] sm:$0x1] %vm11145_vm3, %v11074_v43  ;;  %v16943_v25 = vadd.f32 %v16675_v9, %v21198_v50  ;;  %v10177_v59 = vpop.f32.mrb[11].mxu0 }
 0x3e7   : > { %v11009_v6 = vadd.f32 %v10945_v29, %v21488_v55  ;;  %v11071_v47 = vmax.f32 %v11007_v62, 0.0  ;;  %v11072_v31 = vmax.f32 %v11008_v23, 0.0  ;;  %11247 = vst.msk [vmem:[#allocation3 + $0xb] sm:$0x1] %vm11145_vm3, %v11070_v20  ;;  %v16944_v40 = vadd.f32 %v10157_v60, %v21200_v3 }
 0x3e8   : > { %v11077_v36 = vmax.f32 %v11013_v61, 0.0  ;;  %11252 = vst.msk [vmem:[#allocation3 + $0x10] sm:$0x1] %vm11145_vm3, %v11075_v7  ;;  %11253 = vst.msk [vmem:[#allocation3 + $0x11] sm:$0x1] %vm11145_vm3, %v11076_v52  ;;  %v10321_v26 = vmax.f32 %v21472_v35, %v16943_v25  ;;  %v16945_v50 = vadd.f32 %v16678_v16, %v21202_v46  ;;  %v16946_v9 = vadd.f32 %v10167_v17, %v21204_v5 }
 0x3e9   : > { %v11073_v38 = vmax.f32 %v11009_v6, 0.0  ;;  %11248 = vst.msk [vmem:[#allocation3 + $0xc] sm:$0x1] %vm11145_vm3, %v11071_v47  ;;  %11249 = vst.msk [vmem:[#allocation3 + $0xd] sm:$0x1] %vm11145_vm3, %v11072_v31  ;;  %v10320_v3 = vmax.f32 %v21476_v37, %v16944_v40  ;;  %v16947_v60 = vadd.f32 %v16681_v34, %v21206_v28  ;;  %v16948_v13 = vadd.f32 %v10177_v59, %v21208_v30  ;;  %v16684_v45 = vpop.f32.mrb[12].mxu0 }
 0x3ea   : > { %11254 = vst.msk [vmem:[#allocation3 + $0x12] sm:$0x1] %vm11145_vm3, %v11077_v36  ;;  %v10401_v4 = vcombine.high %v10321_v26, %v10321_v26  ;;  %v10408_v35 = vrot.slane %v10321_v26, %v21467_v21  ;;  %v21531_v46 = vadd.f32 %v16684_v45, %v21210_v42  ;;  %v10187_v5 = vpop.f32.mrb[13].mxu0 }
 0x3eb   : > { %11250 = vst.msk [vmem:[#allocation3 + $0xe] sm:$0x1] %vm11145_vm3, %v11073_v38  ;;  %v10384_v37 = vcombine.high %v10320_v3, %v10320_v3  ;;  %v10391_v28 = vrot.slane %v10320_v3, %v21467_v21  ;;  %v10323_v17 = vmax.f32 %v16945_v50, %v16947_v60  ;;  %v21537_v30 = vmax.f32 %v16946_v9, %v16948_v13 }
 0x3ec   : > { %v10415_v63 = vrot.slane %v10401_v4, %v21467_v21  ;;  %v10416_v48 = vcombine.high %v10408_v35, %v10408_v35  ;;  %v15686_v41 = vrot.slane %v10408_v35, 9  ;;  %v21541_v43 = vadd.f32 %v10187_v5, %v21212_v49 }
 0x3ed   : > { %v10398_v42 = vrot.slane %v10384_v37, %v21467_v21  ;;  %v10399_v29 = vcombine.high %v10391_v28, %v10391_v28  ;;  %v15682_v62 = vrot.slane %v10391_v28, 9  ;;  %v10435_v23 = vcombine.high %v10323_v17, %v10323_v17  ;;  %v21544_v20 = vpop.f32.mrb[14].mxu0 }
 0x3ee   : > { %v10417_v34 = vcombine.high %v10415_v63, %v10415_v63  ;;  %v15687_v61 = vrot.slane %v10416_v48, 9  ;;  %v15688_v7 = vrot.slane %v10415_v63, 9  ;;  %v10890_v52 = vmax.f32 %v10408_v35, %v15686_v41  ;;  %v21546_v25 = vpop.f32.mrb[15].mxu0 }
 0x3ef   : > { %v10400_v59 = vcombine.high %v10398_v42, %v10398_v42  ;;  %v15683_v6 = vrot.slane %v10399_v29, 9  ;;  %v15684_v47 = vrot.slane %v10398_v42, 9  ;;  %v10886_v31 = vmax.f32 %v10391_v28, %v15682_v62 }
 0x3f0   : > { %v15689_v40 = vrot.slane %v10417_v34, 9  ;;  %v10891_v49 = vmax.f32 %v10416_v48, %v15687_v61  ;;  %v10892_v36 = vmax.f32 %v10415_v63, %v15688_v7  ;;  %v10954_v26 = vmul.f32 %v10890_v52, %v21482_v22 }
 0x3f1   : > { %v15685_v50 = vrot.slane %v10400_v59, 9  ;;  %v10887_v9 = vmax.f32 %v10399_v29, %v15683_v6  ;;  %v10888_v38 = vmax.f32 %v10398_v42, %v15684_v47  ;;  %v10950_v3 = vmul.f32 %v10886_v31, %v21482_v22  ;;  %v21550_v60 = vpop.f32.mrb[16].mxu0 }
 0x3f2   : > { %v10893_v13 = vmax.f32 %v10417_v34, %v15689_v40  ;;  %v10955_v45 = vmul.f32 %v10891_v49, %v21482_v22  ;;  %v10956_v4 = vmul.f32 %v10892_v36, %v21482_v22  ;;  %v11018_v35 = vadd.f32 %v10954_v26, %v21488_v55  ;;  %v21555_v5 = vpop.f32.mrb[17].mxu0 }
 0x3f3   : > { %v10889_v37 = vmax.f32 %v10400_v59, %v15685_v50  ;;  %v10951_v28 = vmul.f32 %v10887_v9, %v21482_v22  ;;  %v10952_v63 = vmul.f32 %v10888_v38, %v21482_v22  ;;  %v11014_v48 = vadd.f32 %v10950_v3, %v21488_v55 }
 0x3f4   : > { %v10957_v41 = vmul.f32 %v10893_v13, %v21482_v22  ;;  %v11019_v42 = vadd.f32 %v10955_v45, %v21488_v55  ;;  %v11020_v29 = vadd.f32 %v10956_v4, %v21488_v55  ;;  %v11082_v62 = vmax.f32 %v11018_v35, 0.0 }
 0x3f5   : > { %v10953_v34 = vmul.f32 %v10889_v37, %v21482_v22  ;;  %v11015_v61 = vadd.f32 %v10951_v28, %v21488_v55  ;;  %v11016_v7 = vadd.f32 %v10952_v63, %v21488_v55  ;;  %v11078_v52 = vmax.f32 %v11014_v48, 0.0  ;;  %v21566_v59 = vpop.f32.mrb[18].mxu0 }
 0x3f6   : > { %v11021_v6 = vadd.f32 %v10957_v41, %v21488_v55  ;;  %v11083_v47 = vmax.f32 %v11019_v42, 0.0  ;;  %v11084_v31 = vmax.f32 %v11020_v29, 0.0  ;;  %11259 = vst.msk [vmem:[#allocation3 + $0x19] sm:$0x1] %vm11145_vm3, %v11082_v62  ;;  %v10442_v40 = vrot.slane %v10323_v17, %v21467_v21  ;;  %v21571_v49 = vpop.f32.mrb[19].mxu0 }
 0x3f7   : > { %v11017_v36 = vadd.f32 %v10953_v34, %v21488_v55  ;;  %v11079_v26 = vmax.f32 %v11015_v61, 0.0  ;;  %v11080_v50 = vmax.f32 %v11016_v7, 0.0  ;;  %11255 = vst.msk [vmem:[#allocation3 + $0x15] sm:$0x1] %vm11145_vm3, %v11078_v52  ;;  %v10449_v9 = vrot.slane %v10435_v23, %v21467_v21 }
 0x3f8   : > { %v11085_v38 = vmax.f32 %v11021_v6, 0.0  ;;  %11260 = vst.msk [vmem:[#allocation3 + $0x1a] sm:$0x1] %vm11145_vm3, %v11083_v47  ;;  %11261 = vst.msk [vmem:[#allocation3 + $0x1b] sm:$0x1] %vm11145_vm3, %v11084_v31  ;;  %v10450_v3 = vcombine.high %v10442_v40, %v10442_v40  ;;  %v15694_v13 = vrot.slane %v10442_v40, 9  ;;  %v10418_v17 = vcombine.high %v21537_v30, %v21537_v30 }
 0x3f9   : > { %v11081_v45 = vmax.f32 %v11017_v36, 0.0  ;;  %11256 = vst.msk [vmem:[#allocation3 + $0x16] sm:$0x1] %vm11145_vm3, %v11079_v26  ;;  %11257 = vst.msk [vmem:[#allocation3 + $0x17] sm:$0x1] %vm11145_vm3, %v11080_v50  ;;  %v10451_v4 = vcombine.high %v10449_v9, %v10449_v9  ;;  %v15696_v35 = vrot.slane %v10449_v9, 9  ;;  %v10425_v23 = vrot.slane %v21537_v30, %v21467_v21 }
 0x3fa   : > { %v21584_v37 = vpop.f32.mrb[20].mxu0  ;;  %11262 = vst.msk [vmem:[#allocation3 + $0x1c] sm:$0x1] %vm11145_vm3, %v11085_v38  ;;  %v15695_v28 = vrot.slane %v10450_v3, 9  ;;  %v10898_v63 = vmax.f32 %v10442_v40, %v15694_v13  ;;  %v10432_v48 = vrot.slane %v10418_v17, %v21467_v21  ;;  %v16951_v41 = vadd.f32 %v21544_v20, %v21214_v27 }
 0x3fb   : > { %v21590_v42 = vpop.f32.mrb[21].mxu0  ;;  %11258 = vst.msk [vmem:[#allocation3 + $0x18] sm:$0x1] %vm11145_vm3, %v11081_v45  ;;  %v15697_v29 = vrot.slane %v10451_v4, 9  ;;  %v10900_v62 = vmax.f32 %v10449_v9, %v15696_v35  ;;  %v10433_v34 = vcombine.high %v10425_v23, %v10425_v23  ;;  %v15690_v61 = vrot.slane %v10425_v23, 9 }
 0x3fc   : > { %v10899_v30 = vmax.f32 %v10450_v3, %v15695_v28  ;;  %v10962_v7 = vmul.f32 %v10898_v63, %v21482_v22  ;;  %v10434_v52 = vcombine.high %v10432_v48, %v10432_v48  ;;  %v15692_v6 = vrot.slane %v10432_v48, 9 }
 0x3fd   : > { %v10901_v47 = vmax.f32 %v10451_v4, %v15697_v29  ;;  %v10964_v31 = vmul.f32 %v10900_v62, %v21482_v22  ;;  %v15691_v40 = vrot.slane %v10433_v34, 9  ;;  %v10894_v36 = vmax.f32 %v10425_v23, %v15690_v61  ;;  %v21595_v26 = vpop.f32.mrb[22].mxu0 }
 0x3fe   : > { %v10963_v27 = vmul.f32 %v10899_v30, %v21482_v22  ;;  %v11026_v20 = vadd.f32 %v10962_v7, %v21488_v55  ;;  %v15693_v50 = vrot.slane %v10434_v52, 9  ;;  %v10896_v9 = vmax.f32 %v10432_v48, %v15692_v6  ;;  %v21599_v38 = vpop.f32.mrb[23].mxu0 }
 0x3ff   : > { %v10965_v3 = vmul.f32 %v10901_v47, %v21482_v22  ;;  %v11028_v13 = vadd.f32 %v10964_v31, %v21488_v55  ;;  %v10895_v17 = vmax.f32 %v10433_v34, %v15691_v40  ;;  %v10958_v45 = vmul.f32 %v10894_v36, %v21482_v22 }
 0x400   : > { %v11027_v4 = vadd.f32 %v10963_v27, %v21488_v55  ;;  %v11090_v35 = vmax.f32 %v11026_v20, 0.0  ;;  %v10897_v23 = vmax.f32 %v10434_v52, %v15693_v50  ;;  %v10960_v28 = vmul.f32 %v10896_v9, %v21482_v22 }
 0x401   : > { %v11029_v63 = vadd.f32 %v10965_v3, %v21488_v55  ;;  %v11092_v29 = vmax.f32 %v11028_v13, 0.0  ;;  %v10959_v48 = vmul.f32 %v10895_v17, %v21482_v22  ;;  %v11022_v62 = vadd.f32 %v10958_v45, %v21488_v55  ;;  %v21609_v61 = vpop.f32.mrb[24].mxu0 }
 0x402   : > { %v11091_v30 = vmax.f32 %v11027_v4, 0.0  ;;  %11267 = vst.msk [vmem:[#allocation3 + $0x23] sm:$0x1] %vm11145_vm3, %v11090_v35  ;;  %v10961_v34 = vmul.f32 %v10897_v23, %v21482_v22  ;;  %v11024_v7 = vadd.f32 %v10960_v28, %v21488_v55  ;;  %v10325_v52 = vmax.f32 %v21531_v46, %v16951_v41  ;;  %v21615_v6 = vpop.f32.mrb[25].mxu0 }
 0x403   : > { %v11093_v47 = vmax.f32 %v11029_v63, 0.0  ;;  %11269 = vst.msk [vmem:[#allocation3 + $0x25] sm:$0x1] %vm11145_vm3, %v11092_v29  ;;  %v11023_v31 = vadd.f32 %v10959_v48, %v21488_v55  ;;  %v11086_v40 = vmax.f32 %v11022_v62, 0.0  ;;  %v16952_v36 = vadd.f32 %v21546_v25, %v21216_v57 }
 0x404   : > { %11268 = vst.msk [vmem:[#allocation3 + $0x24] sm:$0x1] %vm11145_vm3, %v11091_v30  ;;  %v11025_v27 = vadd.f32 %v10961_v34, %v21488_v55  ;;  %v11088_v20 = vmax.f32 %v11024_v7, 0.0  ;;  %v10469_v50 = vcombine.high %v10325_v52, %v10325_v52  ;;  %v10476_v9 = vrot.slane %v10325_v52, %v21467_v21 }
 0x405   : > { %11270 = vst.msk [vmem:[#allocation3 + $0x26] sm:$0x1] %vm11145_vm3, %v11093_v47  ;;  %v11087_v46 = vmax.f32 %v11023_v31, 0.0  ;;  %11263 = vst.msk [vmem:[#allocation3 + $0x1f] sm:$0x1] %vm11145_vm3, %v11086_v40  ;;  %v10324_v41 = vmax.f32 %v21541_v43, %v16952_v36  ;;  %v16953_v3 = vadd.f32 %v21550_v60, %v21218_v32  ;;  %v21631_v57 = vadd.f32 %v21555_v5, %v21220_v2  ;;  %v21633_v25 = vpop.f32.mrb[26].mxu0 }
 0x406   : > { %v11089_v13 = vmax.f32 %v11025_v27, 0.0  ;;  %11265 = vst.msk [vmem:[#allocation3 + $0x21] sm:$0x1] %vm11145_vm3, %v11088_v20  ;;  %v10483_v17 = vrot.slane %v10469_v50, %v21467_v21  ;;  %v10484_v45 = vcombine.high %v10476_v9, %v10476_v9  ;;  %v15702_v4 = vrot.slane %v10476_v9, 9  ;;  %v21637_v35 = vpop.f32.mrb[27].mxu0 }
 0x407   : > { %11264 = vst.msk [vmem:[#allocation3 + $0x20] sm:$0x1] %vm11145_vm3, %v11087_v46  ;;  %v10452_v43 = vcombine.high %v10324_v41, %v10324_v41  ;;  %v10459_v32 = vrot.slane %v10324_v41, %v21467_v21  ;;  %v16955_v2 = vadd.f32 %v21566_v59, %v21422_v39  ;;  %v16956_v60 = vadd.f32 %v21571_v49, %v21424_v54 }
 0x408   : > { %11266 = vst.msk [vmem:[#allocation3 + $0x22] sm:$0x1] %vm11145_vm3, %v11089_v13  ;;  %v10485_v5 = vcombine.high %v10483_v17, %v10483_v17  ;;  %v15703_v23 = vrot.slane %v10484_v45, 9  ;;  %v15704_v28 = vrot.slane %v10483_v17, 9  ;;  %v10906_v63 = vmax.f32 %v10476_v9, %v15702_v4 }
 0x409   : > { %v10466_v29 = vrot.slane %v10452_v43, %v21467_v21  ;;  %v10467_v48 = vcombine.high %v10459_v32, %v10459_v32  ;;  %v15698_v62 = vrot.slane %v10459_v32, 9  ;;  %v10327_v30 = vmax.f32 %v16953_v3, %v16955_v2  ;;  %v21647_v34 = vpop.f32.mrb[28].mxu0 }
 0x40a   : > { %v15705_v7 = vrot.slane %v10485_v5, 9  ;;  %v10907_v52 = vmax.f32 %v10484_v45, %v15703_v23  ;;  %v10908_v47 = vmax.f32 %v10483_v17, %v15704_v28  ;;  %v10970_v39 = vmul.f32 %v10906_v63, %v21482_v22  ;;  %v21650_v59 = vpop.f32.mrb[29].mxu0 }
 0x40b   : > { %v10468_v54 = vcombine.high %v10466_v29, %v10466_v29  ;;  %v15699_v49 = vrot.slane %v10467_v48, 9  ;;  %v15700_v31 = vrot.slane %v10466_v29, 9  ;;  %v10902_v40 = vmax.f32 %v10459_v32, %v15698_v62 }
 0x40c   : > { %v10909_v36 = vmax.f32 %v10485_v5, %v15705_v7  ;;  %v10971_v27 = vmul.f32 %v10907_v52, %v21482_v22  ;;  %v10972_v20 = vmul.f32 %v10908_v47, %v21482_v22  ;;  %v11034_v50 = vadd.f32 %v10970_v39, %v21488_v55 }
 0x40d   : > { %v15701_v9 = vrot.slane %v10468_v54, 9  ;;  %v10903_v46 = vmax.f32 %v10467_v48, %v15699_v49  ;;  %v10904_v41 = vmax.f32 %v10466_v29, %v15700_v31  ;;  %v10966_v3 = vmul.f32 %v10902_v40, %v21482_v22  ;;  %v21656_v13 = vpop.f32.mrb[30].mxu0 }
 0x40e   : > { %v10973_v17 = vmul.f32 %v10909_v36, %v21482_v22  ;;  %v11035_v45 = vadd.f32 %v10971_v27, %v21488_v55  ;;  %v11036_v4 = vadd.f32 %v10972_v20, %v21488_v55  ;;  %v11098_v43 = vmax.f32 %v11034_v50, 0.0  ;;  %v21661_v32 = vpop.f32.mrb[31].mxu0 }
 0x40f   : > { %v10905_v2 = vmax.f32 %v10468_v54, %v15701_v9  ;;  %v10967_v5 = vmul.f32 %v10903_v46, %v21482_v22  ;;  %v10968_v23 = vmul.f32 %v10904_v41, %v21482_v22  ;;  %v11030_v28 = vadd.f32 %v10966_v3, %v21488_v55 }
 0x410   : > { %v11037_v63 = vadd.f32 %v10973_v17, %v21488_v55  ;;  %v11099_v29 = vmax.f32 %v11035_v45, 0.0  ;;  %v11100_v48 = vmax.f32 %v11036_v4, 0.0  ;;  %11275 = vst.msk [vmem:[#allocation3 + $0x2d] sm:$0x1] %vm11145_vm3, %v11098_v43  ;;  %v10503_v62 = vcombine.high %v10327_v30, %v10327_v30 }
 0x411   : > { %v10969_v7 = vmul.f32 %v10905_v2, %v21482_v22  ;;  %v11031_v52 = vadd.f32 %v10967_v5, %v21488_v55  ;;  %v11032_v47 = vadd.f32 %v10968_v23, %v21488_v55  ;;  %v11094_v39 = vmax.f32 %v11030_v28, 0.0 }
 0x412   : > { %v11101_v54 = vmax.f32 %v11037_v63, 0.0  ;;  %11276 = vst.msk [vmem:[#allocation3 + $0x2e] sm:$0x1] %vm11145_vm3, %v11099_v29  ;;  %11277 = vst.msk [vmem:[#allocation3 + $0x2f] sm:$0x1] %vm11145_vm3, %v11100_v48  ;;  %v10510_v49 = vrot.slane %v10327_v30, %v21467_v21  ;;  %v10517_v31 = vrot.slane %v10503_v62, %v21467_v21  ;;  %v10326_v40 = vmax.f32 %v21631_v57, %v16956_v60 }
 0x413   : > { %v11033_v36 = vadd.f32 %v10969_v7, %v21488_v55  ;;  %v11095_v27 = vmax.f32 %v11031_v52, 0.0  ;;  %v11096_v20 = vmax.f32 %v11032_v47, 0.0  ;;  %11271 = vst.msk [vmem:[#allocation3 + $0x29] sm:$0x1] %vm11145_vm3, %v11094_v39  ;;  %v16957_v50 = vadd.f32 %v21584_v37, %v21426_v44 }
 0x414   : > { %11278 = vst.msk [vmem:[#allocation3 + $0x30] sm:$0x1] %vm11145_vm3, %v11101_v54  ;;  %v10518_v9 = vcombine.high %v10510_v49, %v10510_v49  ;;  %v10519_v46 = vcombine.high %v10517_v31, %v10517_v31  ;;  %v15710_v41 = vrot.slane %v10510_v49, 9  ;;  %v15712_v3 = vrot.slane %v10517_v31, 9 }
 0x415   : > { %v11097_v30 = vmax.f32 %v11033_v36, 0.0  ;;  %11272 = vst.msk [vmem:[#allocation3 + $0x2a] sm:$0x1] %vm11145_vm3, %v11095_v27  ;;  %11273 = vst.msk [vmem:[#allocation3 + $0x2b] sm:$0x1] %vm11145_vm3, %v11096_v20  ;;  %v10486_v57 = vcombine.high %v10326_v40, %v10326_v40  ;;  %v10493_v60 = vrot.slane %v10326_v40, %v21467_v21  ;;  %v21686_v17 = vadd.f32 %v21590_v42, %v21428_v18 }
 0x416   : > { %v15711_v45 = vrot.slane %v10518_v9, 9  ;;  %v15713_v44 = vrot.slane %v10519_v46, 9  ;;  %v10914_v37 = vmax.f32 %v10510_v49, %v15710_v41  ;;  %v10916_v4 = vmax.f32 %v10517_v31, %v15712_v3  ;;  %v21699_v40 = vld [vmem:[#allocation3 + $0xc] sm:$0x1] }
 0x417   : > { %11274 = vst.msk [vmem:[#allocation3 + $0x2c] sm:$0x1] %vm11145_vm3, %v11097_v30  ;;  %v10500_v43 = vrot.slane %v10486_v57, %v21467_v21  ;;  %v10501_v2 = vcombine.high %v10493_v60, %v10493_v60  ;;  %v15706_v5 = vrot.slane %v10493_v60, 9  ;;  %v16959_v23 = vadd.f32 %v21595_v26, %v21430_v56  ;;  %v21706_v57 = vld [vmem:[#allocation3 + $0xb] sm:$0x1] }
 0x418   : > { %v10915_v28 = vmax.f32 %v10518_v9, %v15711_v45  ;;  %v10917_v63 = vmax.f32 %v10519_v46, %v15713_v44  ;;  %v10978_v29 = vmul.f32 %v10914_v37, %v21482_v22  ;;  %v10980_v18 = vmul.f32 %v10916_v4, %v21482_v22  ;;  %v21710_v45 = vld [vmem:[#allocation3 + $0x10] sm:$0x1] }
 0x419   : > { %v10502_v42 = vcombine.high %v10500_v43, %v10500_v43  ;;  %v15707_v48 = vrot.slane %v10501_v2, 9  ;;  %v15708_v62 = vrot.slane %v10500_v43, 9  ;;  %v10910_v7 = vmax.f32 %v10493_v60, %v15706_v5  ;;  %v21708_v60 = vld [vmem:[#allocation3 + $0xe] sm:$0x1] }
 0x41a   : > { %v10979_v52 = vmul.f32 %v10915_v28, %v21482_v22  ;;  %v10981_v47 = vmul.f32 %v10917_v63, %v21482_v22  ;;  %v11042_v39 = vadd.f32 %v10978_v29, %v21488_v55  ;;  %v11044_v54 = vadd.f32 %v10980_v18, %v21488_v55  ;;  %v21721_v18 = vld [vmem:[#allocation3 + $0xd] sm:$0x1] }
 0x41b   : > { %v15709_v49 = vrot.slane %v10502_v42, 9  ;;  %v10911_v56 = vmax.f32 %v10501_v2, %v15707_v48  ;;  %v10912_v26 = vmax.f32 %v10500_v43, %v15708_v62  ;;  %v10974_v31 = vmul.f32 %v10910_v7, %v21482_v22  ;;  %v21714_v43 = vld [vmem:[#allocation3 + $0x12] sm:$0x1]  ;;  %v21728_v48 = vld [vmem:[#allocation3 + $0x11] sm:$0x1] }
 0x41c   : > { %v11043_v36 = vadd.f32 %v10979_v52, %v21488_v55  ;;  %v11045_v27 = vadd.f32 %v10981_v47, %v21488_v55  ;;  %v11106_v20 = vmax.f32 %v11042_v39, 0.0  ;;  %v11108_v9 = vmax.f32 %v11044_v54, 0.0  ;;  %23431 = vst [vmem:[#allocation35_spill] sm:$0xff] %v21714_v43 }
 0x41d   : > { %v10913_v46 = vmax.f32 %v10502_v42, %v15709_v49  ;;  %v10975_v41 = vmul.f32 %v10911_v56, %v21482_v22  ;;  %v10976_v3 = vmul.f32 %v10912_v26, %v21482_v22  ;;  %v11038_v30 = vadd.f32 %v10974_v31, %v21488_v55  ;;  %v21723_v42 = vld [vmem:[#allocation3 + $0xf] sm:$0x1] }
 0x41e   : > { %v11107_v44 = vmax.f32 %v11043_v36, 0.0  ;;  %v11109_v37 = vmax.f32 %v11045_v27, 0.0  ;;  %11283 = vst.msk [vmem:[#allocation3 + $0x37] sm:$0x1] %vm11145_vm3, %v11106_v20  ;;  %11285 = vst.msk [vmem:[#allocation3 + $0x39] sm:$0x1] %vm11145_vm3, %v11108_v9  ;;  %v10329_v4 = vmax.f32 %v16957_v50, %v16959_v23  ;;  %v11524_v2 = vcombine.low %v21706_v57, %v21699_v40 }
 0x41f   : > { %v10977_v5 = vmul.f32 %v10913_v46, %v21482_v22  ;;  %v11039_v28 = vadd.f32 %v10975_v41, %v21488_v55  ;;  %v11040_v63 = vadd.f32 %v10976_v3, %v21488_v55  ;;  %v11102_v29 = vmax.f32 %v11038_v30, 0.0 }
 0x420   : > { %11284 = vst.msk [vmem:[#allocation3 + $0x38] sm:$0x1] %vm11145_vm3, %v11107_v44  ;;  %11286 = vst.msk [vmem:[#allocation3 + $0x3a] sm:$0x1] %vm11145_vm3, %v11109_v37  ;;  %v10537_v50 = vcombine.high %v10329_v4, %v10329_v4  ;;  %v10544_v23 = vrot.slane %v10329_v4, %v21467_v21  ;;  %v11525_v62 = vcombine.low %v21721_v18, %v21708_v60 }
 0x421   : > { %v11526_v7 = vcombine.low %v21723_v42, %v21710_v45  ;;  %v11041_v52 = vadd.f32 %v10977_v5, %v21488_v55  ;;  %v11103_v47 = vmax.f32 %v11039_v28, 0.0  ;;  %v11104_v39 = vmax.f32 %v11040_v63, 0.0  ;;  %11279 = vst.msk [vmem:[#allocation3 + $0x33] sm:$0x1] %vm11145_vm3, %v11102_v29 }
 0x422   : > { %v11527_v54 = vcombine.low %v21728_v48, %v21714_v43  ;;  %v10551_v49 = vrot.slane %v10537_v50, %v21467_v21  ;;  %v10552_v56 = vcombine.high %v10544_v23, %v10544_v23  ;;  %v15718_v26 = vrot.slane %v10544_v23, 9 }
 0x423   : > { %v11534_v31 = vrot.slane %v11524_v2, %v18477_v8  ;;  %v11105_v36 = vmax.f32 %v11041_v52, 0.0  ;;  %11280 = vst.msk [vmem:[#allocation3 + $0x34] sm:$0x1] %vm11145_vm3, %v11103_v47  ;;  %11281 = vst.msk [vmem:[#allocation3 + $0x35] sm:$0x1] %vm11145_vm3, %v11104_v39  ;;  %v11541_v27 = vrot.slane %v11525_v62, %v18477_v8  ;;  %v11548_v20 = vrot.slane %v11526_v7, %v18477_v8 }
 0x424   : > { %v11555_v9 = vrot.slane %v11527_v54, %v18477_v8  ;;  %v10553_v46 = vcombine.high %v10551_v49, %v10551_v49  ;;  %v15719_v41 = vrot.slane %v10552_v56, 9  ;;  %v15720_v3 = vrot.slane %v10551_v49, 9 }
 0x425   : > { %v10922_v30 = vmax.f32 %v10544_v23, %v15718_v26  ;;  %11282 = vst.msk [vmem:[#allocation3 + $0x36] sm:$0x1] %vm11145_vm3, %v11105_v36  ;;  %v11556_v44 = vcombine.low %v11534_v31, %v11541_v27  ;;  %v16960_v4 = vadd.f32 %v21599_v38, %v21432_v10  ;;  %v16961_v2 = vadd.f32 %v21609_v61, %v21434_v58  ;;  %v21774_v26 = vld [vmem:[%s22796_s4 + $0x10] sm:$0xff]  ;;  %v21779_v27 = vld [vmem:[#allocation3 + $0x15] sm:$0x1] }
 0x426   : > { %v11557_v37 = vcombine.low %v11548_v20, %v11555_v9  ;;  %v15721_v5 = vrot.slane %v10553_v46, 9  ;;  %v10923_v28 = vmax.f32 %v10552_v56, %v15719_v41  ;;  %v10924_v63 = vmax.f32 %v10551_v49, %v15720_v3  ;;  %v21781_v20 = vld [vmem:[#allocation3 + $0x18] sm:$0x1] }
 0x427   : > { %v10986_v29 = vmul.f32 %v10922_v30, %v21482_v22  ;;  %v11564_v50 = vrot.slane %v11556_v44, %v18477_v8  ;;  %v10328_v23 = vmax.f32 %v21686_v17, %v16960_v4  ;;  %v21756_v7 = vadd.f32 %v21615_v6, %v21436_v0  ;;  %v21766_v17 = vld [vmem:[#allocation3 + $0x16] sm:$0x1] }
 0x428   : > { %v11571_v62 = vrot.slane %v11557_v37, %v18477_v8  ;;  %v10925_v52 = vmax.f32 %v10553_v46, %v15721_v5  ;;  %v10987_v10 = vmul.f32 %v10923_v28, %v21482_v22  ;;  %v10988_v58 = vmul.f32 %v10924_v63, %v21482_v22  ;;  %v21790_v5 = vld [vmem:[#allocation3 + $0x1a] sm:$0x1] }
 0x429   : > { %v11050_v38 = vadd.f32 %v10986_v29, %v21488_v55  ;;  %v10520_v47 = vcombine.high %v10328_v23, %v10328_v23  ;;  %v10527_v39 = vrot.slane %v10328_v23, %v21467_v21  ;;  %v16963_v54 = vadd.f32 %v21633_v25, %v21438_v15 }
 0x42a   : > { %v21761_v61 = vcombine.low %v11564_v50, %v11571_v62  ;;  %v10989_v0 = vmul.f32 %v10925_v52, %v21482_v22  ;;  %v11051_v6 = vadd.f32 %v10987_v10, %v21488_v55  ;;  %v11052_v49 = vadd.f32 %v10988_v58, %v21488_v55  ;;  %v21799_v10 = vld [vmem:[#allocation3 + $0x19] sm:$0x1] }
 0x42b   : > { %v11114_v56 = vmax.f32 %v11050_v38, 0.0  ;;  %v10534_v31 = vrot.slane %v10520_v47, %v21467_v21  ;;  %v10535_v15 = vcombine.high %v10527_v39, %v10527_v39  ;;  %v15714_v25 = vrot.slane %v10527_v39, 9 }
 0x42c   : > { %23432 = vst [vmem:[#allocation38_spill] sm:$0xff] %v21761_v61  ;;  %16715 = vmatmul.mubr.msk.f32.vlgmr.msra.gmra.mrb[32].mxu1 %vm11867_vm4, %v21761_v61  ;;  %v10331_v36 = vmax.f32 %v16961_v2, %v16963_v54  ;;  %v11053_v9 = vadd.f32 %v10989_v0, %v21488_v55  ;;  %v11115_v46 = vmax.f32 %v11051_v6, 0.0  ;;  %v11116_v41 = vmax.f32 %v11052_v49, 0.0  ;;  %v21788_v2 = vld [vmem:[#allocation3 + $0x17] sm:$0x1] }
 0x42d   : > { %11291 = vst.msk [vmem:[#allocation3 + $0x41] sm:$0x1] %vm11145_vm3, %v11114_v56  ;;  %v11573_v3 = vcombine.low %v21779_v27, %v21766_v17  ;;  %16727 = vmatpush3.msra.mxu1 %v21493_v11  ;;  %v10536_v30 = vcombine.high %v10534_v31, %v10534_v31  ;;  %v15715_v44 = vrot.slane %v10535_v15, 9  ;;  %v15716_v37 = vrot.slane %v10534_v31, 9 }
 0x42e   : > { %v10918_v4 = vmax.f32 %v10527_v39, %v15714_v25  ;;  %16740 = vmatprep.subr.mxu1 %v21774_v26  ;;  %v11117_v28 = vmax.f32 %v11053_v9, 0.0  ;;  %11292 = vst.msk [vmem:[#allocation3 + $0x42] sm:$0x1] %vm11145_vm3, %v11115_v46  ;;  %11293 = vst.msk [vmem:[#allocation3 + $0x43] sm:$0x1] %vm11145_vm3, %v11116_v41  ;;  %v10571_v63 = vcombine.high %v10331_v36, %v10331_v36 }
 0x42f   : > { %v10578_v29 = vrot.slane %v10331_v36, %v21467_v21  ;;  %v11574_v11 = vcombine.low %v21788_v2, %v21781_v20  ;;  %v15717_v50 = vrot.slane %v10536_v30, 9  ;;  %v10919_v62 = vmax.f32 %v10535_v15, %v15715_v44  ;;  %v21808_v36 = vld [vmem:[#allocation3 + $0x1c] sm:$0x1] }
 0x430   : > { %v10920_v23 = vmax.f32 %v10534_v31, %v15716_v37  ;;  %v10982_v52 = vmul.f32 %v10918_v4, %v21482_v22  ;;  %11294 = vst.msk [vmem:[#allocation3 + $0x44] sm:$0x1] %vm11145_vm3, %v11117_v28  ;;  %v10585_v58 = vrot.slane %v10571_v63, %v21467_v21  ;;  %v11575_v39 = vcombine.low %v21799_v10, %v21790_v5  ;;  %v21814_v63 = vld [vmem:[#allocation3 + $0x1b] sm:$0x1] }
 0x431   : > { %v10586_v38 = vcombine.high %v10578_v29, %v10578_v29  ;;  %v15726_v47 = vrot.slane %v10578_v29, 9  ;;  %v10921_v54 = vmax.f32 %v10536_v30, %v15717_v50  ;;  %v10983_v0 = vmul.f32 %v10919_v62, %v21482_v22  ;;  %23433 = vst [vmem:[#allocation37_spill] sm:$0xff] %v21808_v36 }
 0x432   : > { %v10984_v6 = vmul.f32 %v10920_v23, %v21482_v22  ;;  %v11046_v49 = vadd.f32 %v10982_v52, %v21488_v55  ;;  %v10587_v56 = vcombine.high %v10585_v58, %v10585_v58  ;;  %v15728_v15 = vrot.slane %v10585_v58, 9 }
 0x433   : > { %v15727_v31 = vrot.slane %v10586_v38, 9  ;;  %v10930_v25 = vmax.f32 %v10578_v29, %v15726_v47  ;;  %v10985_v9 = vmul.f32 %v10921_v54, %v21482_v22  ;;  %v11047_v46 = vadd.f32 %v10983_v0, %v21488_v55 }
 0x434   : > { %v11048_v41 = vadd.f32 %v10984_v6, %v21488_v55  ;;  %v11110_v44 = vmax.f32 %v11046_v49, 0.0  ;;  %v15729_v30 = vrot.slane %v10587_v56, 9  ;;  %v10932_v4 = vmax.f32 %v10585_v58, %v15728_v15 }
 0x435   : > { %v10931_v37 = vmax.f32 %v10586_v38, %v15727_v31  ;;  %v10994_v28 = vmul.f32 %v10930_v25, %v21482_v22  ;;  %v11049_v50 = vadd.f32 %v10985_v9, %v21488_v55  ;;  %v11111_v62 = vmax.f32 %v11047_v46, 0.0 }
 0x436   : > { %v11112_v29 = vmax.f32 %v11048_v41, 0.0  ;;  %11287 = vst.msk [vmem:[#allocation3 + $0x3d] sm:$0x1] %vm11145_vm3, %v11110_v44  ;;  %v11576_v23 = vcombine.low %v21814_v63, %v21808_v36  ;;  %v10933_v52 = vmax.f32 %v10587_v56, %v15729_v30  ;;  %v10996_v54 = vmul.f32 %v10932_v4, %v21482_v22 }
 0x437   : > { %v10995_v47 = vmul.f32 %v10931_v37, %v21482_v22  ;;  %v11058_v58 = vadd.f32 %v10994_v28, %v21488_v55  ;;  %v11113_v38 = vmax.f32 %v11049_v50, 0.0  ;;  %11288 = vst.msk [vmem:[#allocation3 + $0x3e] sm:$0x1] %vm11145_vm3, %v11111_v62  ;;  %v11583_v0 = vrot.slane %v11573_v3, %v18477_v8  ;;  %v21855_v50 = vld [vmem:[#allocation3 + $0x1f] sm:$0x1] }
 0x438   : > { %11289 = vst.msk [vmem:[#allocation3 + $0x3f] sm:$0x1] %vm11145_vm3, %v11112_v29  ;;  %v11590_v6 = vrot.slane %v11574_v11, %v18477_v8  ;;  %v11597_v49 = vrot.slane %v11575_v39, %v18477_v8  ;;  %v10997_v31 = vmul.f32 %v10933_v52, %v21482_v22  ;;  %v11060_v15 = vadd.f32 %v10996_v54, %v21488_v55  ;;  %v21837_v11 = vld [vmem:[#allocation3 + $0x20] sm:$0x1]  ;;  %v21839_v39 = vld [vmem:[#allocation3 + $0x22] sm:$0x1] }
 0x439   : > { %v11059_v56 = vadd.f32 %v10995_v47, %v21488_v55  ;;  %v11122_v25 = vmax.f32 %v11058_v58, 0.0  ;;  %11290 = vst.msk [vmem:[#allocation3 + $0x40] sm:$0x1] %vm11145_vm3, %v11113_v38  ;;  %v11604_v9 = vrot.slane %v11576_v23, %v18477_v8  ;;  %v16964_v41 = vadd.f32 %v21637_v35, %v21440_v24  ;;  %v21841_v22 = vld [vmem:[#allocation3 + $0x24] sm:$0x1] }
 0x43a   : > { %v11605_v46 = vcombine.low %v11583_v0, %v11590_v6  ;;  %v16965_v3 = vadd.f32 %v21647_v34, %v21442_v51  ;;  %v11061_v44 = vadd.f32 %v10997_v31, %v21488_v55  ;;  %v11124_v37 = vmax.f32 %v11060_v15, 0.0  ;;  %v21849_v24 = vld [vmem:[#allocation3 + $0x23] sm:$0x1]  ;;  %v21857_v55 = vld [vmem:[#allocation3 + $0x21] sm:$0x1] }
 0x43b   : > { %v11123_v30 = vmax.f32 %v11059_v56, 0.0  ;;  %11299 = vst.msk [vmem:[#allocation3 + $0x4b] sm:$0x1] %vm11145_vm3, %v11122_v25  ;;  %v21847_v4 = vadd.f32 %v21650_v59, %v21444_v19  ;;  %v11606_v35 = vcombine.low %v11597_v49, %v11604_v9  ;;  %v10330_v34 = vmax.f32 %v21756_v7, %v16964_v41  ;;  %v21859_v62 = vld [vmem:[#allocation3 + $0x26] sm:$0x1] }
 0x43c   : > { %v11613_v51 = vrot.slane %v11605_v46, %v18477_v8  ;;  %v16967_v28 = vadd.f32 %v21656_v13, %v21446_v14  ;;  %23434 = vst [vmem:[#allocation17_spill] sm:$0xff] %v21859_v62  ;;  %v11125_v29 = vmax.f32 %v11061_v44, 0.0  ;;  %11301 = vst.msk [vmem:[#allocation3 + $0x4d] sm:$0x1] %vm11145_vm3, %v11124_v37  ;;  %v11622_v19 = vcombine.low %v21855_v50, %v21837_v11  ;;  %v21871_v47 = vld [vmem:[#allocation3 + $0x25] sm:$0x1] }
 0x43d   : > { %11300 = vst.msk [vmem:[#allocation3 + $0x4c] sm:$0x1] %vm11145_vm3, %v11123_v30  ;;  %v11623_v59 = vcombine.low %v21857_v55, %v21839_v39  ;;  %v11624_v14 = vcombine.low %v21849_v24, %v21841_v22  ;;  %v11620_v13 = vrot.slane %v11606_v35, %v18477_v8  ;;  %v10554_v7 = vcombine.high %v10330_v34, %v10330_v34 }
 0x43e   : > { %v10561_v23 = vrot.slane %v10330_v34, %v21467_v21  ;;  %v10333_v52 = vmax.f32 %v16965_v3, %v16967_v28  ;;  %11302 = vst.msk [vmem:[#allocation3 + $0x4e] sm:$0x1] %vm11145_vm3, %v11125_v29  ;;  %v11625_v54 = vcombine.low %v21871_v47, %v21859_v62  ;;  %v11632_v58 = vrot.slane %v11622_v19, %v18477_v8  ;;  %v21987_v61 = vld [vmem:[#allocation3 + $0x3e] sm:$0x1] }
 0x43f   : > { %v11639_v38 = vrot.slane %v11623_v59, %v18477_v8  ;;  %v21879_v0 = vrot.slane %v11624_v14, %v18477_v8  ;;  %v21881_v6 = vcombine.low %v11613_v51, %v11620_v13  ;;  %v10568_v49 = vrot.slane %v10554_v7, %v21467_v21  ;;  %v21893_v59 = vld [vmem:[%s22794_s2] sm:$0x1]  ;;  %23443 = vst [vmem:[#allocation49_spill] sm:$0xff] %v21987_v61 }
 0x440   : > { %v10569_v31 = vcombine.high %v10561_v23, %v10561_v23  ;;  %v15722_v56 = vrot.slane %v10561_v23, 9  ;;  %v10605_v15 = vcombine.high %v10333_v52, %v10333_v52  ;;  %v10612_v25 = vrot.slane %v10333_v52, %v21467_v21 }
 0x441   : > { %23435 = vst [vmem:[#allocation34_spill] sm:$0xff] %v21881_v6  ;;  %v11653_v9 = vrot.slane %v11625_v54, %v18477_v8  ;;  %v11654_v46 = vcombine.low %v11632_v58, %v11639_v38  ;;  %16717 = vmatprep.mubr.msk.f32.mxu1 %vm11867_vm4, %v21881_v6  ;;  %v10570_v41 = vcombine.high %v10568_v49, %v10568_v49  ;;  %v15724_v44 = vrot.slane %v10568_v49, 9 }
 0x442   : > { %v15723_v3 = vrot.slane %v10569_v31, 9  ;;  %v10926_v30 = vmax.f32 %v10561_v23, %v15722_v56  ;;  %v10619_v37 = vrot.slane %v10605_v15, %v21467_v21  ;;  %v10620_v35 = vcombine.high %v10612_v25, %v10612_v25 }
 0x443   : > { %v15734_v51 = vrot.slane %v10612_v25, 9  ;;  %v11655_v34 = vcombine.low %v21879_v0, %v11653_v9  ;;  %v15725_v28 = vrot.slane %v10570_v41, 9  ;;  %v10928_v19 = vmax.f32 %v10568_v49, %v15724_v44  ;;  %v21901_v0 = vld [vmem:[%s22795_s3] sm:$0x1] }
 0x444   : > { %v10927_v29 = vmax.f32 %v10569_v31, %v15723_v3  ;;  %v10990_v14 = vmul.f32 %v21893_v59, %v10926_v30  ;;  %v10621_v13 = vcombine.high %v10619_v37, %v10619_v37  ;;  %v15735_v7 = vrot.slane %v10620_v35, 9 }
 0x445   : > { %v15736_v52 = vrot.slane %v10619_v37, 9  ;;  %v10938_v23 = vmax.f32 %v10612_v25, %v15734_v51  ;;  %v10929_v54 = vmax.f32 %v10570_v41, %v15725_v28  ;;  %v10992_v38 = vmul.f32 %v21893_v59, %v10928_v19  ;;  %v21911_v19 = vld [vmem:[#allocation3 + $0x2a] sm:$0x1] }
 0x446   : > { %v10991_v58 = vmul.f32 %v21893_v59, %v10927_v29  ;;  %v11054_v49 = vadd.f32 %v21901_v0, %v10990_v14  ;;  %v15737_v31 = vrot.slane %v10621_v13, 9  ;;  %v10939_v56 = vmax.f32 %v10620_v35, %v15735_v7 }
 0x447   : > { %v10940_v15 = vmax.f32 %v10619_v37, %v15736_v52  ;;  %v11002_v9 = vmul.f32 %v21893_v59, %v10938_v23  ;;  %v10993_v3 = vmul.f32 %v21893_v59, %v10929_v54  ;;  %v11056_v41 = vadd.f32 %v21901_v0, %v10992_v38  ;;  %v21916_v52 = vld [vmem:[#allocation3 + $0x2c] sm:$0x1]  ;;  %v21918_v23 = vld [vmem:[#allocation3 + $0x2e] sm:$0x1] }
 0x448   : > { %v11055_v25 = vadd.f32 %v21901_v0, %v10991_v58  ;;  %v11118_v44 = vmax.f32 %v11054_v49, 0.0  ;;  %v10941_v30 = vmax.f32 %v10621_v13, %v15737_v31  ;;  %v11003_v51 = vmul.f32 %v21893_v59, %v10939_v56  ;;  %v21923_v49 = vld [vmem:[#allocation3 + $0x29] sm:$0x1]  ;;  %v21925_v31 = vld [vmem:[#allocation3 + $0x2d] sm:$0x1] }
 0x449   : > { %v11004_v28 = vmul.f32 %v21893_v59, %v10940_v15  ;;  %v11066_v29 = vadd.f32 %v21901_v0, %v11002_v9  ;;  %v11057_v37 = vadd.f32 %v21901_v0, %v10993_v3  ;;  %v11120_v14 = vmax.f32 %v11056_v41, 0.0  ;;  %v21927_v56 = vld [vmem:[#allocation3 + $0x30] sm:$0x1]  ;;  %v21934_v3 = vld [vmem:[#allocation3 + $0x2b] sm:$0x1] }
 0x44a   : > { %v11119_v35 = vmax.f32 %v11055_v25, 0.0  ;;  %11295 = vst.msk [vmem:[#allocation3 + $0x47] sm:$0x1] %vm11145_vm3, %v11118_v44  ;;  %v11662_v7 = vrot.slane %v11654_v46, %v18477_v8  ;;  %v11005_v13 = vmul.f32 %v21893_v59, %v10941_v30  ;;  %v11067_v54 = vadd.f32 %v21901_v0, %v11003_v51  ;;  %23436 = vst [vmem:[#allocation16_spill] sm:$0xff] %v21927_v56  ;;  %v21938_v41 = vld [vmem:[#allocation3 + $0x34] sm:$0x1] }
 0x44b   : > { %v11068_v58 = vadd.f32 %v21901_v0, %v11004_v28  ;;  %v11130_v38 = vmax.f32 %v11066_v29, 0.0  ;;  %v11121_v15 = vmax.f32 %v11057_v37, 0.0  ;;  %11297 = vst.msk [vmem:[#allocation3 + $0x49] sm:$0x1] %vm11145_vm3, %v11120_v14  ;;  %v11669_v46 = vrot.slane %v11655_v34, %v18477_v8  ;;  %v21942_v28 = vld [vmem:[#allocation3 + $0x2f] sm:$0x1] }
 0x44c   : > { %11296 = vst.msk [vmem:[#allocation3 + $0x48] sm:$0x1] %vm11145_vm3, %v11119_v35  ;;  %v16968_v9 = vadd.f32 %v21661_v32, %v21448_v1  ;;  %v11671_v25 = vcombine.low %v21923_v49, %v21911_v19  ;;  %v11069_v44 = vadd.f32 %v21901_v0, %v11005_v13  ;;  %v11131_v30 = vmax.f32 %v11067_v54, 0.0  ;;  %v21946_v29 = vld [vmem:[#allocation3 + $0x38] sm:$0x1] }
 0x44d   : > { %v11132_v51 = vmax.f32 %v11068_v58, 0.0  ;;  %11307 = vst.msk [vmem:[#allocation3 + $0x55] sm:$0x1] %vm11145_vm3, %v11130_v38  ;;  %v11672_v34 = vcombine.low %v21934_v3, %v21916_v52  ;;  %23437 = vst [vmem:[#allocation42_spill] sm:$0xff] %v21946_v29  ;;  %v21949_v1 = vcombine.low %v11662_v7, %v11669_v46  ;;  %v11673_v37 = vcombine.low %v21925_v31, %v21918_v23  ;;  %v21956_v14 = vld [vmem:[#allocation3 + $0x33] sm:$0x1] }
 0x44e   : > { %11298 = vst.msk [vmem:[#allocation3 + $0x4a] sm:$0x1] %vm11145_vm3, %v11121_v15  ;;  %v10332_v32 = vmax.f32 %v21847_v4, %v16968_v9  ;;  %v11674_v35 = vcombine.low %v21942_v28, %v21927_v56  ;;  %v21958_v13 = vld [vmem:[#allocation3 + $0x36] sm:$0x1]  ;;  %v21960_v54 = vld [vmem:[#allocation3 + $0x3a] sm:$0x1]  ;;  %v11681_v7 = vrot.slane %v11671_v25, %v18477_v8  ;;  %v11720_v38 = vcombine.low %v21956_v14, %v21938_v41 }
 0x44f   : > { %23438 = vst [vmem:[#allocation40_spill] sm:$0xff] %v21949_v1  ;;  %23439 = vst [vmem:[#allocation18_spill] sm:$0xff] %v21958_v13  ;;  %v11133_v58 = vmax.f32 %v11069_v44, 0.0  ;;  %v11688_v4 = vrot.slane %v11672_v34, %v18477_v8  ;;  %16718 = vmatmul.mubr.msk.f32.gmra.mrb[34].mxu1 %vm11867_vm4, %v21949_v1  ;;  %v11695_v9 = vrot.slane %v11673_v37, %v18477_v8  ;;  %v21977_v25 = vld [vmem:[#allocation3 + $0x39] sm:$0x1] }
 0x450   : > { %23440 = vst [vmem:[#allocation43_spill] sm:$0xff] %v21960_v54  ;;  %11308 = vst.msk [vmem:[#allocation3 + $0x56] sm:$0x1] %vm11145_vm3, %v11131_v30  ;;  %v10588_v15 = vcombine.high %v10332_v32, %v10332_v32  ;;  %v10595_v46 = vrot.slane %v10332_v32, %v21467_v21  ;;  %v11702_v44 = vrot.slane %v11674_v35, %v18477_v8  ;;  %v21973_v30 = vld [vmem:[#allocation3 + $0x35] sm:$0x1] }
 0x451   : > { %11309 = vst.msk [vmem:[#allocation3 + $0x57] sm:$0x1] %vm11145_vm3, %v11132_v51  ;;  %v21975_v51 = vld [vmem:[#allocation3 + $0x37] sm:$0x1]  ;;  %23442 = vst [vmem:[#allocation44_spill] sm:$0xff] %v21977_v25  ;;  %v11703_v34 = vcombine.low %v11681_v7, %v11688_v4  ;;  %v11721_v16 = vcombine.low %v21973_v30, %v21958_v13  ;;  %v11723_v32 = vcombine.low %v21977_v25, %v21960_v54 }
 0x452   : > { %23441 = vst [vmem:[#allocation46_spill] sm:$0xff] %v21975_v51  ;;  %11310 = vst.msk [vmem:[#allocation3 + $0x58] sm:$0x1] %vm11145_vm3, %v11133_v58  ;;  %v11722_v53 = vcombine.low %v21975_v51, %v21946_v29  ;;  %v10602_v37 = vrot.slane %v10588_v15, %v21467_v21  ;;  %v10603_v35 = vcombine.high %v10595_v46, %v10595_v46  ;;  %v15730_v1 = vrot.slane %v10595_v46, 9  ;;  %v21993_v54 = vld [vmem:[#allocation3 + $0x3d] sm:$0x1] }
 0x453   : > { %v11704_v6 = vcombine.low %v11695_v9, %v11702_v44  ;;  %v11711_v56 = vrot.slane %v11703_v34, %v18477_v8  ;;  %v11730_v58 = vrot.slane %v11720_v38, %v18477_v8  ;;  %v11737_v7 = vrot.slane %v11721_v16, %v18477_v8  ;;  %v21995_v15 = vld [vmem:[#allocation3 + $0x40] sm:$0x1]  ;;  %v21999_v34 = vld [vmem:[#allocation3 + $0x42] sm:$0x1] }
 0x454   : > { %v11744_v4 = vrot.slane %v11722_v53, %v18477_v8  ;;  %v10604_v62 = vcombine.high %v10602_v37, %v10602_v37  ;;  %v15731_v36 = vrot.slane %v10603_v35, 9  ;;  %v15732_v43 = vrot.slane %v10602_v37, 9  ;;  %23444 = vst [vmem:[#allocation45_spill] sm:$0xff] %v21999_v34 }
 0x455   : > { %v10934_v29 = vmax.f32 %v10595_v46, %v15730_v1  ;;  %v11718_v9 = vrot.slane %v11704_v6, %v18477_v8  ;;  %v11751_v44 = vrot.slane %v11723_v32, %v18477_v8  ;;  %v11752_v21 = vcombine.low %v11730_v58, %v11737_v7  ;;  %v22004_v1 = vld [vmem:[#allocation3 + $0x3f] sm:$0x1]  ;;  %v22006_v46 = vld [vmem:[#allocation3 + $0x44] sm:$0x1] }
 0x456   : > { %v11769_v16 = vcombine.low %v21993_v54, %v21987_v61  ;;  %v15733_v38 = vrot.slane %v10604_v62, 9  ;;  %v10935_v53 = vmax.f32 %v10603_v35, %v15731_v36  ;;  %v10936_v25 = vmax.f32 %v10602_v37, %v15732_v43  ;;  %23445 = vst [vmem:[#allocation21_spill] sm:$0xff] %v22006_v46  ;;  %v22018_v37 = vld [vmem:[#allocation3 + $0x43] sm:$0x1] }
 0x457   : > { %v10998_v13 = vmul.f32 %v21893_v59, %v10934_v29  ;;  %v22008_v51 = vcombine.low %v11711_v56, %v11718_v9  ;;  %v11753_v6 = vcombine.low %v11744_v4, %v11751_v44  ;;  %v11760_v32 = vrot.slane %v11752_v21, %v18477_v8  ;;  %v22016_v29 = vld [vmem:[#allocation3 + $0x41] sm:$0x1] }
 0x458   : > { %v11770_v58 = vcombine.low %v22004_v1, %v21995_v15  ;;  %v10937_v7 = vmax.f32 %v10604_v62, %v15733_v38  ;;  %v10999_v61 = vmul.f32 %v21893_v59, %v10935_v53  ;;  %v11000_v36 = vmul.f32 %v21893_v59, %v10936_v25  ;;  %v22028_v25 = vld [vmem:[#allocation3 + $0x48] sm:$0x1]  ;;  %v22033_v38 = vld [vmem:[#allocation3 + $0x4a] sm:$0x1]  ;;  %v22035_v53 = vld [vmem:[#allocation3 + $0x4c] sm:$0x1] }
 0x459   : > { %23446 = vst [vmem:[#allocation25_spill] sm:$0xff] %v22008_v51  ;;  %v11062_v43 = vadd.f32 %v21901_v0, %v10998_v13  ;;  %16720 = vmatprep.mubr.msk.f32.mxu1 %vm11867_vm4, %v22008_v51  ;;  %v11767_v56 = vrot.slane %v11753_v6, %v18477_v8  ;;  %v11771_v21 = vcombine.low %v22016_v29, %v21999_v34  ;;  %23447 = vst [vmem:[#allocation51_spill] sm:$0xff] %v22028_v25  ;;  %v22042_v34 = vld [vmem:[#allocation3 + $0x47] sm:$0x1] }
 0x45a   : > { %v11772_v62 = vcombine.low %v22018_v37, %v22006_v46  ;;  %v11779_v35 = vrot.slane %v11769_v16, %v18477_v8  ;;  %v11001_v13 = vmul.f32 %v21893_v59, %v10937_v7  ;;  %v11063_v4 = vadd.f32 %v21901_v0, %v10999_v61  ;;  %23448 = vst [vmem:[#allocation50_spill] sm:$0xff] %v22033_v38  ;;  %v22044_v59 = vld [vmem:[#allocation3 + $0x4e] sm:$0x1] }
 0x45b   : > { %v11064_v9 = vadd.f32 %v21901_v0, %v11000_v36  ;;  %v11126_v44 = vmax.f32 %v11062_v43, 0.0  ;;  %23449 = vst [vmem:[#allocation52_spill] sm:$0xff] %v22035_v53  ;;  %v22037_v6 = vcombine.low %v11760_v32, %v11767_v56  ;;  %v11786_v51 = vrot.slane %v11770_v58, %v18477_v8  ;;  %23451 = vst [vmem:[#allocation54_spill] sm:$0xff] %v22044_v59  ;;  %v22048_v43 = vld [vmem:[#allocation3 + $0x49] sm:$0x1] }
 0x45c   : > { %v11793_v46 = vrot.slane %v11771_v21, %v18477_v8  ;;  %v11800_v16 = vrot.slane %v11772_v62, %v18477_v8  ;;  %v11065_v61 = vadd.f32 %v21901_v0, %v11001_v13  ;;  %v11127_v7 = vmax.f32 %v11063_v4, 0.0  ;;  %v22050_v32 = vld [vmem:[#allocation3 + $0x4b] sm:$0x1]  ;;  %v22056_v62 = vld [vmem:[#allocation3 + $0x4d] sm:$0x1] }
 0x45d   : > { %23450 = vst [vmem:[#allocation56_spill] sm:$0xff] %v22037_v6  ;;  %v11128_v36 = vmax.f32 %v11064_v9, 0.0  ;;  %11303 = vst.msk [vmem:[#allocation3 + $0x51] sm:$0x1] %vm11145_vm3, %v11126_v44  ;;  %v11818_v58 = vcombine.low %v22042_v34, %v22028_v25  ;;  %16721 = vmatmul.mubr.msk.f32.gmra.mrb[36].mxu1 %vm11867_vm4, %v22037_v6  ;;  %v11801_v56 = vcombine.low %v11779_v35, %v11786_v51  ;;  %v17617_v51 = vld [vmem:[#allocation3 + $0x2] sm:$0x1] }
 0x45e   : > { %23452 = vst [vmem:[#allocation57_spill] sm:$0xff] %v22050_v32  ;;  %v11802_v21 = vcombine.low %v11793_v46, %v11800_v16  ;;  %23453 = vst [vmem:[#allocation55_spill] sm:$0xff] %v22056_v62  ;;  %v11819_v0 = vcombine.low %v22048_v43, %v22033_v38  ;;  %v11820_v13 = vcombine.low %v22050_v32, %v22035_v53  ;;  %v11129_v4 = vmax.f32 %v11065_v61, 0.0  ;;  %v17618_v46 = vld [vmem:[#allocation3 + $0x3] sm:$0x1] }
 0x45f   : > { %11304 = vst.msk [vmem:[#allocation3 + $0x52] sm:$0x1] %vm11145_vm3, %v11127_v7  ;;  %11305 = vst.msk [vmem:[#allocation3 + $0x53] sm:$0x1] %vm11145_vm3, %v11128_v36  ;;  %v11821_v9 = vcombine.low %v22056_v62, %v22044_v59  ;;  %v11828_v44 = vrot.slane %v11818_v58, %v18477_v8  ;;  %v11998_v35 = vcombine.low %v17617_v51, %v17618_v46  ;;  %v11321_v16 = vld [vmem:[#allocation3 + $0xa] sm:$0x1] }
 0x460   : > { %v11809_v6 = vrot.slane %v11801_v56, %v18477_v8  ;;  %v11816_v38 = vrot.slane %v11802_v21, %v18477_v8  ;;  %v11835_v53 = vrot.slane %v11819_v0, %v18477_v8  ;;  %v11842_v61 = vrot.slane %v11820_v13, %v18477_v8  ;;  %11306 = vst.msk [vmem:[#allocation3 + $0x54] sm:$0x1] %vm11145_vm3, %v11129_v4  ;;  %v17619_v36 = vld [vmem:[#allocation3 + $0x4] sm:$0x1]  ;;  %v17620_v59 = vld [vmem:[#allocation3 + $0x5] sm:$0x1] }
 0x461   : > { %v11849_v7 = vrot.slane %v11821_v9, %v18477_v8  ;;  %v11999_v62 = vcombine.low %v17619_v36, %v17620_v59  ;;  %v17621_v58 = vld [vmem:[#allocation3 + $0x6] sm:$0x1]  ;;  %v17622_v32 = vld [vmem:[#allocation3 + $0x7] sm:$0x1]  ;;  %v23454_v56 = vcombine.low %v21516_v12, %v21453_v33  ;;  %v22080_v13 = vrot.slane %v11998_v35, %v18477_v8  ;;  %v11331_v33 = vld [vmem:[#allocation3 + $0x14] sm:$0x1] }
 0x462   : > { %v12000_v25 = vcombine.low %v17621_v58, %v17622_v32  ;;  %v22077_v21 = vcombine.low %v11809_v6, %v11816_v38  ;;  %v11850_v0 = vcombine.low %v11828_v44, %v11835_v53  ;;  %v12046_v4 = vcombine.low %v11321_v16, %v21706_v57 }
 0x463   : > { %v12007_v51 = vrot.slane %v23454_v56, %v18477_v8  ;;  %v11851_v9 = vcombine.low %v11842_v61, %v11849_v7  ;;  %v22084_v46 = vrot.slane %v11999_v62, %v18477_v8  ;;  %v12047_v32 = vcombine.low %v21699_v40, %v21721_v18 }
 0x464   : > { %v22087_v59 = vrot.slane %v12000_v25, %v18477_v8  ;;  %16723 = vmatprep.mubr.msk.f32.mxu1 %vm11867_vm4, %v22077_v21  ;;  %v11858_v12 = vrot.slane %v11850_v0, %v18477_v8  ;;  %v12048_v57 = vcombine.low %v21708_v60, %v21723_v42  ;;  %v12049_v53 = vcombine.low %v21710_v45, %v21728_v48  ;;  %v11341_v42 = vld [vmem:[#allocation3 + $0x1e] sm:$0x1] }
 0x465   : > { %v12029_v38 = vcombine.low %v12007_v51, %v22080_v13  ;;  %v11865_v25 = vrot.slane %v11851_v9, %v18477_v8  ;;  %v12056_v40 = vrot.slane %v12046_v4, %v18477_v8  ;;  %v22104_v18 = vrot.slane %v12047_v32, %v18477_v8 }
 0x466   : > { %v12030_v6 = vcombine.low %v22084_v46, %v22087_v59  ;;  %v22108_v44 = vrot.slane %v12048_v57, %v18477_v8  ;;  %v22111_v60 = vrot.slane %v12049_v53, %v18477_v8  ;;  %v12095_v45 = vcombine.low %v11331_v33, %v21779_v27 }
 0x467   : > { %v12037_v62 = vrot.slane %v12029_v38, %v18477_v8  ;;  %v22114_v48 = vcombine.low %v11858_v12, %v11865_v25  ;;  %v12078_v16 = vcombine.low %v12056_v40, %v22104_v18  ;;  %v12096_v61 = vcombine.low %v21766_v17, %v21788_v2  ;;  %v11351_v2 = vld [vmem:[#allocation3 + $0x28] sm:$0x1] }
 0x468   : > { %v12044_v35 = vrot.slane %v12030_v6, %v18477_v8  ;;  %v12079_v7 = vcombine.low %v22108_v44, %v22111_v60  ;;  %v12097_v36 = vcombine.low %v21781_v20, %v21799_v10  ;;  %v12098_v58 = vcombine.low %v21790_v5, %v21814_v63 }
 0x469   : > { %v12105_v27 = vrot.slane %v12095_v45, %v18477_v8  ;;  %16724 = vmatmul.mubr.msk.f32.gmra.mrb[38].mxu1 %vm11867_vm4, %v22114_v48  ;;  %v12086_v51 = vrot.slane %v12078_v16, %v18477_v8  ;;  %v22131_v0 = vrot.slane %v12096_v61, %v18477_v8  ;;  %v12144_v17 = vcombine.low %v11341_v42, %v21855_v50  ;;  %v11371_v45 = vld [vmem:[#allocation3 + $0x3c] sm:$0x1]  ;;  %v23456_v16 = vld [vmem:[#allocation18_spill] sm:$0xff] }
 0x46a   : > { %v12045_v56 = vcombine.low %v12037_v62, %v12044_v35  ;;  %v12093_v4 = vrot.slane %v12079_v7, %v18477_v8  ;;  %v22136_v20 = vrot.slane %v12097_v36, %v18477_v8  ;;  %v22139_v5 = vrot.slane %v12098_v58, %v18477_v8  ;;  %v23455_v35 = vld [vmem:[#allocation46_spill] sm:$0xff]  ;;  %v23457_v36 = vld [vmem:[#allocation44_spill] sm:$0xff] }
 0x46b   : > { %v12145_v10 = vcombine.low %v21837_v11, %v21857_v55  ;;  %v12127_v63 = vcombine.low %v12105_v27, %v22131_v0  ;;  %v12146_v9 = vcombine.low %v21839_v39, %v21849_v24  ;;  %v12147_v50 = vcombine.low %v21841_v22, %v21871_v47  ;;  %v11361_v55 = vld [vmem:[#allocation3 + $0x32] sm:$0x1]  ;;  %v22170_v47 = vld [vmem:[%s22796_s4 + $0x18] sm:$0xff]  ;;  %v23458_v58 = vld [vmem:[#allocation42_spill] sm:$0xff] }
 0x46c   : > { %16728 = vmatprep.mubr.msk.f32.mxu1 %vm11867_vm4, %v12045_v56  ;;  %v12154_v32 = vrot.slane %v12144_v17, %v18477_v8  ;;  %v22150_v33 = vcombine.low %v12086_v51, %v12093_v4  ;;  %v12128_v12 = vcombine.low %v22136_v20, %v22139_v5  ;;  %v12193_v11 = vcombine.low %v11351_v2, %v21923_v49  ;;  %v11381_v17 = vld [vmem:[#allocation3 + $0x46] sm:$0x1] }
 0x46d   : > { %v22155_v38 = vrot.slane %v12145_v10, %v18477_v8  ;;  %v12135_v57 = vrot.slane %v12127_v63, %v18477_v8  ;;  %v22160_v39 = vrot.slane %v12146_v9, %v18477_v8  ;;  %v22163_v22 = vrot.slane %v12147_v50, %v18477_v8  ;;  %v23459_v9 = vld [vmem:[#allocation49_spill] sm:$0xff] }
 0x46e   : > { %v12194_v24 = vcombine.low %v21911_v19, %v21934_v3  ;;  %16729 = vmatmul.mubr.msk.f32.vlgmr.msra.gmra.mrb[32].mxu1 %vm11867_vm4, %v22150_v33  ;;  %v12142_v49 = vrot.slane %v12128_v12, %v18477_v8  ;;  %v12195_v25 = vcombine.low %v21916_v52, %v21925_v31  ;;  %v12196_v6 = vcombine.low %v21918_v23, %v21942_v28  ;;  %v23460_v12 = vld [vmem:[#allocation45_spill] sm:$0xff] }
 0x46f   : > { %v12176_v53 = vcombine.low %v12154_v32, %v22155_v38  ;;  %16741 = vmatpush3.msra.mxu1 %v21774_v26  ;;  %v12177_v19 = vcombine.low %v22160_v39, %v22163_v22  ;;  %v12203_v3 = vrot.slane %v12193_v11, %v18477_v8  ;;  %v12242_v62 = vcombine.low %v11361_v55, %v21956_v14 }
 0x470   : > { %v22185_v40 = vrot.slane %v12194_v24, %v18477_v8  ;;  %v22188_v42 = vcombine.low %v12135_v57, %v12142_v49  ;;  %v22192_v31 = vrot.slane %v12195_v25, %v18477_v8  ;;  %v22195_v26 = vrot.slane %v12196_v6, %v18477_v8  ;;  %16754 = vmatprep.subr.mxu1 %v22170_v47  ;;  %v23461_v25 = vld [vmem:[#allocation51_spill] sm:$0xff]  ;;  %v23462_v6 = vld [vmem:[#allocation57_spill] sm:$0xff] }
 0x471   : > { %v12184_v52 = vrot.slane %v12176_v53, %v18477_v8  ;;  %v12191_v23 = vrot.slane %v12177_v19, %v18477_v8  ;;  %v12243_v14 = vcombine.low %v21938_v41, %v21973_v30  ;;  %v12244_v61 = vcombine.low %v23456_v16, %v23455_v35  ;;  %v23463_v19 = vld [vmem:[#allocation50_spill] sm:$0xff]  ;;  %v11330_v35 = vld [vmem:[#allocation3 + $0x13] sm:$0x1] }
 0x472   : > { %v12225_v28 = vcombine.low %v12203_v3, %v22185_v40  ;;  %16731 = vmatprep.mubr.msk.f32.mxu1 %vm11867_vm4, %v22188_v42  ;;  %v12226_v7 = vcombine.low %v22192_v31, %v22195_v26  ;;  %v12245_v27 = vcombine.low %v23458_v58, %v23457_v36  ;;  %v12252_v56 = vrot.slane %v12242_v62, %v18477_v8  ;;  %v11340_v58 = vld [vmem:[#allocation3 + $0x1d] sm:$0x1] }
 0x473   : > { %v12291_v51 = vcombine.low %v11371_v45, %v21993_v54  ;;  %v22212_v2 = vcombine.low %v12184_v52, %v12191_v23  ;;  %v22216_v30 = vrot.slane %v12243_v14, %v18477_v8  ;;  %v22219_v4 = vrot.slane %v12244_v61, %v18477_v8  ;;  %v23464_v52 = vld [vmem:[#allocation55_spill] sm:$0xff]  ;;  %v23465_v23 = vld [vmem:[#allocation52_spill] sm:$0xff] }
 0x474   : > { %v12233_v41 = vrot.slane %v12225_v28, %v18477_v8  ;;  %v12240_v10 = vrot.slane %v12226_v7, %v18477_v8  ;;  %v22223_v63 = vrot.slane %v12245_v27, %v18477_v8  ;;  %v12292_v50 = vcombine.low %v23459_v9, %v22004_v1  ;;  %v17623_v7 = vld [vmem:[#allocation3 + $0x8] sm:$0x1] }
 0x475   : > { %v12293_v54 = vcombine.low %v21995_v15, %v22016_v29  ;;  %16732 = vmatmul.mubr.msk.f32.gmra.mrb[34].mxu1 %vm11867_vm4, %v22212_v2  ;;  %v12274_v32 = vcombine.low %v12252_v56, %v22216_v30  ;;  %v12294_v11 = vcombine.low %v23460_v12, %v22018_v37  ;;  %v12301_v55 = vrot.slane %v12291_v51, %v18477_v8  ;;  %v11320_v29 = vld [vmem:[#allocation3 + $0x9] sm:$0x1] }
 0x476   : > { %v12340_v57 = vcombine.low %v11381_v17, %v22042_v34  ;;  %v22236_v24 = vcombine.low %v12233_v41, %v12240_v10  ;;  %v12275_v1 = vcombine.low %v22219_v4, %v22223_v63  ;;  %v22241_v49 = vrot.slane %v12292_v50, %v18477_v8  ;;  %v23466_v50 = vld [vmem:[#allocation35_spill] sm:$0xff] }
 0x477   : > { %v22244_v15 = vrot.slane %v12293_v54, %v18477_v8  ;;  %v12282_v53 = vrot.slane %v12274_v32, %v18477_v8  ;;  %v22248_v37 = vrot.slane %v12294_v11, %v18477_v8  ;;  %v12341_v34 = vcombine.low %v23461_v25, %v22048_v43  ;;  %v11360_v25 = vld [vmem:[#allocation3 + $0x31] sm:$0x1] }
 0x478   : > { %v12342_v3 = vcombine.low %v23463_v19, %v23462_v6  ;;  %16734 = vmatprep.mubr.msk.f32.mxu1 %vm11867_vm4, %v22236_v24  ;;  %v12289_v62 = vrot.slane %v12275_v1, %v18477_v8  ;;  %v12323_v45 = vcombine.low %v12301_v55, %v22241_v49  ;;  %v12343_v28 = vcombine.low %v23465_v23, %v23464_v52  ;;  %v11350_v55 = vld [vmem:[#allocation3 + $0x27] sm:$0x1]  ;;  %v11370_v52 = vld [vmem:[#allocation3 + $0x3b] sm:$0x1] }
 0x479   : > { %v12350_v14 = vrot.slane %v12340_v57, %v18477_v8  ;;  %v12324_v16 = vcombine.low %v22244_v15, %v22248_v37  ;;  %v22264_v43 = vrot.slane %v12341_v34, %v18477_v8  ;;  %v12518_v36 = vcombine.low %v17623_v7, %v11320_v29 }
 0x47a   : > { %v22267_v61 = vrot.slane %v12342_v3, %v18477_v8  ;;  %v22269_v27 = vcombine.low %v12282_v53, %v12289_v62  ;;  %v12331_v56 = vrot.slane %v12323_v45, %v18477_v8  ;;  %v22273_v51 = vrot.slane %v12343_v28, %v18477_v8 }
 0x47b   : > { %v12526_v17 = vcombine.low %v22080_v13, %v22084_v46  ;;  %v12338_v41 = vrot.slane %v12324_v16, %v18477_v8  ;;  %v12372_v10 = vcombine.low %v12350_v14, %v22264_v43  ;;  %v12525_v9 = vrot.slane %v12518_v36, %v18477_v8  ;;  %v23467_v13 = vld [vmem:[#allocation37_spill] sm:$0xff]  ;;  %v23470_v36 = vld [vmem:[#allocation43_spill] sm:$0xff] }
 0x47c   : > { %v12543_v54 = vcombine.low %v23466_v50, %v11330_v35  ;;  %16735 = vmatmul.mubr.msk.f32.gmra.mrb[36].mxu1 %vm11867_vm4, %v22269_v27  ;;  %v12373_v32 = vcombine.low %v22267_v61, %v22273_v51  ;;  %v12551_v11 = vcombine.low %v22104_v18, %v22108_v44  ;;  %v12568_v46 = vcombine.low %v23467_v13, %v11340_v58  ;;  %v11380_v35 = vld [vmem:[#allocation3 + $0x45] sm:$0x1]  ;;  %v11390_v50 = vld [vmem:[#allocation3 + $0x4f] sm:$0x1] }
 0x47d   : > { %v12534_v12 = vrot.slane %v12526_v17, %v18477_v8  ;;  %v22289_v57 = vcombine.low %v12331_v56, %v12338_v41  ;;  %v12380_v1 = vrot.slane %v12372_v10, %v18477_v8  ;;  %v12527_v29 = vcombine.low %v22087_v59, %v12525_v9  ;;  %v23468_v59 = vld [vmem:[#allocation17_spill] sm:$0xff] }
 0x47e   : > { %v12550_v53 = vrot.slane %v12543_v54, %v18477_v8  ;;  %v12387_v34 = vrot.slane %v12373_v32, %v18477_v8  ;;  %v12559_v6 = vrot.slane %v12551_v11, %v18477_v8  ;;  %v12575_v19 = vrot.slane %v12568_v46, %v18477_v8  ;;  %v23471_v10 = vld [vmem:[#allocation21_spill] sm:$0xff]  ;;  %v23472_v46 = vld [vmem:[#allocation54_spill] sm:$0xff] }
 0x47f   : > { %v12576_v18 = vcombine.low %v22131_v0, %v22136_v20  ;;  %16737 = vmatprep.mubr.msk.f32.mxu1 %vm11867_vm4, %v22289_v57  ;;  %v12541_v44 = vrot.slane %v12527_v29, %v18477_v8  ;;  %v12593_v62 = vcombine.low %v23468_v59, %v11350_v55  ;;  %v12601_v45 = vcombine.low %v22155_v38, %v22160_v39  ;;  %v23469_v0 = vld [vmem:[#allocation16_spill] sm:$0xff] }
 0x480   : > { %v12552_v3 = vcombine.low %v22111_v60, %v12550_v53  ;;  %v22306_v23 = vcombine.low %v12380_v1, %v12387_v34  ;;  %v12577_v28 = vcombine.low %v22139_v5, %v12575_v19  ;;  %v12618_v20 = vcombine.low %v23469_v0, %v11360_v25  ;;  %v11394_v59 = vld [vmem:[#allocation3 + $0x53] sm:$0x1] }
 0x481   : > { %v12584_v14 = vrot.slane %v12576_v18, %v18477_v8  ;;  %v12542_v16 = vcombine.low %v12534_v12, %v12541_v44  ;;  %v12600_v60 = vrot.slane %v12593_v62, %v18477_v8  ;;  %v12626_v5 = vcombine.low %v22185_v40, %v22192_v31  ;;  %v11395_v18 = vld [vmem:[#allocation3 + $0x54] sm:$0x1]  ;;  %v11396_v44 = vld [vmem:[#allocation3 + $0x55] sm:$0x1]  ;;  %v11398_v62 = vld [vmem:[#allocation3 + $0x57] sm:$0x1] }
 0x482   : > { %v12566_v7 = vrot.slane %v12552_v3, %v18477_v8  ;;  %16738 = vmatmul.mubr.msk.f32.gmra.mrb[38].mxu1 %vm11867_vm4, %v22306_v23  ;;  %v12591_v38 = vrot.slane %v12577_v28, %v18477_v8  ;;  %v12625_v39 = vrot.slane %v12618_v20, %v18477_v8  ;;  %v12643_v58 = vcombine.low %v23470_v36, %v11370_v52  ;;  %v11397_v3 = vld [vmem:[#allocation3 + $0x56] sm:$0x1]  ;;  %v11391_v28 = vld [vmem:[#allocation3 + $0x50] sm:$0x1] }
 0x483   : > { %16742 = vmatprep.mubr.msk.f32.mxu1 %vm11867_vm4, %v12542_v16  ;;  %v12602_v56 = vcombine.low %v22163_v22, %v12600_v60  ;;  %v12609_v17 = vrot.slane %v12601_v45, %v18477_v8  ;;  %v12651_v41 = vcombine.low %v22216_v30, %v22219_v4  ;;  %v12668_v9 = vcombine.low %v23471_v10, %v11380_v35  ;;  %v11138_v4 = vld [vmem:[%s22796_s4 + $0x20] sm:$0xff] }
 0x484   : > { %v22326_v54 = vcombine.low %v12559_v6, %v12566_v7  ;;  %v22328_v32 = vcombine.low %v12584_v14, %v12591_v38  ;;  %v12627_v40 = vcombine.low %v22195_v26, %v12625_v39  ;;  %v12650_v31 = vrot.slane %v12643_v58, %v18477_v8  ;;  %v11392_v14 = vld [vmem:[#allocation3 + $0x51] sm:$0x1]  ;;  %v11139_v7 = vld [vmem:[%s22796_s4 + $0x28] sm:$0xff]  ;;  %v11399_v58 = vld [vmem:[#allocation3 + $0x58] sm:$0x1] }
 0x485   : > { %v12616_v12 = vrot.slane %v12602_v56, %v18477_v8  ;;  %v12634_v22 = vrot.slane %v12626_v5, %v18477_v8  ;;  %v12675_v11 = vrot.slane %v12668_v9, %v18477_v8  ;;  %v12676_v30 = vcombine.low %v22241_v49, %v22244_v15 }
 0x486   : > { %16743 = vmatmul.mubr.msk.f32.vlgmr.msra.gmra.mrb[32].mxu1 %vm11867_vm4, %v22326_v54  ;;  %v12641_v26 = vrot.slane %v12627_v40, %v18477_v8  ;;  %v12652_v13 = vcombine.low %v22223_v63, %v12650_v31  ;;  %v12693_v55 = vcombine.low %v23472_v46, %v11390_v50  ;;  %v12659_v49 = vrot.slane %v12651_v41, %v18477_v8  ;;  %v23473_v40 = vld [vmem:[#allocation38_spill] sm:$0xff] }
 0x487   : > { %16755 = vmatpush3.msra.mxu1 %v22170_v47  ;;  %16745 = vmatprep.mubr.msk.f32.mxu1 %vm11867_vm4, %v22328_v32  ;;  %v12677_v15 = vcombine.low %v22248_v37, %v12675_v11  ;;  %v22350_v1 = vcombine.low %v12609_v17, %v12616_v12  ;;  %v12701_v63 = vcombine.low %v22264_v43, %v22267_v61  ;;  %v23474_v11 = vld [vmem:[#allocation34_spill] sm:$0xff] }
 0x488   : > { %v12666_v29 = vrot.slane %v12652_v13, %v18477_v8  ;;  %v12700_v53 = vrot.slane %v12693_v55, %v18477_v8  ;;  %16768 = vmatprep.subr.mxu1 %v11138_v4  ;;  %v22356_v25 = vcombine.low %v12634_v22, %v12641_v26  ;;  %v12684_v47 = vrot.slane %v12676_v30, %v18477_v8  ;;  %v11140_v22 = vld [vmem:[%s22796_s4 + $0x30] sm:$0xff]  ;;  %v23476_v55 = vld [vmem:[#allocation25_spill] sm:$0xff] }
 0x489   : > { %v12691_v34 = vrot.slane %v12677_v15, %v18477_v8  ;;  %v12709_v19 = vrot.slane %v12701_v63, %v18477_v8  ;;  %v12857_v52 = vcombine.low %v11395_v18, %v11396_v44  ;;  %v12858_v20 = vcombine.low %v11397_v3, %v11398_v62  ;;  %v23475_v26 = vld [vmem:[#allocation40_spill] sm:$0xff] }
 0x48a   : > { %16746 = vmatmul.mubr.msk.f32.gmra.mrb[34].mxu1 %vm11867_vm4, %v22350_v1  ;;  %v12702_v37 = vcombine.low %v22273_v51, %v12700_v53  ;;  %v22365_v6 = vcombine.low %v12659_v49, %v12666_v29  ;;  %v11393_v51 = vld [vmem:[#allocation3 + $0x52] sm:$0x1]  ;;  %v12855_v35 = vcombine.low %v11391_v28, %v11392_v14  ;;  %v13021_v41 = vcombine.low %v11394_v59, %v11395_v18  ;;  %v11400_v53 = vld [vmem:[#allocation3 + $0x59] sm:$0x1]  ;;  %v11402_v18 = vld [vmem:[#allocation3 + $0x5b] sm:$0x1] }
 0x48b   : > { %16748 = vmatprep.mubr.msk.f32.mxu1 %vm11867_vm4, %v22356_v25  ;;  %v22369_v61 = vcombine.low %v12684_v47, %v12691_v34  ;;  %v12856_v0 = vcombine.low %v11393_v51, %v11394_v59  ;;  %v22382_v16 = vrot.slane %v12857_v52, %v18477_v8  ;;  %v22393_v38 = vrot.slane %v12858_v20, %v18477_v8  ;;  %v23477_v49 = vld [vmem:[#allocation56_spill] sm:$0xff]  ;;  %v11406_v59 = vld [vmem:[#allocation3 + $0x5f] sm:$0x1]  ;;  %v11408_v52 = vld [vmem:[#allocation3 + $0x61] sm:$0x1] }
 0x48c   : > { %v12716_v43 = vrot.slane %v12702_v37, %v18477_v8  ;;  %v13023_v10 = vcombine.low %v11398_v62, %v11399_v58  ;;  %v13020_v9 = vcombine.low %v11392_v14, %v11393_v51  ;;  %v13022_v50 = vcombine.low %v11396_v44, %v11397_v3  ;;  %v11141_v37 = vld [vmem:[%s22796_s4 + $0x38] sm:$0xff]  ;;  %v11403_v44 = vld [vmem:[#allocation3 + $0x5c] sm:$0x1]  ;;  %v11404_v3 = vld [vmem:[#allocation3 + $0x5d] sm:$0x1] }
 0x48d   : > { %v22390_v60 = vrot.slane %v12856_v0, %v18477_v8  ;;  %v12888_v39 = vcombine.low %v22382_v16, %v22393_v38  ;;  %v13037_v31 = vrot.slane %v13021_v41, %v18477_v8  ;;  %v13185_v47 = vcombine.low %v11399_v58, %v11400_v53  ;;  %v11405_v51 = vld [vmem:[#allocation3 + $0x5e] sm:$0x1]  ;;  %v11407_v62 = vld [vmem:[#allocation3 + $0x60] sm:$0x1]  ;;  %v11409_v41 = vld [vmem:[#allocation3 + $0x62] sm:$0x1] }
 0x48e   : > { %16749 = vmatmul.mubr.msk.f32.gmra.mrb[36].mxu1 %vm11867_vm4, %v22365_v6  ;;  %v22375_v45 = vcombine.low %v12709_v19, %v12716_v43  ;;  %v13051_v12 = vrot.slane %v13023_v10, %v18477_v8  ;;  %v13030_v30 = vrot.slane %v13020_v9, %v18477_v8  ;;  %v13334_v20 = vcombine.low %v11403_v44, %v11404_v3 }
 0x48f   : > { %16751 = vmatprep.mubr.msk.f32.mxu1 %vm11867_vm4, %v22369_v61  ;;  %v12902_v36 = vrot.slane %v12888_v39, %v18477_v8  ;;  %v13192_v34 = vrot.slane %v13185_v47, %v18477_v8  ;;  %v13193_v19 = vcombine.low %v22390_v60, %v22382_v16  ;;  %v13336_v16 = vcombine.low %v11407_v62, %v11408_v52 }
 0x490   : > { %v13052_v13 = vcombine.low %v13030_v30, %v13037_v31  ;;  %v13498_v10 = vcombine.low %v11402_v18, %v11403_v44  ;;  %v13499_v9 = vcombine.low %v11404_v3, %v11405_v51 }
 0x491   : > { %v13194_v43 = vcombine.low %v22393_v38, %v13192_v34  ;;  %v13201_v28 = vrot.slane %v13193_v19, %v18477_v8  ;;  %v13350_v38 = vrot.slane %v13334_v20, %v18477_v8  ;;  %v13364_v39 = vrot.slane %v13336_v16, %v18477_v8 }
 0x492   : > { %16752 = vmatmul.mubr.msk.f32.gmra.mrb[38].mxu1 %vm11867_vm4, %v22375_v45  ;;  %v13060_v15 = vrot.slane %v13052_v13, %v18477_v8 }
 0x493   : > { %16756 = vmatprep.mubr.msk.f32.mxu1 %vm11867_vm4, %v22150_v33  ;;  %v12865_v33 = vrot.slane %v12855_v35, %v18477_v8  ;;  %v13208_v14 = vrot.slane %v13194_v43, %v18477_v8  ;;  %v13335_v35 = vcombine.low %v11405_v51, %v11406_v59 }
 0x495   : > { %v12887_v5 = vcombine.low %v12865_v33, %v22390_v60  ;;  %v13357_v33 = vrot.slane %v13335_v35, %v18477_v8 }
 0x496   : > { %16757 = vmatmul.mubr.msk.f32.vlgmr.msra.gmra.mrb[32].mxu1 %vm11867_vm4, %v22188_v42 }
 0x497   : > { %16769 = vmatpush3.msra.mxu1 %v11138_v4  ;;  %16759 = vmatprep.mubr.msk.f32.mxu1 %vm11867_vm4, %v22212_v2  ;;  %v12895_v56 = vrot.slane %v12887_v5, %v18477_v8  ;;  %v13044_v4 = vrot.slane %v13022_v50, %v18477_v8  ;;  %v11142_v5 = vld [vmem:[%s22796_s4 + $0x40] sm:$0xff]  ;;  %v13366_v58 = vcombine.low %v13357_v33, %v13364_v39 }
 0x498   : > { %16782 = vmatprep.subr.mxu1 %v11139_v7  ;;  %v13500_v50 = vcombine.low %v11406_v59, %v11407_v62  ;;  %v22548_v62 = vld [vmem:[%s22798_s6] sm:$0x1] }
 0x499   : > { %v22411_v17 = vcombine.low %v12895_v56, %v12902_v36  ;;  %v13053_v46 = vcombine.low %v13044_v4, %v13051_v12 }
 0x49a   : > { %16760 = vmatmul.mubr.msk.f32.gmra.mrb[34].mxu1 %vm11867_vm4, %v22236_v24 }
 0x49b   : > { %16762 = vmatprep.mubr.msk.f32.mxu1 %vm11867_vm4, %v22269_v27  ;;  %v13067_v29 = vrot.slane %v13053_v46, %v18477_v8 }
 0x49d   : > { %v22438_v63 = vcombine.low %v13060_v15, %v13067_v29 }
 0x49e   : > { %16763 = vmatmul.mubr.msk.f32.gmra.mrb[36].mxu1 %vm11867_vm4, %v22289_v57 }
 0x49f   : > { %16765 = vmatprep.mubr.msk.f32.mxu1 %vm11867_vm4, %v22306_v23 }
 0x4a2   : > { %16766 = vmatmul.mubr.msk.f32.gmra.mrb[38].mxu1 %vm11867_vm4, %v22411_v17 }
 0x4a3   : > { %16770 = vmatprep.mubr.msk.f32.mxu1 %vm11867_vm4, %v23473_v40  ;;  %v13515_v40 = vrot.slane %v13499_v9, %v18477_v8 }
 0x4a6   : > { %16771 = vmatmul.mubr.msk.f32.vlgmr.msra.gmra.mrb[32].mxu1 %vm11867_vm4, %v23474_v11 }
 0x4a7   : > { %16783 = vmatpush3.msra.mxu1 %v11139_v7  ;;  %16773 = vmatprep.mubr.msk.f32.mxu1 %vm11867_vm4, %v23475_v26  ;;  %v13209_v7 = vcombine.low %v13201_v28, %v13208_v14 }
 0x4a8   : > { %16796 = vmatprep.subr.mxu1 %v11140_v22 }
 0x4aa   : > { %16774 = vmatmul.mubr.msk.f32.gmra.mrb[34].mxu1 %vm11867_vm4, %v23476_v55 }
 0x4ab   : > { %16776 = vmatprep.mubr.msk.f32.mxu1 %vm11867_vm4, %v23477_v49 }
 0x4ae   : > { %16777 = vmatmul.mubr.msk.f32.gmra.mrb[36].mxu1 %vm11867_vm4, %v22077_v21 }
 0x4af   : > { %16779 = vmatprep.mubr.msk.f32.mxu1 %vm11867_vm4, %v22114_v48 }
 0x4b2   : > { %16780 = vmatmul.mubr.msk.f32.gmra.mrb[38].mxu1 %vm11867_vm4, %v22438_v63 }
 0x4b3   : > { %16784 = vmatprep.mubr.msk.f32.mxu1 %vm11867_vm4, %v22326_v54  ;;  %v11401_v54 = vld [vmem:[#allocation3 + $0x5a] sm:$0x1] }
 0x4b4   : > { %v13333_v0 = vcombine.low %v11401_v54, %v11402_v18  ;;  %v22542_v18 = vld [vmem:[%s22797_s5] sm:$0x1] }
 0x4b6   : > { %16785 = vmatmul.mubr.msk.f32.vlgmr.msra.gmra.mrb[32].mxu1 %vm11867_vm4, %v22328_v32  ;;  %v13343_v60 = vrot.slane %v13333_v0, %v18477_v8 }
 0x4b7   : > { %16797 = vmatpush3.msra.mxu1 %v11140_v22  ;;  %16787 = vmatprep.mubr.msk.f32.mxu1 %vm11867_vm4, %v22350_v1 }
 0x4b8   : > { %16810 = vmatprep.subr.mxu1 %v11141_v37  ;;  %v13365_v36 = vcombine.low %v13343_v60, %v13350_v38 }
 0x4ba   : > { %16788 = vmatmul.mubr.msk.f32.gmra.mrb[34].mxu1 %vm11867_vm4, %v22356_v25  ;;  %v13373_v56 = vrot.slane %v13365_v36, %v18477_v8 }
 0x4bb   : > { %16790 = vmatprep.mubr.msk.f32.mxu1 %vm11867_vm4, %v22365_v6 }
 0x4be   : > { %16791 = vmatmul.mubr.msk.f32.gmra.mrb[36].mxu1 %vm11867_vm4, %v22369_v61 }
 0x4bf   : > { %16793 = vmatprep.mubr.msk.f32.mxu1 %vm11867_vm4, %v22375_v45 }
 0x4c2   : > { %16794 = vmatmul.mubr.msk.f32.gmra.mrb[38].mxu1 %vm11867_vm4, %v13209_v7 }
 0x4c3   : > { %16798 = vmatprep.mubr.msk.f32.mxu1 %vm11867_vm4, %v22188_v42  ;;  %v13380_v42 = vrot.slane %v13366_v58, %v18477_v8 }
 0x4c6   : > { %16799 = vmatmul.mubr.msk.f32.vlgmr.msra.gmra.mrb[32].mxu1 %vm11867_vm4, %v22212_v2  ;;  %v13381_v2 = vcombine.low %v13373_v56, %v13380_v42 }
 0x4c7   : > { %16811 = vmatpush3.msra.mxu1 %v11141_v37  ;;  %16801 = vmatprep.mubr.msk.f32.mxu1 %vm11867_vm4, %v22236_v24  ;;  %v13501_v24 = vcombine.low %v11408_v52, %v11409_v41 }
 0x4c8   : > { %16824 = vmatprep.subr.mxu1 %v11142_v5 }
 0x4c9   : > { %v13529_v31 = vrot.slane %v13501_v24, %v18477_v8 }
 0x4ca   : > { %16802 = vmatmul.mubr.msk.f32.gmra.mrb[34].mxu1 %vm11867_vm4, %v22269_v27  ;;  %v13508_v27 = vrot.slane %v13498_v10, %v18477_v8 }
 0x4cb   : > { %16804 = vmatprep.mubr.msk.f32.mxu1 %vm11867_vm4, %v22289_v57  ;;  %v13522_v57 = vrot.slane %v13500_v50, %v18477_v8 }
 0x4cd   : > { %v13531_v12 = vcombine.low %v13522_v57, %v13529_v31 }
 0x4ce   : > { %16805 = vmatmul.mubr.msk.f32.gmra.mrb[36].mxu1 %vm11867_vm4, %v22306_v23  ;;  %v13530_v23 = vcombine.low %v13508_v27, %v13515_v40 }
 0x4cf   : > { %16807 = vmatprep.mubr.msk.f32.mxu1 %vm11867_vm4, %v22411_v17  ;;  %v23478_v17 = vmov 0.0   ;;  %v13545_v30 = vrot.slane %v13531_v12, %v18477_v8 }
 0x4d0   : > { %v13538_v22 = vrot.slane %v13530_v23, %v18477_v8 }
 0x4d2   : > { %16808 = vmatmul.mubr.msk.f32.gmra.mrb[38].mxu1 %vm11867_vm4, %v13381_v2  ;;  %v13546_v4 = vcombine.low %v13538_v22, %v13545_v30 }
 0x4d3   : > { %16812 = vmatprep.mubr.msk.f32.mxu1 %vm11867_vm4, %v23474_v11  ;;  %v11410_v11 = vld [vmem:[#allocation3 + $0x63] sm:$0x1] }
 0x4d6   : > { %16813 = vmatmul.mubr.msk.f32.vlgmr.msra.gmra.mrb[32].mxu1 %vm11867_vm4, %v23475_v26  ;;  %v13663_v26 = vcombine.low %v11409_v41, %v11410_v11 }
 0x4d7   : > { %16825 = vmatpush3.msra.mxu1 %v11142_v5  ;;  %16815 = vmatprep.mubr.msk.f32.mxu1 %vm11867_vm4, %v23476_v55 }
 0x4d8   : > { %16838 = vmatprep.subr.mxu1 %v23478_v17  ;;  %v13670_v13 = vrot.slane %v13663_v26, %v18477_v8 }
 0x4da   : > { %16816 = vmatmul.mubr.msk.f32.gmra.mrb[34].mxu1 %vm11867_vm4, %v23477_v49  ;;  %v13672_v46 = vcombine.low %v13364_v39, %v13670_v13 }
 0x4db   : > { %16818 = vmatprep.mubr.msk.f32.mxu1 %vm11867_vm4, %v22077_v21  ;;  %v13671_v21 = vcombine.low %v13350_v38, %v13357_v33  ;;  %v14007_v33 = vld [vmem:[%s22799_s7] sm:$0xff] }
 0x4dc   : > { %v13686_v55 = vrot.slane %v13672_v46, %v18477_v8 }
 0x4de   : > { %16819 = vmatmul.mubr.msk.f32.gmra.mrb[36].mxu1 %vm11867_vm4, %v22114_v48  ;;  %v13679_v48 = vrot.slane %v13671_v21, %v18477_v8 }
 0x4df   : > { %16821 = vmatprep.mubr.msk.f32.mxu1 %vm11867_vm4, %v22438_v63 }
 0x4e2   : > { %16822 = vmatmul.mubr.msk.f32.gmra.mrb[38].mxu1 %vm11867_vm4, %v13546_v4 }
 0x4e3   : > { %16826 = vmatprep.mubr.msk.f32.mxu1 %vm11867_vm4, %v22328_v32  ;;  %v13687_v32 = vcombine.low %v13679_v48, %v13686_v55 }
 0x4e6   : > { %16827 = vmatmul.mubr.msk.f32.vlgmr.msra.gmra.mrb[32].mxu1 %vm11867_vm4, %v22350_v1  ;;  %v14008_v1 = vld [vmem:[%s22799_s7 + $0x8] sm:$0xff] }
 0x4e7   : > { %16829 = vmatprep.mubr.msk.f32.mxu1 %vm11867_vm4, %v22356_v25  ;;  %16839 = vmatpush3.msra.mxu1 %v14008_v1  ;;  %v14155_v1 = vld [vmem:[%s22799_s7 + $0x10] sm:$0xff] }
 0x4e8   : > { %16843 = vmatprep.subr.mxu1 %v23478_v17 }
 0x4ea   : > { %16830 = vmatmul.mubr.msk.f32.gmra.mrb[34].mxu1 %vm11867_vm4, %v22365_v6 }
 0x4eb   : > { %16832 = vmatprep.mubr.msk.f32.mxu1 %vm11867_vm4, %v22369_v61  ;;  %v23479_v61 = vld [vmem:[#allocation36_spill] sm:$0xff] }
 0x4ee   : > { %16833 = vmatmul.mubr.msk.f32.gmra.mrb[36].mxu1 %vm11867_vm4, %v22375_v45 }
 0x4ef   : > { %16835 = vmatprep.mubr.msk.f32.mxu1 %vm11867_vm4, %v13209_v7 }
 0x4f2   : > { %16836 = vmatmul.mubr.msk.f32.gmra.mrb[38].mxu1 %vm11867_vm4, %v13687_v32 }
 0x4f3   : > { %16840 = vmatprep.mubr.msk.f32.mxu1 %vm17691_vm5, %v23478_v17 }
 0x5b9   : > { %v16828_v8 = vpop.f32.mrb[32].mxu1 }
 0x5ba   : > { %v13756_v25 = vpop.f32.mrb[33].mxu1 }
 0x5bb   : > { %v13803_v6 = vmax.f32 %v13756_v25, %v16828_v8 }
 0x5bd   : > { %v13818_v45 = vrot.slane %v13803_v6, %v23479_v61  ;;  %v16831_v49 = vpop.f32.mrb[34].mxu1  ;;  %v13811_v15 = vcombine.high %v13803_v6, %v13803_v6 }
 0x5be   : > { %v13766_v29 = vpop.f32.mrb[35].mxu1 }
 0x5bf   : > { %v13826_v53 = vcombine.high %v13818_v45, %v13818_v45  ;;  %v22536_v63 = vmax.f32 %v13766_v29, %v16831_v49  ;;  %v15810_v47 = vrot.slane %v13818_v45, 9  ;;  %v13825_v19 = vrot.slane %v13811_v15, %v23479_v61 }
 0x5c1   : > { %v15811_v34 = vrot.slane %v13826_v53, 9  ;;  %v16834_v37 = vpop.f32.mrb[36].mxu1  ;;  %v13943_v44 = vmax.f32 %v13818_v45, %v15810_v47  ;;  %v15812_v52 = vrot.slane %v13825_v19, 9  ;;  %v13827_v20 = vcombine.high %v13825_v19, %v13825_v19 }
 0x5c2   : > { %v13776_v43 = vpop.f32.mrb[37].mxu1 }
 0x5c3   : > { %v13944_v54 = vmax.f32 %v13826_v53, %v15811_v34  ;;  %v13805_v3 = vmax.f32 %v13776_v43, %v16834_v37  ;;  %v13959_v35 = vmul.f32 %v13943_v44, %v22542_v18  ;;  %v13945_v39 = vmax.f32 %v13825_v19, %v15812_v52 }
 0x5c4   : > { %v15813_v42 = vrot.slane %v13827_v20, 9  ;;  %v13835_v34 = vrot.slane %v22536_v63, %v23479_v61 }
 0x5c5   : > { %v13960_v51 = vmul.f32 %v13944_v54, %v22542_v18  ;;  %v16837_v59 = vpop.f32.mrb[38].mxu1  ;;  %v13845_v0 = vcombine.high %v13805_v3, %v13805_v3  ;;  %v13852_v7 = vrot.slane %v13805_v3, %v23479_v61  ;;  %v13975_v41 = vadd.f32 %v13959_v35, %v22548_v62 }
 0x5c6   : > { %v13786_v28 = vpop.f32.mrb[39].mxu1  ;;  %v13961_v40 = vmul.f32 %v13945_v39, %v22542_v18  ;;  %v13946_v47 = vmax.f32 %v13827_v20, %v15813_v42  ;;  %v13843_v20 = vcombine.high %v13835_v34, %v13835_v34  ;;  %v14305_v39 = vld [vmem:[%s22799_s7 + $0x20] sm:$0xff] }
 0x5c7   : > { %v13976_v14 = vadd.f32 %v13960_v51, %v22548_v62  ;;  %v13859_v60 = vrot.slane %v13845_v0, %v23479_v61  ;;  %v13806_v38 = vmax.f32 %v13786_v28, %v16837_v59  ;;  %v13860_v5 = vcombine.high %v13852_v7, %v13852_v7  ;;  %v14230_v0 = vld [vmem:[%s22799_s7 + $0x18] sm:$0xff] }
 0x5c8   : > { %v15818_v58 = vrot.slane %v13852_v7, 9  ;;  %v13991_v46 = vmax.f32 %v13975_v41, 0.0  ;;  %v13977_v37 = vadd.f32 %v13961_v40, %v22548_v62  ;;  %v13962_v52 = vmul.f32 %v13946_v47, %v22542_v18  ;;  %v14380_v41 = vld [vmem:[%s22799_s7 + $0x28] sm:$0xff] }
 0x5c9   : > { %v13992_v16 = vmax.f32 %v13976_v14, 0.0  ;;  %v13861_v36 = vcombine.high %v13859_v60, %v13859_v60  ;;  %v15820_v56 = vrot.slane %v13859_v60, 9  ;;  %v13862_v10 = vcombine.high %v13806_v38, %v13806_v38 }
 0x5ca   : > { %v13869_v2 = vrot.slane %v13806_v38, %v23479_v61  ;;  %v15819_v9 = vrot.slane %v13860_v5, 9  ;;  %v13951_v24 = vmax.f32 %v13852_v7, %v15818_v58  ;;  %v15814_v28 = vrot.slane %v13835_v34, 9 }
 0x5cb   : > { %16841 = vmatmul.mubr.msk.f32.vlgmr.msra.gmra.mrb[40].mxu1 %vm11867_vm4, %v13992_v16  ;;  %v15821_v50 = vrot.slane %v13861_v36, 9  ;;  %v13953_v27 = vmax.f32 %v13859_v60, %v15820_v56  ;;  %v13876_v57 = vrot.slane %v13862_v10, %v23479_v61  ;;  %v13993_v14 = vmax.f32 %v13977_v37, 0.0 }
 0x5cc   : > { %16844 = vmatpush3.msra.mxu1 %v14007_v33  ;;  %16845 = vmatprep.mubr.msk.f32.mxu1 %vm17691_vm5, %v23478_v17  ;;  %v13877_v31 = vcombine.high %v13869_v2, %v13869_v2  ;;  %v15822_v23 = vrot.slane %v13869_v2, 9  ;;  %v13952_v12 = vmax.f32 %v13860_v5, %v15819_v9  ;;  %v13967_v30 = vmul.f32 %v13951_v24, %v22542_v18 }
 0x5cd   : > { %16848 = vmatprep.subr.mxu1 %v23478_v17  ;;  %v13954_v22 = vmax.f32 %v13861_v36, %v15821_v50  ;;  %v13969_v11 = vmul.f32 %v13953_v27, %v22542_v18  ;;  %v13878_v4 = vcombine.high %v13876_v57, %v13876_v57  ;;  %v15824_v13 = vrot.slane %v13876_v57, 9  ;;  %v14455_v27 = vld [vmem:[%s22799_s7 + $0x30] sm:$0xff] }
 0x5ce   : > { %v15823_v26 = vrot.slane %v13877_v31, 9  ;;  %v13955_v21 = vmax.f32 %v13869_v2, %v15822_v23  ;;  %v13968_v48 = vmul.f32 %v13952_v12, %v22542_v18  ;;  %v22570_v32 = vadd.f32 %v13967_v30, %v22548_v62  ;;  %v14530_v12 = vld [vmem:[%s22799_s7 + $0x38] sm:$0xff] }
 0x5cf   : > { %v13970_v55 = vmul.f32 %v13954_v22, %v22542_v18  ;;  %v15825_v8 = vrot.slane %v13878_v4, 9  ;;  %v13957_v6 = vmax.f32 %v13876_v57, %v15824_v13  ;;  %v22593_v54 = vadd.f32 %v13969_v11, %v22548_v62 }
 0x5d0   : > { %v13956_v25 = vmax.f32 %v13877_v31, %v15823_v26  ;;  %v13971_v45 = vmul.f32 %v13955_v21, %v22542_v18  ;;  %v22590_v43 = vadd.f32 %v13968_v48, %v22548_v62  ;;  %v13947_v35 = vmax.f32 %v13835_v34, %v15814_v28  ;;  %v14755_v26 = vld [vmem:[%s22799_s7 + $0x50] sm:$0xff]  ;;  %v14830_v21 = vld [vmem:[%s22799_s7 + $0x58] sm:$0xff]  ;;  %v14905_v48 = vld [vmem:[%s22799_s7 + $0x60] sm:$0xff] }
 0x5d1   : > { %v13958_v49 = vmax.f32 %v13878_v4, %v15825_v8  ;;  %v13973_v29 = vmul.f32 %v13957_v6, %v22542_v18  ;;  %v22596_v44 = vadd.f32 %v13970_v55, %v22548_v62  ;;  %v13978_v16 = vadd.f32 %v13962_v52, %v22548_v62  ;;  %v14680_v4 = vld [vmem:[%s22799_s7 + $0x48] sm:$0xff]  ;;  %v15055_v8 = vld [vmem:[%s22799_s7 + $0x70] sm:$0xff]  ;;  %v15130_v6 = vld [vmem:[%s22799_s7 + $0x78] sm:$0xff] }
 0x5d2   : > { %v13972_v15 = vmul.f32 %v13956_v25, %v22542_v18  ;;  %v22580_v53 = vadd.f32 %v13971_v45, %v22548_v62  ;;  %v13828_v7 = vcombine.high %v22536_v63, %v22536_v63  ;;  %v15815_v60 = vrot.slane %v13843_v20, 9  ;;  %v15213_v34 = vld [vmem:[%s22802_s10 + $0x18] sm:$0xff] }
 0x5d3   : > { %16846 = vmatmul.mubr.msk.f32.vlgmr.msra.gmra.mrb[40].mxu1 %vm11867_vm4, %v13991_v46  ;;  %v13974_v19 = vmul.f32 %v13958_v49, %v22542_v18  ;;  %v22602_v51 = vadd.f32 %v13973_v29, %v22548_v62  ;;  %v13963_v38 = vmul.f32 %v13947_v35, %v22542_v18  ;;  %v13994_v33 = vmax.f32 %v13978_v16, 0.0  ;;  %v15211_v29 = vld [vmem:[%s22802_s10 + $0x8] sm:$0xff] }
 0x5d4   : > { %16849 = vmatpush3.msra.mxu1 %v14155_v1  ;;  %16850 = vmatprep.mubr.msk.f32.mxu1 %vm17691_vm5, %v23478_v17  ;;  %v22599_v3 = vadd.f32 %v13972_v15, %v22548_v62  ;;  %v13842_v5 = vrot.slane %v13828_v7, %v23479_v61  ;;  %v13948_v36 = vmax.f32 %v13843_v20, %v15815_v60  ;;  %v13999_v11 = vmax.f32 %v22570_v32, 0.0  ;;  %v14980_v32 = vld [vmem:[%s22799_s7 + $0x68] sm:$0xff]  ;;  %v15210_v15 = vld [vmem:[%s22802_s10] sm:$0xff] }
 0x5d5   : > { %16853 = vmatprep.subr.mxu1 %v23478_v17  ;;  %v22605_v59 = vadd.f32 %v13974_v19, %v22548_v62  ;;  %v13979_v58 = vadd.f32 %v13963_v38, %v22548_v62  ;;  %v14001_v13 = vmax.f32 %v22593_v54, 0.0  ;;  %v14002_v46 = vmax.f32 %v22596_v44, 0.0 }
 0x5d6   : > { %v15816_v63 = vrot.slane %v13842_v5, 9  ;;  %v13964_v56 = vmul.f32 %v13948_v36, %v22542_v18  ;;  %v13844_v61 = vcombine.high %v13842_v5, %v13842_v5  ;;  %v14003_v55 = vmax.f32 %v22580_v53, 0.0  ;;  %v15212_v53 = vld [vmem:[%s22802_s10 + $0x10] sm:$0xff] }
 0x5d7   : > { %v13995_v42 = vmax.f32 %v13979_v58, 0.0  ;;  %v14004_v1 = vmax.f32 %v22599_v3, 0.0  ;;  %v14005_v25 = vmax.f32 %v22602_v51, 0.0  ;;  %v17692_v45 = vmov 0.0|0.0  }
 0x5d8   : > { %v13949_v10 = vmax.f32 %v13842_v5, %v15816_v63  ;;  %v13980_v2 = vadd.f32 %v13964_v56, %v22548_v62  ;;  %v15817_v9 = vrot.slane %v13844_v61, 9  ;;  %v14006_v49 = vmax.f32 %v22605_v59, 0.0  ;;  %v15214_v59 = vld [vmem:[%s22803_s11] sm:$0x1] }
 0x5d9   : > { %v16930_v47 = vpack.c.bf16 %v15211_v29, %v15210_v15  ;;  %v16933_v37 = vpack.c.bf16 %v15213_v34, %v15212_v53 }
 0x5da   : > { %v13965_v50 = vmul.f32 %v13949_v10, %v22542_v18  ;;  %v13996_v24 = vmax.f32 %v13980_v2, 0.0  ;;  %v13950_v40 = vmax.f32 %v13844_v61, %v15817_v9 }
 0x5db   : > { %16851 = vmatmul.mubr.msk.f32.vlgmr.msra.gmra.mrb[40].mxu1 %vm11867_vm4, %v13993_v14 }
 0x5dc   : > { %16854 = vmatpush3.msra.mxu1 %v14230_v0  ;;  %16855 = vmatprep.mubr.msk.f32.mxu1 %vm17691_vm5, %v23478_v17  ;;  %v13981_v57 = vadd.f32 %v13965_v50, %v22548_v62  ;;  %v13966_v31 = vmul.f32 %v13950_v40, %v22542_v18  ;;  %v14605_v18 = vld [vmem:[%s22799_s7 + $0x40] sm:$0xff] }
 0x5dd   : > { %16858 = vmatprep.subr.mxu1 %v23478_v17 }
 0x5de   : > { %v13997_v23 = vmax.f32 %v13981_v57, 0.0  ;;  %v13982_v22 = vadd.f32 %v13966_v31, %v22548_v62  ;;  %v14000_v62 = vmax.f32 %v22590_v43, 0.0  ;;  %v15207_v43 = vld [vmem:[%s22801_s9] sm:$0x1] }
 0x5e0   : > { %v13998_v30 = vmax.f32 %v13982_v22, 0.0 }
 0x5e3   : > { %16856 = vmatmul.mubr.msk.f32.vlgmr.msra.gmra.mrb[40].mxu1 %vm11867_vm4, %v13994_v33 }
 0x5e4   : > { %16859 = vmatpush3.msra.mxu1 %v14305_v39  ;;  %16860 = vmatprep.mubr.msk.f32.mxu1 %vm17691_vm5, %v23478_v17 }
 0x5e5   : > { %16863 = vmatprep.subr.mxu1 %v23478_v17 }
 0x5eb   : > { %16861 = vmatmul.mubr.msk.f32.vlgmr.msra.gmra.mrb[40].mxu1 %vm11867_vm4, %v13995_v42 }
 0x5ec   : > { %16864 = vmatpush3.msra.mxu1 %v14380_v41  ;;  %16865 = vmatprep.mubr.msk.f32.mxu1 %vm17691_vm5, %v23478_v17 }
 0x5ed   : > { %16868 = vmatprep.subr.mxu1 %v23478_v17 }
 0x5f3   : > { %16866 = vmatmul.mubr.msk.f32.vlgmr.msra.gmra.mrb[40].mxu1 %vm11867_vm4, %v13996_v24 }
 0x5f4   : > { %16869 = vmatpush3.msra.mxu1 %v14455_v27  ;;  %16870 = vmatprep.mubr.msk.f32.mxu1 %vm17691_vm5, %v23478_v17 }
 0x5f5   : > { %16873 = vmatprep.subr.mxu1 %v23478_v17 }
 0x5fb   : > { %16871 = vmatmul.mubr.msk.f32.vlgmr.msra.gmra.mrb[40].mxu1 %vm11867_vm4, %v13997_v23 }
 0x5fc   : > { %16874 = vmatpush3.msra.mxu1 %v14530_v12  ;;  %16875 = vmatprep.mubr.msk.f32.mxu1 %vm17691_vm5, %v23478_v17 }
 0x5fd   : > { %16878 = vmatprep.subr.mxu1 %v23478_v17 }
 0x603   : > { %16876 = vmatmul.mubr.msk.f32.vlgmr.msra.gmra.mrb[40].mxu1 %vm11867_vm4, %v13998_v30 }
 0x604   : > { %16879 = vmatpush3.msra.mxu1 %v14605_v18  ;;  %16880 = vmatprep.mubr.msk.f32.mxu1 %vm17691_vm5, %v23478_v17 }
 0x605   : > { %16883 = vmatprep.subr.mxu1 %v23478_v17 }
 0x60b   : > { %16881 = vmatmul.mubr.msk.f32.vlgmr.msra.gmra.mrb[40].mxu1 %vm11867_vm4, %v13999_v11 }
 0x60c   : > { %16884 = vmatpush3.msra.mxu1 %v14680_v4  ;;  %16885 = vmatprep.mubr.msk.f32.mxu1 %vm17691_vm5, %v23478_v17 }
 0x60d   : > { %16888 = vmatprep.subr.mxu1 %v23478_v17 }
 0x613   : > { %16886 = vmatmul.mubr.msk.f32.vlgmr.msra.gmra.mrb[40].mxu1 %vm11867_vm4, %v14000_v62 }
 0x614   : > { %16889 = vmatpush3.msra.mxu1 %v14755_v26  ;;  %16890 = vmatprep.mubr.msk.f32.mxu1 %vm17691_vm5, %v23478_v17 }
 0x615   : > { %16893 = vmatprep.subr.mxu1 %v23478_v17 }
 0x61b   : > { %16891 = vmatmul.mubr.msk.f32.vlgmr.msra.gmra.mrb[40].mxu1 %vm11867_vm4, %v14001_v13 }
 0x61c   : > { %16894 = vmatpush3.msra.mxu1 %v14830_v21  ;;  %16895 = vmatprep.mubr.msk.f32.mxu1 %vm17691_vm5, %v23478_v17 }
 0x61d   : > { %16898 = vmatprep.subr.mxu1 %v23478_v17 }
 0x623   : > { %16896 = vmatmul.mubr.msk.f32.vlgmr.msra.gmra.mrb[40].mxu1 %vm11867_vm4, %v14002_v46 }
 0x624   : > { %16899 = vmatpush3.msra.mxu1 %v14905_v48  ;;  %16900 = vmatprep.mubr.msk.f32.mxu1 %vm17691_vm5, %v23478_v17 }
 0x625   : > { %16903 = vmatprep.subr.mxu1 %v23478_v17 }
 0x62b   : > { %16901 = vmatmul.mubr.msk.f32.vlgmr.msra.gmra.mrb[40].mxu1 %vm11867_vm4, %v14003_v55 }
 0x62c   : > { %16904 = vmatpush3.msra.mxu1 %v14980_v32  ;;  %16905 = vmatprep.mubr.msk.f32.mxu1 %vm17691_vm5, %v23478_v17 }
 0x62d   : > { %16908 = vmatprep.subr.mxu1 %v23478_v17 }
 0x633   : > { %16906 = vmatmul.mubr.msk.f32.vlgmr.msra.gmra.mrb[40].mxu1 %vm11867_vm4, %v14004_v1 }
 0x634   : > { %16909 = vmatpush3.msra.mxu1 %v15055_v8  ;;  %16910 = vmatprep.mubr.msk.f32.mxu1 %vm17691_vm5, %v23478_v17 }
 0x635   : > { %16913 = vmatprep.subr.mxu1 %v23478_v17 }
 0x63b   : > { %16911 = vmatmul.mubr.msk.f32.vlgmr.msra.gmra.mrb[40].mxu1 %vm11867_vm4, %v14005_v25 }
 0x63c   : > { %16914 = vmatpush3.msra.mxu1 %v15130_v6  ;;  %16915 = vmatprep.mubr.msk.f32.mxu1 %vm17691_vm5, %v23478_v17 }
 0x63d   : > { %16929 = vmatprep.subr.bf16.mxu1 %v17692_v45 }
 0x643   : > { %16916 = vmatmul.mubr.msk.f32.vlgmr.msra.gmra.mrb[40].mxu1 %vm11867_vm4, %v14006_v49 }
 0x644   : > { %16926 = vmatprep.mubr.msk.f32.mxu1 %vm17691_vm5, %v23478_v17  ;;  %16931 = vmatpush3.bf16.msra.mxu1 %v16930_v47  ;;  %v15205_v17 = vld [vmem:[%s22800_s8] sm:$0x1] }
 0x645   : > { %16932 = vmatprep.subr.bf16.mxu1 %v17692_v45 }
 0x648   : > { %16934 = vmatpush3.bf16.msra.mxu1 %v16933_v37 }
 0x716   : > { %v15200_v19 = vpop.f32.mrb[40].mxu1 }
 0x717   : > { %v15206_v54 = vmul.f32 %v15205_v17, %v15200_v19  ;;  %v16917_v44 = vpop.f32.mrb[41].mxu1 }
 0x719   : > { %v15208_v3 = vadd.f32 %v15207_v43, %v15206_v54 }
 0x71b   : > { %v15209_v51 = vmax.f32 %v15208_v3, 0.0 }
 0x71d   : > { %16927 = vmatmul.mubr.msk.f32.vlgmr.msra.gmra.mrb[42].mxu1 %vm15215_vm6, %v15209_v51 }
 0x7f0   : > { %v15285_v52 = vpop.f32.mrb[42].mxu1 }
 0x7f1   : > { %v15286_v28 = vadd.f32 %v15285_v52, %v15214_v59  ;;  %v16928_v14 = vpop.f32.mrb[43].mxu1 }
 0x7f3   : > { %v15290_v0 = vsel %vm15289_vm7, %v15286_v28, -inf }
 0x7f4   : > { %15291 = vmax.xlane.f32.xlu0 %v15290_v0 }
 0x881   : > { %v15292_v20 = vpop.xlane.xlu0 %15291 }
 0x882   : > { %v15293_v35 = vsub.f32 %v15286_v28, %v15292_v20 }
 0x884   : > { %v15294_v16 = vmul.f32 1.442695, %v15293_v35 }
 0x886   : > { %17361 = vpow2.f32 %v15294_v16 }
 0x890   : > { %v17362_v7 = vpop.eup %17361 }
 0x891   : > { %v15296_v60 = vsel %vm15289_vm7, %v17362_v7, 0.0 }
 0x892   : > { %15297 = vadd.xlane.f32.xlu0 %v15296_v60 }
 0x91f   : > { %v15298_v38 = vpop.xlane.xlu0 %15297 }
 0x920   : > { %17363 = vlog2.f32 %v15298_v38 }
 0x92a   : > { %v17364_v33 = vpop.eup %17363 }
 0x92b   : > { %v15300_v39 = vmul.f32 0.6931472, %v17364_v33 }
 0x92d   : > { %v15301_v5 = vsub.f32 %v15293_v35, %v15300_v39 }
 0x92f   : > { %15302 = vst.msk [vmem:[%s405_s29] sm:$0x1] %vm15289_vm7, %v15301_v5 }
 0x930   : > { %17637 = shalt.err (!%p17634_p3)
}
 0x931   : > { %s17638_s26 = scalar_lea.hbm %s22749_s18, 16  ;;  %s17642_s16 = scalar_lea.hbm %s22804_s12, 32 }
 0x932   : > { %p17639_p4 = scmp.ne.s32.totalorder %s22749_s18, %s17638_s26  ;;  %p17643_p9 = scmp.lt.u32.totalorder %s22749_s18, %s22804_s12 }
 0x933   : > { %p17644_p10 = scmp.lt.u32.totalorder %s17642_s16, %s17638_s26  ;;  %p17646_p12 = scmp.lt.u32.totalorder %s17638_s26, %s22749_s18 }
 0x934   : > { %p17640_p7 = pnand %p17639_p4, %p17797_p5 }
 0x935   : > { %p17645_p11 = por %p17644_p10, %p17643_p9 }
 0x936   : > { %p17641_p8 = pneg %p17640_p7 }
 0x937   : > { %p17647_p13 = por %p17646_p12, %p17645_p11 }
 0x939   : > { %p17648_p0 = pnand %p17647_p13, %p17641_p8 }
 0x93b   : > { %17651 = shalt.err (!%p17648_p0)
}
 0x93c   : > { %17287 = dma.vmem_to_hbm [thread:$0]  (%p17797_p5), %s22751_s15, 16, %s22749_s18, %s15304_s19  }
 0x93d PF: > { %p17293_p1 = scmp.ge.s32.totalorder %s17686_s24, 2  ;;  %s15328_s1 = sand.u32 1, %s17674_s21  }
 0x93e   : > { %s15329_s20 = scalar_lea.sflag [#allocation5], %s15328_s1 }
 0x93f   : > { %p17290_p2 = pnand %p17293_p1, %p17801_p6 }
 0x941   : > { %17669 = dma.done.wait (!%p17290_p2), %s15329_s20, 16  }
 0x942   : > { %17671 = vsyncadd (!%p17290_p2), %s15329_s20, 4294967280  ;;  %p22_p3 = scmp.ge.s32.totalorder %s17784_s27, 4   ;;  %s23480_s21 = smov %s17678_s22 }
 0x943   : > { %s23481_s22 = smov %s17682_s23  ;;  %s23482_s23 = smov %s17795_s30 }
 0x944   : > { %s23483_s24 = smov %s17784_s27  ;;  %24 = sbr.rel (!%p22_p3) target bundleno = 6 (0x6), region = 105 }
 0x94b   :  { %15333 = vsyncpa [#allocation5], 1 }
 0x94c   :  { %15335 = vsyncpa [#allocation5 + $0x1], 1 }

</bundles_post_ra>
